<compile_context>
chip_gen: v5e
topology: v5e:2x2
jax: 0.10.0
libtpu: 0.0.40
codegen_flags: <defaults>
</compile_context>

<pallas_src>
import functools
import math

import jax
import jax.numpy as jnp
from jax import lax
from jax.experimental import pallas as pl
from jax.experimental.pallas import tpu as pltpu  # noqa: F401  (kept for TPU-specific tuning hooks)


# -----------------------------------------------------------------------------
# Config (small, consistent with the module's __init__)
# -----------------------------------------------------------------------------
N_TS = 4          # n_ts
D_VAL = 2 * N_TS  # value / mask channel count fed to attention
BATCH = 2
SEQ_LEN = 8       # Lk (observed time points)
EMBED_TIME = 32   # embed_time == Lq (query length, torch.linspace(0,1,embed_time))
N_HEADS = 4
NHIDDEN = 32
MLP_HIDDEN = 150
CLASSIF_OUT = 2   # model_type = 'classification', default classifier


# -----------------------------------------------------------------------------
# Fused Pallas kernel: multi-time attention -> GRU -> classifier MLP
# -----------------------------------------------------------------------------
def _mtan_fused_kernel(q_emb_ref, k_emb_ref, val_ref, mask_ref,
                       wq_t_ref, bq_ref, wk_t_ref, bk_ref, wo_t_ref, bo_ref,
                       wih_t_ref, bih_ref, whh_t_ref, bhh_ref,
                       w1_t_ref, b1_ref, w2_t_ref, b2_ref, w3_t_ref, b3_ref,
                       out_ref, *, n_heads):
    q_emb = q_emb_ref[...]                       # (Lq, T)
    Lq, T = q_emb.shape
    B, Lk, D = val_ref.shape
    dk = T // n_heads
    scale = 1.0 / math.sqrt(dk)

    wq_t = wq_t_ref[...]; bq = bq_ref[...]
    wk_t = wk_t_ref[...]; bk = bk_ref[...]
    wo_t = wo_t_ref[...]; bo = bo_ref[...]
    nhid = wo_t.shape[1]

    wih_t = wih_t_ref[...]; bih = bih_ref[...]   # (H, 3H), (1, 3H)
    whh_t = whh_t_ref[...]; bhh = bhh_ref[...]
    H = wih_t.shape[0]

    # Shared query projection (query has batch size 1 in the reference module).
    q = jnp.dot(q_emb, wq_t, preferred_element_type=jnp.float32) + bq   # (Lq, T)

    # ---------------- multi-time attention + hoisted GRU input gates -----------
    xg_list = []                                  # per-batch (Lq, 3H) input gates
    for b in range(B):
        k_emb = k_emb_ref[b]                      # (Lk, T)
        val = val_ref[b]                          # (Lk, D)
        mask = mask_ref[b]                        # (Lk, D)
        k = jnp.dot(k_emb, wk_t, preferred_element_type=jnp.float32) + bk
        mval = mask * val                         # (Lk, D)

        att_b = jnp.zeros((Lq, nhid), jnp.float32)
        for h in range(n_heads):
            qh = q[:, h * dk:(h + 1) * dk]        # (Lq, dk)
            kh = k[:, h * dk:(h + 1) * dk]        # (Lk, dk)
            # scores on the MXU (AB^T contraction, no explicit transpose)
            s = jnp.einsum('qd,kd->qk', qh, kh,
                           preferred_element_type=jnp.float32) * scale   # (Lq, Lk)
            # per-channel masked softmax as two matmuls:
            #   e @ (mask*val) / e @ mask   (shift-invariant, matches -1e9 masking)
            e = jnp.exp(s - jnp.max(s, axis=-1, keepdims=True))          # (Lq, Lk)
            num = jnp.dot(e, mval, preferred_element_type=jnp.float32)   # (Lq, D)
            den = jnp.dot(e, mask, preferred_element_type=jnp.float32)   # (Lq, D)
            den_safe = jnp.where(den > 0.0, den, 1.0)
            o_h = jnp.where(den > 0.0, num / den_safe, 0.0)              # (Lq, D)
            # head-major output projection block, accumulated (avoids concat)
            att_b = att_b + jnp.dot(o_h, wo_t[h * D:(h + 1) * D, :],
                                    preferred_element_type=jnp.float32)
        att_b = att_b + bo                        # (Lq, nhid) == GRU input sequence

        # hoist the input-side GRU gate matmul out of the recurrence
        xg_list.append(jnp.dot(att_b, wih_t,
                               preferred_element_type=jnp.float32) + bih)  # (Lq, 3H)

    # ---------------- GRU recurrence (seq-first, batch rows together) ----------
    h_state = jnp.zeros((B, H), jnp.float32)
    for t in range(Lq):                           # fully unrolled, Lq is static
        g_x = jnp.concatenate([xg[t:t + 1, :] for xg in xg_list], axis=0)  # (B, 3H)
        g_h = jnp.dot(h_state, whh_t, preferred_element_type=jnp.float32) + bhh
        r = jax.nn.sigmoid(g_x[:, :H] + g_h[:, :H])
        z = jax.nn.sigmoid(g_x[:, H:2 * H] + g_h[:, H:2 * H])
        n = jnp.tanh(g_x[:, 2 * H:] + r * g_h[:, 2 * H:])
        h_state = (1.0 - z) * n + z * h_state

    # ---------------- classifier MLP -------------------------------------------
    a1 = jnp.maximum(jnp.dot(h_state, w1_t_ref[...],
                             preferred_element_type=jnp.float32) + b1_ref[...], 0.0)
    a2 = jnp.maximum(jnp.dot(a1, w2_t_ref[...],
                             preferred_element_type=jnp.float32) + b2_ref[...], 0.0)
    out_ref[...] = jnp.dot(a2, w3_t_ref[...],
                           preferred_element_type=jnp.float32) + b3_ref[...]


def mtan_enc_fused(query_emb, key_emb, x, mask, p):
    B, Lk, D = x.shape
    Lq, T = query_emb.shape
    n_out = p["w3"].shape[0]

    # host-side layout plumbing: transpose / concatenate weights once
    wih_t = jnp.concatenate([p["wir"], p["wiz"], p["win"]], axis=0).T   # (H, 3H)
    whh_t = jnp.concatenate([p["whr"], p["whz"], p["whn"]], axis=0).T   # (H, 3H)
    bih = jnp.concatenate([p["bir"], p["biz"], p["bin"]]).reshape(1, -1)
    bhh = jnp.concatenate([p["bhr"], p["bhz"], p["bhn"]]).reshape(1, -1)

    kernel = functools.partial(_mtan_fused_kernel, n_heads=N_HEADS)
    return pl.pallas_call(
        kernel,
        out_shape=jax.ShapeDtypeStruct((B, n_out), jnp.float32),
    )(query_emb, key_emb, x, mask,
      p["wq"].T, p["bq"].reshape(1, -1),
      p["wk"].T, p["bk"].reshape(1, -1),
      p["wo"].T, p["bo"].reshape(1, -1),
      wih_t, bih, whh_t, bhh,
      p["w1"].T, p["b1"].reshape(1, -1),
      p["w2"].T, p["b2"].reshape(1, -1),
      p["w3"].T, p["b3"].reshape(1, -1))


# -----------------------------------------------------------------------------
# Glue: time embedding (learn_emb=True) + full forward
# -----------------------------------------------------------------------------
def learn_time_embedding(tt, p):
    tt = tt[..., None]                                   # (..., 1)
    out1 = tt @ p["tl_w"].T + p["tl_b"]                  # (..., 1)
    out2 = jnp.sin(tt @ p["per_w"].T + p["per_b"])       # (..., embed_time-1)
    return jnp.concatenate([out1, out2], axis=-1)        # (..., embed_time)


def mtan_enc_forward(x, time_steps, p):
    mask = x[:, :, N_TS:]
    mask = jnp.concatenate([mask, mask], axis=2)         # (B, Lk, 2*n_ts)
    key_emb = learn_time_embedding(time_steps, p)        # (B, Lk, T)
    q_pts = jnp.linspace(0.0, 1.0, EMBED_TIME)
    query_emb = learn_time_embedding(q_pts[None, :], p)[0]   # (Lq, T)
    out = mtan_enc_fused(query_emb, key_emb, x, mask, p)     # (B, classif_out)
    return jnp.squeeze(out)


# -----------------------------------------------------------------------------
# Pure-JAX reference (same math as the PyTorch module, no Pallas) for validation
# -----------------------------------------------------------------------------
def _ref_attention(query_emb, key_emb, value, mask, p):
    B, Lk, D = value.shape
    _, Lq, T = query_emb.shape
    dk = T // N_HEADS
    q = query_emb @ p["wq"].T + p["bq"]
    k = key_emb @ p["wk"].T + p["bk"]
    qh = q.reshape(1, Lq, N_HEADS, dk).transpose(0, 2, 1, 3)[0]       # (h, Lq, dk)
    kh = k.reshape(B, Lk, N_HEADS, dk).transpose(0, 2, 1, 3)          # (B, h, Lk, dk)
    scores = jnp.einsum("hqd,bhkd->bhqk", qh, kh) / math.sqrt(dk)     # (B, h, Lq, Lk)
    s = jnp.broadcast_to(scores[..., None], (B, N_HEADS, Lq, Lk, D))
    m = mask[:, None, None, :, :]
    s = jnp.where(m == 0.0, -1e9, s)
    pattn = jax.nn.softmax(s, axis=-2)
    out = jnp.sum(pattn * value[:, None, None, :, :], axis=-2)        # (B, h, Lq, D)
    out = out.transpose(0, 2, 1, 3).reshape(B, Lq, N_HEADS * D)
    return out @ p["wo"].T + p["bo"]


def _ref_gru(x_seq, p):
    B, H = x_seq.shape[1], x_seq.shape[2]

    def step(h, x_t):
        r = jax.nn.sigmoid(x_t @ p["wir"].T + p["bir"] + h @ p["whr"].T + p["bhr"])
        z = jax.nn.sigmoid(x_t @ p["wiz"].T + p["biz"] + h @ p["whz"].T + p["bhz"])
        n = jnp.tanh(x_t @ p["win"].T + p["bin"] + r * (h @ p["whn"].T + p["bhn"]))
        return (1.0 - z) * n + z * h, None

    h_final, _ = lax.scan(step, jnp.zeros((B, H), jnp.float32), x_seq)
    return h_final


def mtan_enc_forward_ref(x, time_steps, p):
    mask = x[:, :, N_TS:]
    mask = jnp.concatenate([mask, mask], axis=2)
    key_emb = learn_time_embedding(time_steps, p)
    q_pts = jnp.linspace(0.0, 1.0, EMBED_TIME)
    query_emb = learn_time_embedding(q_pts[None, :], p)
    att = _ref_attention(query_emb, key_emb, x, mask, p)
    h = _ref_gru(jnp.transpose(att, (1, 0, 2)), p)
    a1 = jnp.maximum(h @ p["w1"].T + p["b1"], 0.0)
    a2 = jnp.maximum(a1 @ p["w2"].T + p["b2"], 0.0)
    return jnp.squeeze(a2 @ p["w3"].T + p["b3"])


# -----------------------------------------------------------------------------
# Deterministic parameter init (PyTorch nn.Linear / nn.GRU style uniform bounds)
# -----------------------------------------------------------------------------
def _init_linear(key, out_dim, in_dim):
    kw, kb = jax.random.split(key)
    bound = 1.0 / math.sqrt(in_dim)
    w = jax.random.uniform(kw, (out_dim, in_dim), jnp.float32, -bound, bound)
    b = jax.random.uniform(kb, (out_dim,), jnp.float32, -bound, bound)
    return w, b


def make_params(seed=0):
    keys = jax.random.split(jax.random.PRNGKey(seed), 32)
    ki = iter(keys)
    p = {}
    # time embedding (learn_emb=True): periodic Linear(1, T-1), linear Linear(1, 1)
    p["per_w"], p["per_b"] = _init_linear(next(ki), EMBED_TIME - 1, 1)
    p["tl_w"], p["tl_b"] = _init_linear(next(ki), 1, 1)
    # MultiTimeAttention: Linear(T,T) x2 for q/k, Linear(D*heads, nhidden) for output
    p["wq"], p["bq"] = _init_linear(next(ki), EMBED_TIME, EMBED_TIME)
    p["wk"], p["bk"] = _init_linear(next(ki), EMBED_TIME, EMBED_TIME)
    p["wo"], p["bo"] = _init_linear(next(ki), NHIDDEN, D_VAL * N_HEADS)
    # GRU(nhidden, nhidden): gates r, z, n (PyTorch weight_ih/_hh row order)
    for name in ("wir", "wiz", "win", "whr", "whz", "whn"):
        w, b = _init_linear(next(ki), NHIDDEN, NHIDDEN)
        p[name] = w
        p["b" + name[1:]] = b
    # default_classifier(classif_out, nhidden)
    p["w1"], p["b1"] = _init_linear(next(ki), MLP_HIDDEN, NHIDDEN)
    p["w2"], p["b2"] = _init_linear(next(ki), MLP_HIDDEN, MLP_HIDDEN)
    p["w3"], p["b3"] = _init_linear(next(ki), CLASSIF_OUT, MLP_HIDDEN)
    return p


# -----------------------------------------------------------------------------
# Main
# -----------------------------------------------------------------------------
if __name__ == "__main__":
    root = jax.random.PRNGKey(0)
    k_val, k_mask, k_time = jax.random.split(root, 3)

    values = jax.random.normal(k_val, (BATCH, SEQ_LEN, N_TS), jnp.float32)
    obs_mask = (jax.random.uniform(k_mask, (BATCH, SEQ_LEN, N_TS)) > 0.3).astype(jnp.float32)
    x = jnp.concatenate([values * obs_mask, obs_mask], axis=2)        # (B, Lk, 2*n_ts)
    time_steps = jnp.sort(jax.random.uniform(k_time, (BATCH, SEQ_LEN)), axis=1)

    params = make_params(seed=0)

    fwd = jax.jit(mtan_enc_forward)
    out = fwd(x, time_steps, params)
    out = jax.block_until_ready(out)

    ref = mtan_enc_forward_ref(x, time_steps, params)
    assert out.shape == (BATCH, CLASSIF_OUT), out.shape
    assert jnp.allclose(out, ref, atol=1e-3, rtol=1e-3), (out, ref)

    print("KERNEL_OK")
</pallas_src>

<mosaic_0001>
module attributes {stable_mosaic.version = 11 : i64} {
  func.func @_mtan_fused_kernel(%arg0: memref<32x32xf32, #tpu.memory_space<vmem>>, %arg1: memref<2x8x32xf32, #tpu.memory_space<vmem>>, %arg2: memref<2x8x8xf32, #tpu.memory_space<vmem>>, %arg3: memref<2x8x8xf32, #tpu.memory_space<vmem>>, %arg4: memref<32x32xf32, #tpu.memory_space<vmem>>, %arg5: memref<1x32xf32, #tpu.memory_space<vmem>>, %arg6: memref<32x32xf32, #tpu.memory_space<vmem>>, %arg7: memref<1x32xf32, #tpu.memory_space<vmem>>, %arg8: memref<32x32xf32, #tpu.memory_space<vmem>>, %arg9: memref<1x32xf32, #tpu.memory_space<vmem>>, %arg10: memref<32x96xf32, #tpu.memory_space<vmem>>, %arg11: memref<1x96xf32, #tpu.memory_space<vmem>>, %arg12: memref<32x96xf32, #tpu.memory_space<vmem>>, %arg13: memref<1x96xf32, #tpu.memory_space<vmem>>, %arg14: memref<32x150xf32, #tpu.memory_space<vmem>>, %arg15: memref<1x150xf32, #tpu.memory_space<vmem>>, %arg16: memref<150x150xf32, #tpu.memory_space<vmem>>, %arg17: memref<1x150xf32, #tpu.memory_space<vmem>>, %arg18: memref<150x2xf32, #tpu.memory_space<vmem>>, %arg19: memref<1x2xf32, #tpu.memory_space<vmem>>, %arg20: memref<2x2xf32, #tpu.memory_space<vmem>>) attributes {dimension_semantics = [], scalar_prefetch = 0 : i64, scratch_operands = 0 : i64, tpu.core_type = #tpu.core_type<tc>} {
    %c0 = arith.constant 0 : index
    %c0_0 = arith.constant 0 : index
    %0 = vector.load %arg0[%c0, %c0_0] : memref<32x32xf32, #tpu.memory_space<vmem>>, vector<32x32xf32>
    %c0_1 = arith.constant 0 : index
    %c0_2 = arith.constant 0 : index
    %1 = vector.load %arg4[%c0_1, %c0_2] : memref<32x32xf32, #tpu.memory_space<vmem>>, vector<32x32xf32>
    %c0_3 = arith.constant 0 : index
    %c0_4 = arith.constant 0 : index
    %2 = vector.load %arg5[%c0_3, %c0_4] : memref<1x32xf32, #tpu.memory_space<vmem>>, vector<1x32xf32>
    %c0_5 = arith.constant 0 : index
    %c0_6 = arith.constant 0 : index
    %3 = vector.load %arg6[%c0_5, %c0_6] : memref<32x32xf32, #tpu.memory_space<vmem>>, vector<32x32xf32>
    %c0_7 = arith.constant 0 : index
    %c0_8 = arith.constant 0 : index
    %4 = vector.load %arg7[%c0_7, %c0_8] : memref<1x32xf32, #tpu.memory_space<vmem>>, vector<1x32xf32>
    %c0_9 = arith.constant 0 : index
    %c0_10 = arith.constant 0 : index
    %5 = vector.load %arg8[%c0_9, %c0_10] : memref<32x32xf32, #tpu.memory_space<vmem>>, vector<32x32xf32>
    %c0_11 = arith.constant 0 : index
    %c0_12 = arith.constant 0 : index
    %6 = vector.load %arg9[%c0_11, %c0_12] : memref<1x32xf32, #tpu.memory_space<vmem>>, vector<1x32xf32>
    %c0_13 = arith.constant 0 : index
    %c0_14 = arith.constant 0 : index
    %7 = vector.load %arg10[%c0_13, %c0_14] : memref<32x96xf32, #tpu.memory_space<vmem>>, vector<32x96xf32>
    %c0_15 = arith.constant 0 : index
    %c0_16 = arith.constant 0 : index
    %8 = vector.load %arg11[%c0_15, %c0_16] : memref<1x96xf32, #tpu.memory_space<vmem>>, vector<1x96xf32>
    %c0_17 = arith.constant 0 : index
    %c0_18 = arith.constant 0 : index
    %9 = vector.load %arg12[%c0_17, %c0_18] : memref<32x96xf32, #tpu.memory_space<vmem>>, vector<32x96xf32>
    %c0_19 = arith.constant 0 : index
    %c0_20 = arith.constant 0 : index
    %10 = vector.load %arg13[%c0_19, %c0_20] : memref<1x96xf32, #tpu.memory_space<vmem>>, vector<1x96xf32>
    %cst = arith.constant dense<0.000000e+00> : vector<32x32xf32>
    %11 = tpu.matmul %0, %1, %cst {dimension_numbers = #tpu.dot_dimension_numbers<[1], [0], [0], [1], [0, 0, 1, 1], [], []>} : vector<32x32xf32>, vector<32x32xf32>, vector<32x32xf32> -> vector<32x32xf32>
    %12 = vector.broadcast %2 : vector<1x32xf32> to vector<32x32xf32>
    %13 = arith.addf %11, %12 : vector<32x32xf32>
    %c0_21 = arith.constant 0 : index
    %c0_22 = arith.constant 0 : index
    %c0_23 = arith.constant 0 : index
    %14 = vector.load %arg1[%c0_21, %c0_22, %c0_23] : memref<2x8x32xf32, #tpu.memory_space<vmem>>, vector<1x8x32xf32>
    %15 = vector.shape_cast %14 : vector<1x8x32xf32> to vector<8x32xf32>
    %c0_24 = arith.constant 0 : index
    %c0_25 = arith.constant 0 : index
    %c0_26 = arith.constant 0 : index
    %16 = vector.load %arg2[%c0_24, %c0_25, %c0_26] : memref<2x8x8xf32, #tpu.memory_space<vmem>>, vector<1x8x8xf32>
    %17 = vector.shape_cast %16 : vector<1x8x8xf32> to vector<8x8xf32>
    %c0_27 = arith.constant 0 : index
    %c0_28 = arith.constant 0 : index
    %c0_29 = arith.constant 0 : index
    %18 = vector.load %arg3[%c0_27, %c0_28, %c0_29] : memref<2x8x8xf32, #tpu.memory_space<vmem>>, vector<1x8x8xf32>
    %19 = vector.shape_cast %18 : vector<1x8x8xf32> to vector<8x8xf32>
    %cst_30 = arith.constant dense<0.000000e+00> : vector<8x32xf32>
    %20 = tpu.matmul %15, %3, %cst_30 {dimension_numbers = #tpu.dot_dimension_numbers<[1], [0], [0], [1], [0, 0, 1, 1], [], []>} : vector<8x32xf32>, vector<32x32xf32>, vector<8x32xf32> -> vector<8x32xf32>
    %21 = vector.broadcast %4 : vector<1x32xf32> to vector<8x32xf32>
    %22 = arith.addf %20, %21 : vector<8x32xf32>
    %23 = arith.mulf %19, %17 : vector<8x8xf32>
    %cst_31 = arith.constant 0.000000e+00 : f32
    %24 = vector.broadcast %cst_31 : f32 to vector<32x32xf32>
    %25 = vector.extract_strided_slice %13 {offsets = [0, 0], sizes = [32, 8], strides = [1, 1]} : vector<32x32xf32> to vector<32x8xf32>
    %26 = vector.extract_strided_slice %22 {offsets = [0, 0], sizes = [8, 8], strides = [1, 1]} : vector<8x32xf32> to vector<8x8xf32>
    "tpu.trace_start"() <{level = 10 : i32, message = "qd,kd->qk"}> : () -> ()
    %cst_32 = arith.constant dense<0.000000e+00> : vector<32x8xf32>
    %27 = tpu.matmul %25, %26, %cst_32 {dimension_numbers = #tpu.dot_dimension_numbers<[1], [1], [0], [0], [0, 0, 1, 0], [], []>} : vector<32x8xf32>, vector<8x8xf32>, vector<32x8xf32> -> vector<32x8xf32>
    "tpu.trace_stop"() : () -> ()
    %cst_33 = arith.constant 0.353553385 : f32
    %28 = vector.broadcast %cst_33 : f32 to vector<32x8xf32>
    %29 = arith.mulf %27, %28 : vector<32x8xf32>
    %cst_34 = arith.constant dense<0xFF800000> : vector<32xf32>
    %30 = vector.multi_reduction <maximumf>, %29, %cst_34 [1] : vector<32x8xf32> to vector<32xf32>
    %31 = vector.shape_cast %30 : vector<32xf32> to vector<32x1xf32>
    %32 = vector.broadcast %31 : vector<32x1xf32> to vector<32x8xf32>
    %33 = arith.subf %29, %32 : vector<32x8xf32>
    %34 = math.exp %33 : vector<32x8xf32>
    %cst_35 = arith.constant dense<0.000000e+00> : vector<32x8xf32>
    %35 = tpu.matmul %34, %23, %cst_35 {dimension_numbers = #tpu.dot_dimension_numbers<[1], [0], [0], [1], [0, 0, 1, 1], [], []>} : vector<32x8xf32>, vector<8x8xf32>, vector<32x8xf32> -> vector<32x8xf32>
    %cst_36 = arith.constant dense<0.000000e+00> : vector<32x8xf32>
    %36 = tpu.matmul %34, %19, %cst_36 {dimension_numbers = #tpu.dot_dimension_numbers<[1], [0], [0], [1], [0, 0, 1, 1], [], []>} : vector<32x8xf32>, vector<8x8xf32>, vector<32x8xf32> -> vector<32x8xf32>
    %cst_37 = arith.constant 0.000000e+00 : f32
    %37 = vector.broadcast %cst_37 : f32 to vector<32x8xf32>
    %38 = arith.cmpf ogt, %36, %37 : vector<32x8xf32>
    %cst_38 = arith.constant 1.000000e+00 : f32
    %39 = vector.broadcast %cst_38 : f32 to vector<32x8xf32>
    %40 = arith.select %38, %36, %39 : vector<32x8xi1>, vector<32x8xf32>
    %cst_39 = arith.constant 0.000000e+00 : f32
    %41 = vector.broadcast %cst_39 : f32 to vector<32x8xf32>
    %42 = arith.cmpf ogt, %36, %41 : vector<32x8xf32>
    %43 = arith.divf %35, %40 : vector<32x8xf32>
    %cst_40 = arith.constant 0.000000e+00 : f32
    %44 = vector.broadcast %cst_40 : f32 to vector<32x8xf32>
    %45 = arith.select %42, %43, %44 : vector<32x8xi1>, vector<32x8xf32>
    %46 = vector.extract_strided_slice %5 {offsets = [0, 0], sizes = [8, 32], strides = [1, 1]} : vector<32x32xf32> to vector<8x32xf32>
    %cst_41 = arith.constant dense<0.000000e+00> : vector<32x32xf32>
    %47 = tpu.matmul %45, %46, %cst_41 {dimension_numbers = #tpu.dot_dimension_numbers<[1], [0], [0], [1], [0, 0, 1, 1], [], []>} : vector<32x8xf32>, vector<8x32xf32>, vector<32x32xf32> -> vector<32x32xf32>
    %48 = arith.addf %24, %47 : vector<32x32xf32>
    %49 = vector.extract_strided_slice %13 {offsets = [0, 8], sizes = [32, 8], strides = [1, 1]} : vector<32x32xf32> to vector<32x8xf32>
    %50 = vector.extract_strided_slice %22 {offsets = [0, 8], sizes = [8, 8], strides = [1, 1]} : vector<8x32xf32> to vector<8x8xf32>
    "tpu.trace_start"() <{level = 10 : i32, message = "qd,kd->qk"}> : () -> ()
    %cst_42 = arith.constant dense<0.000000e+00> : vector<32x8xf32>
    %51 = tpu.matmul %49, %50, %cst_42 {dimension_numbers = #tpu.dot_dimension_numbers<[1], [1], [0], [0], [0, 0, 1, 0], [], []>} : vector<32x8xf32>, vector<8x8xf32>, vector<32x8xf32> -> vector<32x8xf32>
    "tpu.trace_stop"() : () -> ()
    %cst_43 = arith.constant 0.353553385 : f32
    %52 = vector.broadcast %cst_43 : f32 to vector<32x8xf32>
    %53 = arith.mulf %51, %52 : vector<32x8xf32>
    %cst_44 = arith.constant dense<0xFF800000> : vector<32xf32>
    %54 = vector.multi_reduction <maximumf>, %53, %cst_44 [1] : vector<32x8xf32> to vector<32xf32>
    %55 = vector.shape_cast %54 : vector<32xf32> to vector<32x1xf32>
    %56 = vector.broadcast %55 : vector<32x1xf32> to vector<32x8xf32>
    %57 = arith.subf %53, %56 : vector<32x8xf32>
    %58 = math.exp %57 : vector<32x8xf32>
    %cst_45 = arith.constant dense<0.000000e+00> : vector<32x8xf32>
    %59 = tpu.matmul %58, %23, %cst_45 {dimension_numbers = #tpu.dot_dimension_numbers<[1], [0], [0], [1], [0, 0, 1, 1], [], []>} : vector<32x8xf32>, vector<8x8xf32>, vector<32x8xf32> -> vector<32x8xf32>
    %cst_46 = arith.constant dense<0.000000e+00> : vector<32x8xf32>
    %60 = tpu.matmul %58, %19, %cst_46 {dimension_numbers = #tpu.dot_dimension_numbers<[1], [0], [0], [1], [0, 0, 1, 1], [], []>} : vector<32x8xf32>, vector<8x8xf32>, vector<32x8xf32> -> vector<32x8xf32>
    %cst_47 = arith.constant 0.000000e+00 : f32
    %61 = vector.broadcast %cst_47 : f32 to vector<32x8xf32>
    %62 = arith.cmpf ogt, %60, %61 : vector<32x8xf32>
    %cst_48 = arith.constant 1.000000e+00 : f32
    %63 = vector.broadcast %cst_48 : f32 to vector<32x8xf32>
    %64 = arith.select %62, %60, %63 : vector<32x8xi1>, vector<32x8xf32>
    %cst_49 = arith.constant 0.000000e+00 : f32
    %65 = vector.broadcast %cst_49 : f32 to vector<32x8xf32>
    %66 = arith.cmpf ogt, %60, %65 : vector<32x8xf32>
    %67 = arith.divf %59, %64 : vector<32x8xf32>
    %cst_50 = arith.constant 0.000000e+00 : f32
    %68 = vector.broadcast %cst_50 : f32 to vector<32x8xf32>
    %69 = arith.select %66, %67, %68 : vector<32x8xi1>, vector<32x8xf32>
    %70 = vector.extract_strided_slice %5 {offsets = [8, 0], sizes = [8, 32], strides = [1, 1]} : vector<32x32xf32> to vector<8x32xf32>
    %cst_51 = arith.constant dense<0.000000e+00> : vector<32x32xf32>
    %71 = tpu.matmul %69, %70, %cst_51 {dimension_numbers = #tpu.dot_dimension_numbers<[1], [0], [0], [1], [0, 0, 1, 1], [], []>} : vector<32x8xf32>, vector<8x32xf32>, vector<32x32xf32> -> vector<32x32xf32>
    %72 = arith.addf %48, %71 : vector<32x32xf32>
    %73 = vector.extract_strided_slice %13 {offsets = [0, 16], sizes = [32, 8], strides = [1, 1]} : vector<32x32xf32> to vector<32x8xf32>
    %74 = vector.extract_strided_slice %22 {offsets = [0, 16], sizes = [8, 8], strides = [1, 1]} : vector<8x32xf32> to vector<8x8xf32>
    "tpu.trace_start"() <{level = 10 : i32, message = "qd,kd->qk"}> : () -> ()
    %cst_52 = arith.constant dense<0.000000e+00> : vector<32x8xf32>
    %75 = tpu.matmul %73, %74, %cst_52 {dimension_numbers = #tpu.dot_dimension_numbers<[1], [1], [0], [0], [0, 0, 1, 0], [], []>} : vector<32x8xf32>, vector<8x8xf32>, vector<32x8xf32> -> vector<32x8xf32>
    "tpu.trace_stop"() : () -> ()
    %cst_53 = arith.constant 0.353553385 : f32
    %76 = vector.broadcast %cst_53 : f32 to vector<32x8xf32>
    %77 = arith.mulf %75, %76 : vector<32x8xf32>
    %cst_54 = arith.constant dense<0xFF800000> : vector<32xf32>
    %78 = vector.multi_reduction <maximumf>, %77, %cst_54 [1] : vector<32x8xf32> to vector<32xf32>
    %79 = vector.shape_cast %78 : vector<32xf32> to vector<32x1xf32>
    %80 = vector.broadcast %79 : vector<32x1xf32> to vector<32x8xf32>
    %81 = arith.subf %77, %80 : vector<32x8xf32>
    %82 = math.exp %81 : vector<32x8xf32>
    %cst_55 = arith.constant dense<0.000000e+00> : vector<32x8xf32>
    %83 = tpu.matmul %82, %23, %cst_55 {dimension_numbers = #tpu.dot_dimension_numbers<[1], [0], [0], [1], [0, 0, 1, 1], [], []>} : vector<32x8xf32>, vector<8x8xf32>, vector<32x8xf32> -> vector<32x8xf32>
    %cst_56 = arith.constant dense<0.000000e+00> : vector<32x8xf32>
    %84 = tpu.matmul %82, %19, %cst_56 {dimension_numbers = #tpu.dot_dimension_numbers<[1], [0], [0], [1], [0, 0, 1, 1], [], []>} : vector<32x8xf32>, vector<8x8xf32>, vector<32x8xf32> -> vector<32x8xf32>
    %cst_57 = arith.constant 0.000000e+00 : f32
    %85 = vector.broadcast %cst_57 : f32 to vector<32x8xf32>
    %86 = arith.cmpf ogt, %84, %85 : vector<32x8xf32>
    %cst_58 = arith.constant 1.000000e+00 : f32
    %87 = vector.broadcast %cst_58 : f32 to vector<32x8xf32>
    %88 = arith.select %86, %84, %87 : vector<32x8xi1>, vector<32x8xf32>
    %cst_59 = arith.constant 0.000000e+00 : f32
    %89 = vector.broadcast %cst_59 : f32 to vector<32x8xf32>
    %90 = arith.cmpf ogt, %84, %89 : vector<32x8xf32>
    %91 = arith.divf %83, %88 : vector<32x8xf32>
    %cst_60 = arith.constant 0.000000e+00 : f32
    %92 = vector.broadcast %cst_60 : f32 to vector<32x8xf32>
    %93 = arith.select %90, %91, %92 : vector<32x8xi1>, vector<32x8xf32>
    %94 = vector.extract_strided_slice %5 {offsets = [16, 0], sizes = [8, 32], strides = [1, 1]} : vector<32x32xf32> to vector<8x32xf32>
    %cst_61 = arith.constant dense<0.000000e+00> : vector<32x32xf32>
    %95 = tpu.matmul %93, %94, %cst_61 {dimension_numbers = #tpu.dot_dimension_numbers<[1], [0], [0], [1], [0, 0, 1, 1], [], []>} : vector<32x8xf32>, vector<8x32xf32>, vector<32x32xf32> -> vector<32x32xf32>
    %96 = arith.addf %72, %95 : vector<32x32xf32>
    %97 = vector.extract_strided_slice %13 {offsets = [0, 24], sizes = [32, 8], strides = [1, 1]} : vector<32x32xf32> to vector<32x8xf32>
    %98 = vector.extract_strided_slice %22 {offsets = [0, 24], sizes = [8, 8], strides = [1, 1]} : vector<8x32xf32> to vector<8x8xf32>
    "tpu.trace_start"() <{level = 10 : i32, message = "qd,kd->qk"}> : () -> ()
    %cst_62 = arith.constant dense<0.000000e+00> : vector<32x8xf32>
    %99 = tpu.matmul %97, %98, %cst_62 {dimension_numbers = #tpu.dot_dimension_numbers<[1], [1], [0], [0], [0, 0, 1, 0], [], []>} : vector<32x8xf32>, vector<8x8xf32>, vector<32x8xf32> -> vector<32x8xf32>
    "tpu.trace_stop"() : () -> ()
    %cst_63 = arith.constant 0.353553385 : f32
    %100 = vector.broadcast %cst_63 : f32 to vector<32x8xf32>
    %101 = arith.mulf %99, %100 : vector<32x8xf32>
    %cst_64 = arith.constant dense<0xFF800000> : vector<32xf32>
    %102 = vector.multi_reduction <maximumf>, %101, %cst_64 [1] : vector<32x8xf32> to vector<32xf32>
    %103 = vector.shape_cast %102 : vector<32xf32> to vector<32x1xf32>
    %104 = vector.broadcast %103 : vector<32x1xf32> to vector<32x8xf32>
    %105 = arith.subf %101, %104 : vector<32x8xf32>
    %106 = math.exp %105 : vector<32x8xf32>
    %cst_65 = arith.constant dense<0.000000e+00> : vector<32x8xf32>
    %107 = tpu.matmul %106, %23, %cst_65 {dimension_numbers = #tpu.dot_dimension_numbers<[1], [0], [0], [1], [0, 0, 1, 1], [], []>} : vector<32x8xf32>, vector<8x8xf32>, vector<32x8xf32> -> vector<32x8xf32>
    %cst_66 = arith.constant dense<0.000000e+00> : vector<32x8xf32>
    %108 = tpu.matmul %106, %19, %cst_66 {dimension_numbers = #tpu.dot_dimension_numbers<[1], [0], [0], [1], [0, 0, 1, 1], [], []>} : vector<32x8xf32>, vector<8x8xf32>, vector<32x8xf32> -> vector<32x8xf32>
    %cst_67 = arith.constant 0.000000e+00 : f32
    %109 = vector.broadcast %cst_67 : f32 to vector<32x8xf32>
    %110 = arith.cmpf ogt, %108, %109 : vector<32x8xf32>
    %cst_68 = arith.constant 1.000000e+00 : f32
    %111 = vector.broadcast %cst_68 : f32 to vector<32x8xf32>
    %112 = arith.select %110, %108, %111 : vector<32x8xi1>, vector<32x8xf32>
    %cst_69 = arith.constant 0.000000e+00 : f32
    %113 = vector.broadcast %cst_69 : f32 to vector<32x8xf32>
    %114 = arith.cmpf ogt, %108, %113 : vector<32x8xf32>
    %115 = arith.divf %107, %112 : vector<32x8xf32>
    %cst_70 = arith.constant 0.000000e+00 : f32
    %116 = vector.broadcast %cst_70 : f32 to vector<32x8xf32>
    %117 = arith.select %114, %115, %116 : vector<32x8xi1>, vector<32x8xf32>
    %118 = vector.extract_strided_slice %5 {offsets = [24, 0], sizes = [8, 32], strides = [1, 1]} : vector<32x32xf32> to vector<8x32xf32>
    %cst_71 = arith.constant dense<0.000000e+00> : vector<32x32xf32>
    %119 = tpu.matmul %117, %118, %cst_71 {dimension_numbers = #tpu.dot_dimension_numbers<[1], [0], [0], [1], [0, 0, 1, 1], [], []>} : vector<32x8xf32>, vector<8x32xf32>, vector<32x32xf32> -> vector<32x32xf32>
    %120 = arith.addf %96, %119 : vector<32x32xf32>
    %121 = vector.broadcast %6 : vector<1x32xf32> to vector<32x32xf32>
    %122 = arith.addf %120, %121 : vector<32x32xf32>
    %cst_72 = arith.constant dense<0.000000e+00> : vector<32x96xf32>
    %123 = tpu.matmul %122, %7, %cst_72 {dimension_numbers = #tpu.dot_dimension_numbers<[1], [0], [0], [1], [0, 0, 1, 1], [], []>} : vector<32x32xf32>, vector<32x96xf32>, vector<32x96xf32> -> vector<32x96xf32>
    %124 = vector.broadcast %8 : vector<1x96xf32> to vector<32x96xf32>
    %125 = arith.addf %123, %124 : vector<32x96xf32>
    %c1 = arith.constant 1 : index
    %c0_73 = arith.constant 0 : index
    %c0_74 = arith.constant 0 : index
    %126 = vector.load %arg1[%c1, %c0_73, %c0_74] : memref<2x8x32xf32, #tpu.memory_space<vmem>>, vector<1x8x32xf32>
    %127 = vector.shape_cast %126 : vector<1x8x32xf32> to vector<8x32xf32>
    %c1_75 = arith.constant 1 : index
    %c0_76 = arith.constant 0 : index
    %c0_77 = arith.constant 0 : index
    %128 = vector.load %arg2[%c1_75, %c0_76, %c0_77] : memref<2x8x8xf32, #tpu.memory_space<vmem>>, vector<1x8x8xf32>
    %129 = vector.shape_cast %128 : vector<1x8x8xf32> to vector<8x8xf32>
    %c1_78 = arith.constant 1 : index
    %c0_79 = arith.constant 0 : index
    %c0_80 = arith.constant 0 : index
    %130 = vector.load %arg3[%c1_78, %c0_79, %c0_80] : memref<2x8x8xf32, #tpu.memory_space<vmem>>, vector<1x8x8xf32>
    %131 = vector.shape_cast %130 : vector<1x8x8xf32> to vector<8x8xf32>
    %cst_81 = arith.constant dense<0.000000e+00> : vector<8x32xf32>
    %132 = tpu.matmul %127, %3, %cst_81 {dimension_numbers = #tpu.dot_dimension_numbers<[1], [0], [0], [1], [0, 0, 1, 1], [], []>} : vector<8x32xf32>, vector<32x32xf32>, vector<8x32xf32> -> vector<8x32xf32>
    %133 = vector.broadcast %4 : vector<1x32xf32> to vector<8x32xf32>
    %134 = arith.addf %132, %133 : vector<8x32xf32>
    %135 = arith.mulf %131, %129 : vector<8x8xf32>
    %cst_82 = arith.constant 0.000000e+00 : f32
    %136 = vector.broadcast %cst_82 : f32 to vector<32x32xf32>
    %137 = vector.extract_strided_slice %13 {offsets = [0, 0], sizes = [32, 8], strides = [1, 1]} : vector<32x32xf32> to vector<32x8xf32>
    %138 = vector.extract_strided_slice %134 {offsets = [0, 0], sizes = [8, 8], strides = [1, 1]} : vector<8x32xf32> to vector<8x8xf32>
    "tpu.trace_start"() <{level = 10 : i32, message = "qd,kd->qk"}> : () -> ()
    %cst_83 = arith.constant dense<0.000000e+00> : vector<32x8xf32>
    %139 = tpu.matmul %137, %138, %cst_83 {dimension_numbers = #tpu.dot_dimension_numbers<[1], [1], [0], [0], [0, 0, 1, 0], [], []>} : vector<32x8xf32>, vector<8x8xf32>, vector<32x8xf32> -> vector<32x8xf32>
    "tpu.trace_stop"() : () -> ()
    %cst_84 = arith.constant 0.353553385 : f32
    %140 = vector.broadcast %cst_84 : f32 to vector<32x8xf32>
    %141 = arith.mulf %139, %140 : vector<32x8xf32>
    %cst_85 = arith.constant dense<0xFF800000> : vector<32xf32>
    %142 = vector.multi_reduction <maximumf>, %141, %cst_85 [1] : vector<32x8xf32> to vector<32xf32>
    %143 = vector.shape_cast %142 : vector<32xf32> to vector<32x1xf32>
    %144 = vector.broadcast %143 : vector<32x1xf32> to vector<32x8xf32>
    %145 = arith.subf %141, %144 : vector<32x8xf32>
    %146 = math.exp %145 : vector<32x8xf32>
    %cst_86 = arith.constant dense<0.000000e+00> : vector<32x8xf32>
    %147 = tpu.matmul %146, %135, %cst_86 {dimension_numbers = #tpu.dot_dimension_numbers<[1], [0], [0], [1], [0, 0, 1, 1], [], []>} : vector<32x8xf32>, vector<8x8xf32>, vector<32x8xf32> -> vector<32x8xf32>
    %cst_87 = arith.constant dense<0.000000e+00> : vector<32x8xf32>
    %148 = tpu.matmul %146, %131, %cst_87 {dimension_numbers = #tpu.dot_dimension_numbers<[1], [0], [0], [1], [0, 0, 1, 1], [], []>} : vector<32x8xf32>, vector<8x8xf32>, vector<32x8xf32> -> vector<32x8xf32>
    %cst_88 = arith.constant 0.000000e+00 : f32
    %149 = vector.broadcast %cst_88 : f32 to vector<32x8xf32>
    %150 = arith.cmpf ogt, %148, %149 : vector<32x8xf32>
    %cst_89 = arith.constant 1.000000e+00 : f32
    %151 = vector.broadcast %cst_89 : f32 to vector<32x8xf32>
    %152 = arith.select %150, %148, %151 : vector<32x8xi1>, vector<32x8xf32>
    %cst_90 = arith.constant 0.000000e+00 : f32
    %153 = vector.broadcast %cst_90 : f32 to vector<32x8xf32>
    %154 = arith.cmpf ogt, %148, %153 : vector<32x8xf32>
    %155 = arith.divf %147, %152 : vector<32x8xf32>
    %cst_91 = arith.constant 0.000000e+00 : f32
    %156 = vector.broadcast %cst_91 : f32 to vector<32x8xf32>
    %157 = arith.select %154, %155, %156 : vector<32x8xi1>, vector<32x8xf32>
    %158 = vector.extract_strided_slice %5 {offsets = [0, 0], sizes = [8, 32], strides = [1, 1]} : vector<32x32xf32> to vector<8x32xf32>
    %cst_92 = arith.constant dense<0.000000e+00> : vector<32x32xf32>
    %159 = tpu.matmul %157, %158, %cst_92 {dimension_numbers = #tpu.dot_dimension_numbers<[1], [0], [0], [1], [0, 0, 1, 1], [], []>} : vector<32x8xf32>, vector<8x32xf32>, vector<32x32xf32> -> vector<32x32xf32>
    %160 = arith.addf %136, %159 : vector<32x32xf32>
    %161 = vector.extract_strided_slice %13 {offsets = [0, 8], sizes = [32, 8], strides = [1, 1]} : vector<32x32xf32> to vector<32x8xf32>
    %162 = vector.extract_strided_slice %134 {offsets = [0, 8], sizes = [8, 8], strides = [1, 1]} : vector<8x32xf32> to vector<8x8xf32>
    "tpu.trace_start"() <{level = 10 : i32, message = "qd,kd->qk"}> : () -> ()
    %cst_93 = arith.constant dense<0.000000e+00> : vector<32x8xf32>
    %163 = tpu.matmul %161, %162, %cst_93 {dimension_numbers = #tpu.dot_dimension_numbers<[1], [1], [0], [0], [0, 0, 1, 0], [], []>} : vector<32x8xf32>, vector<8x8xf32>, vector<32x8xf32> -> vector<32x8xf32>
    "tpu.trace_stop"() : () -> ()
    %cst_94 = arith.constant 0.353553385 : f32
    %164 = vector.broadcast %cst_94 : f32 to vector<32x8xf32>
    %165 = arith.mulf %163, %164 : vector<32x8xf32>
    %cst_95 = arith.constant dense<0xFF800000> : vector<32xf32>
    %166 = vector.multi_reduction <maximumf>, %165, %cst_95 [1] : vector<32x8xf32> to vector<32xf32>
    %167 = vector.shape_cast %166 : vector<32xf32> to vector<32x1xf32>
    %168 = vector.broadcast %167 : vector<32x1xf32> to vector<32x8xf32>
    %169 = arith.subf %165, %168 : vector<32x8xf32>
    %170 = math.exp %169 : vector<32x8xf32>
    %cst_96 = arith.constant dense<0.000000e+00> : vector<32x8xf32>
    %171 = tpu.matmul %170, %135, %cst_96 {dimension_numbers = #tpu.dot_dimension_numbers<[1], [0], [0], [1], [0, 0, 1, 1], [], []>} : vector<32x8xf32>, vector<8x8xf32>, vector<32x8xf32> -> vector<32x8xf32>
    %cst_97 = arith.constant dense<0.000000e+00> : vector<32x8xf32>
    %172 = tpu.matmul %170, %131, %cst_97 {dimension_numbers = #tpu.dot_dimension_numbers<[1], [0], [0], [1], [0, 0, 1, 1], [], []>} : vector<32x8xf32>, vector<8x8xf32>, vector<32x8xf32> -> vector<32x8xf32>
    %cst_98 = arith.constant 0.000000e+00 : f32
    %173 = vector.broadcast %cst_98 : f32 to vector<32x8xf32>
    %174 = arith.cmpf ogt, %172, %173 : vector<32x8xf32>
    %cst_99 = arith.constant 1.000000e+00 : f32
    %175 = vector.broadcast %cst_99 : f32 to vector<32x8xf32>
    %176 = arith.select %174, %172, %175 : vector<32x8xi1>, vector<32x8xf32>
    %cst_100 = arith.constant 0.000000e+00 : f32
    %177 = vector.broadcast %cst_100 : f32 to vector<32x8xf32>
    %178 = arith.cmpf ogt, %172, %177 : vector<32x8xf32>
    %179 = arith.divf %171, %176 : vector<32x8xf32>
    %cst_101 = arith.constant 0.000000e+00 : f32
    %180 = vector.broadcast %cst_101 : f32 to vector<32x8xf32>
    %181 = arith.select %178, %179, %180 : vector<32x8xi1>, vector<32x8xf32>
    %182 = vector.extract_strided_slice %5 {offsets = [8, 0], sizes = [8, 32], strides = [1, 1]} : vector<32x32xf32> to vector<8x32xf32>
    %cst_102 = arith.constant dense<0.000000e+00> : vector<32x32xf32>
    %183 = tpu.matmul %181, %182, %cst_102 {dimension_numbers = #tpu.dot_dimension_numbers<[1], [0], [0], [1], [0, 0, 1, 1], [], []>} : vector<32x8xf32>, vector<8x32xf32>, vector<32x32xf32> -> vector<32x32xf32>
    %184 = arith.addf %160, %183 : vector<32x32xf32>
    %185 = vector.extract_strided_slice %13 {offsets = [0, 16], sizes = [32, 8], strides = [1, 1]} : vector<32x32xf32> to vector<32x8xf32>
    %186 = vector.extract_strided_slice %134 {offsets = [0, 16], sizes = [8, 8], strides = [1, 1]} : vector<8x32xf32> to vector<8x8xf32>
    "tpu.trace_start"() <{level = 10 : i32, message = "qd,kd->qk"}> : () -> ()
    %cst_103 = arith.constant dense<0.000000e+00> : vector<32x8xf32>
    %187 = tpu.matmul %185, %186, %cst_103 {dimension_numbers = #tpu.dot_dimension_numbers<[1], [1], [0], [0], [0, 0, 1, 0], [], []>} : vector<32x8xf32>, vector<8x8xf32>, vector<32x8xf32> -> vector<32x8xf32>
    "tpu.trace_stop"() : () -> ()
    %cst_104 = arith.constant 0.353553385 : f32
    %188 = vector.broadcast %cst_104 : f32 to vector<32x8xf32>
    %189 = arith.mulf %187, %188 : vector<32x8xf32>
    %cst_105 = arith.constant dense<0xFF800000> : vector<32xf32>
    %190 = vector.multi_reduction <maximumf>, %189, %cst_105 [1] : vector<32x8xf32> to vector<32xf32>
    %191 = vector.shape_cast %190 : vector<32xf32> to vector<32x1xf32>
    %192 = vector.broadcast %191 : vector<32x1xf32> to vector<32x8xf32>
    %193 = arith.subf %189, %192 : vector<32x8xf32>
    %194 = math.exp %193 : vector<32x8xf32>
    %cst_106 = arith.constant dense<0.000000e+00> : vector<32x8xf32>
    %195 = tpu.matmul %194, %135, %cst_106 {dimension_numbers = #tpu.dot_dimension_numbers<[1], [0], [0], [1], [0, 0, 1, 1], [], []>} : vector<32x8xf32>, vector<8x8xf32>, vector<32x8xf32> -> vector<32x8xf32>
    %cst_107 = arith.constant dense<0.000000e+00> : vector<32x8xf32>
    %196 = tpu.matmul %194, %131, %cst_107 {dimension_numbers = #tpu.dot_dimension_numbers<[1], [0], [0], [1], [0, 0, 1, 1], [], []>} : vector<32x8xf32>, vector<8x8xf32>, vector<32x8xf32> -> vector<32x8xf32>
    %cst_108 = arith.constant 0.000000e+00 : f32
    %197 = vector.broadcast %cst_108 : f32 to vector<32x8xf32>
    %198 = arith.cmpf ogt, %196, %197 : vector<32x8xf32>
    %cst_109 = arith.constant 1.000000e+00 : f32
    %199 = vector.broadcast %cst_109 : f32 to vector<32x8xf32>
    %200 = arith.select %198, %196, %199 : vector<32x8xi1>, vector<32x8xf32>
    %cst_110 = arith.constant 0.000000e+00 : f32
    %201 = vector.broadcast %cst_110 : f32 to vector<32x8xf32>
    %202 = arith.cmpf ogt, %196, %201 : vector<32x8xf32>
    %203 = arith.divf %195, %200 : vector<32x8xf32>
    %cst_111 = arith.constant 0.000000e+00 : f32
    %204 = vector.broadcast %cst_111 : f32 to vector<32x8xf32>
    %205 = arith.select %202, %203, %204 : vector<32x8xi1>, vector<32x8xf32>
    %206 = vector.extract_strided_slice %5 {offsets = [16, 0], sizes = [8, 32], strides = [1, 1]} : vector<32x32xf32> to vector<8x32xf32>
    %cst_112 = arith.constant dense<0.000000e+00> : vector<32x32xf32>
    %207 = tpu.matmul %205, %206, %cst_112 {dimension_numbers = #tpu.dot_dimension_numbers<[1], [0], [0], [1], [0, 0, 1, 1], [], []>} : vector<32x8xf32>, vector<8x32xf32>, vector<32x32xf32> -> vector<32x32xf32>
    %208 = arith.addf %184, %207 : vector<32x32xf32>
    %209 = vector.extract_strided_slice %13 {offsets = [0, 24], sizes = [32, 8], strides = [1, 1]} : vector<32x32xf32> to vector<32x8xf32>
    %210 = vector.extract_strided_slice %134 {offsets = [0, 24], sizes = [8, 8], strides = [1, 1]} : vector<8x32xf32> to vector<8x8xf32>
    "tpu.trace_start"() <{level = 10 : i32, message = "qd,kd->qk"}> : () -> ()
    %cst_113 = arith.constant dense<0.000000e+00> : vector<32x8xf32>
    %211 = tpu.matmul %209, %210, %cst_113 {dimension_numbers = #tpu.dot_dimension_numbers<[1], [1], [0], [0], [0, 0, 1, 0], [], []>} : vector<32x8xf32>, vector<8x8xf32>, vector<32x8xf32> -> vector<32x8xf32>
    "tpu.trace_stop"() : () -> ()
    %cst_114 = arith.constant 0.353553385 : f32
    %212 = vector.broadcast %cst_114 : f32 to vector<32x8xf32>
    %213 = arith.mulf %211, %212 : vector<32x8xf32>
    %cst_115 = arith.constant dense<0xFF800000> : vector<32xf32>
    %214 = vector.multi_reduction <maximumf>, %213, %cst_115 [1] : vector<32x8xf32> to vector<32xf32>
    %215 = vector.shape_cast %214 : vector<32xf32> to vector<32x1xf32>
    %216 = vector.broadcast %215 : vector<32x1xf32> to vector<32x8xf32>
    %217 = arith.subf %213, %216 : vector<32x8xf32>
    %218 = math.exp %217 : vector<32x8xf32>
    %cst_116 = arith.constant dense<0.000000e+00> : vector<32x8xf32>
    %219 = tpu.matmul %218, %135, %cst_116 {dimension_numbers = #tpu.dot_dimension_numbers<[1], [0], [0], [1], [0, 0, 1, 1], [], []>} : vector<32x8xf32>, vector<8x8xf32>, vector<32x8xf32> -> vector<32x8xf32>
    %cst_117 = arith.constant dense<0.000000e+00> : vector<32x8xf32>
    %220 = tpu.matmul %218, %131, %cst_117 {dimension_numbers = #tpu.dot_dimension_numbers<[1], [0], [0], [1], [0, 0, 1, 1], [], []>} : vector<32x8xf32>, vector<8x8xf32>, vector<32x8xf32> -> vector<32x8xf32>
    %cst_118 = arith.constant 0.000000e+00 : f32
    %221 = vector.broadcast %cst_118 : f32 to vector<32x8xf32>
    %222 = arith.cmpf ogt, %220, %221 : vector<32x8xf32>
    %cst_119 = arith.constant 1.000000e+00 : f32
    %223 = vector.broadcast %cst_119 : f32 to vector<32x8xf32>
    %224 = arith.select %222, %220, %223 : vector<32x8xi1>, vector<32x8xf32>
    %cst_120 = arith.constant 0.000000e+00 : f32
    %225 = vector.broadcast %cst_120 : f32 to vector<32x8xf32>
    %226 = arith.cmpf ogt, %220, %225 : vector<32x8xf32>
    %227 = arith.divf %219, %224 : vector<32x8xf32>
    %cst_121 = arith.constant 0.000000e+00 : f32
    %228 = vector.broadcast %cst_121 : f32 to vector<32x8xf32>
    %229 = arith.select %226, %227, %228 : vector<32x8xi1>, vector<32x8xf32>
    %230 = vector.extract_strided_slice %5 {offsets = [24, 0], sizes = [8, 32], strides = [1, 1]} : vector<32x32xf32> to vector<8x32xf32>
    %cst_122 = arith.constant dense<0.000000e+00> : vector<32x32xf32>
    %231 = tpu.matmul %229, %230, %cst_122 {dimension_numbers = #tpu.dot_dimension_numbers<[1], [0], [0], [1], [0, 0, 1, 1], [], []>} : vector<32x8xf32>, vector<8x32xf32>, vector<32x32xf32> -> vector<32x32xf32>
    %232 = arith.addf %208, %231 : vector<32x32xf32>
    %233 = vector.broadcast %6 : vector<1x32xf32> to vector<32x32xf32>
    %234 = arith.addf %232, %233 : vector<32x32xf32>
    %cst_123 = arith.constant dense<0.000000e+00> : vector<32x96xf32>
    %235 = tpu.matmul %234, %7, %cst_123 {dimension_numbers = #tpu.dot_dimension_numbers<[1], [0], [0], [1], [0, 0, 1, 1], [], []>} : vector<32x32xf32>, vector<32x96xf32>, vector<32x96xf32> -> vector<32x96xf32>
    %236 = vector.broadcast %8 : vector<1x96xf32> to vector<32x96xf32>
    %237 = arith.addf %235, %236 : vector<32x96xf32>
    %cst_124 = arith.constant 0.000000e+00 : f32
    %238 = vector.broadcast %cst_124 : f32 to vector<2x32xf32>
    %239 = vector.extract_strided_slice %125 {offsets = [0, 0], sizes = [1, 96], strides = [1, 1]} : vector<32x96xf32> to vector<1x96xf32>
    %240 = vector.extract_strided_slice %237 {offsets = [0, 0], sizes = [1, 96], strides = [1, 1]} : vector<32x96xf32> to vector<1x96xf32>
    %241 = tpu.concatenate %239, %240 in 0 : vector<1x96xf32>, vector<1x96xf32> -> vector<2x96xf32>
    %cst_125 = arith.constant dense<0.000000e+00> : vector<2x96xf32>
    %242 = tpu.matmul %238, %9, %cst_125 {dimension_numbers = #tpu.dot_dimension_numbers<[1], [0], [0], [1], [0, 0, 1, 1], [], []>} : vector<2x32xf32>, vector<32x96xf32>, vector<2x96xf32> -> vector<2x96xf32>
    %243 = vector.broadcast %10 : vector<1x96xf32> to vector<2x96xf32>
    %244 = arith.addf %242, %243 : vector<2x96xf32>
    %245 = vector.extract_strided_slice %241 {offsets = [0, 0], sizes = [2, 32], strides = [1, 1]} : vector<2x96xf32> to vector<2x32xf32>
    %246 = vector.extract_strided_slice %244 {offsets = [0, 0], sizes = [2, 32], strides = [1, 1]} : vector<2x96xf32> to vector<2x32xf32>
    %247 = arith.addf %245, %246 : vector<2x32xf32>
    %248 = arith.negf %247 : vector<2x32xf32>
    %249 = math.exp %248 : vector<2x32xf32>
    %cst_126 = arith.constant 1.000000e+00 : f32
    %250 = vector.broadcast %cst_126 : f32 to vector<2x32xf32>
    %251 = arith.addf %250, %249 : vector<2x32xf32>
    %252 = arith.divf %250, %251 : vector<2x32xf32>
    %253 = vector.extract_strided_slice %241 {offsets = [0, 32], sizes = [2, 32], strides = [1, 1]} : vector<2x96xf32> to vector<2x32xf32>
    %254 = vector.extract_strided_slice %244 {offsets = [0, 32], sizes = [2, 32], strides = [1, 1]} : vector<2x96xf32> to vector<2x32xf32>
    %255 = arith.addf %253, %254 : vector<2x32xf32>
    %256 = arith.negf %255 : vector<2x32xf32>
    %257 = math.exp %256 : vector<2x32xf32>
    %cst_127 = arith.constant 1.000000e+00 : f32
    %258 = vector.broadcast %cst_127 : f32 to vector<2x32xf32>
    %259 = arith.addf %258, %257 : vector<2x32xf32>
    %260 = arith.divf %258, %259 : vector<2x32xf32>
    %261 = vector.extract_strided_slice %241 {offsets = [0, 64], sizes = [2, 32], strides = [1, 1]} : vector<2x96xf32> to vector<2x32xf32>
    %262 = vector.extract_strided_slice %244 {offsets = [0, 64], sizes = [2, 32], strides = [1, 1]} : vector<2x96xf32> to vector<2x32xf32>
    %263 = arith.mulf %252, %262 : vector<2x32xf32>
    %264 = arith.addf %261, %263 : vector<2x32xf32>
    %265 = math.tanh %264 : vector<2x32xf32>
    %cst_128 = arith.constant 1.000000e+00 : f32
    %266 = vector.broadcast %cst_128 : f32 to vector<2x32xf32>
    %267 = arith.subf %266, %260 : vector<2x32xf32>
    %268 = arith.mulf %267, %265 : vector<2x32xf32>
    %269 = arith.mulf %260, %238 : vector<2x32xf32>
    %270 = arith.addf %268, %269 : vector<2x32xf32>
    %271 = vector.extract_strided_slice %125 {offsets = [1, 0], sizes = [1, 96], strides = [1, 1]} : vector<32x96xf32> to vector<1x96xf32>
    %272 = vector.extract_strided_slice %237 {offsets = [1, 0], sizes = [1, 96], strides = [1, 1]} : vector<32x96xf32> to vector<1x96xf32>
    %273 = tpu.concatenate %271, %272 in 0 : vector<1x96xf32>, vector<1x96xf32> -> vector<2x96xf32>
    %cst_129 = arith.constant dense<0.000000e+00> : vector<2x96xf32>
    %274 = tpu.matmul %270, %9, %cst_129 {dimension_numbers = #tpu.dot_dimension_numbers<[1], [0], [0], [1], [0, 0, 1, 1], [], []>} : vector<2x32xf32>, vector<32x96xf32>, vector<2x96xf32> -> vector<2x96xf32>
    %275 = vector.broadcast %10 : vector<1x96xf32> to vector<2x96xf32>
    %276 = arith.addf %274, %275 : vector<2x96xf32>
    %277 = vector.extract_strided_slice %273 {offsets = [0, 0], sizes = [2, 32], strides = [1, 1]} : vector<2x96xf32> to vector<2x32xf32>
    %278 = vector.extract_strided_slice %276 {offsets = [0, 0], sizes = [2, 32], strides = [1, 1]} : vector<2x96xf32> to vector<2x32xf32>
    %279 = arith.addf %277, %278 : vector<2x32xf32>
    %280 = arith.negf %279 : vector<2x32xf32>
    %281 = math.exp %280 : vector<2x32xf32>
    %cst_130 = arith.constant 1.000000e+00 : f32
    %282 = vector.broadcast %cst_130 : f32 to vector<2x32xf32>
    %283 = arith.addf %282, %281 : vector<2x32xf32>
    %284 = arith.divf %282, %283 : vector<2x32xf32>
    %285 = vector.extract_strided_slice %273 {offsets = [0, 32], sizes = [2, 32], strides = [1, 1]} : vector<2x96xf32> to vector<2x32xf32>
    %286 = vector.extract_strided_slice %276 {offsets = [0, 32], sizes = [2, 32], strides = [1, 1]} : vector<2x96xf32> to vector<2x32xf32>
    %287 = arith.addf %285, %286 : vector<2x32xf32>
    %288 = arith.negf %287 : vector<2x32xf32>
    %289 = math.exp %288 : vector<2x32xf32>
    %cst_131 = arith.constant 1.000000e+00 : f32
    %290 = vector.broadcast %cst_131 : f32 to vector<2x32xf32>
    %291 = arith.addf %290, %289 : vector<2x32xf32>
    %292 = arith.divf %290, %291 : vector<2x32xf32>
    %293 = vector.extract_strided_slice %273 {offsets = [0, 64], sizes = [2, 32], strides = [1, 1]} : vector<2x96xf32> to vector<2x32xf32>
    %294 = vector.extract_strided_slice %276 {offsets = [0, 64], sizes = [2, 32], strides = [1, 1]} : vector<2x96xf32> to vector<2x32xf32>
    %295 = arith.mulf %284, %294 : vector<2x32xf32>
    %296 = arith.addf %293, %295 : vector<2x32xf32>
    %297 = math.tanh %296 : vector<2x32xf32>
    %cst_132 = arith.constant 1.000000e+00 : f32
    %298 = vector.broadcast %cst_132 : f32 to vector<2x32xf32>
    %299 = arith.subf %298, %292 : vector<2x32xf32>
    %300 = arith.mulf %299, %297 : vector<2x32xf32>
    %301 = arith.mulf %292, %270 : vector<2x32xf32>
    %302 = arith.addf %300, %301 : vector<2x32xf32>
    %303 = vector.extract_strided_slice %125 {offsets = [2, 0], sizes = [1, 96], strides = [1, 1]} : vector<32x96xf32> to vector<1x96xf32>
    %304 = vector.extract_strided_slice %237 {offsets = [2, 0], sizes = [1, 96], strides = [1, 1]} : vector<32x96xf32> to vector<1x96xf32>
    %305 = tpu.concatenate %303, %304 in 0 : vector<1x96xf32>, vector<1x96xf32> -> vector<2x96xf32>
    %cst_133 = arith.constant dense<0.000000e+00> : vector<2x96xf32>
    %306 = tpu.matmul %302, %9, %cst_133 {dimension_numbers = #tpu.dot_dimension_numbers<[1], [0], [0], [1], [0, 0, 1, 1], [], []>} : vector<2x32xf32>, vector<32x96xf32>, vector<2x96xf32> -> vector<2x96xf32>
    %307 = vector.broadcast %10 : vector<1x96xf32> to vector<2x96xf32>
    %308 = arith.addf %306, %307 : vector<2x96xf32>
    %309 = vector.extract_strided_slice %305 {offsets = [0, 0], sizes = [2, 32], strides = [1, 1]} : vector<2x96xf32> to vector<2x32xf32>
    %310 = vector.extract_strided_slice %308 {offsets = [0, 0], sizes = [2, 32], strides = [1, 1]} : vector<2x96xf32> to vector<2x32xf32>
    %311 = arith.addf %309, %310 : vector<2x32xf32>
    %312 = arith.negf %311 : vector<2x32xf32>
    %313 = math.exp %312 : vector<2x32xf32>
    %cst_134 = arith.constant 1.000000e+00 : f32
    %314 = vector.broadcast %cst_134 : f32 to vector<2x32xf32>
    %315 = arith.addf %314, %313 : vector<2x32xf32>
    %316 = arith.divf %314, %315 : vector<2x32xf32>
    %317 = vector.extract_strided_slice %305 {offsets = [0, 32], sizes = [2, 32], strides = [1, 1]} : vector<2x96xf32> to vector<2x32xf32>
    %318 = vector.extract_strided_slice %308 {offsets = [0, 32], sizes = [2, 32], strides = [1, 1]} : vector<2x96xf32> to vector<2x32xf32>
    %319 = arith.addf %317, %318 : vector<2x32xf32>
    %320 = arith.negf %319 : vector<2x32xf32>
    %321 = math.exp %320 : vector<2x32xf32>
    %cst_135 = arith.constant 1.000000e+00 : f32
    %322 = vector.broadcast %cst_135 : f32 to vector<2x32xf32>
    %323 = arith.addf %322, %321 : vector<2x32xf32>
    %324 = arith.divf %322, %323 : vector<2x32xf32>
    %325 = vector.extract_strided_slice %305 {offsets = [0, 64], sizes = [2, 32], strides = [1, 1]} : vector<2x96xf32> to vector<2x32xf32>
    %326 = vector.extract_strided_slice %308 {offsets = [0, 64], sizes = [2, 32], strides = [1, 1]} : vector<2x96xf32> to vector<2x32xf32>
    %327 = arith.mulf %316, %326 : vector<2x32xf32>
    %328 = arith.addf %325, %327 : vector<2x32xf32>
    %329 = math.tanh %328 : vector<2x32xf32>
    %cst_136 = arith.constant 1.000000e+00 : f32
    %330 = vector.broadcast %cst_136 : f32 to vector<2x32xf32>
    %331 = arith.subf %330, %324 : vector<2x32xf32>
    %332 = arith.mulf %331, %329 : vector<2x32xf32>
    %333 = arith.mulf %324, %302 : vector<2x32xf32>
    %334 = arith.addf %332, %333 : vector<2x32xf32>
    %335 = vector.extract_strided_slice %125 {offsets = [3, 0], sizes = [1, 96], strides = [1, 1]} : vector<32x96xf32> to vector<1x96xf32>
    %336 = vector.extract_strided_slice %237 {offsets = [3, 0], sizes = [1, 96], strides = [1, 1]} : vector<32x96xf32> to vector<1x96xf32>
    %337 = tpu.concatenate %335, %336 in 0 : vector<1x96xf32>, vector<1x96xf32> -> vector<2x96xf32>
    %cst_137 = arith.constant dense<0.000000e+00> : vector<2x96xf32>
    %338 = tpu.matmul %334, %9, %cst_137 {dimension_numbers = #tpu.dot_dimension_numbers<[1], [0], [0], [1], [0, 0, 1, 1], [], []>} : vector<2x32xf32>, vector<32x96xf32>, vector<2x96xf32> -> vector<2x96xf32>
    %339 = vector.broadcast %10 : vector<1x96xf32> to vector<2x96xf32>
    %340 = arith.addf %338, %339 : vector<2x96xf32>
    %341 = vector.extract_strided_slice %337 {offsets = [0, 0], sizes = [2, 32], strides = [1, 1]} : vector<2x96xf32> to vector<2x32xf32>
    %342 = vector.extract_strided_slice %340 {offsets = [0, 0], sizes = [2, 32], strides = [1, 1]} : vector<2x96xf32> to vector<2x32xf32>
    %343 = arith.addf %341, %342 : vector<2x32xf32>
    %344 = arith.negf %343 : vector<2x32xf32>
    %345 = math.exp %344 : vector<2x32xf32>
    %cst_138 = arith.constant 1.000000e+00 : f32
    %346 = vector.broadcast %cst_138 : f32 to vector<2x32xf32>
    %347 = arith.addf %346, %345 : vector<2x32xf32>
    %348 = arith.divf %346, %347 : vector<2x32xf32>
    %349 = vector.extract_strided_slice %337 {offsets = [0, 32], sizes = [2, 32], strides = [1, 1]} : vector<2x96xf32> to vector<2x32xf32>
    %350 = vector.extract_strided_slice %340 {offsets = [0, 32], sizes = [2, 32], strides = [1, 1]} : vector<2x96xf32> to vector<2x32xf32>
    %351 = arith.addf %349, %350 : vector<2x32xf32>
    %352 = arith.negf %351 : vector<2x32xf32>
    %353 = math.exp %352 : vector<2x32xf32>
    %cst_139 = arith.constant 1.000000e+00 : f32
    %354 = vector.broadcast %cst_139 : f32 to vector<2x32xf32>
    %355 = arith.addf %354, %353 : vector<2x32xf32>
    %356 = arith.divf %354, %355 : vector<2x32xf32>
    %357 = vector.extract_strided_slice %337 {offsets = [0, 64], sizes = [2, 32], strides = [1, 1]} : vector<2x96xf32> to vector<2x32xf32>
    %358 = vector.extract_strided_slice %340 {offsets = [0, 64], sizes = [2, 32], strides = [1, 1]} : vector<2x96xf32> to vector<2x32xf32>
    %359 = arith.mulf %348, %358 : vector<2x32xf32>
    %360 = arith.addf %357, %359 : vector<2x32xf32>
    %361 = math.tanh %360 : vector<2x32xf32>
    %cst_140 = arith.constant 1.000000e+00 : f32
    %362 = vector.broadcast %cst_140 : f32 to vector<2x32xf32>
    %363 = arith.subf %362, %356 : vector<2x32xf32>
    %364 = arith.mulf %363, %361 : vector<2x32xf32>
    %365 = arith.mulf %356, %334 : vector<2x32xf32>
    %366 = arith.addf %364, %365 : vector<2x32xf32>
    %367 = vector.extract_strided_slice %125 {offsets = [4, 0], sizes = [1, 96], strides = [1, 1]} : vector<32x96xf32> to vector<1x96xf32>
    %368 = vector.extract_strided_slice %237 {offsets = [4, 0], sizes = [1, 96], strides = [1, 1]} : vector<32x96xf32> to vector<1x96xf32>
    %369 = tpu.concatenate %367, %368 in 0 : vector<1x96xf32>, vector<1x96xf32> -> vector<2x96xf32>
    %cst_141 = arith.constant dense<0.000000e+00> : vector<2x96xf32>
    %370 = tpu.matmul %366, %9, %cst_141 {dimension_numbers = #tpu.dot_dimension_numbers<[1], [0], [0], [1], [0, 0, 1, 1], [], []>} : vector<2x32xf32>, vector<32x96xf32>, vector<2x96xf32> -> vector<2x96xf32>
    %371 = vector.broadcast %10 : vector<1x96xf32> to vector<2x96xf32>
    %372 = arith.addf %370, %371 : vector<2x96xf32>
    %373 = vector.extract_strided_slice %369 {offsets = [0, 0], sizes = [2, 32], strides = [1, 1]} : vector<2x96xf32> to vector<2x32xf32>
    %374 = vector.extract_strided_slice %372 {offsets = [0, 0], sizes = [2, 32], strides = [1, 1]} : vector<2x96xf32> to vector<2x32xf32>
    %375 = arith.addf %373, %374 : vector<2x32xf32>
    %376 = arith.negf %375 : vector<2x32xf32>
    %377 = math.exp %376 : vector<2x32xf32>
    %cst_142 = arith.constant 1.000000e+00 : f32
    %378 = vector.broadcast %cst_142 : f32 to vector<2x32xf32>
    %379 = arith.addf %378, %377 : vector<2x32xf32>
    %380 = arith.divf %378, %379 : vector<2x32xf32>
    %381 = vector.extract_strided_slice %369 {offsets = [0, 32], sizes = [2, 32], strides = [1, 1]} : vector<2x96xf32> to vector<2x32xf32>
    %382 = vector.extract_strided_slice %372 {offsets = [0, 32], sizes = [2, 32], strides = [1, 1]} : vector<2x96xf32> to vector<2x32xf32>
    %383 = arith.addf %381, %382 : vector<2x32xf32>
    %384 = arith.negf %383 : vector<2x32xf32>
    %385 = math.exp %384 : vector<2x32xf32>
    %cst_143 = arith.constant 1.000000e+00 : f32
    %386 = vector.broadcast %cst_143 : f32 to vector<2x32xf32>
    %387 = arith.addf %386, %385 : vector<2x32xf32>
    %388 = arith.divf %386, %387 : vector<2x32xf32>
    %389 = vector.extract_strided_slice %369 {offsets = [0, 64], sizes = [2, 32], strides = [1, 1]} : vector<2x96xf32> to vector<2x32xf32>
    %390 = vector.extract_strided_slice %372 {offsets = [0, 64], sizes = [2, 32], strides = [1, 1]} : vector<2x96xf32> to vector<2x32xf32>
    %391 = arith.mulf %380, %390 : vector<2x32xf32>
    %392 = arith.addf %389, %391 : vector<2x32xf32>
    %393 = math.tanh %392 : vector<2x32xf32>
    %cst_144 = arith.constant 1.000000e+00 : f32
    %394 = vector.broadcast %cst_144 : f32 to vector<2x32xf32>
    %395 = arith.subf %394, %388 : vector<2x32xf32>
    %396 = arith.mulf %395, %393 : vector<2x32xf32>
    %397 = arith.mulf %388, %366 : vector<2x32xf32>
    %398 = arith.addf %396, %397 : vector<2x32xf32>
    %399 = vector.extract_strided_slice %125 {offsets = [5, 0], sizes = [1, 96], strides = [1, 1]} : vector<32x96xf32> to vector<1x96xf32>
    %400 = vector.extract_strided_slice %237 {offsets = [5, 0], sizes = [1, 96], strides = [1, 1]} : vector<32x96xf32> to vector<1x96xf32>
    %401 = tpu.concatenate %399, %400 in 0 : vector<1x96xf32>, vector<1x96xf32> -> vector<2x96xf32>
    %cst_145 = arith.constant dense<0.000000e+00> : vector<2x96xf32>
    %402 = tpu.matmul %398, %9, %cst_145 {dimension_numbers = #tpu.dot_dimension_numbers<[1], [0], [0], [1], [0, 0, 1, 1], [], []>} : vector<2x32xf32>, vector<32x96xf32>, vector<2x96xf32> -> vector<2x96xf32>
    %403 = vector.broadcast %10 : vector<1x96xf32> to vector<2x96xf32>
    %404 = arith.addf %402, %403 : vector<2x96xf32>
    %405 = vector.extract_strided_slice %401 {offsets = [0, 0], sizes = [2, 32], strides = [1, 1]} : vector<2x96xf32> to vector<2x32xf32>
    %406 = vector.extract_strided_slice %404 {offsets = [0, 0], sizes = [2, 32], strides = [1, 1]} : vector<2x96xf32> to vector<2x32xf32>
    %407 = arith.addf %405, %406 : vector<2x32xf32>
    %408 = arith.negf %407 : vector<2x32xf32>
    %409 = math.exp %408 : vector<2x32xf32>
    %cst_146 = arith.constant 1.000000e+00 : f32
    %410 = vector.broadcast %cst_146 : f32 to vector<2x32xf32>
    %411 = arith.addf %410, %409 : vector<2x32xf32>
    %412 = arith.divf %410, %411 : vector<2x32xf32>
    %413 = vector.extract_strided_slice %401 {offsets = [0, 32], sizes = [2, 32], strides = [1, 1]} : vector<2x96xf32> to vector<2x32xf32>
    %414 = vector.extract_strided_slice %404 {offsets = [0, 32], sizes = [2, 32], strides = [1, 1]} : vector<2x96xf32> to vector<2x32xf32>
    %415 = arith.addf %413, %414 : vector<2x32xf32>
    %416 = arith.negf %415 : vector<2x32xf32>
    %417 = math.exp %416 : vector<2x32xf32>
    %cst_147 = arith.constant 1.000000e+00 : f32
    %418 = vector.broadcast %cst_147 : f32 to vector<2x32xf32>
    %419 = arith.addf %418, %417 : vector<2x32xf32>
    %420 = arith.divf %418, %419 : vector<2x32xf32>
    %421 = vector.extract_strided_slice %401 {offsets = [0, 64], sizes = [2, 32], strides = [1, 1]} : vector<2x96xf32> to vector<2x32xf32>
    %422 = vector.extract_strided_slice %404 {offsets = [0, 64], sizes = [2, 32], strides = [1, 1]} : vector<2x96xf32> to vector<2x32xf32>
    %423 = arith.mulf %412, %422 : vector<2x32xf32>
    %424 = arith.addf %421, %423 : vector<2x32xf32>
    %425 = math.tanh %424 : vector<2x32xf32>
    %cst_148 = arith.constant 1.000000e+00 : f32
    %426 = vector.broadcast %cst_148 : f32 to vector<2x32xf32>
    %427 = arith.subf %426, %420 : vector<2x32xf32>
    %428 = arith.mulf %427, %425 : vector<2x32xf32>
    %429 = arith.mulf %420, %398 : vector<2x32xf32>
    %430 = arith.addf %428, %429 : vector<2x32xf32>
    %431 = vector.extract_strided_slice %125 {offsets = [6, 0], sizes = [1, 96], strides = [1, 1]} : vector<32x96xf32> to vector<1x96xf32>
    %432 = vector.extract_strided_slice %237 {offsets = [6, 0], sizes = [1, 96], strides = [1, 1]} : vector<32x96xf32> to vector<1x96xf32>
    %433 = tpu.concatenate %431, %432 in 0 : vector<1x96xf32>, vector<1x96xf32> -> vector<2x96xf32>
    %cst_149 = arith.constant dense<0.000000e+00> : vector<2x96xf32>
    %434 = tpu.matmul %430, %9, %cst_149 {dimension_numbers = #tpu.dot_dimension_numbers<[1], [0], [0], [1], [0, 0, 1, 1], [], []>} : vector<2x32xf32>, vector<32x96xf32>, vector<2x96xf32> -> vector<2x96xf32>
    %435 = vector.broadcast %10 : vector<1x96xf32> to vector<2x96xf32>
    %436 = arith.addf %434, %435 : vector<2x96xf32>
    %437 = vector.extract_strided_slice %433 {offsets = [0, 0], sizes = [2, 32], strides = [1, 1]} : vector<2x96xf32> to vector<2x32xf32>
    %438 = vector.extract_strided_slice %436 {offsets = [0, 0], sizes = [2, 32], strides = [1, 1]} : vector<2x96xf32> to vector<2x32xf32>
    %439 = arith.addf %437, %438 : vector<2x32xf32>
    %440 = arith.negf %439 : vector<2x32xf32>
    %441 = math.exp %440 : vector<2x32xf32>
    %cst_150 = arith.constant 1.000000e+00 : f32
    %442 = vector.broadcast %cst_150 : f32 to vector<2x32xf32>
    %443 = arith.addf %442, %441 : vector<2x32xf32>
    %444 = arith.divf %442, %443 : vector<2x32xf32>
    %445 = vector.extract_strided_slice %433 {offsets = [0, 32], sizes = [2, 32], strides = [1, 1]} : vector<2x96xf32> to vector<2x32xf32>
    %446 = vector.extract_strided_slice %436 {offsets = [0, 32], sizes = [2, 32], strides = [1, 1]} : vector<2x96xf32> to vector<2x32xf32>
    %447 = arith.addf %445, %446 : vector<2x32xf32>
    %448 = arith.negf %447 : vector<2x32xf32>
    %449 = math.exp %448 : vector<2x32xf32>
    %cst_151 = arith.constant 1.000000e+00 : f32
    %450 = vector.broadcast %cst_151 : f32 to vector<2x32xf32>
    %451 = arith.addf %450, %449 : vector<2x32xf32>
    %452 = arith.divf %450, %451 : vector<2x32xf32>
    %453 = vector.extract_strided_slice %433 {offsets = [0, 64], sizes = [2, 32], strides = [1, 1]} : vector<2x96xf32> to vector<2x32xf32>
    %454 = vector.extract_strided_slice %436 {offsets = [0, 64], sizes = [2, 32], strides = [1, 1]} : vector<2x96xf32> to vector<2x32xf32>
    %455 = arith.mulf %444, %454 : vector<2x32xf32>
    %456 = arith.addf %453, %455 : vector<2x32xf32>
    %457 = math.tanh %456 : vector<2x32xf32>
    %cst_152 = arith.constant 1.000000e+00 : f32
    %458 = vector.broadcast %cst_152 : f32 to vector<2x32xf32>
    %459 = arith.subf %458, %452 : vector<2x32xf32>
    %460 = arith.mulf %459, %457 : vector<2x32xf32>
    %461 = arith.mulf %452, %430 : vector<2x32xf32>
    %462 = arith.addf %460, %461 : vector<2x32xf32>
    %463 = vector.extract_strided_slice %125 {offsets = [7, 0], sizes = [1, 96], strides = [1, 1]} : vector<32x96xf32> to vector<1x96xf32>
    %464 = vector.extract_strided_slice %237 {offsets = [7, 0], sizes = [1, 96], strides = [1, 1]} : vector<32x96xf32> to vector<1x96xf32>
    %465 = tpu.concatenate %463, %464 in 0 : vector<1x96xf32>, vector<1x96xf32> -> vector<2x96xf32>
    %cst_153 = arith.constant dense<0.000000e+00> : vector<2x96xf32>
    %466 = tpu.matmul %462, %9, %cst_153 {dimension_numbers = #tpu.dot_dimension_numbers<[1], [0], [0], [1], [0, 0, 1, 1], [], []>} : vector<2x32xf32>, vector<32x96xf32>, vector<2x96xf32> -> vector<2x96xf32>
    %467 = vector.broadcast %10 : vector<1x96xf32> to vector<2x96xf32>
    %468 = arith.addf %466, %467 : vector<2x96xf32>
    %469 = vector.extract_strided_slice %465 {offsets = [0, 0], sizes = [2, 32], strides = [1, 1]} : vector<2x96xf32> to vector<2x32xf32>
    %470 = vector.extract_strided_slice %468 {offsets = [0, 0], sizes = [2, 32], strides = [1, 1]} : vector<2x96xf32> to vector<2x32xf32>
    %471 = arith.addf %469, %470 : vector<2x32xf32>
    %472 = arith.negf %471 : vector<2x32xf32>
    %473 = math.exp %472 : vector<2x32xf32>
    %cst_154 = arith.constant 1.000000e+00 : f32
    %474 = vector.broadcast %cst_154 : f32 to vector<2x32xf32>
    %475 = arith.addf %474, %473 : vector<2x32xf32>
    %476 = arith.divf %474, %475 : vector<2x32xf32>
    %477 = vector.extract_strided_slice %465 {offsets = [0, 32], sizes = [2, 32], strides = [1, 1]} : vector<2x96xf32> to vector<2x32xf32>
    %478 = vector.extract_strided_slice %468 {offsets = [0, 32], sizes = [2, 32], strides = [1, 1]} : vector<2x96xf32> to vector<2x32xf32>
    %479 = arith.addf %477, %478 : vector<2x32xf32>
    %480 = arith.negf %479 : vector<2x32xf32>
    %481 = math.exp %480 : vector<2x32xf32>
    %cst_155 = arith.constant 1.000000e+00 : f32
    %482 = vector.broadcast %cst_155 : f32 to vector<2x32xf32>
    %483 = arith.addf %482, %481 : vector<2x32xf32>
    %484 = arith.divf %482, %483 : vector<2x32xf32>
    %485 = vector.extract_strided_slice %465 {offsets = [0, 64], sizes = [2, 32], strides = [1, 1]} : vector<2x96xf32> to vector<2x32xf32>
    %486 = vector.extract_strided_slice %468 {offsets = [0, 64], sizes = [2, 32], strides = [1, 1]} : vector<2x96xf32> to vector<2x32xf32>
    %487 = arith.mulf %476, %486 : vector<2x32xf32>
    %488 = arith.addf %485, %487 : vector<2x32xf32>
    %489 = math.tanh %488 : vector<2x32xf32>
    %cst_156 = arith.constant 1.000000e+00 : f32
    %490 = vector.broadcast %cst_156 : f32 to vector<2x32xf32>
    %491 = arith.subf %490, %484 : vector<2x32xf32>
    %492 = arith.mulf %491, %489 : vector<2x32xf32>
    %493 = arith.mulf %484, %462 : vector<2x32xf32>
    %494 = arith.addf %492, %493 : vector<2x32xf32>
    %495 = vector.extract_strided_slice %125 {offsets = [8, 0], sizes = [1, 96], strides = [1, 1]} : vector<32x96xf32> to vector<1x96xf32>
    %496 = vector.extract_strided_slice %237 {offsets = [8, 0], sizes = [1, 96], strides = [1, 1]} : vector<32x96xf32> to vector<1x96xf32>
    %497 = tpu.concatenate %495, %496 in 0 : vector<1x96xf32>, vector<1x96xf32> -> vector<2x96xf32>
    %cst_157 = arith.constant dense<0.000000e+00> : vector<2x96xf32>
    %498 = tpu.matmul %494, %9, %cst_157 {dimension_numbers = #tpu.dot_dimension_numbers<[1], [0], [0], [1], [0, 0, 1, 1], [], []>} : vector<2x32xf32>, vector<32x96xf32>, vector<2x96xf32> -> vector<2x96xf32>
    %499 = vector.broadcast %10 : vector<1x96xf32> to vector<2x96xf32>
    %500 = arith.addf %498, %499 : vector<2x96xf32>
    %501 = vector.extract_strided_slice %497 {offsets = [0, 0], sizes = [2, 32], strides = [1, 1]} : vector<2x96xf32> to vector<2x32xf32>
    %502 = vector.extract_strided_slice %500 {offsets = [0, 0], sizes = [2, 32], strides = [1, 1]} : vector<2x96xf32> to vector<2x32xf32>
    %503 = arith.addf %501, %502 : vector<2x32xf32>
    %504 = arith.negf %503 : vector<2x32xf32>
    %505 = math.exp %504 : vector<2x32xf32>
    %cst_158 = arith.constant 1.000000e+00 : f32
    %506 = vector.broadcast %cst_158 : f32 to vector<2x32xf32>
    %507 = arith.addf %506, %505 : vector<2x32xf32>
    %508 = arith.divf %506, %507 : vector<2x32xf32>
    %509 = vector.extract_strided_slice %497 {offsets = [0, 32], sizes = [2, 32], strides = [1, 1]} : vector<2x96xf32> to vector<2x32xf32>
    %510 = vector.extract_strided_slice %500 {offsets = [0, 32], sizes = [2, 32], strides = [1, 1]} : vector<2x96xf32> to vector<2x32xf32>
    %511 = arith.addf %509, %510 : vector<2x32xf32>
    %512 = arith.negf %511 : vector<2x32xf32>
    %513 = math.exp %512 : vector<2x32xf32>
    %cst_159 = arith.constant 1.000000e+00 : f32
    %514 = vector.broadcast %cst_159 : f32 to vector<2x32xf32>
    %515 = arith.addf %514, %513 : vector<2x32xf32>
    %516 = arith.divf %514, %515 : vector<2x32xf32>
    %517 = vector.extract_strided_slice %497 {offsets = [0, 64], sizes = [2, 32], strides = [1, 1]} : vector<2x96xf32> to vector<2x32xf32>
    %518 = vector.extract_strided_slice %500 {offsets = [0, 64], sizes = [2, 32], strides = [1, 1]} : vector<2x96xf32> to vector<2x32xf32>
    %519 = arith.mulf %508, %518 : vector<2x32xf32>
    %520 = arith.addf %517, %519 : vector<2x32xf32>
    %521 = math.tanh %520 : vector<2x32xf32>
    %cst_160 = arith.constant 1.000000e+00 : f32
    %522 = vector.broadcast %cst_160 : f32 to vector<2x32xf32>
    %523 = arith.subf %522, %516 : vector<2x32xf32>
    %524 = arith.mulf %523, %521 : vector<2x32xf32>
    %525 = arith.mulf %516, %494 : vector<2x32xf32>
    %526 = arith.addf %524, %525 : vector<2x32xf32>
    %527 = vector.extract_strided_slice %125 {offsets = [9, 0], sizes = [1, 96], strides = [1, 1]} : vector<32x96xf32> to vector<1x96xf32>
    %528 = vector.extract_strided_slice %237 {offsets = [9, 0], sizes = [1, 96], strides = [1, 1]} : vector<32x96xf32> to vector<1x96xf32>
    %529 = tpu.concatenate %527, %528 in 0 : vector<1x96xf32>, vector<1x96xf32> -> vector<2x96xf32>
    %cst_161 = arith.constant dense<0.000000e+00> : vector<2x96xf32>
    %530 = tpu.matmul %526, %9, %cst_161 {dimension_numbers = #tpu.dot_dimension_numbers<[1], [0], [0], [1], [0, 0, 1, 1], [], []>} : vector<2x32xf32>, vector<32x96xf32>, vector<2x96xf32> -> vector<2x96xf32>
    %531 = vector.broadcast %10 : vector<1x96xf32> to vector<2x96xf32>
    %532 = arith.addf %530, %531 : vector<2x96xf32>
    %533 = vector.extract_strided_slice %529 {offsets = [0, 0], sizes = [2, 32], strides = [1, 1]} : vector<2x96xf32> to vector<2x32xf32>
    %534 = vector.extract_strided_slice %532 {offsets = [0, 0], sizes = [2, 32], strides = [1, 1]} : vector<2x96xf32> to vector<2x32xf32>
    %535 = arith.addf %533, %534 : vector<2x32xf32>
    %536 = arith.negf %535 : vector<2x32xf32>
    %537 = math.exp %536 : vector<2x32xf32>
    %cst_162 = arith.constant 1.000000e+00 : f32
    %538 = vector.broadcast %cst_162 : f32 to vector<2x32xf32>
    %539 = arith.addf %538, %537 : vector<2x32xf32>
    %540 = arith.divf %538, %539 : vector<2x32xf32>
    %541 = vector.extract_strided_slice %529 {offsets = [0, 32], sizes = [2, 32], strides = [1, 1]} : vector<2x96xf32> to vector<2x32xf32>
    %542 = vector.extract_strided_slice %532 {offsets = [0, 32], sizes = [2, 32], strides = [1, 1]} : vector<2x96xf32> to vector<2x32xf32>
    %543 = arith.addf %541, %542 : vector<2x32xf32>
    %544 = arith.negf %543 : vector<2x32xf32>
    %545 = math.exp %544 : vector<2x32xf32>
    %cst_163 = arith.constant 1.000000e+00 : f32
    %546 = vector.broadcast %cst_163 : f32 to vector<2x32xf32>
    %547 = arith.addf %546, %545 : vector<2x32xf32>
    %548 = arith.divf %546, %547 : vector<2x32xf32>
    %549 = vector.extract_strided_slice %529 {offsets = [0, 64], sizes = [2, 32], strides = [1, 1]} : vector<2x96xf32> to vector<2x32xf32>
    %550 = vector.extract_strided_slice %532 {offsets = [0, 64], sizes = [2, 32], strides = [1, 1]} : vector<2x96xf32> to vector<2x32xf32>
    %551 = arith.mulf %540, %550 : vector<2x32xf32>
    %552 = arith.addf %549, %551 : vector<2x32xf32>
    %553 = math.tanh %552 : vector<2x32xf32>
    %cst_164 = arith.constant 1.000000e+00 : f32
    %554 = vector.broadcast %cst_164 : f32 to vector<2x32xf32>
    %555 = arith.subf %554, %548 : vector<2x32xf32>
    %556 = arith.mulf %555, %553 : vector<2x32xf32>
    %557 = arith.mulf %548, %526 : vector<2x32xf32>
    %558 = arith.addf %556, %557 : vector<2x32xf32>
    %559 = vector.extract_strided_slice %125 {offsets = [10, 0], sizes = [1, 96], strides = [1, 1]} : vector<32x96xf32> to vector<1x96xf32>
    %560 = vector.extract_strided_slice %237 {offsets = [10, 0], sizes = [1, 96], strides = [1, 1]} : vector<32x96xf32> to vector<1x96xf32>
    %561 = tpu.concatenate %559, %560 in 0 : vector<1x96xf32>, vector<1x96xf32> -> vector<2x96xf32>
    %cst_165 = arith.constant dense<0.000000e+00> : vector<2x96xf32>
    %562 = tpu.matmul %558, %9, %cst_165 {dimension_numbers = #tpu.dot_dimension_numbers<[1], [0], [0], [1], [0, 0, 1, 1], [], []>} : vector<2x32xf32>, vector<32x96xf32>, vector<2x96xf32> -> vector<2x96xf32>
    %563 = vector.broadcast %10 : vector<1x96xf32> to vector<2x96xf32>
    %564 = arith.addf %562, %563 : vector<2x96xf32>
    %565 = vector.extract_strided_slice %561 {offsets = [0, 0], sizes = [2, 32], strides = [1, 1]} : vector<2x96xf32> to vector<2x32xf32>
    %566 = vector.extract_strided_slice %564 {offsets = [0, 0], sizes = [2, 32], strides = [1, 1]} : vector<2x96xf32> to vector<2x32xf32>
    %567 = arith.addf %565, %566 : vector<2x32xf32>
    %568 = arith.negf %567 : vector<2x32xf32>
    %569 = math.exp %568 : vector<2x32xf32>
    %cst_166 = arith.constant 1.000000e+00 : f32
    %570 = vector.broadcast %cst_166 : f32 to vector<2x32xf32>
    %571 = arith.addf %570, %569 : vector<2x32xf32>
    %572 = arith.divf %570, %571 : vector<2x32xf32>
    %573 = vector.extract_strided_slice %561 {offsets = [0, 32], sizes = [2, 32], strides = [1, 1]} : vector<2x96xf32> to vector<2x32xf32>
    %574 = vector.extract_strided_slice %564 {offsets = [0, 32], sizes = [2, 32], strides = [1, 1]} : vector<2x96xf32> to vector<2x32xf32>
    %575 = arith.addf %573, %574 : vector<2x32xf32>
    %576 = arith.negf %575 : vector<2x32xf32>
    %577 = math.exp %576 : vector<2x32xf32>
    %cst_167 = arith.constant 1.000000e+00 : f32
    %578 = vector.broadcast %cst_167 : f32 to vector<2x32xf32>
    %579 = arith.addf %578, %577 : vector<2x32xf32>
    %580 = arith.divf %578, %579 : vector<2x32xf32>
    %581 = vector.extract_strided_slice %561 {offsets = [0, 64], sizes = [2, 32], strides = [1, 1]} : vector<2x96xf32> to vector<2x32xf32>
    %582 = vector.extract_strided_slice %564 {offsets = [0, 64], sizes = [2, 32], strides = [1, 1]} : vector<2x96xf32> to vector<2x32xf32>
    %583 = arith.mulf %572, %582 : vector<2x32xf32>
    %584 = arith.addf %581, %583 : vector<2x32xf32>
    %585 = math.tanh %584 : vector<2x32xf32>
    %cst_168 = arith.constant 1.000000e+00 : f32
    %586 = vector.broadcast %cst_168 : f32 to vector<2x32xf32>
    %587 = arith.subf %586, %580 : vector<2x32xf32>
    %588 = arith.mulf %587, %585 : vector<2x32xf32>
    %589 = arith.mulf %580, %558 : vector<2x32xf32>
    %590 = arith.addf %588, %589 : vector<2x32xf32>
    %591 = vector.extract_strided_slice %125 {offsets = [11, 0], sizes = [1, 96], strides = [1, 1]} : vector<32x96xf32> to vector<1x96xf32>
    %592 = vector.extract_strided_slice %237 {offsets = [11, 0], sizes = [1, 96], strides = [1, 1]} : vector<32x96xf32> to vector<1x96xf32>
    %593 = tpu.concatenate %591, %592 in 0 : vector<1x96xf32>, vector<1x96xf32> -> vector<2x96xf32>
    %cst_169 = arith.constant dense<0.000000e+00> : vector<2x96xf32>
    %594 = tpu.matmul %590, %9, %cst_169 {dimension_numbers = #tpu.dot_dimension_numbers<[1], [0], [0], [1], [0, 0, 1, 1], [], []>} : vector<2x32xf32>, vector<32x96xf32>, vector<2x96xf32> -> vector<2x96xf32>
    %595 = vector.broadcast %10 : vector<1x96xf32> to vector<2x96xf32>
    %596 = arith.addf %594, %595 : vector<2x96xf32>
    %597 = vector.extract_strided_slice %593 {offsets = [0, 0], sizes = [2, 32], strides = [1, 1]} : vector<2x96xf32> to vector<2x32xf32>
    %598 = vector.extract_strided_slice %596 {offsets = [0, 0], sizes = [2, 32], strides = [1, 1]} : vector<2x96xf32> to vector<2x32xf32>
    %599 = arith.addf %597, %598 : vector<2x32xf32>
    %600 = arith.negf %599 : vector<2x32xf32>
    %601 = math.exp %600 : vector<2x32xf32>
    %cst_170 = arith.constant 1.000000e+00 : f32
    %602 = vector.broadcast %cst_170 : f32 to vector<2x32xf32>
    %603 = arith.addf %602, %601 : vector<2x32xf32>
    %604 = arith.divf %602, %603 : vector<2x32xf32>
    %605 = vector.extract_strided_slice %593 {offsets = [0, 32], sizes = [2, 32], strides = [1, 1]} : vector<2x96xf32> to vector<2x32xf32>
    %606 = vector.extract_strided_slice %596 {offsets = [0, 32], sizes = [2, 32], strides = [1, 1]} : vector<2x96xf32> to vector<2x32xf32>
    %607 = arith.addf %605, %606 : vector<2x32xf32>
    %608 = arith.negf %607 : vector<2x32xf32>
    %609 = math.exp %608 : vector<2x32xf32>
    %cst_171 = arith.constant 1.000000e+00 : f32
    %610 = vector.broadcast %cst_171 : f32 to vector<2x32xf32>
    %611 = arith.addf %610, %609 : vector<2x32xf32>
    %612 = arith.divf %610, %611 : vector<2x32xf32>
    %613 = vector.extract_strided_slice %593 {offsets = [0, 64], sizes = [2, 32], strides = [1, 1]} : vector<2x96xf32> to vector<2x32xf32>
    %614 = vector.extract_strided_slice %596 {offsets = [0, 64], sizes = [2, 32], strides = [1, 1]} : vector<2x96xf32> to vector<2x32xf32>
    %615 = arith.mulf %604, %614 : vector<2x32xf32>
    %616 = arith.addf %613, %615 : vector<2x32xf32>
    %617 = math.tanh %616 : vector<2x32xf32>
    %cst_172 = arith.constant 1.000000e+00 : f32
    %618 = vector.broadcast %cst_172 : f32 to vector<2x32xf32>
    %619 = arith.subf %618, %612 : vector<2x32xf32>
    %620 = arith.mulf %619, %617 : vector<2x32xf32>
    %621 = arith.mulf %612, %590 : vector<2x32xf32>
    %622 = arith.addf %620, %621 : vector<2x32xf32>
    %623 = vector.extract_strided_slice %125 {offsets = [12, 0], sizes = [1, 96], strides = [1, 1]} : vector<32x96xf32> to vector<1x96xf32>
    %624 = vector.extract_strided_slice %237 {offsets = [12, 0], sizes = [1, 96], strides = [1, 1]} : vector<32x96xf32> to vector<1x96xf32>
    %625 = tpu.concatenate %623, %624 in 0 : vector<1x96xf32>, vector<1x96xf32> -> vector<2x96xf32>
    %cst_173 = arith.constant dense<0.000000e+00> : vector<2x96xf32>
    %626 = tpu.matmul %622, %9, %cst_173 {dimension_numbers = #tpu.dot_dimension_numbers<[1], [0], [0], [1], [0, 0, 1, 1], [], []>} : vector<2x32xf32>, vector<32x96xf32>, vector<2x96xf32> -> vector<2x96xf32>
    %627 = vector.broadcast %10 : vector<1x96xf32> to vector<2x96xf32>
    %628 = arith.addf %626, %627 : vector<2x96xf32>
    %629 = vector.extract_strided_slice %625 {offsets = [0, 0], sizes = [2, 32], strides = [1, 1]} : vector<2x96xf32> to vector<2x32xf32>
    %630 = vector.extract_strided_slice %628 {offsets = [0, 0], sizes = [2, 32], strides = [1, 1]} : vector<2x96xf32> to vector<2x32xf32>
    %631 = arith.addf %629, %630 : vector<2x32xf32>
    %632 = arith.negf %631 : vector<2x32xf32>
    %633 = math.exp %632 : vector<2x32xf32>
    %cst_174 = arith.constant 1.000000e+00 : f32
    %634 = vector.broadcast %cst_174 : f32 to vector<2x32xf32>
    %635 = arith.addf %634, %633 : vector<2x32xf32>
    %636 = arith.divf %634, %635 : vector<2x32xf32>
    %637 = vector.extract_strided_slice %625 {offsets = [0, 32], sizes = [2, 32], strides = [1, 1]} : vector<2x96xf32> to vector<2x32xf32>
    %638 = vector.extract_strided_slice %628 {offsets = [0, 32], sizes = [2, 32], strides = [1, 1]} : vector<2x96xf32> to vector<2x32xf32>
    %639 = arith.addf %637, %638 : vector<2x32xf32>
    %640 = arith.negf %639 : vector<2x32xf32>
    %641 = math.exp %640 : vector<2x32xf32>
    %cst_175 = arith.constant 1.000000e+00 : f32
    %642 = vector.broadcast %cst_175 : f32 to vector<2x32xf32>
    %643 = arith.addf %642, %641 : vector<2x32xf32>
    %644 = arith.divf %642, %643 : vector<2x32xf32>
    %645 = vector.extract_strided_slice %625 {offsets = [0, 64], sizes = [2, 32], strides = [1, 1]} : vector<2x96xf32> to vector<2x32xf32>
    %646 = vector.extract_strided_slice %628 {offsets = [0, 64], sizes = [2, 32], strides = [1, 1]} : vector<2x96xf32> to vector<2x32xf32>
    %647 = arith.mulf %636, %646 : vector<2x32xf32>
    %648 = arith.addf %645, %647 : vector<2x32xf32>
    %649 = math.tanh %648 : vector<2x32xf32>
    %cst_176 = arith.constant 1.000000e+00 : f32
    %650 = vector.broadcast %cst_176 : f32 to vector<2x32xf32>
    %651 = arith.subf %650, %644 : vector<2x32xf32>
    %652 = arith.mulf %651, %649 : vector<2x32xf32>
    %653 = arith.mulf %644, %622 : vector<2x32xf32>
    %654 = arith.addf %652, %653 : vector<2x32xf32>
    %655 = vector.extract_strided_slice %125 {offsets = [13, 0], sizes = [1, 96], strides = [1, 1]} : vector<32x96xf32> to vector<1x96xf32>
    %656 = vector.extract_strided_slice %237 {offsets = [13, 0], sizes = [1, 96], strides = [1, 1]} : vector<32x96xf32> to vector<1x96xf32>
    %657 = tpu.concatenate %655, %656 in 0 : vector<1x96xf32>, vector<1x96xf32> -> vector<2x96xf32>
    %cst_177 = arith.constant dense<0.000000e+00> : vector<2x96xf32>
    %658 = tpu.matmul %654, %9, %cst_177 {dimension_numbers = #tpu.dot_dimension_numbers<[1], [0], [0], [1], [0, 0, 1, 1], [], []>} : vector<2x32xf32>, vector<32x96xf32>, vector<2x96xf32> -> vector<2x96xf32>
    %659 = vector.broadcast %10 : vector<1x96xf32> to vector<2x96xf32>
    %660 = arith.addf %658, %659 : vector<2x96xf32>
    %661 = vector.extract_strided_slice %657 {offsets = [0, 0], sizes = [2, 32], strides = [1, 1]} : vector<2x96xf32> to vector<2x32xf32>
    %662 = vector.extract_strided_slice %660 {offsets = [0, 0], sizes = [2, 32], strides = [1, 1]} : vector<2x96xf32> to vector<2x32xf32>
    %663 = arith.addf %661, %662 : vector<2x32xf32>
    %664 = arith.negf %663 : vector<2x32xf32>
    %665 = math.exp %664 : vector<2x32xf32>
    %cst_178 = arith.constant 1.000000e+00 : f32
    %666 = vector.broadcast %cst_178 : f32 to vector<2x32xf32>
    %667 = arith.addf %666, %665 : vector<2x32xf32>
    %668 = arith.divf %666, %667 : vector<2x32xf32>
    %669 = vector.extract_strided_slice %657 {offsets = [0, 32], sizes = [2, 32], strides = [1, 1]} : vector<2x96xf32> to vector<2x32xf32>
    %670 = vector.extract_strided_slice %660 {offsets = [0, 32], sizes = [2, 32], strides = [1, 1]} : vector<2x96xf32> to vector<2x32xf32>
    %671 = arith.addf %669, %670 : vector<2x32xf32>
    %672 = arith.negf %671 : vector<2x32xf32>
    %673 = math.exp %672 : vector<2x32xf32>
    %cst_179 = arith.constant 1.000000e+00 : f32
    %674 = vector.broadcast %cst_179 : f32 to vector<2x32xf32>
    %675 = arith.addf %674, %673 : vector<2x32xf32>
    %676 = arith.divf %674, %675 : vector<2x32xf32>
    %677 = vector.extract_strided_slice %657 {offsets = [0, 64], sizes = [2, 32], strides = [1, 1]} : vector<2x96xf32> to vector<2x32xf32>
    %678 = vector.extract_strided_slice %660 {offsets = [0, 64], sizes = [2, 32], strides = [1, 1]} : vector<2x96xf32> to vector<2x32xf32>
    %679 = arith.mulf %668, %678 : vector<2x32xf32>
    %680 = arith.addf %677, %679 : vector<2x32xf32>
    %681 = math.tanh %680 : vector<2x32xf32>
    %cst_180 = arith.constant 1.000000e+00 : f32
    %682 = vector.broadcast %cst_180 : f32 to vector<2x32xf32>
    %683 = arith.subf %682, %676 : vector<2x32xf32>
    %684 = arith.mulf %683, %681 : vector<2x32xf32>
    %685 = arith.mulf %676, %654 : vector<2x32xf32>
    %686 = arith.addf %684, %685 : vector<2x32xf32>
    %687 = vector.extract_strided_slice %125 {offsets = [14, 0], sizes = [1, 96], strides = [1, 1]} : vector<32x96xf32> to vector<1x96xf32>
    %688 = vector.extract_strided_slice %237 {offsets = [14, 0], sizes = [1, 96], strides = [1, 1]} : vector<32x96xf32> to vector<1x96xf32>
    %689 = tpu.concatenate %687, %688 in 0 : vector<1x96xf32>, vector<1x96xf32> -> vector<2x96xf32>
    %cst_181 = arith.constant dense<0.000000e+00> : vector<2x96xf32>
    %690 = tpu.matmul %686, %9, %cst_181 {dimension_numbers = #tpu.dot_dimension_numbers<[1], [0], [0], [1], [0, 0, 1, 1], [], []>} : vector<2x32xf32>, vector<32x96xf32>, vector<2x96xf32> -> vector<2x96xf32>
    %691 = vector.broadcast %10 : vector<1x96xf32> to vector<2x96xf32>
    %692 = arith.addf %690, %691 : vector<2x96xf32>
    %693 = vector.extract_strided_slice %689 {offsets = [0, 0], sizes = [2, 32], strides = [1, 1]} : vector<2x96xf32> to vector<2x32xf32>
    %694 = vector.extract_strided_slice %692 {offsets = [0, 0], sizes = [2, 32], strides = [1, 1]} : vector<2x96xf32> to vector<2x32xf32>
    %695 = arith.addf %693, %694 : vector<2x32xf32>
    %696 = arith.negf %695 : vector<2x32xf32>
    %697 = math.exp %696 : vector<2x32xf32>
    %cst_182 = arith.constant 1.000000e+00 : f32
    %698 = vector.broadcast %cst_182 : f32 to vector<2x32xf32>
    %699 = arith.addf %698, %697 : vector<2x32xf32>
    %700 = arith.divf %698, %699 : vector<2x32xf32>
    %701 = vector.extract_strided_slice %689 {offsets = [0, 32], sizes = [2, 32], strides = [1, 1]} : vector<2x96xf32> to vector<2x32xf32>
    %702 = vector.extract_strided_slice %692 {offsets = [0, 32], sizes = [2, 32], strides = [1, 1]} : vector<2x96xf32> to vector<2x32xf32>
    %703 = arith.addf %701, %702 : vector<2x32xf32>
    %704 = arith.negf %703 : vector<2x32xf32>
    %705 = math.exp %704 : vector<2x32xf32>
    %cst_183 = arith.constant 1.000000e+00 : f32
    %706 = vector.broadcast %cst_183 : f32 to vector<2x32xf32>
    %707 = arith.addf %706, %705 : vector<2x32xf32>
    %708 = arith.divf %706, %707 : vector<2x32xf32>
    %709 = vector.extract_strided_slice %689 {offsets = [0, 64], sizes = [2, 32], strides = [1, 1]} : vector<2x96xf32> to vector<2x32xf32>
    %710 = vector.extract_strided_slice %692 {offsets = [0, 64], sizes = [2, 32], strides = [1, 1]} : vector<2x96xf32> to vector<2x32xf32>
    %711 = arith.mulf %700, %710 : vector<2x32xf32>
    %712 = arith.addf %709, %711 : vector<2x32xf32>
    %713 = math.tanh %712 : vector<2x32xf32>
    %cst_184 = arith.constant 1.000000e+00 : f32
    %714 = vector.broadcast %cst_184 : f32 to vector<2x32xf32>
    %715 = arith.subf %714, %708 : vector<2x32xf32>
    %716 = arith.mulf %715, %713 : vector<2x32xf32>
    %717 = arith.mulf %708, %686 : vector<2x32xf32>
    %718 = arith.addf %716, %717 : vector<2x32xf32>
    %719 = vector.extract_strided_slice %125 {offsets = [15, 0], sizes = [1, 96], strides = [1, 1]} : vector<32x96xf32> to vector<1x96xf32>
    %720 = vector.extract_strided_slice %237 {offsets = [15, 0], sizes = [1, 96], strides = [1, 1]} : vector<32x96xf32> to vector<1x96xf32>
    %721 = tpu.concatenate %719, %720 in 0 : vector<1x96xf32>, vector<1x96xf32> -> vector<2x96xf32>
    %cst_185 = arith.constant dense<0.000000e+00> : vector<2x96xf32>
    %722 = tpu.matmul %718, %9, %cst_185 {dimension_numbers = #tpu.dot_dimension_numbers<[1], [0], [0], [1], [0, 0, 1, 1], [], []>} : vector<2x32xf32>, vector<32x96xf32>, vector<2x96xf32> -> vector<2x96xf32>
    %723 = vector.broadcast %10 : vector<1x96xf32> to vector<2x96xf32>
    %724 = arith.addf %722, %723 : vector<2x96xf32>
    %725 = vector.extract_strided_slice %721 {offsets = [0, 0], sizes = [2, 32], strides = [1, 1]} : vector<2x96xf32> to vector<2x32xf32>
    %726 = vector.extract_strided_slice %724 {offsets = [0, 0], sizes = [2, 32], strides = [1, 1]} : vector<2x96xf32> to vector<2x32xf32>
    %727 = arith.addf %725, %726 : vector<2x32xf32>
    %728 = arith.negf %727 : vector<2x32xf32>
    %729 = math.exp %728 : vector<2x32xf32>
    %cst_186 = arith.constant 1.000000e+00 : f32
    %730 = vector.broadcast %cst_186 : f32 to vector<2x32xf32>
    %731 = arith.addf %730, %729 : vector<2x32xf32>
    %732 = arith.divf %730, %731 : vector<2x32xf32>
    %733 = vector.extract_strided_slice %721 {offsets = [0, 32], sizes = [2, 32], strides = [1, 1]} : vector<2x96xf32> to vector<2x32xf32>
    %734 = vector.extract_strided_slice %724 {offsets = [0, 32], sizes = [2, 32], strides = [1, 1]} : vector<2x96xf32> to vector<2x32xf32>
    %735 = arith.addf %733, %734 : vector<2x32xf32>
    %736 = arith.negf %735 : vector<2x32xf32>
    %737 = math.exp %736 : vector<2x32xf32>
    %cst_187 = arith.constant 1.000000e+00 : f32
    %738 = vector.broadcast %cst_187 : f32 to vector<2x32xf32>
    %739 = arith.addf %738, %737 : vector<2x32xf32>
    %740 = arith.divf %738, %739 : vector<2x32xf32>
    %741 = vector.extract_strided_slice %721 {offsets = [0, 64], sizes = [2, 32], strides = [1, 1]} : vector<2x96xf32> to vector<2x32xf32>
    %742 = vector.extract_strided_slice %724 {offsets = [0, 64], sizes = [2, 32], strides = [1, 1]} : vector<2x96xf32> to vector<2x32xf32>
    %743 = arith.mulf %732, %742 : vector<2x32xf32>
    %744 = arith.addf %741, %743 : vector<2x32xf32>
    %745 = math.tanh %744 : vector<2x32xf32>
    %cst_188 = arith.constant 1.000000e+00 : f32
    %746 = vector.broadcast %cst_188 : f32 to vector<2x32xf32>
    %747 = arith.subf %746, %740 : vector<2x32xf32>
    %748 = arith.mulf %747, %745 : vector<2x32xf32>
    %749 = arith.mulf %740, %718 : vector<2x32xf32>
    %750 = arith.addf %748, %749 : vector<2x32xf32>
    %751 = vector.extract_strided_slice %125 {offsets = [16, 0], sizes = [1, 96], strides = [1, 1]} : vector<32x96xf32> to vector<1x96xf32>
    %752 = vector.extract_strided_slice %237 {offsets = [16, 0], sizes = [1, 96], strides = [1, 1]} : vector<32x96xf32> to vector<1x96xf32>
    %753 = tpu.concatenate %751, %752 in 0 : vector<1x96xf32>, vector<1x96xf32> -> vector<2x96xf32>
    %cst_189 = arith.constant dense<0.000000e+00> : vector<2x96xf32>
    %754 = tpu.matmul %750, %9, %cst_189 {dimension_numbers = #tpu.dot_dimension_numbers<[1], [0], [0], [1], [0, 0, 1, 1], [], []>} : vector<2x32xf32>, vector<32x96xf32>, vector<2x96xf32> -> vector<2x96xf32>
    %755 = vector.broadcast %10 : vector<1x96xf32> to vector<2x96xf32>
    %756 = arith.addf %754, %755 : vector<2x96xf32>
    %757 = vector.extract_strided_slice %753 {offsets = [0, 0], sizes = [2, 32], strides = [1, 1]} : vector<2x96xf32> to vector<2x32xf32>
    %758 = vector.extract_strided_slice %756 {offsets = [0, 0], sizes = [2, 32], strides = [1, 1]} : vector<2x96xf32> to vector<2x32xf32>
    %759 = arith.addf %757, %758 : vector<2x32xf32>
    %760 = arith.negf %759 : vector<2x32xf32>
    %761 = math.exp %760 : vector<2x32xf32>
    %cst_190 = arith.constant 1.000000e+00 : f32
    %762 = vector.broadcast %cst_190 : f32 to vector<2x32xf32>
    %763 = arith.addf %762, %761 : vector<2x32xf32>
    %764 = arith.divf %762, %763 : vector<2x32xf32>
    %765 = vector.extract_strided_slice %753 {offsets = [0, 32], sizes = [2, 32], strides = [1, 1]} : vector<2x96xf32> to vector<2x32xf32>
    %766 = vector.extract_strided_slice %756 {offsets = [0, 32], sizes = [2, 32], strides = [1, 1]} : vector<2x96xf32> to vector<2x32xf32>
    %767 = arith.addf %765, %766 : vector<2x32xf32>
    %768 = arith.negf %767 : vector<2x32xf32>
    %769 = math.exp %768 : vector<2x32xf32>
    %cst_191 = arith.constant 1.000000e+00 : f32
    %770 = vector.broadcast %cst_191 : f32 to vector<2x32xf32>
    %771 = arith.addf %770, %769 : vector<2x32xf32>
    %772 = arith.divf %770, %771 : vector<2x32xf32>
    %773 = vector.extract_strided_slice %753 {offsets = [0, 64], sizes = [2, 32], strides = [1, 1]} : vector<2x96xf32> to vector<2x32xf32>
    %774 = vector.extract_strided_slice %756 {offsets = [0, 64], sizes = [2, 32], strides = [1, 1]} : vector<2x96xf32> to vector<2x32xf32>
    %775 = arith.mulf %764, %774 : vector<2x32xf32>
    %776 = arith.addf %773, %775 : vector<2x32xf32>
    %777 = math.tanh %776 : vector<2x32xf32>
    %cst_192 = arith.constant 1.000000e+00 : f32
    %778 = vector.broadcast %cst_192 : f32 to vector<2x32xf32>
    %779 = arith.subf %778, %772 : vector<2x32xf32>
    %780 = arith.mulf %779, %777 : vector<2x32xf32>
    %781 = arith.mulf %772, %750 : vector<2x32xf32>
    %782 = arith.addf %780, %781 : vector<2x32xf32>
    %783 = vector.extract_strided_slice %125 {offsets = [17, 0], sizes = [1, 96], strides = [1, 1]} : vector<32x96xf32> to vector<1x96xf32>
    %784 = vector.extract_strided_slice %237 {offsets = [17, 0], sizes = [1, 96], strides = [1, 1]} : vector<32x96xf32> to vector<1x96xf32>
    %785 = tpu.concatenate %783, %784 in 0 : vector<1x96xf32>, vector<1x96xf32> -> vector<2x96xf32>
    %cst_193 = arith.constant dense<0.000000e+00> : vector<2x96xf32>
    %786 = tpu.matmul %782, %9, %cst_193 {dimension_numbers = #tpu.dot_dimension_numbers<[1], [0], [0], [1], [0, 0, 1, 1], [], []>} : vector<2x32xf32>, vector<32x96xf32>, vector<2x96xf32> -> vector<2x96xf32>
    %787 = vector.broadcast %10 : vector<1x96xf32> to vector<2x96xf32>
    %788 = arith.addf %786, %787 : vector<2x96xf32>
    %789 = vector.extract_strided_slice %785 {offsets = [0, 0], sizes = [2, 32], strides = [1, 1]} : vector<2x96xf32> to vector<2x32xf32>
    %790 = vector.extract_strided_slice %788 {offsets = [0, 0], sizes = [2, 32], strides = [1, 1]} : vector<2x96xf32> to vector<2x32xf32>
    %791 = arith.addf %789, %790 : vector<2x32xf32>
    %792 = arith.negf %791 : vector<2x32xf32>
    %793 = math.exp %792 : vector<2x32xf32>
    %cst_194 = arith.constant 1.000000e+00 : f32
    %794 = vector.broadcast %cst_194 : f32 to vector<2x32xf32>
    %795 = arith.addf %794, %793 : vector<2x32xf32>
    %796 = arith.divf %794, %795 : vector<2x32xf32>
    %797 = vector.extract_strided_slice %785 {offsets = [0, 32], sizes = [2, 32], strides = [1, 1]} : vector<2x96xf32> to vector<2x32xf32>
    %798 = vector.extract_strided_slice %788 {offsets = [0, 32], sizes = [2, 32], strides = [1, 1]} : vector<2x96xf32> to vector<2x32xf32>
    %799 = arith.addf %797, %798 : vector<2x32xf32>
    %800 = arith.negf %799 : vector<2x32xf32>
    %801 = math.exp %800 : vector<2x32xf32>
    %cst_195 = arith.constant 1.000000e+00 : f32
    %802 = vector.broadcast %cst_195 : f32 to vector<2x32xf32>
    %803 = arith.addf %802, %801 : vector<2x32xf32>
    %804 = arith.divf %802, %803 : vector<2x32xf32>
    %805 = vector.extract_strided_slice %785 {offsets = [0, 64], sizes = [2, 32], strides = [1, 1]} : vector<2x96xf32> to vector<2x32xf32>
    %806 = vector.extract_strided_slice %788 {offsets = [0, 64], sizes = [2, 32], strides = [1, 1]} : vector<2x96xf32> to vector<2x32xf32>
    %807 = arith.mulf %796, %806 : vector<2x32xf32>
    %808 = arith.addf %805, %807 : vector<2x32xf32>
    %809 = math.tanh %808 : vector<2x32xf32>
    %cst_196 = arith.constant 1.000000e+00 : f32
    %810 = vector.broadcast %cst_196 : f32 to vector<2x32xf32>
    %811 = arith.subf %810, %804 : vector<2x32xf32>
    %812 = arith.mulf %811, %809 : vector<2x32xf32>
    %813 = arith.mulf %804, %782 : vector<2x32xf32>
    %814 = arith.addf %812, %813 : vector<2x32xf32>
    %815 = vector.extract_strided_slice %125 {offsets = [18, 0], sizes = [1, 96], strides = [1, 1]} : vector<32x96xf32> to vector<1x96xf32>
    %816 = vector.extract_strided_slice %237 {offsets = [18, 0], sizes = [1, 96], strides = [1, 1]} : vector<32x96xf32> to vector<1x96xf32>
    %817 = tpu.concatenate %815, %816 in 0 : vector<1x96xf32>, vector<1x96xf32> -> vector<2x96xf32>
    %cst_197 = arith.constant dense<0.000000e+00> : vector<2x96xf32>
    %818 = tpu.matmul %814, %9, %cst_197 {dimension_numbers = #tpu.dot_dimension_numbers<[1], [0], [0], [1], [0, 0, 1, 1], [], []>} : vector<2x32xf32>, vector<32x96xf32>, vector<2x96xf32> -> vector<2x96xf32>
    %819 = vector.broadcast %10 : vector<1x96xf32> to vector<2x96xf32>
    %820 = arith.addf %818, %819 : vector<2x96xf32>
    %821 = vector.extract_strided_slice %817 {offsets = [0, 0], sizes = [2, 32], strides = [1, 1]} : vector<2x96xf32> to vector<2x32xf32>
    %822 = vector.extract_strided_slice %820 {offsets = [0, 0], sizes = [2, 32], strides = [1, 1]} : vector<2x96xf32> to vector<2x32xf32>
    %823 = arith.addf %821, %822 : vector<2x32xf32>
    %824 = arith.negf %823 : vector<2x32xf32>
    %825 = math.exp %824 : vector<2x32xf32>
    %cst_198 = arith.constant 1.000000e+00 : f32
    %826 = vector.broadcast %cst_198 : f32 to vector<2x32xf32>
    %827 = arith.addf %826, %825 : vector<2x32xf32>
    %828 = arith.divf %826, %827 : vector<2x32xf32>
    %829 = vector.extract_strided_slice %817 {offsets = [0, 32], sizes = [2, 32], strides = [1, 1]} : vector<2x96xf32> to vector<2x32xf32>
    %830 = vector.extract_strided_slice %820 {offsets = [0, 32], sizes = [2, 32], strides = [1, 1]} : vector<2x96xf32> to vector<2x32xf32>
    %831 = arith.addf %829, %830 : vector<2x32xf32>
    %832 = arith.negf %831 : vector<2x32xf32>
    %833 = math.exp %832 : vector<2x32xf32>
    %cst_199 = arith.constant 1.000000e+00 : f32
    %834 = vector.broadcast %cst_199 : f32 to vector<2x32xf32>
    %835 = arith.addf %834, %833 : vector<2x32xf32>
    %836 = arith.divf %834, %835 : vector<2x32xf32>
    %837 = vector.extract_strided_slice %817 {offsets = [0, 64], sizes = [2, 32], strides = [1, 1]} : vector<2x96xf32> to vector<2x32xf32>
    %838 = vector.extract_strided_slice %820 {offsets = [0, 64], sizes = [2, 32], strides = [1, 1]} : vector<2x96xf32> to vector<2x32xf32>
    %839 = arith.mulf %828, %838 : vector<2x32xf32>
    %840 = arith.addf %837, %839 : vector<2x32xf32>
    %841 = math.tanh %840 : vector<2x32xf32>
    %cst_200 = arith.constant 1.000000e+00 : f32
    %842 = vector.broadcast %cst_200 : f32 to vector<2x32xf32>
    %843 = arith.subf %842, %836 : vector<2x32xf32>
    %844 = arith.mulf %843, %841 : vector<2x32xf32>
    %845 = arith.mulf %836, %814 : vector<2x32xf32>
    %846 = arith.addf %844, %845 : vector<2x32xf32>
    %847 = vector.extract_strided_slice %125 {offsets = [19, 0], sizes = [1, 96], strides = [1, 1]} : vector<32x96xf32> to vector<1x96xf32>
    %848 = vector.extract_strided_slice %237 {offsets = [19, 0], sizes = [1, 96], strides = [1, 1]} : vector<32x96xf32> to vector<1x96xf32>
    %849 = tpu.concatenate %847, %848 in 0 : vector<1x96xf32>, vector<1x96xf32> -> vector<2x96xf32>
    %cst_201 = arith.constant dense<0.000000e+00> : vector<2x96xf32>
    %850 = tpu.matmul %846, %9, %cst_201 {dimension_numbers = #tpu.dot_dimension_numbers<[1], [0], [0], [1], [0, 0, 1, 1], [], []>} : vector<2x32xf32>, vector<32x96xf32>, vector<2x96xf32> -> vector<2x96xf32>
    %851 = vector.broadcast %10 : vector<1x96xf32> to vector<2x96xf32>
    %852 = arith.addf %850, %851 : vector<2x96xf32>
    %853 = vector.extract_strided_slice %849 {offsets = [0, 0], sizes = [2, 32], strides = [1, 1]} : vector<2x96xf32> to vector<2x32xf32>
    %854 = vector.extract_strided_slice %852 {offsets = [0, 0], sizes = [2, 32], strides = [1, 1]} : vector<2x96xf32> to vector<2x32xf32>
    %855 = arith.addf %853, %854 : vector<2x32xf32>
    %856 = arith.negf %855 : vector<2x32xf32>
    %857 = math.exp %856 : vector<2x32xf32>
    %cst_202 = arith.constant 1.000000e+00 : f32
    %858 = vector.broadcast %cst_202 : f32 to vector<2x32xf32>
    %859 = arith.addf %858, %857 : vector<2x32xf32>
    %860 = arith.divf %858, %859 : vector<2x32xf32>
    %861 = vector.extract_strided_slice %849 {offsets = [0, 32], sizes = [2, 32], strides = [1, 1]} : vector<2x96xf32> to vector<2x32xf32>
    %862 = vector.extract_strided_slice %852 {offsets = [0, 32], sizes = [2, 32], strides = [1, 1]} : vector<2x96xf32> to vector<2x32xf32>
    %863 = arith.addf %861, %862 : vector<2x32xf32>
    %864 = arith.negf %863 : vector<2x32xf32>
    %865 = math.exp %864 : vector<2x32xf32>
    %cst_203 = arith.constant 1.000000e+00 : f32
    %866 = vector.broadcast %cst_203 : f32 to vector<2x32xf32>
    %867 = arith.addf %866, %865 : vector<2x32xf32>
    %868 = arith.divf %866, %867 : vector<2x32xf32>
    %869 = vector.extract_strided_slice %849 {offsets = [0, 64], sizes = [2, 32], strides = [1, 1]} : vector<2x96xf32> to vector<2x32xf32>
    %870 = vector.extract_strided_slice %852 {offsets = [0, 64], sizes = [2, 32], strides = [1, 1]} : vector<2x96xf32> to vector<2x32xf32>
    %871 = arith.mulf %860, %870 : vector<2x32xf32>
    %872 = arith.addf %869, %871 : vector<2x32xf32>
    %873 = math.tanh %872 : vector<2x32xf32>
    %cst_204 = arith.constant 1.000000e+00 : f32
    %874 = vector.broadcast %cst_204 : f32 to vector<2x32xf32>
    %875 = arith.subf %874, %868 : vector<2x32xf32>
    %876 = arith.mulf %875, %873 : vector<2x32xf32>
    %877 = arith.mulf %868, %846 : vector<2x32xf32>
    %878 = arith.addf %876, %877 : vector<2x32xf32>
    %879 = vector.extract_strided_slice %125 {offsets = [20, 0], sizes = [1, 96], strides = [1, 1]} : vector<32x96xf32> to vector<1x96xf32>
    %880 = vector.extract_strided_slice %237 {offsets = [20, 0], sizes = [1, 96], strides = [1, 1]} : vector<32x96xf32> to vector<1x96xf32>
    %881 = tpu.concatenate %879, %880 in 0 : vector<1x96xf32>, vector<1x96xf32> -> vector<2x96xf32>
    %cst_205 = arith.constant dense<0.000000e+00> : vector<2x96xf32>
    %882 = tpu.matmul %878, %9, %cst_205 {dimension_numbers = #tpu.dot_dimension_numbers<[1], [0], [0], [1], [0, 0, 1, 1], [], []>} : vector<2x32xf32>, vector<32x96xf32>, vector<2x96xf32> -> vector<2x96xf32>
    %883 = vector.broadcast %10 : vector<1x96xf32> to vector<2x96xf32>
    %884 = arith.addf %882, %883 : vector<2x96xf32>
    %885 = vector.extract_strided_slice %881 {offsets = [0, 0], sizes = [2, 32], strides = [1, 1]} : vector<2x96xf32> to vector<2x32xf32>
    %886 = vector.extract_strided_slice %884 {offsets = [0, 0], sizes = [2, 32], strides = [1, 1]} : vector<2x96xf32> to vector<2x32xf32>
    %887 = arith.addf %885, %886 : vector<2x32xf32>
    %888 = arith.negf %887 : vector<2x32xf32>
    %889 = math.exp %888 : vector<2x32xf32>
    %cst_206 = arith.constant 1.000000e+00 : f32
    %890 = vector.broadcast %cst_206 : f32 to vector<2x32xf32>
    %891 = arith.addf %890, %889 : vector<2x32xf32>
    %892 = arith.divf %890, %891 : vector<2x32xf32>
    %893 = vector.extract_strided_slice %881 {offsets = [0, 32], sizes = [2, 32], strides = [1, 1]} : vector<2x96xf32> to vector<2x32xf32>
    %894 = vector.extract_strided_slice %884 {offsets = [0, 32], sizes = [2, 32], strides = [1, 1]} : vector<2x96xf32> to vector<2x32xf32>
    %895 = arith.addf %893, %894 : vector<2x32xf32>
    %896 = arith.negf %895 : vector<2x32xf32>
    %897 = math.exp %896 : vector<2x32xf32>
    %cst_207 = arith.constant 1.000000e+00 : f32
    %898 = vector.broadcast %cst_207 : f32 to vector<2x32xf32>
    %899 = arith.addf %898, %897 : vector<2x32xf32>
    %900 = arith.divf %898, %899 : vector<2x32xf32>
    %901 = vector.extract_strided_slice %881 {offsets = [0, 64], sizes = [2, 32], strides = [1, 1]} : vector<2x96xf32> to vector<2x32xf32>
    %902 = vector.extract_strided_slice %884 {offsets = [0, 64], sizes = [2, 32], strides = [1, 1]} : vector<2x96xf32> to vector<2x32xf32>
    %903 = arith.mulf %892, %902 : vector<2x32xf32>
    %904 = arith.addf %901, %903 : vector<2x32xf32>
    %905 = math.tanh %904 : vector<2x32xf32>
    %cst_208 = arith.constant 1.000000e+00 : f32
    %906 = vector.broadcast %cst_208 : f32 to vector<2x32xf32>
    %907 = arith.subf %906, %900 : vector<2x32xf32>
    %908 = arith.mulf %907, %905 : vector<2x32xf32>
    %909 = arith.mulf %900, %878 : vector<2x32xf32>
    %910 = arith.addf %908, %909 : vector<2x32xf32>
    %911 = vector.extract_strided_slice %125 {offsets = [21, 0], sizes = [1, 96], strides = [1, 1]} : vector<32x96xf32> to vector<1x96xf32>
    %912 = vector.extract_strided_slice %237 {offsets = [21, 0], sizes = [1, 96], strides = [1, 1]} : vector<32x96xf32> to vector<1x96xf32>
    %913 = tpu.concatenate %911, %912 in 0 : vector<1x96xf32>, vector<1x96xf32> -> vector<2x96xf32>
    %cst_209 = arith.constant dense<0.000000e+00> : vector<2x96xf32>
    %914 = tpu.matmul %910, %9, %cst_209 {dimension_numbers = #tpu.dot_dimension_numbers<[1], [0], [0], [1], [0, 0, 1, 1], [], []>} : vector<2x32xf32>, vector<32x96xf32>, vector<2x96xf32> -> vector<2x96xf32>
    %915 = vector.broadcast %10 : vector<1x96xf32> to vector<2x96xf32>
    %916 = arith.addf %914, %915 : vector<2x96xf32>
    %917 = vector.extract_strided_slice %913 {offsets = [0, 0], sizes = [2, 32], strides = [1, 1]} : vector<2x96xf32> to vector<2x32xf32>
    %918 = vector.extract_strided_slice %916 {offsets = [0, 0], sizes = [2, 32], strides = [1, 1]} : vector<2x96xf32> to vector<2x32xf32>
    %919 = arith.addf %917, %918 : vector<2x32xf32>
    %920 = arith.negf %919 : vector<2x32xf32>
    %921 = math.exp %920 : vector<2x32xf32>
    %cst_210 = arith.constant 1.000000e+00 : f32
    %922 = vector.broadcast %cst_210 : f32 to vector<2x32xf32>
    %923 = arith.addf %922, %921 : vector<2x32xf32>
    %924 = arith.divf %922, %923 : vector<2x32xf32>
    %925 = vector.extract_strided_slice %913 {offsets = [0, 32], sizes = [2, 32], strides = [1, 1]} : vector<2x96xf32> to vector<2x32xf32>
    %926 = vector.extract_strided_slice %916 {offsets = [0, 32], sizes = [2, 32], strides = [1, 1]} : vector<2x96xf32> to vector<2x32xf32>
    %927 = arith.addf %925, %926 : vector<2x32xf32>
    %928 = arith.negf %927 : vector<2x32xf32>
    %929 = math.exp %928 : vector<2x32xf32>
    %cst_211 = arith.constant 1.000000e+00 : f32
    %930 = vector.broadcast %cst_211 : f32 to vector<2x32xf32>
    %931 = arith.addf %930, %929 : vector<2x32xf32>
    %932 = arith.divf %930, %931 : vector<2x32xf32>
    %933 = vector.extract_strided_slice %913 {offsets = [0, 64], sizes = [2, 32], strides = [1, 1]} : vector<2x96xf32> to vector<2x32xf32>
    %934 = vector.extract_strided_slice %916 {offsets = [0, 64], sizes = [2, 32], strides = [1, 1]} : vector<2x96xf32> to vector<2x32xf32>
    %935 = arith.mulf %924, %934 : vector<2x32xf32>
    %936 = arith.addf %933, %935 : vector<2x32xf32>
    %937 = math.tanh %936 : vector<2x32xf32>
    %cst_212 = arith.constant 1.000000e+00 : f32
    %938 = vector.broadcast %cst_212 : f32 to vector<2x32xf32>
    %939 = arith.subf %938, %932 : vector<2x32xf32>
    %940 = arith.mulf %939, %937 : vector<2x32xf32>
    %941 = arith.mulf %932, %910 : vector<2x32xf32>
    %942 = arith.addf %940, %941 : vector<2x32xf32>
    %943 = vector.extract_strided_slice %125 {offsets = [22, 0], sizes = [1, 96], strides = [1, 1]} : vector<32x96xf32> to vector<1x96xf32>
    %944 = vector.extract_strided_slice %237 {offsets = [22, 0], sizes = [1, 96], strides = [1, 1]} : vector<32x96xf32> to vector<1x96xf32>
    %945 = tpu.concatenate %943, %944 in 0 : vector<1x96xf32>, vector<1x96xf32> -> vector<2x96xf32>
    %cst_213 = arith.constant dense<0.000000e+00> : vector<2x96xf32>
    %946 = tpu.matmul %942, %9, %cst_213 {dimension_numbers = #tpu.dot_dimension_numbers<[1], [0], [0], [1], [0, 0, 1, 1], [], []>} : vector<2x32xf32>, vector<32x96xf32>, vector<2x96xf32> -> vector<2x96xf32>
    %947 = vector.broadcast %10 : vector<1x96xf32> to vector<2x96xf32>
    %948 = arith.addf %946, %947 : vector<2x96xf32>
    %949 = vector.extract_strided_slice %945 {offsets = [0, 0], sizes = [2, 32], strides = [1, 1]} : vector<2x96xf32> to vector<2x32xf32>
    %950 = vector.extract_strided_slice %948 {offsets = [0, 0], sizes = [2, 32], strides = [1, 1]} : vector<2x96xf32> to vector<2x32xf32>
    %951 = arith.addf %949, %950 : vector<2x32xf32>
    %952 = arith.negf %951 : vector<2x32xf32>
    %953 = math.exp %952 : vector<2x32xf32>
    %cst_214 = arith.constant 1.000000e+00 : f32
    %954 = vector.broadcast %cst_214 : f32 to vector<2x32xf32>
    %955 = arith.addf %954, %953 : vector<2x32xf32>
    %956 = arith.divf %954, %955 : vector<2x32xf32>
    %957 = vector.extract_strided_slice %945 {offsets = [0, 32], sizes = [2, 32], strides = [1, 1]} : vector<2x96xf32> to vector<2x32xf32>
    %958 = vector.extract_strided_slice %948 {offsets = [0, 32], sizes = [2, 32], strides = [1, 1]} : vector<2x96xf32> to vector<2x32xf32>
    %959 = arith.addf %957, %958 : vector<2x32xf32>
    %960 = arith.negf %959 : vector<2x32xf32>
    %961 = math.exp %960 : vector<2x32xf32>
    %cst_215 = arith.constant 1.000000e+00 : f32
    %962 = vector.broadcast %cst_215 : f32 to vector<2x32xf32>
    %963 = arith.addf %962, %961 : vector<2x32xf32>
    %964 = arith.divf %962, %963 : vector<2x32xf32>
    %965 = vector.extract_strided_slice %945 {offsets = [0, 64], sizes = [2, 32], strides = [1, 1]} : vector<2x96xf32> to vector<2x32xf32>
    %966 = vector.extract_strided_slice %948 {offsets = [0, 64], sizes = [2, 32], strides = [1, 1]} : vector<2x96xf32> to vector<2x32xf32>
    %967 = arith.mulf %956, %966 : vector<2x32xf32>
    %968 = arith.addf %965, %967 : vector<2x32xf32>
    %969 = math.tanh %968 : vector<2x32xf32>
    %cst_216 = arith.constant 1.000000e+00 : f32
    %970 = vector.broadcast %cst_216 : f32 to vector<2x32xf32>
    %971 = arith.subf %970, %964 : vector<2x32xf32>
    %972 = arith.mulf %971, %969 : vector<2x32xf32>
    %973 = arith.mulf %964, %942 : vector<2x32xf32>
    %974 = arith.addf %972, %973 : vector<2x32xf32>
    %975 = vector.extract_strided_slice %125 {offsets = [23, 0], sizes = [1, 96], strides = [1, 1]} : vector<32x96xf32> to vector<1x96xf32>
    %976 = vector.extract_strided_slice %237 {offsets = [23, 0], sizes = [1, 96], strides = [1, 1]} : vector<32x96xf32> to vector<1x96xf32>
    %977 = tpu.concatenate %975, %976 in 0 : vector<1x96xf32>, vector<1x96xf32> -> vector<2x96xf32>
    %cst_217 = arith.constant dense<0.000000e+00> : vector<2x96xf32>
    %978 = tpu.matmul %974, %9, %cst_217 {dimension_numbers = #tpu.dot_dimension_numbers<[1], [0], [0], [1], [0, 0, 1, 1], [], []>} : vector<2x32xf32>, vector<32x96xf32>, vector<2x96xf32> -> vector<2x96xf32>
    %979 = vector.broadcast %10 : vector<1x96xf32> to vector<2x96xf32>
    %980 = arith.addf %978, %979 : vector<2x96xf32>
    %981 = vector.extract_strided_slice %977 {offsets = [0, 0], sizes = [2, 32], strides = [1, 1]} : vector<2x96xf32> to vector<2x32xf32>
    %982 = vector.extract_strided_slice %980 {offsets = [0, 0], sizes = [2, 32], strides = [1, 1]} : vector<2x96xf32> to vector<2x32xf32>
    %983 = arith.addf %981, %982 : vector<2x32xf32>
    %984 = arith.negf %983 : vector<2x32xf32>
    %985 = math.exp %984 : vector<2x32xf32>
    %cst_218 = arith.constant 1.000000e+00 : f32
    %986 = vector.broadcast %cst_218 : f32 to vector<2x32xf32>
    %987 = arith.addf %986, %985 : vector<2x32xf32>
    %988 = arith.divf %986, %987 : vector<2x32xf32>
    %989 = vector.extract_strided_slice %977 {offsets = [0, 32], sizes = [2, 32], strides = [1, 1]} : vector<2x96xf32> to vector<2x32xf32>
    %990 = vector.extract_strided_slice %980 {offsets = [0, 32], sizes = [2, 32], strides = [1, 1]} : vector<2x96xf32> to vector<2x32xf32>
    %991 = arith.addf %989, %990 : vector<2x32xf32>
    %992 = arith.negf %991 : vector<2x32xf32>
    %993 = math.exp %992 : vector<2x32xf32>
    %cst_219 = arith.constant 1.000000e+00 : f32
    %994 = vector.broadcast %cst_219 : f32 to vector<2x32xf32>
    %995 = arith.addf %994, %993 : vector<2x32xf32>
    %996 = arith.divf %994, %995 : vector<2x32xf32>
    %997 = vector.extract_strided_slice %977 {offsets = [0, 64], sizes = [2, 32], strides = [1, 1]} : vector<2x96xf32> to vector<2x32xf32>
    %998 = vector.extract_strided_slice %980 {offsets = [0, 64], sizes = [2, 32], strides = [1, 1]} : vector<2x96xf32> to vector<2x32xf32>
    %999 = arith.mulf %988, %998 : vector<2x32xf32>
    %1000 = arith.addf %997, %999 : vector<2x32xf32>
    %1001 = math.tanh %1000 : vector<2x32xf32>
    %cst_220 = arith.constant 1.000000e+00 : f32
    %1002 = vector.broadcast %cst_220 : f32 to vector<2x32xf32>
    %1003 = arith.subf %1002, %996 : vector<2x32xf32>
    %1004 = arith.mulf %1003, %1001 : vector<2x32xf32>
    %1005 = arith.mulf %996, %974 : vector<2x32xf32>
    %1006 = arith.addf %1004, %1005 : vector<2x32xf32>
    %1007 = vector.extract_strided_slice %125 {offsets = [24, 0], sizes = [1, 96], strides = [1, 1]} : vector<32x96xf32> to vector<1x96xf32>
    %1008 = vector.extract_strided_slice %237 {offsets = [24, 0], sizes = [1, 96], strides = [1, 1]} : vector<32x96xf32> to vector<1x96xf32>
    %1009 = tpu.concatenate %1007, %1008 in 0 : vector<1x96xf32>, vector<1x96xf32> -> vector<2x96xf32>
    %cst_221 = arith.constant dense<0.000000e+00> : vector<2x96xf32>
    %1010 = tpu.matmul %1006, %9, %cst_221 {dimension_numbers = #tpu.dot_dimension_numbers<[1], [0], [0], [1], [0, 0, 1, 1], [], []>} : vector<2x32xf32>, vector<32x96xf32>, vector<2x96xf32> -> vector<2x96xf32>
    %1011 = vector.broadcast %10 : vector<1x96xf32> to vector<2x96xf32>
    %1012 = arith.addf %1010, %1011 : vector<2x96xf32>
    %1013 = vector.extract_strided_slice %1009 {offsets = [0, 0], sizes = [2, 32], strides = [1, 1]} : vector<2x96xf32> to vector<2x32xf32>
    %1014 = vector.extract_strided_slice %1012 {offsets = [0, 0], sizes = [2, 32], strides = [1, 1]} : vector<2x96xf32> to vector<2x32xf32>
    %1015 = arith.addf %1013, %1014 : vector<2x32xf32>
    %1016 = arith.negf %1015 : vector<2x32xf32>
    %1017 = math.exp %1016 : vector<2x32xf32>
    %cst_222 = arith.constant 1.000000e+00 : f32
    %1018 = vector.broadcast %cst_222 : f32 to vector<2x32xf32>
    %1019 = arith.addf %1018, %1017 : vector<2x32xf32>
    %1020 = arith.divf %1018, %1019 : vector<2x32xf32>
    %1021 = vector.extract_strided_slice %1009 {offsets = [0, 32], sizes = [2, 32], strides = [1, 1]} : vector<2x96xf32> to vector<2x32xf32>
    %1022 = vector.extract_strided_slice %1012 {offsets = [0, 32], sizes = [2, 32], strides = [1, 1]} : vector<2x96xf32> to vector<2x32xf32>
    %1023 = arith.addf %1021, %1022 : vector<2x32xf32>
    %1024 = arith.negf %1023 : vector<2x32xf32>
    %1025 = math.exp %1024 : vector<2x32xf32>
    %cst_223 = arith.constant 1.000000e+00 : f32
    %1026 = vector.broadcast %cst_223 : f32 to vector<2x32xf32>
    %1027 = arith.addf %1026, %1025 : vector<2x32xf32>
    %1028 = arith.divf %1026, %1027 : vector<2x32xf32>
    %1029 = vector.extract_strided_slice %1009 {offsets = [0, 64], sizes = [2, 32], strides = [1, 1]} : vector<2x96xf32> to vector<2x32xf32>
    %1030 = vector.extract_strided_slice %1012 {offsets = [0, 64], sizes = [2, 32], strides = [1, 1]} : vector<2x96xf32> to vector<2x32xf32>
    %1031 = arith.mulf %1020, %1030 : vector<2x32xf32>
    %1032 = arith.addf %1029, %1031 : vector<2x32xf32>
    %1033 = math.tanh %1032 : vector<2x32xf32>
    %cst_224 = arith.constant 1.000000e+00 : f32
    %1034 = vector.broadcast %cst_224 : f32 to vector<2x32xf32>
    %1035 = arith.subf %1034, %1028 : vector<2x32xf32>
    %1036 = arith.mulf %1035, %1033 : vector<2x32xf32>
    %1037 = arith.mulf %1028, %1006 : vector<2x32xf32>
    %1038 = arith.addf %1036, %1037 : vector<2x32xf32>
    %1039 = vector.extract_strided_slice %125 {offsets = [25, 0], sizes = [1, 96], strides = [1, 1]} : vector<32x96xf32> to vector<1x96xf32>
    %1040 = vector.extract_strided_slice %237 {offsets = [25, 0], sizes = [1, 96], strides = [1, 1]} : vector<32x96xf32> to vector<1x96xf32>
    %1041 = tpu.concatenate %1039, %1040 in 0 : vector<1x96xf32>, vector<1x96xf32> -> vector<2x96xf32>
    %cst_225 = arith.constant dense<0.000000e+00> : vector<2x96xf32>
    %1042 = tpu.matmul %1038, %9, %cst_225 {dimension_numbers = #tpu.dot_dimension_numbers<[1], [0], [0], [1], [0, 0, 1, 1], [], []>} : vector<2x32xf32>, vector<32x96xf32>, vector<2x96xf32> -> vector<2x96xf32>
    %1043 = vector.broadcast %10 : vector<1x96xf32> to vector<2x96xf32>
    %1044 = arith.addf %1042, %1043 : vector<2x96xf32>
    %1045 = vector.extract_strided_slice %1041 {offsets = [0, 0], sizes = [2, 32], strides = [1, 1]} : vector<2x96xf32> to vector<2x32xf32>
    %1046 = vector.extract_strided_slice %1044 {offsets = [0, 0], sizes = [2, 32], strides = [1, 1]} : vector<2x96xf32> to vector<2x32xf32>
    %1047 = arith.addf %1045, %1046 : vector<2x32xf32>
    %1048 = arith.negf %1047 : vector<2x32xf32>
    %1049 = math.exp %1048 : vector<2x32xf32>
    %cst_226 = arith.constant 1.000000e+00 : f32
    %1050 = vector.broadcast %cst_226 : f32 to vector<2x32xf32>
    %1051 = arith.addf %1050, %1049 : vector<2x32xf32>
    %1052 = arith.divf %1050, %1051 : vector<2x32xf32>
    %1053 = vector.extract_strided_slice %1041 {offsets = [0, 32], sizes = [2, 32], strides = [1, 1]} : vector<2x96xf32> to vector<2x32xf32>
    %1054 = vector.extract_strided_slice %1044 {offsets = [0, 32], sizes = [2, 32], strides = [1, 1]} : vector<2x96xf32> to vector<2x32xf32>
    %1055 = arith.addf %1053, %1054 : vector<2x32xf32>
    %1056 = arith.negf %1055 : vector<2x32xf32>
    %1057 = math.exp %1056 : vector<2x32xf32>
    %cst_227 = arith.constant 1.000000e+00 : f32
    %1058 = vector.broadcast %cst_227 : f32 to vector<2x32xf32>
    %1059 = arith.addf %1058, %1057 : vector<2x32xf32>
    %1060 = arith.divf %1058, %1059 : vector<2x32xf32>
    %1061 = vector.extract_strided_slice %1041 {offsets = [0, 64], sizes = [2, 32], strides = [1, 1]} : vector<2x96xf32> to vector<2x32xf32>
    %1062 = vector.extract_strided_slice %1044 {offsets = [0, 64], sizes = [2, 32], strides = [1, 1]} : vector<2x96xf32> to vector<2x32xf32>
    %1063 = arith.mulf %1052, %1062 : vector<2x32xf32>
    %1064 = arith.addf %1061, %1063 : vector<2x32xf32>
    %1065 = math.tanh %1064 : vector<2x32xf32>
    %cst_228 = arith.constant 1.000000e+00 : f32
    %1066 = vector.broadcast %cst_228 : f32 to vector<2x32xf32>
    %1067 = arith.subf %1066, %1060 : vector<2x32xf32>
    %1068 = arith.mulf %1067, %1065 : vector<2x32xf32>
    %1069 = arith.mulf %1060, %1038 : vector<2x32xf32>
    %1070 = arith.addf %1068, %1069 : vector<2x32xf32>
    %1071 = vector.extract_strided_slice %125 {offsets = [26, 0], sizes = [1, 96], strides = [1, 1]} : vector<32x96xf32> to vector<1x96xf32>
    %1072 = vector.extract_strided_slice %237 {offsets = [26, 0], sizes = [1, 96], strides = [1, 1]} : vector<32x96xf32> to vector<1x96xf32>
    %1073 = tpu.concatenate %1071, %1072 in 0 : vector<1x96xf32>, vector<1x96xf32> -> vector<2x96xf32>
    %cst_229 = arith.constant dense<0.000000e+00> : vector<2x96xf32>
    %1074 = tpu.matmul %1070, %9, %cst_229 {dimension_numbers = #tpu.dot_dimension_numbers<[1], [0], [0], [1], [0, 0, 1, 1], [], []>} : vector<2x32xf32>, vector<32x96xf32>, vector<2x96xf32> -> vector<2x96xf32>
    %1075 = vector.broadcast %10 : vector<1x96xf32> to vector<2x96xf32>
    %1076 = arith.addf %1074, %1075 : vector<2x96xf32>
    %1077 = vector.extract_strided_slice %1073 {offsets = [0, 0], sizes = [2, 32], strides = [1, 1]} : vector<2x96xf32> to vector<2x32xf32>
    %1078 = vector.extract_strided_slice %1076 {offsets = [0, 0], sizes = [2, 32], strides = [1, 1]} : vector<2x96xf32> to vector<2x32xf32>
    %1079 = arith.addf %1077, %1078 : vector<2x32xf32>
    %1080 = arith.negf %1079 : vector<2x32xf32>
    %1081 = math.exp %1080 : vector<2x32xf32>
    %cst_230 = arith.constant 1.000000e+00 : f32
    %1082 = vector.broadcast %cst_230 : f32 to vector<2x32xf32>
    %1083 = arith.addf %1082, %1081 : vector<2x32xf32>
    %1084 = arith.divf %1082, %1083 : vector<2x32xf32>
    %1085 = vector.extract_strided_slice %1073 {offsets = [0, 32], sizes = [2, 32], strides = [1, 1]} : vector<2x96xf32> to vector<2x32xf32>
    %1086 = vector.extract_strided_slice %1076 {offsets = [0, 32], sizes = [2, 32], strides = [1, 1]} : vector<2x96xf32> to vector<2x32xf32>
    %1087 = arith.addf %1085, %1086 : vector<2x32xf32>
    %1088 = arith.negf %1087 : vector<2x32xf32>
    %1089 = math.exp %1088 : vector<2x32xf32>
    %cst_231 = arith.constant 1.000000e+00 : f32
    %1090 = vector.broadcast %cst_231 : f32 to vector<2x32xf32>
    %1091 = arith.addf %1090, %1089 : vector<2x32xf32>
    %1092 = arith.divf %1090, %1091 : vector<2x32xf32>
    %1093 = vector.extract_strided_slice %1073 {offsets = [0, 64], sizes = [2, 32], strides = [1, 1]} : vector<2x96xf32> to vector<2x32xf32>
    %1094 = vector.extract_strided_slice %1076 {offsets = [0, 64], sizes = [2, 32], strides = [1, 1]} : vector<2x96xf32> to vector<2x32xf32>
    %1095 = arith.mulf %1084, %1094 : vector<2x32xf32>
    %1096 = arith.addf %1093, %1095 : vector<2x32xf32>
    %1097 = math.tanh %1096 : vector<2x32xf32>
    %cst_232 = arith.constant 1.000000e+00 : f32
    %1098 = vector.broadcast %cst_232 : f32 to vector<2x32xf32>
    %1099 = arith.subf %1098, %1092 : vector<2x32xf32>
    %1100 = arith.mulf %1099, %1097 : vector<2x32xf32>
    %1101 = arith.mulf %1092, %1070 : vector<2x32xf32>
    %1102 = arith.addf %1100, %1101 : vector<2x32xf32>
    %1103 = vector.extract_strided_slice %125 {offsets = [27, 0], sizes = [1, 96], strides = [1, 1]} : vector<32x96xf32> to vector<1x96xf32>
    %1104 = vector.extract_strided_slice %237 {offsets = [27, 0], sizes = [1, 96], strides = [1, 1]} : vector<32x96xf32> to vector<1x96xf32>
    %1105 = tpu.concatenate %1103, %1104 in 0 : vector<1x96xf32>, vector<1x96xf32> -> vector<2x96xf32>
    %cst_233 = arith.constant dense<0.000000e+00> : vector<2x96xf32>
    %1106 = tpu.matmul %1102, %9, %cst_233 {dimension_numbers = #tpu.dot_dimension_numbers<[1], [0], [0], [1], [0, 0, 1, 1], [], []>} : vector<2x32xf32>, vector<32x96xf32>, vector<2x96xf32> -> vector<2x96xf32>
    %1107 = vector.broadcast %10 : vector<1x96xf32> to vector<2x96xf32>
    %1108 = arith.addf %1106, %1107 : vector<2x96xf32>
    %1109 = vector.extract_strided_slice %1105 {offsets = [0, 0], sizes = [2, 32], strides = [1, 1]} : vector<2x96xf32> to vector<2x32xf32>
    %1110 = vector.extract_strided_slice %1108 {offsets = [0, 0], sizes = [2, 32], strides = [1, 1]} : vector<2x96xf32> to vector<2x32xf32>
    %1111 = arith.addf %1109, %1110 : vector<2x32xf32>
    %1112 = arith.negf %1111 : vector<2x32xf32>
    %1113 = math.exp %1112 : vector<2x32xf32>
    %cst_234 = arith.constant 1.000000e+00 : f32
    %1114 = vector.broadcast %cst_234 : f32 to vector<2x32xf32>
    %1115 = arith.addf %1114, %1113 : vector<2x32xf32>
    %1116 = arith.divf %1114, %1115 : vector<2x32xf32>
    %1117 = vector.extract_strided_slice %1105 {offsets = [0, 32], sizes = [2, 32], strides = [1, 1]} : vector<2x96xf32> to vector<2x32xf32>
    %1118 = vector.extract_strided_slice %1108 {offsets = [0, 32], sizes = [2, 32], strides = [1, 1]} : vector<2x96xf32> to vector<2x32xf32>
    %1119 = arith.addf %1117, %1118 : vector<2x32xf32>
    %1120 = arith.negf %1119 : vector<2x32xf32>
    %1121 = math.exp %1120 : vector<2x32xf32>
    %cst_235 = arith.constant 1.000000e+00 : f32
    %1122 = vector.broadcast %cst_235 : f32 to vector<2x32xf32>
    %1123 = arith.addf %1122, %1121 : vector<2x32xf32>
    %1124 = arith.divf %1122, %1123 : vector<2x32xf32>
    %1125 = vector.extract_strided_slice %1105 {offsets = [0, 64], sizes = [2, 32], strides = [1, 1]} : vector<2x96xf32> to vector<2x32xf32>
    %1126 = vector.extract_strided_slice %1108 {offsets = [0, 64], sizes = [2, 32], strides = [1, 1]} : vector<2x96xf32> to vector<2x32xf32>
    %1127 = arith.mulf %1116, %1126 : vector<2x32xf32>
    %1128 = arith.addf %1125, %1127 : vector<2x32xf32>
    %1129 = math.tanh %1128 : vector<2x32xf32>
    %cst_236 = arith.constant 1.000000e+00 : f32
    %1130 = vector.broadcast %cst_236 : f32 to vector<2x32xf32>
    %1131 = arith.subf %1130, %1124 : vector<2x32xf32>
    %1132 = arith.mulf %1131, %1129 : vector<2x32xf32>
    %1133 = arith.mulf %1124, %1102 : vector<2x32xf32>
    %1134 = arith.addf %1132, %1133 : vector<2x32xf32>
    %1135 = vector.extract_strided_slice %125 {offsets = [28, 0], sizes = [1, 96], strides = [1, 1]} : vector<32x96xf32> to vector<1x96xf32>
    %1136 = vector.extract_strided_slice %237 {offsets = [28, 0], sizes = [1, 96], strides = [1, 1]} : vector<32x96xf32> to vector<1x96xf32>
    %1137 = tpu.concatenate %1135, %1136 in 0 : vector<1x96xf32>, vector<1x96xf32> -> vector<2x96xf32>
    %cst_237 = arith.constant dense<0.000000e+00> : vector<2x96xf32>
    %1138 = tpu.matmul %1134, %9, %cst_237 {dimension_numbers = #tpu.dot_dimension_numbers<[1], [0], [0], [1], [0, 0, 1, 1], [], []>} : vector<2x32xf32>, vector<32x96xf32>, vector<2x96xf32> -> vector<2x96xf32>
    %1139 = vector.broadcast %10 : vector<1x96xf32> to vector<2x96xf32>
    %1140 = arith.addf %1138, %1139 : vector<2x96xf32>
    %1141 = vector.extract_strided_slice %1137 {offsets = [0, 0], sizes = [2, 32], strides = [1, 1]} : vector<2x96xf32> to vector<2x32xf32>
    %1142 = vector.extract_strided_slice %1140 {offsets = [0, 0], sizes = [2, 32], strides = [1, 1]} : vector<2x96xf32> to vector<2x32xf32>
    %1143 = arith.addf %1141, %1142 : vector<2x32xf32>
    %1144 = arith.negf %1143 : vector<2x32xf32>
    %1145 = math.exp %1144 : vector<2x32xf32>
    %cst_238 = arith.constant 1.000000e+00 : f32
    %1146 = vector.broadcast %cst_238 : f32 to vector<2x32xf32>
    %1147 = arith.addf %1146, %1145 : vector<2x32xf32>
    %1148 = arith.divf %1146, %1147 : vector<2x32xf32>
    %1149 = vector.extract_strided_slice %1137 {offsets = [0, 32], sizes = [2, 32], strides = [1, 1]} : vector<2x96xf32> to vector<2x32xf32>
    %1150 = vector.extract_strided_slice %1140 {offsets = [0, 32], sizes = [2, 32], strides = [1, 1]} : vector<2x96xf32> to vector<2x32xf32>
    %1151 = arith.addf %1149, %1150 : vector<2x32xf32>
    %1152 = arith.negf %1151 : vector<2x32xf32>
    %1153 = math.exp %1152 : vector<2x32xf32>
    %cst_239 = arith.constant 1.000000e+00 : f32
    %1154 = vector.broadcast %cst_239 : f32 to vector<2x32xf32>
    %1155 = arith.addf %1154, %1153 : vector<2x32xf32>
    %1156 = arith.divf %1154, %1155 : vector<2x32xf32>
    %1157 = vector.extract_strided_slice %1137 {offsets = [0, 64], sizes = [2, 32], strides = [1, 1]} : vector<2x96xf32> to vector<2x32xf32>
    %1158 = vector.extract_strided_slice %1140 {offsets = [0, 64], sizes = [2, 32], strides = [1, 1]} : vector<2x96xf32> to vector<2x32xf32>
    %1159 = arith.mulf %1148, %1158 : vector<2x32xf32>
    %1160 = arith.addf %1157, %1159 : vector<2x32xf32>
    %1161 = math.tanh %1160 : vector<2x32xf32>
    %cst_240 = arith.constant 1.000000e+00 : f32
    %1162 = vector.broadcast %cst_240 : f32 to vector<2x32xf32>
    %1163 = arith.subf %1162, %1156 : vector<2x32xf32>
    %1164 = arith.mulf %1163, %1161 : vector<2x32xf32>
    %1165 = arith.mulf %1156, %1134 : vector<2x32xf32>
    %1166 = arith.addf %1164, %1165 : vector<2x32xf32>
    %1167 = vector.extract_strided_slice %125 {offsets = [29, 0], sizes = [1, 96], strides = [1, 1]} : vector<32x96xf32> to vector<1x96xf32>
    %1168 = vector.extract_strided_slice %237 {offsets = [29, 0], sizes = [1, 96], strides = [1, 1]} : vector<32x96xf32> to vector<1x96xf32>
    %1169 = tpu.concatenate %1167, %1168 in 0 : vector<1x96xf32>, vector<1x96xf32> -> vector<2x96xf32>
    %cst_241 = arith.constant dense<0.000000e+00> : vector<2x96xf32>
    %1170 = tpu.matmul %1166, %9, %cst_241 {dimension_numbers = #tpu.dot_dimension_numbers<[1], [0], [0], [1], [0, 0, 1, 1], [], []>} : vector<2x32xf32>, vector<32x96xf32>, vector<2x96xf32> -> vector<2x96xf32>
    %1171 = vector.broadcast %10 : vector<1x96xf32> to vector<2x96xf32>
    %1172 = arith.addf %1170, %1171 : vector<2x96xf32>
    %1173 = vector.extract_strided_slice %1169 {offsets = [0, 0], sizes = [2, 32], strides = [1, 1]} : vector<2x96xf32> to vector<2x32xf32>
    %1174 = vector.extract_strided_slice %1172 {offsets = [0, 0], sizes = [2, 32], strides = [1, 1]} : vector<2x96xf32> to vector<2x32xf32>
    %1175 = arith.addf %1173, %1174 : vector<2x32xf32>
    %1176 = arith.negf %1175 : vector<2x32xf32>
    %1177 = math.exp %1176 : vector<2x32xf32>
    %cst_242 = arith.constant 1.000000e+00 : f32
    %1178 = vector.broadcast %cst_242 : f32 to vector<2x32xf32>
    %1179 = arith.addf %1178, %1177 : vector<2x32xf32>
    %1180 = arith.divf %1178, %1179 : vector<2x32xf32>
    %1181 = vector.extract_strided_slice %1169 {offsets = [0, 32], sizes = [2, 32], strides = [1, 1]} : vector<2x96xf32> to vector<2x32xf32>
    %1182 = vector.extract_strided_slice %1172 {offsets = [0, 32], sizes = [2, 32], strides = [1, 1]} : vector<2x96xf32> to vector<2x32xf32>
    %1183 = arith.addf %1181, %1182 : vector<2x32xf32>
    %1184 = arith.negf %1183 : vector<2x32xf32>
    %1185 = math.exp %1184 : vector<2x32xf32>
    %cst_243 = arith.constant 1.000000e+00 : f32
    %1186 = vector.broadcast %cst_243 : f32 to vector<2x32xf32>
    %1187 = arith.addf %1186, %1185 : vector<2x32xf32>
    %1188 = arith.divf %1186, %1187 : vector<2x32xf32>
    %1189 = vector.extract_strided_slice %1169 {offsets = [0, 64], sizes = [2, 32], strides = [1, 1]} : vector<2x96xf32> to vector<2x32xf32>
    %1190 = vector.extract_strided_slice %1172 {offsets = [0, 64], sizes = [2, 32], strides = [1, 1]} : vector<2x96xf32> to vector<2x32xf32>
    %1191 = arith.mulf %1180, %1190 : vector<2x32xf32>
    %1192 = arith.addf %1189, %1191 : vector<2x32xf32>
    %1193 = math.tanh %1192 : vector<2x32xf32>
    %cst_244 = arith.constant 1.000000e+00 : f32
    %1194 = vector.broadcast %cst_244 : f32 to vector<2x32xf32>
    %1195 = arith.subf %1194, %1188 : vector<2x32xf32>
    %1196 = arith.mulf %1195, %1193 : vector<2x32xf32>
    %1197 = arith.mulf %1188, %1166 : vector<2x32xf32>
    %1198 = arith.addf %1196, %1197 : vector<2x32xf32>
    %1199 = vector.extract_strided_slice %125 {offsets = [30, 0], sizes = [1, 96], strides = [1, 1]} : vector<32x96xf32> to vector<1x96xf32>
    %1200 = vector.extract_strided_slice %237 {offsets = [30, 0], sizes = [1, 96], strides = [1, 1]} : vector<32x96xf32> to vector<1x96xf32>
    %1201 = tpu.concatenate %1199, %1200 in 0 : vector<1x96xf32>, vector<1x96xf32> -> vector<2x96xf32>
    %cst_245 = arith.constant dense<0.000000e+00> : vector<2x96xf32>
    %1202 = tpu.matmul %1198, %9, %cst_245 {dimension_numbers = #tpu.dot_dimension_numbers<[1], [0], [0], [1], [0, 0, 1, 1], [], []>} : vector<2x32xf32>, vector<32x96xf32>, vector<2x96xf32> -> vector<2x96xf32>
    %1203 = vector.broadcast %10 : vector<1x96xf32> to vector<2x96xf32>
    %1204 = arith.addf %1202, %1203 : vector<2x96xf32>
    %1205 = vector.extract_strided_slice %1201 {offsets = [0, 0], sizes = [2, 32], strides = [1, 1]} : vector<2x96xf32> to vector<2x32xf32>
    %1206 = vector.extract_strided_slice %1204 {offsets = [0, 0], sizes = [2, 32], strides = [1, 1]} : vector<2x96xf32> to vector<2x32xf32>
    %1207 = arith.addf %1205, %1206 : vector<2x32xf32>
    %1208 = arith.negf %1207 : vector<2x32xf32>
    %1209 = math.exp %1208 : vector<2x32xf32>
    %cst_246 = arith.constant 1.000000e+00 : f32
    %1210 = vector.broadcast %cst_246 : f32 to vector<2x32xf32>
    %1211 = arith.addf %1210, %1209 : vector<2x32xf32>
    %1212 = arith.divf %1210, %1211 : vector<2x32xf32>
    %1213 = vector.extract_strided_slice %1201 {offsets = [0, 32], sizes = [2, 32], strides = [1, 1]} : vector<2x96xf32> to vector<2x32xf32>
    %1214 = vector.extract_strided_slice %1204 {offsets = [0, 32], sizes = [2, 32], strides = [1, 1]} : vector<2x96xf32> to vector<2x32xf32>
    %1215 = arith.addf %1213, %1214 : vector<2x32xf32>
    %1216 = arith.negf %1215 : vector<2x32xf32>
    %1217 = math.exp %1216 : vector<2x32xf32>
    %cst_247 = arith.constant 1.000000e+00 : f32
    %1218 = vector.broadcast %cst_247 : f32 to vector<2x32xf32>
    %1219 = arith.addf %1218, %1217 : vector<2x32xf32>
    %1220 = arith.divf %1218, %1219 : vector<2x32xf32>
    %1221 = vector.extract_strided_slice %1201 {offsets = [0, 64], sizes = [2, 32], strides = [1, 1]} : vector<2x96xf32> to vector<2x32xf32>
    %1222 = vector.extract_strided_slice %1204 {offsets = [0, 64], sizes = [2, 32], strides = [1, 1]} : vector<2x96xf32> to vector<2x32xf32>
    %1223 = arith.mulf %1212, %1222 : vector<2x32xf32>
    %1224 = arith.addf %1221, %1223 : vector<2x32xf32>
    %1225 = math.tanh %1224 : vector<2x32xf32>
    %cst_248 = arith.constant 1.000000e+00 : f32
    %1226 = vector.broadcast %cst_248 : f32 to vector<2x32xf32>
    %1227 = arith.subf %1226, %1220 : vector<2x32xf32>
    %1228 = arith.mulf %1227, %1225 : vector<2x32xf32>
    %1229 = arith.mulf %1220, %1198 : vector<2x32xf32>
    %1230 = arith.addf %1228, %1229 : vector<2x32xf32>
    %1231 = vector.extract_strided_slice %125 {offsets = [31, 0], sizes = [1, 96], strides = [1, 1]} : vector<32x96xf32> to vector<1x96xf32>
    %1232 = vector.extract_strided_slice %237 {offsets = [31, 0], sizes = [1, 96], strides = [1, 1]} : vector<32x96xf32> to vector<1x96xf32>
    %1233 = tpu.concatenate %1231, %1232 in 0 : vector<1x96xf32>, vector<1x96xf32> -> vector<2x96xf32>
    %cst_249 = arith.constant dense<0.000000e+00> : vector<2x96xf32>
    %1234 = tpu.matmul %1230, %9, %cst_249 {dimension_numbers = #tpu.dot_dimension_numbers<[1], [0], [0], [1], [0, 0, 1, 1], [], []>} : vector<2x32xf32>, vector<32x96xf32>, vector<2x96xf32> -> vector<2x96xf32>
    %1235 = vector.broadcast %10 : vector<1x96xf32> to vector<2x96xf32>
    %1236 = arith.addf %1234, %1235 : vector<2x96xf32>
    %1237 = vector.extract_strided_slice %1233 {offsets = [0, 0], sizes = [2, 32], strides = [1, 1]} : vector<2x96xf32> to vector<2x32xf32>
    %1238 = vector.extract_strided_slice %1236 {offsets = [0, 0], sizes = [2, 32], strides = [1, 1]} : vector<2x96xf32> to vector<2x32xf32>
    %1239 = arith.addf %1237, %1238 : vector<2x32xf32>
    %1240 = arith.negf %1239 : vector<2x32xf32>
    %1241 = math.exp %1240 : vector<2x32xf32>
    %cst_250 = arith.constant 1.000000e+00 : f32
    %1242 = vector.broadcast %cst_250 : f32 to vector<2x32xf32>
    %1243 = arith.addf %1242, %1241 : vector<2x32xf32>
    %1244 = arith.divf %1242, %1243 : vector<2x32xf32>
    %1245 = vector.extract_strided_slice %1233 {offsets = [0, 32], sizes = [2, 32], strides = [1, 1]} : vector<2x96xf32> to vector<2x32xf32>
    %1246 = vector.extract_strided_slice %1236 {offsets = [0, 32], sizes = [2, 32], strides = [1, 1]} : vector<2x96xf32> to vector<2x32xf32>
    %1247 = arith.addf %1245, %1246 : vector<2x32xf32>
    %1248 = arith.negf %1247 : vector<2x32xf32>
    %1249 = math.exp %1248 : vector<2x32xf32>
    %cst_251 = arith.constant 1.000000e+00 : f32
    %1250 = vector.broadcast %cst_251 : f32 to vector<2x32xf32>
    %1251 = arith.addf %1250, %1249 : vector<2x32xf32>
    %1252 = arith.divf %1250, %1251 : vector<2x32xf32>
    %1253 = vector.extract_strided_slice %1233 {offsets = [0, 64], sizes = [2, 32], strides = [1, 1]} : vector<2x96xf32> to vector<2x32xf32>
    %1254 = vector.extract_strided_slice %1236 {offsets = [0, 64], sizes = [2, 32], strides = [1, 1]} : vector<2x96xf32> to vector<2x32xf32>
    %1255 = arith.mulf %1244, %1254 : vector<2x32xf32>
    %1256 = arith.addf %1253, %1255 : vector<2x32xf32>
    %1257 = math.tanh %1256 : vector<2x32xf32>
    %cst_252 = arith.constant 1.000000e+00 : f32
    %1258 = vector.broadcast %cst_252 : f32 to vector<2x32xf32>
    %1259 = arith.subf %1258, %1252 : vector<2x32xf32>
    %1260 = arith.mulf %1259, %1257 : vector<2x32xf32>
    %1261 = arith.mulf %1252, %1230 : vector<2x32xf32>
    %1262 = arith.addf %1260, %1261 : vector<2x32xf32>
    %c0_253 = arith.constant 0 : index
    %c0_254 = arith.constant 0 : index
    %1263 = vector.load %arg14[%c0_253, %c0_254] : memref<32x150xf32, #tpu.memory_space<vmem>>, vector<32x150xf32>
    %cst_255 = arith.constant dense<0.000000e+00> : vector<2x150xf32>
    %1264 = tpu.matmul %1262, %1263, %cst_255 {dimension_numbers = #tpu.dot_dimension_numbers<[1], [0], [0], [1], [0, 0, 1, 1], [], []>} : vector<2x32xf32>, vector<32x150xf32>, vector<2x150xf32> -> vector<2x150xf32>
    %c0_256 = arith.constant 0 : index
    %c0_257 = arith.constant 0 : index
    %1265 = vector.load %arg15[%c0_256, %c0_257] : memref<1x150xf32, #tpu.memory_space<vmem>>, vector<1x150xf32>
    %1266 = vector.broadcast %1265 : vector<1x150xf32> to vector<2x150xf32>
    %1267 = arith.addf %1264, %1266 : vector<2x150xf32>
    %cst_258 = arith.constant 0.000000e+00 : f32
    %1268 = vector.broadcast %cst_258 : f32 to vector<2x150xf32>
    %1269 = arith.maximumf %1267, %1268 : vector<2x150xf32>
    %c0_259 = arith.constant 0 : index
    %c0_260 = arith.constant 0 : index
    %1270 = vector.load %arg16[%c0_259, %c0_260] : memref<150x150xf32, #tpu.memory_space<vmem>>, vector<150x150xf32>
    %cst_261 = arith.constant dense<0.000000e+00> : vector<2x150xf32>
    %1271 = tpu.matmul %1269, %1270, %cst_261 {dimension_numbers = #tpu.dot_dimension_numbers<[1], [0], [0], [1], [0, 0, 1, 1], [], []>} : vector<2x150xf32>, vector<150x150xf32>, vector<2x150xf32> -> vector<2x150xf32>
    %c0_262 = arith.constant 0 : index
    %c0_263 = arith.constant 0 : index
    %1272 = vector.load %arg17[%c0_262, %c0_263] : memref<1x150xf32, #tpu.memory_space<vmem>>, vector<1x150xf32>
    %1273 = vector.broadcast %1272 : vector<1x150xf32> to vector<2x150xf32>
    %1274 = arith.addf %1271, %1273 : vector<2x150xf32>
    %cst_264 = arith.constant 0.000000e+00 : f32
    %1275 = vector.broadcast %cst_264 : f32 to vector<2x150xf32>
    %1276 = arith.maximumf %1274, %1275 : vector<2x150xf32>
    %c0_265 = arith.constant 0 : index
    %c0_266 = arith.constant 0 : index
    %1277 = vector.load %arg18[%c0_265, %c0_266] : memref<150x2xf32, #tpu.memory_space<vmem>>, vector<150x2xf32>
    %cst_267 = arith.constant dense<0.000000e+00> : vector<2x2xf32>
    %1278 = tpu.matmul %1276, %1277, %cst_267 {dimension_numbers = #tpu.dot_dimension_numbers<[1], [0], [0], [1], [0, 0, 1, 1], [], []>} : vector<2x150xf32>, vector<150x2xf32>, vector<2x2xf32> -> vector<2x2xf32>
    %c0_268 = arith.constant 0 : index
    %c0_269 = arith.constant 0 : index
    %1279 = vector.load %arg19[%c0_268, %c0_269] : memref<1x2xf32, #tpu.memory_space<vmem>>, vector<1x2xf32>
    %1280 = vector.broadcast %1279 : vector<1x2xf32> to vector<2x2xf32>
    %1281 = arith.addf %1278, %1280 : vector<2x2xf32>
    %c0_270 = arith.constant 0 : index
    %c0_271 = arith.constant 0 : index
    %1282 = vector.load %arg20[%c0_270, %c0_271] : memref<2x2xf32, #tpu.memory_space<vmem>>, vector<2x2xf32>
    tpu.vector_store %arg20[%c0_270, %c0_271], %1281 {strides = array<i32>} : memref<2x2xf32, #tpu.memory_space<vmem>>, vector<2x2xf32>,
    return
  }
}

</mosaic_0001>

<bundles_post_ra>
// kernel: mtan_enc_forward.1
= control target key start
LH: loop header
LB: loop body
LE: loop exit
PB: predicated region body
PF: predicated region fallthrough
CT: control target
= control target key end

     0   :  { %s6978_s0 = inlined_call_operand.vmem [shape: f32[32,32], index: 0, kind: input, shape index: {}]   ;;  %s6979_s1 = inlined_call_operand.vmem [shape: f32[2,8,32], index: 1, kind: input, shape index: {}]   ;;  %s6980_s2 = inlined_call_operand.vmem [shape: f32[2,8,8], index: 2, kind: input, shape index: {}]   ;;  %s6981_s3 = inlined_call_operand.vmem [shape: f32[2,8,8], index: 3, kind: input, shape index: {}]   ;;  %s6982_s4 = inlined_call_operand.vmem [shape: f32[32,32], index: 4, kind: input, shape index: {}]   ;;  %s6983_s5 = inlined_call_operand.vmem [shape: f32[1,32], index: 5, kind: input, shape index: {}]   ;;  %s6984_s6 = inlined_call_operand.vmem [shape: f32[32,32], index: 6, kind: input, shape index: {}]   ;;  %s6985_s7 = inlined_call_operand.vmem [shape: f32[1,32], index: 7, kind: input, shape index: {}]   ;;  %s6986_s8 = inlined_call_operand.vmem [shape: f32[32,32], index: 8, kind: input, shape index: {}]   ;;  %s6987_s9 = inlined_call_operand.vmem [shape: f32[1,32], index: 9, kind: input, shape index: {}]   ;;  %s6988_s10 = inlined_call_operand.vmem [shape: f32[32,96], index: 10, kind: input, shape index: {}]   ;;  %s6989_s11 = inlined_call_operand.vmem [shape: f32[1,96], index: 11, kind: input, shape index: {}]   ;;  %s6990_s12 = inlined_call_operand.vmem [shape: f32[32,96], index: 12, kind: input, shape index: {}]   ;;  %s6991_s13 = inlined_call_operand.vmem [shape: f32[1,96], index: 13, kind: input, shape index: {}]   ;;  %s6992_s14 = inlined_call_operand.vmem [shape: f32[32,150], index: 14, kind: input, shape index: {}]   ;;  %s6993_s15 = inlined_call_operand.vmem [shape: f32[1,150], index: 15, kind: input, shape index: {}]   ;;  %s6994_s16 = inlined_call_operand.vmem [shape: f32[150,150], index: 16, kind: input, shape index: {}]   ;;  %s6995_s17 = inlined_call_operand.vmem [shape: f32[1,150], index: 17, kind: input, shape index: {}]   ;;  %s6996_s18 = inlined_call_operand.vmem [shape: f32[150,2], index: 18, kind: input, shape index: {}]   ;;  %s6997_s19 = inlined_call_operand.vmem [shape: f32[1,2], index: 19, kind: input, shape index: {}]   ;;  %s6998_s20 = inlined_call_operand.hbm [shape: f32[2,2], index: 20, kind: output, shape index: {}]  }
   0x1   :  { %7004 = sst [smem:[#allocation5_spill]] %s6978_s0 }
   0x2   :  { %7005 = sst [smem:[#allocation6_spill]] %s6979_s1 }
   0x3   :  { %7006 = sst [smem:[#allocation7_spill]] %s6980_s2 }
   0x4   :  { %7007 = sst [smem:[#allocation8_spill]] %s6981_s3 }
   0x5   :  { %7008 = sst [smem:[#allocation9_spill]] %s6982_s4 }
   0x6   :  { %s7009_s23 = sld [smem:[#allocation9_spill]]  ;;  %v5525_v1 = vld [vmem:[%s6984_s6 + $0x18] sm:$0xff]  ;;  %v5534_v3 = vld [vmem:[%s6984_s6 + $0x10] sm:$0xff]  ;;  %v5542_v5 = vld [vmem:[%s6984_s6 + $0x8] sm:$0xff]  ;;  %vm98_vm0 = vcmask 261120  }
   0x7   :  { %161 = vmatpush.msra.mxu1 %v5525_v1  ;;  %v5551_v7 = vld [vmem:[%s6984_s6] sm:$0xff]  ;;  %s7010_s25 = sld [smem:[#allocation5_spill]] }
   0x8   :  { %s7011_s27 = sld [smem:[#allocation6_spill]] }
   0x9   :  { %162 = vmatpush.msra.mxu1 %v5534_v3 }
   0xb   :  { %163 = vmatpush.msra.mxu1 %v5542_v5 }
   0xc   :  { %v73_v0 = vld [vmem:[%s7009_s23 + $0x18] sm:$0xff]  ;;  %v72_v2 = vld [vmem:[%s7009_s23 + $0x10] sm:$0xff]  ;;  %v71_v4 = vld [vmem:[%s7009_s23 + $0x8] sm:$0xff] }
   0xd   :  { %123 = vmatpush.msra.mxu0 %v73_v0  ;;  %v70_v6 = vld [vmem:[%s7009_s23] sm:$0xff]  ;;  %164 = vmatpush.msra.mxu1 %v5551_v7 }
   0xe   :  { %v66_v8 = vld [vmem:[%s7010_s25] sm:$0xff] }
   0xf   :  { %124 = vmatpush.msra.mxu0 %v72_v2  ;;  %v140_v9 = vld [vmem:[%s7011_s27] sm:$0xff] }
  0x11   :  { %125 = vmatpush.msra.mxu0 %v71_v4 }
  0x13   :  { %126 = vmatpush.msra.mxu0 %v70_v6 }
  0x14   :  { %25 = vsyncpa [#allocation3], 0  ;;  %4810 = vmatmul.msk.f32.vlgmr.msra.gmra.mxu0 %vm98_vm0, %v66_v8  ;;  %4814 = vmatmul.msk.f32.vlgmr.msra.gmra.mxu1 %vm98_vm0, %v140_v9  ;;  %v67_v10 = vld [vmem:[%s7010_s25 + $0x8] sm:$0xff]  ;;  %v68_v11 = vld [vmem:[%s7010_s25 + $0x10] sm:$0xff]  ;;  %vm170_vm1 = vcmask 64512   ;;  %s5407_s24 = smov 120  }
  0x15   :  { %v69_v12 = vld [vmem:[%s7010_s25 + $0x18] sm:$0xff]  ;;  %v5043_v13 = vld [vmem:[%s6985_s7] ss:$0 sm:$0xff]  ;;  %s7012_s25 = sld [smem:[#allocation7_spill]]  ;;  %s5408_s4 = smov 112  }
  0x16   :  { %v5042_v14 = vld [vmem:[%s6983_s5] ss:$0 sm:$0xff]  ;;  %s7013_s6 = sld [smem:[#allocation8_spill]]  ;;  %s5409_s29 = smov 104  }
  0x17   :  { %v80_v61 = vld [vmem:[%s6986_s8] sm:$0xff]  ;;  %s5411_s21 = smov 64  }
  0x1b   :  { %v141_v25 = vld [vmem:[%s7012_s25] sm:$0xff] }
  0x1c   :  { %4811 = vmatmul.msk.f32.gmra.mxu0 %vm98_vm0, %v67_v10  ;;  %v5615_v26 = vld [vmem:[%s7013_s6] sm:$0xff] }
  0x1d   :  { %v5618_v27 = vmul.f32 %v5615_v26, %v141_v25  ;;  %518 = vmatpush.msrb.mxu0 %v5615_v26 }
  0x1f   :  { %270 = vmatpush.msra.mxu3 %v5618_v27  ;;  %790 = vmatpush.msra.mxu0 %v5618_v27 }
  0x24   :  { %4812 = vmatmul.msk.f32.gmra.mxu0 %vm98_vm0, %v68_v11 }
  0x2c   :  { %4813 = vmatmul.msk.f32.gmra.mxu0 %vm98_vm0, %v69_v12 }
  0x91   :  { %v128_v15 = vpop.f32.mrf.mxu0  ;;  %v166_v16 = vpop.f32.mrf.mxu1 }
  0x92   :  { %v5581_v17 = vadd.f32 %v5043_v13, %v166_v16  ;;  %v5587_v18 = vadd.f32 %v5042_v14, %v128_v15 }
  0x94   :  { %393 = vrot.lane.b32.xlu2 %v5581_v17, %s5407_s24  ;;  %4815 = vmatpush.xpose.msk.msrb.mxu1 %vm170_vm1, %v5581_v17 }
  0x95   :  { %5034 = vmatpush.xpose.msk.msra.mxu2 %vm170_vm1, %v5581_v17 }
  0x97   :  { %4816 = vmatmul.msk.f32.vlgmr.msrb.gmra.mxu1 %vm170_vm1, %v5587_v18 }
  0x98   :  { %299 = vmatpush.msra.mxu1 %v5615_v26 }
  0x99   :  { %v131_v19 = vpop.f32.mrf.mxu0  ;;  %489 = vmatpush.msrb.mxu2 %v5618_v27 }
  0x9a   :  { %v5593_v20 = vadd.f32 %v5042_v14, %v131_v19 }
  0x9c   :  { %4817 = vmatmul.msk.f32.vlgmr.msra.gmra.mxu2 %vm170_vm1, %v5593_v20  ;;  %385 = vrot.lane.b32.xlu2 %v5587_v18, %s5407_s24 }
  0xa1   :  { %v134_v21 = vpop.f32.mrf.mxu0 }
  0xa2   :  { %v5599_v22 = vadd.f32 %v5042_v14, %v134_v21 }
  0xa4   :  { %4818 = vmatmul.msk.f32.gmra.mxu2 %vm170_vm1, %v5599_v22 }
  0xa9   :  { %v137_v23 = vpop.f32.mrf.mxu0 }
  0xaa   :  { %v5603_v24 = vadd.f32 %v5042_v14, %v137_v23 }
  0xac   :  { %4819 = vmatmul.msk.f32.gmra.mxu2 %vm170_vm1, %v5603_v24  ;;  %391 = vrot.lane.b32.xlu2 %v5603_v24, %s5407_s24 }
  0xee   :  { %v394_v28 = vpop.permute.xlu2 %393 }
  0xef   :  { %4828 = vmatpush.xpose.msk.msrb.mxu3 %vm170_vm1, %v394_v28 }
  0xf6   :  { %v5642_v57 = vpop.permute.xlu2 %385 }
 0x106   :  { %v5654_v60 = vpop.permute.xlu2 %391 }
 0x114   :  { %v203_v29 = vpop.f32.mrf.mxu1 }
 0x115   :  { %v215_v30 = vmul.f32 0.35355338, %v203_v29 }
 0x117   :  { %v219_v31 = vsel %vm170_vm1, %v215_v30, -inf }
 0x118   :  { %220 = vmax.xlane.f32.xlu0 %v219_v31 }
 0x11f   :  { %v206_v32 = vpop.f32.mrf.mxu2 }
 0x120   :  { %v216_v33 = vmul.f32 0.35355338, %v206_v32 }
 0x122   :  { %v222_v34 = vsel %vm170_vm1, %v216_v33, -inf }
 0x123   :  { %223 = vmax.xlane.f32.xlu0 %v222_v34 }
 0x127   :  { %v209_v35 = vpop.f32.mrf.mxu2 }
 0x128   :  { %v217_v36 = vmul.f32 0.35355338, %v209_v35 }
 0x12a   :  { %v225_v37 = vsel %vm170_vm1, %v217_v36, -inf }
 0x12b   :  { %226 = vmax.xlane.f32.xlu1 %v225_v37 }
 0x12f   :  { %v212_v38 = vpop.f32.mrf.mxu2 }
 0x130   :  { %v218_v39 = vmul.f32 0.35355338, %v212_v38 }
 0x132   :  { %v228_v40 = vsel %vm170_vm1, %v218_v39, -inf }
 0x133   :  { %229 = vmax.xlane.f32.xlu1 %v228_v40 }
 0x137   :  { %387 = vrot.lane.b32.xlu0 %v5593_v20, %s5407_s24 }
 0x14c   :  { %389 = vrot.lane.b32.xlu1 %v5599_v22, %s5407_s24 }
 0x18b   :  { %v221_v41 = vpop.xlane.xlu0 %220 }
 0x18c   :  { %v231_v42 = vsub.f32 %v215_v30, %v221_v41 }
 0x18e   :  { %v235_v43 = vmul.f32 1.442695, %v231_v42 }
 0x190   :  { %5048 = vpow2.f32 %v235_v43 }
 0x196   :  { %v5049_v44 = vpop.eup %5048  ;;  %v224_v45 = vpop.xlane.xlu0 %223 }
 0x197   :  { %v232_v46 = vsub.f32 %v216_v33, %v224_v45  ;;  %4820 = vmatmul.msk.f32.vlgmr.msra.gmra.mxu3 %vm170_vm1, %v5049_v44  ;;  %4824 = vmatmul.msk.f32.vlgmr.msra.gmra.mxu1 %vm170_vm1, %v5049_v44 }
 0x198   :  { %672 = vmatpush.msra.mxu3 %v80_v61 }
 0x199   :  { %v237_v47 = vmul.f32 1.442695, %v232_v46 }
 0x19b   :  { %5050 = vpow2.f32 %v237_v47 }
 0x19e   :  { %v227_v48 = vpop.xlane.xlu1 %226 }
 0x19f   :  { %v233_v49 = vsub.f32 %v217_v36, %v227_v48 }
 0x1a1   :  { %v5051_v50 = vpop.eup %5050  ;;  %v239_v51 = vmul.f32 1.442695, %v233_v49 }
 0x1a2   :  { %4821 = vmatmul.msk.f32.gmra.mxu3 %vm170_vm1, %v5051_v50  ;;  %4825 = vmatmul.msk.f32.gmra.mxu1 %vm170_vm1, %v5051_v50 }
 0x1a3   :  { %5052 = vpow2.f32 %v239_v51 }
 0x1a6   :  { %v230_v52 = vpop.xlane.xlu1 %229 }
 0x1a7   :  { %v234_v53 = vsub.f32 %v218_v39, %v230_v52 }
 0x1a9   :  { %v5053_v54 = vpop.eup %5052  ;;  %v241_v55 = vmul.f32 1.442695, %v234_v53  ;;  %v5646_v58 = vpop.permute.xlu0 %387 }
 0x1aa   :  { %4822 = vmatmul.msk.f32.gmra.mxu3 %vm170_vm1, %v5053_v54  ;;  %4826 = vmatmul.msk.f32.gmra.mxu1 %vm170_vm1, %v5053_v54 }
 0x1ab   :  { %5054 = vpow2.f32 %v241_v55 }
 0x1b1   :  { %v5055_v56 = vpop.eup %5054 }
 0x1b2   :  { %4823 = vmatmul.msk.f32.gmra.mxu3 %vm170_vm1, %v5055_v56  ;;  %4827 = vmatmul.msk.f32.gmra.mxu1 %vm170_vm1, %v5055_v56 }
 0x1ba   :  { %4829 = vmatmul.msk.f32.vlgmr.msrb.gmra.mxu3 %vm170_vm1, %v5642_v57 }
 0x1be   :  { %v5650_v59 = vpop.permute.xlu1 %389 }
 0x1c2   :  { %4830 = vmatmul.msk.f32.gmra.mxu3 %vm170_vm1, %v5646_v58 }
 0x1ca   :  { %4831 = vmatmul.msk.f32.gmra.mxu3 %vm170_vm1, %v5650_v59 }
 0x1d2   :  { %4832 = vmatmul.msk.f32.gmra.mxu3 %vm170_vm1, %v5654_v60 }
 0x214   :  { %v301_v62 = vpop.f32.mrf.mxu1 }
 0x215   :  { %vm313_vm2 = vcmp.gt.f32.partialorder %v301_v62, 0.0 }
 0x216   :  { %v317_v63 = vsel %vm313_vm2, %v301_v62, 1.0 }
 0x217   :  { %5056 = vrcp.f32 %v317_v63  ;;  %v332_v9 = vand.u32 2147483648, %v317_v63  ;;  %v330_v12 = vand.u32 2147483647, %v317_v63  ;;  %vm326_vm5 = vweird.f32 %v317_v63 }
 0x219   :  { %v333_v14 = vor.u32 1.1754944e-38, %v332_v9  ;;  %vm331_vm7 = vcmp.eq.f32.partialorder %v330_v12, 8.507059e+37 }
 0x21a   :  { %v272_v2 = vpop.f32.mrf.mxu3 }
 0x21d   :  { %v5057_v0 = vpop.eup %5056 }
 0x21e   :  { %v322_v4 = vmul.f32 %v5057_v0, %v317_v63  ;;  %vm327_vm4 = vweird.f32 %v5057_v0 }
 0x21f   :  { %v304_v6 = vpop.f32.mrf.mxu1  ;;  %vm328_vm6 = vmor %vm326_vm5, %vm327_vm4 }
 0x220   :  { %v323_v8 = vsub.f32 1.0, %v322_v4  ;;  %vm314_vm3 = vcmp.gt.f32.partialorder %v304_v6, 0.0 }
 0x221   :  { %v318_v10 = vsel %vm314_vm3, %v304_v6, 1.0 }
 0x222   :  { %v324_v11 = vmul.f32 %v5057_v0, %v323_v8  ;;  %5058 = vrcp.f32 %v318_v10  ;;  %v347_v32 = vand.u32 2147483648, %v318_v10  ;;  %v345_v34 = vand.u32 2147483647, %v318_v10 }
 0x223   :  { %vm341_vm10 = vweird.f32 %v318_v10 }
 0x224   :  { %v325_v13 = vadd.f32 %v5057_v0, %v324_v11  ;;  %v348_v39 = vor.u32 1.1754944e-38, %v347_v32  ;;  %vm346_vm13 = vcmp.eq.f32.partialorder %v345_v34, 8.507059e+37 }
 0x225   :  { %v275_v15 = vpop.f32.mrf.mxu3 }
 0x226   :  { %v329_v16 = vsel %vm328_vm6, %v5057_v0, %v325_v13 }
 0x227   :  { %v334_v19 = vsel %vm331_vm7, %v333_v14, %v329_v16  ;;  %v307_v21 = vpop.f32.mrf.mxu1 }
 0x228   :  { %v5059_v23 = vpop.eup %5058  ;;  %v335_v25 = vmul.f32 %v334_v19, %v272_v2  ;;  %vm315_vm8 = vcmp.gt.f32.partialorder %v307_v21, 0.0 }
 0x229   :  { %v337_v28 = vmul.f32 %v5059_v23, %v318_v10  ;;  %v319_v29 = vsel %vm315_vm8, %v307_v21, 1.0  ;;  %vm342_vm9 = vweird.f32 %v5059_v23 }
 0x22a   :  { %v381_v30 = vsel %vm313_vm2, %v335_v25, 0.0  ;;  %5060 = vrcp.f32 %v319_v29  ;;  %vm343_vm11 = vmor %vm341_vm10, %vm342_vm9  ;;  %v362_v46 = vand.u32 2147483648, %v319_v29  ;;  %v360_v48 = vand.u32 2147483647, %v319_v29 }
 0x22b   :  { %v338_v31 = vsub.f32 1.0, %v337_v28  ;;  %4845 = vmatmul.msk.f32.vlgmr.msra.gmra.mxu3 %vm170_vm1, %v381_v30  ;;  %vm356_vm15 = vweird.f32 %v319_v29 }
 0x22c   :  { %v363_v53 = vor.u32 1.1754944e-38, %v362_v46  ;;  %vm361_vm4 = vcmp.eq.f32.partialorder %v360_v48, 8.507059e+37 }
 0x22d   :  { %v339_v33 = vmul.f32 %v5059_v23, %v338_v31  ;;  %v278_v35 = vpop.f32.mrf.mxu3 }
 0x22f   :  { %v340_v36 = vadd.f32 %v5059_v23, %v339_v33  ;;  %v310_v37 = vpop.f32.mrf.mxu1 }
 0x230   :  { %v5061_v38 = vpop.eup %5060  ;;  %vm316_vm12 = vcmp.gt.f32.partialorder %v310_v37, 0.0 }
 0x231   :  { %v344_v40 = vsel %vm343_vm11, %v5059_v23, %v340_v36  ;;  %v352_v41 = vmul.f32 %v5061_v38, %v319_v29  ;;  %v320_v42 = vsel %vm316_vm12, %v310_v37, 1.0  ;;  %vm357_vm14 = vweird.f32 %v5061_v38 }
 0x232   :  { %v349_v43 = vsel %vm346_vm13, %v348_v39, %v344_v40  ;;  %5062 = vrcp.f32 %v320_v42  ;;  %vm358_vm2 = vmor %vm356_vm15, %vm357_vm14  ;;  %v377_v63 = vand.u32 2147483648, %v320_v42  ;;  %v375_v2 = vand.u32 2147483647, %v320_v42 }
 0x233   :  { %v350_v44 = vmul.f32 %v349_v43, %v275_v15  ;;  %v353_v45 = vsub.f32 1.0, %v352_v41 }
 0x234   :  { %v378_v10 = vor.u32 1.1754944e-38, %v377_v63  ;;  %vm376_vm7 = vcmp.eq.f32.partialorder %v375_v2, 8.507059e+37 }
 0x235   :  { %v354_v47 = vmul.f32 %v5061_v38, %v353_v45  ;;  %v281_v49 = vpop.f32.mrf.mxu3  ;;  %v382_v50 = vsel %vm314_vm3, %v350_v44, 0.0  ;;  %vm371_vm3 = vweird.f32 %v320_v42 }
 0x236   :  { %4846 = vmatmul.msk.f32.gmra.mxu3 %vm170_vm1, %v382_v50 }
 0x237   :  { %v355_v51 = vadd.f32 %v5061_v38, %v354_v47 }
 0x238   :  { %v5063_v52 = vpop.eup %5062 }
 0x239   :  { %v359_v54 = vsel %vm358_vm2, %v5061_v38, %v355_v51  ;;  %v367_v55 = vmul.f32 %v5063_v52, %v320_v42  ;;  %vm372_vm5 = vweird.f32 %v5063_v52 }
 0x23a   :  { %v364_v56 = vsel %vm361_vm4, %v363_v53, %v359_v54  ;;  %vm373_vm6 = vmor %vm371_vm3, %vm372_vm5  ;;  %v5735_v54 = vld [vmem:[%s6986_s8 + $0x8] sm:$0xff] }
 0x23b   :  { %v365_v61 = vmul.f32 %v364_v56, %v278_v35  ;;  %v368_v62 = vsub.f32 1.0, %v367_v55  ;;  %631 = vmatpush.msrb.mxu1 %v5735_v54 }
 0x23d   :  { %v369_v0 = vmul.f32 %v5063_v52, %v368_v62  ;;  %v422_v4 = vpop.f32.mrf.mxu3  ;;  %v383_v6 = vsel %vm315_vm8, %v365_v61, 0.0  ;;  %819 = vmatpush.msra.mxu1 %v5615_v26 }
 0x23e   :  { %v434_v8 = vmul.f32 0.35355338, %v422_v4  ;;  %4847 = vmatmul.msk.f32.gmra.mxu3 %vm170_vm1, %v383_v6 }
 0x23f   :  { %v370_v9 = vadd.f32 %v5063_v52, %v369_v0 }
 0x240   :  { %v438_v11 = vsel %vm170_vm1, %v434_v8, -inf }
 0x241   :  { %v374_v12 = vsel %vm373_vm6, %v5063_v52, %v370_v9  ;;  %439 = vmax.xlane.f32.xlu2 %v438_v11 }
 0x242   :  { %v379_v13 = vsel %vm376_vm7, %v378_v10, %v374_v12 }
 0x243   :  { %v380_v14 = vmul.f32 %v379_v13, %v281_v49 }
 0x245   :  { %v425_v15 = vpop.f32.mrf.mxu3  ;;  %v384_v16 = vsel %vm316_vm12, %v380_v14, 0.0 }
 0x246   :  { %v435_v19 = vmul.f32 0.35355338, %v425_v15  ;;  %4848 = vmatmul.msk.f32.gmra.mxu3 %vm170_vm1, %v384_v16 }
 0x248   :  { %v441_v21 = vsel %vm170_vm1, %v435_v19, -inf }
 0x249   :  { %442 = vmax.xlane.f32.xlu0 %v441_v21 }
 0x24d   :  { %v428_v23 = vpop.f32.mrf.mxu3 }
 0x24e   :  { %v436_v25 = vmul.f32 0.35355338, %v428_v23 }
 0x250   :  { %v444_v28 = vsel %vm170_vm1, %v436_v25, -inf }
 0x251   :  { %445 = vmax.xlane.f32.xlu1 %v444_v28 }
 0x255   :  { %v431_v29 = vpop.f32.mrf.mxu3 }
 0x256   :  { %v437_v30 = vmul.f32 0.35355338, %v431_v29 }
 0x258   :  { %v447_v31 = vsel %vm170_vm1, %v437_v30, -inf }
 0x259   :  { %694 = vrot.lane.b32.xlu2 %v5581_v17, %s5408_s4 }
 0x25d   :  { %686 = vrot.lane.b32.xlu0 %v5587_v18, %s5408_s4 }
 0x265   :  { %692 = vrot.lane.b32.xlu0 %v5603_v24, %s5408_s4 }
 0x26a   :  { %688 = vrot.lane.b32.xlu1 %v5593_v20, %s5408_s4 }
 0x26d   :  { %950 = vrot.lane.b32.xlu0 %v5587_v18, %s5409_s29 }
 0x272   :  { %952 = vrot.lane.b32.xlu1 %v5593_v20, %s5409_s29 }
 0x275   :  { %956 = vrot.lane.b32.xlu0 %v5603_v24, %s5409_s29 }
 0x282   :  { %448 = vmax.xlane.f32.xlu2 %v447_v31 }
 0x29a   :  { %690 = vrot.lane.b32.xlu2 %v5599_v22, %s5408_s4 }
 0x2a2   :  { %958 = vrot.lane.b32.xlu2 %v5581_v17, %s5409_s29 }
 0x2aa   :  { %954 = vrot.lane.b32.xlu2 %v5599_v22, %s5409_s29 }
 0x2b4   :  { %v440_v32 = vpop.xlane.xlu2 %439 }
 0x2b5   :  { %v450_v33 = vsub.f32 %v434_v8, %v440_v32 }
 0x2b7   :  { %v454_v34 = vmul.f32 1.442695, %v450_v33 }
 0x2b9   :  { %5064 = vpow2.f32 %v454_v34 }
 0x2bc   :  { %v695_v35 = vpop.permute.xlu2 %694  ;;  %v443_v36 = vpop.xlane.xlu0 %442 }
 0x2bd   :  { %v451_v37 = vsub.f32 %v435_v19, %v443_v36  ;;  %4849 = vmatpush.xpose.msk.msra.mxu2 %vm170_vm1, %v695_v35 }
 0x2bf   :  { %v5065_v38 = vpop.eup %5064  ;;  %v456_v39 = vmul.f32 1.442695, %v451_v37 }
 0x2c0   :  { %4833 = vmatmul.msk.f32.vlgmr.msrb.gmra.mxu2 %vm170_vm1, %v5065_v38  ;;  %4837 = vmatmul.msk.f32.vlgmr.msrb.gmra.mxu0 %vm170_vm1, %v5065_v38 }
 0x2c1   :  { %5066 = vpow2.f32 %v456_v39  ;;  %1054 = vmatpush.msrb.mxu0 %v5618_v27 }
 0x2c4   :  { %v446_v17 = vpop.xlane.xlu1 %445 }
 0x2c5   :  { %v452_v40 = vsub.f32 %v436_v25, %v446_v17 }
 0x2c7   :  { %v5067_v41 = vpop.eup %5066  ;;  %v458_v42 = vmul.f32 1.442695, %v452_v40 }
 0x2c8   :  { %4834 = vmatmul.msk.f32.gmra.mxu2 %vm170_vm1, %v5067_v41  ;;  %4838 = vmatmul.msk.f32.gmra.mxu0 %vm170_vm1, %v5067_v41 }
 0x2c9   :  { %5068 = vpow2.f32 %v458_v42 }
 0x2cf   :  { %v5069_v43 = vpop.eup %5068  ;;  %v5710_v49 = vpop.permute.xlu0 %686 }
 0x2d0   :  { %4835 = vmatmul.msk.f32.gmra.mxu2 %vm170_vm1, %v5069_v43  ;;  %4839 = vmatmul.msk.f32.gmra.mxu0 %vm170_vm1, %v5069_v43 }
 0x2d7   :  { %v5720_v51 = vpop.permute.xlu0 %692 }
 0x2dc   :  { %v5714_v50 = vpop.permute.xlu1 %688 }
 0x2df   :  { %v5724_v52 = vpop.permute.xlu0 %950 }
 0x2e4   :  { %v5728_v53 = vpop.permute.xlu1 %952 }
 0x2e7   :  { %v5744_v62 = vpop.permute.xlu0 %956 }
 0x2f5   :  { %v449_v44 = vpop.xlane.xlu2 %448 }
 0x2f6   :  { %v453_v45 = vsub.f32 %v437_v30, %v449_v44 }
 0x2f8   :  { %v460_v46 = vmul.f32 1.442695, %v453_v45 }
 0x2fa   :  { %5070 = vpow2.f32 %v460_v46 }
 0x2fd   :  { %v5705_v47 = vpop.permute.xlu2 %690 }
 0x300   :  { %v5071_v27 = vpop.eup %5070 }
 0x301   :  { %4836 = vmatmul.msk.f32.gmra.mxu2 %vm170_vm1, %v5071_v27  ;;  %4840 = vmatmul.msk.f32.gmra.mxu0 %vm170_vm1, %v5071_v27 }
 0x305   :  { %v959_v48 = vpop.permute.xlu2 %958 }
 0x306   :  { %4866 = vmatpush.xpose.msk.msrb.mxu2 %vm170_vm1, %v959_v48 }
 0x309   :  { %4850 = vmatmul.msk.f32.vlgmr.msra.gmra.mxu2 %vm170_vm1, %v5710_v49 }
 0x30d   :  { %v5739_v55 = vpop.permute.xlu2 %954 }
 0x311   :  { %4851 = vmatmul.msk.f32.gmra.mxu2 %vm170_vm1, %v5714_v50 }
 0x319   :  { %4852 = vmatmul.msk.f32.gmra.mxu2 %vm170_vm1, %v5705_v47 }
 0x321   :  { %4853 = vmatmul.msk.f32.gmra.mxu2 %vm170_vm1, %v5720_v51 }
 0x329   :  { %4867 = vmatmul.msk.f32.vlgmr.msrb.gmra.mxu2 %vm170_vm1, %v5724_v52 }
 0x331   :  { %4868 = vmatmul.msk.f32.gmra.mxu2 %vm170_vm1, %v5728_v53 }
 0x339   :  { %4869 = vmatmul.msk.f32.gmra.mxu2 %vm170_vm1, %v5739_v55 }
 0x33d   :  { %v520_v56 = vpop.f32.mrf.mxu0 }
 0x33e   :  { %vm532_vm8 = vcmp.gt.f32.partialorder %v520_v56, 0.0 }
 0x33f   :  { %v536_v61 = vsel %vm532_vm8, %v520_v56, 1.0 }
 0x340   :  { %5072 = vrcp.f32 %v536_v61  ;;  %v551_v8 = vand.u32 2147483648, %v536_v61  ;;  %v549_v10 = vand.u32 2147483647, %v536_v61  ;;  %vm545_vm11 = vweird.f32 %v536_v61 }
 0x341   :  { %4870 = vmatmul.msk.f32.gmra.mxu2 %vm170_vm1, %v5744_v62 }
 0x342   :  { %v552_v15 = vor.u32 1.1754944e-38, %v551_v8  ;;  %vm550_vm14 = vcmp.eq.f32.partialorder %v549_v10, 8.507059e+37 }
 0x343   :  { %v491_v11 = vpop.f32.mrf.mxu2 }
 0x345   :  { %v523_v63 = vpop.f32.mrf.mxu0 }
 0x346   :  { %v5073_v0 = vpop.eup %5072  ;;  %vm533_vm9 = vcmp.gt.f32.partialorder %v523_v63, 0.0 }
 0x347   :  { %v541_v2 = vmul.f32 %v5073_v0, %v536_v61  ;;  %v537_v4 = vsel %vm533_vm9, %v523_v63, 1.0  ;;  %vm546_vm10 = vweird.f32 %v5073_v0 }
 0x348   :  { %5074 = vrcp.f32 %v537_v4  ;;  %vm547_vm12 = vmor %vm545_vm11, %vm546_vm10  ;;  %v566_v29 = vand.u32 2147483648, %v537_v4  ;;  %v564_v32 = vand.u32 2147483647, %v537_v4  ;;  %vm560_vm2 = vweird.f32 %v537_v4 }
 0x349   :  { %v542_v6 = vsub.f32 1.0, %v541_v2 }
 0x34a   :  { %v567_v36 = vor.u32 1.1754944e-38, %v566_v29  ;;  %vm565_vm5 = vcmp.eq.f32.partialorder %v564_v32, 8.507059e+37 }
 0x34b   :  { %v543_v9 = vmul.f32 %v5073_v0, %v542_v6  ;;  %v494_v35 = vpop.f32.mrf.mxu2 }
 0x34d   :  { %v544_v12 = vadd.f32 %v5073_v0, %v543_v9  ;;  %v526_v13 = vpop.f32.mrf.mxu0 }
 0x34e   :  { %v5075_v14 = vpop.eup %5074  ;;  %vm534_vm13 = vcmp.gt.f32.partialorder %v526_v13, 0.0 }
 0x34f   :  { %v548_v16 = vsel %vm547_vm12, %v5073_v0, %v544_v12  ;;  %v556_v19 = vmul.f32 %v5075_v14, %v537_v4  ;;  %v538_v21 = vsel %vm534_vm13, %v526_v13, 1.0  ;;  %vm561_vm15 = vweird.f32 %v5075_v14 }
 0x350   :  { %v553_v23 = vsel %vm550_vm14, %v552_v15, %v548_v16  ;;  %5076 = vrcp.f32 %v538_v21  ;;  %vm562_vm4 = vmor %vm560_vm2, %vm561_vm15  ;;  %v581_v41 = vand.u32 2147483648, %v538_v21  ;;  %v579_v43 = vand.u32 2147483647, %v538_v21 }
 0x351   :  { %v554_v25 = vmul.f32 %v553_v23, %v491_v11  ;;  %v557_v28 = vsub.f32 1.0, %v556_v19  ;;  %vm575_vm6 = vweird.f32 %v538_v21 }
 0x353   :  { %v600_v30 = vsel %vm532_vm8, %v554_v25, 0.0  ;;  %v558_v31 = vmul.f32 %v5075_v14, %v557_v28  ;;  %vm580_vm8 = vcmp.eq.f32.partialorder %v579_v43, 8.507059e+37  ;;  %v497_v27 = vpop.f32.mrf.mxu2 }
 0x354   :  { %4841 = vmatmul.msk.f32.vlgmr.msrb.gmra.mxu1 %vm170_vm1, %v600_v30 }
 0x355   :  { %v559_v33 = vadd.f32 %v5075_v14, %v558_v31  ;;  %1083 = vmatpush.msrb.mxu1 %v5615_v26  ;;  %v582_v26 = vor.u32 1.1754944e-38, %v581_v41 }
 0x356   :  { %v5077_v34 = vpop.eup %5076 }
 0x357   :  { %v563_v37 = vsel %vm562_vm4, %v5075_v14, %v559_v33  ;;  %v571_v38 = vmul.f32 %v5077_v34, %v538_v21  ;;  %vm576_vm3 = vweird.f32 %v5077_v34 }
 0x358   :  { %v568_v39 = vsel %vm565_vm5, %v567_v36, %v563_v37  ;;  %vm577_vm7 = vmor %vm575_vm6, %vm576_vm3 }
 0x359   :  { %v569_v17 = vmul.f32 %v568_v39, %v494_v35  ;;  %v572_v40 = vsub.f32 1.0, %v571_v38 }
 0x35b   :  { %v573_v42 = vmul.f32 %v5077_v34, %v572_v40  ;;  %v601_v44 = vsel %vm533_vm9, %v569_v17, 0.0 }
 0x35c   :  { %4842 = vmatmul.msk.f32.gmra.mxu1 %vm170_vm1, %v601_v44 }
 0x35d   :  { %v574_v45 = vadd.f32 %v5077_v34, %v573_v42 }
 0x35f   :  { %v578_v46 = vsel %vm577_vm7, %v5077_v34, %v574_v45 }
 0x360   :  { %v583_v48 = vsel %vm580_vm8, %v582_v26, %v578_v46 }
 0x361   :  { %v584_v56 = vmul.f32 %v583_v48, %v497_v27 }
 0x363   :  { %v602_v61 = vsel %vm534_vm13, %v584_v56, 0.0 }
 0x364   :  { %4843 = vmatmul.msk.f32.gmra.mxu1 %vm170_vm1, %v602_v61 }
 0x37e   :  { %v529_v0 = vpop.f32.mrf.mxu0 }
 0x37f   :  { %vm535_vm10 = vcmp.gt.f32.partialorder %v529_v0, 0.0 }
 0x380   :  { %v539_v63 = vsel %vm535_vm10, %v529_v0, 1.0 }
 0x381   :  { %5078 = vrcp.f32 %v539_v63  ;;  %v596_v9 = vand.u32 2147483648, %v539_v63  ;;  %v594_v11 = vand.u32 2147483647, %v539_v63  ;;  %vm590_vm11 = vweird.f32 %v539_v63 }
 0x383   :  { %v597_v13 = vor.u32 1.1754944e-38, %v596_v9  ;;  %vm595_vm13 = vcmp.eq.f32.partialorder %v594_v11, 8.507059e+37 }
 0x384   :  { %v500_v2 = vpop.f32.mrf.mxu2 }
 0x387   :  { %v5079_v4 = vpop.eup %5078 }
 0x388   :  { %v586_v6 = vmul.f32 %v5079_v4, %v539_v63  ;;  %vm591_vm9 = vweird.f32 %v5079_v4 }
 0x389   :  { %vm592_vm12 = vmor %vm590_vm11, %vm591_vm9 }
 0x38a   :  { %v587_v8 = vsub.f32 1.0, %v586_v6 }
 0x38c   :  { %v588_v10 = vmul.f32 %v5079_v4, %v587_v8  ;;  %v723_v12 = vpop.f32.mrf.mxu2 }
 0x38d   :  { %v735_v14 = vmul.f32 0.35355338, %v723_v12 }
 0x38e   :  { %v589_v15 = vadd.f32 %v5079_v4, %v588_v10 }
 0x38f   :  { %v739_v16 = vsel %vm170_vm1, %v735_v14, -inf }
 0x390   :  { %v593_v19 = vsel %vm592_vm12, %v5079_v4, %v589_v15  ;;  %740 = vmax.xlane.f32.xlu1 %v739_v16 }
 0x391   :  { %v598_v21 = vsel %vm595_vm13, %v597_v13, %v593_v19 }
 0x392   :  { %v599_v23 = vmul.f32 %v598_v21, %v500_v2 }
 0x394   :  { %v726_v25 = vpop.f32.mrf.mxu2  ;;  %v603_v28 = vsel %vm535_vm10, %v599_v23, 0.0 }
 0x395   :  { %v736_v29 = vmul.f32 0.35355338, %v726_v25  ;;  %4844 = vmatmul.msk.f32.gmra.mxu1 %vm170_vm1, %v603_v28 }
 0x397   :  { %v742_v30 = vsel %vm170_vm1, %v736_v29, -inf }
 0x398   :  { %743 = vmax.xlane.f32.xlu2 %v742_v30 }
 0x39c   :  { %v729_v31 = vpop.f32.mrf.mxu2 }
 0x39d   :  { %v737_v32 = vmul.f32 0.35355338, %v729_v31 }
 0x39f   :  { %v745_v33 = vsel %vm170_vm1, %v737_v32, -inf }
 0x3a0   :  { %746 = vmax.xlane.f32.xlu0 %v745_v33 }
 0x3a4   :  { %v732_v34 = vpop.f32.mrf.mxu2 }
 0x3a5   :  { %v738_v35 = vmul.f32 0.35355338, %v732_v34  ;;  %v4887_v34 = vld [vmem:[%s7011_s27 + $0x8] sm:$0xff] }
 0x3a7   :  { %v748_v36 = vsel %vm170_vm1, %v738_v35, -inf }
 0x3a8   :  { %749 = vmax.xlane.f32.xlu1 %v748_v36 }
 0x3ac   :  { %v987_v37 = vpop.f32.mrf.mxu2 }
 0x3ad   :  { %v999_v38 = vmul.f32 0.35355338, %v987_v37 }
 0x3af   :  { %v1003_v39 = vsel %vm170_vm1, %v999_v38, -inf }
 0x3b0   :  { %1004 = vmax.xlane.f32.xlu2 %v1003_v39 }
 0x3b4   :  { %v990_v17 = vpop.f32.mrf.mxu2 }
 0x3b5   :  { %v1000_v40 = vmul.f32 0.35355338, %v990_v17 }
 0x3b7   :  { %v1006_v41 = vsel %vm170_vm1, %v1000_v40, -inf }
 0x3b8   :  { %1007 = vmax.xlane.f32.xlu0 %v1006_v41 }
 0x3bc   :  { %v993_v42 = vpop.f32.mrf.mxu2 }
 0x3bd   :  { %v1001_v43 = vmul.f32 0.35355338, %v993_v42 }
 0x3bf   :  { %v1009_v44 = vsel %vm170_vm1, %v1001_v43, -inf }
 0x3c0   :  { %1010 = vmax.xlane.f32.xlu1 %v1009_v44 }
 0x3c4   :  { %v996_v45 = vpop.f32.mrf.mxu2 }
 0x3c5   :  { %v1002_v26 = vmul.f32 0.35355338, %v996_v45 }
 0x3c7   :  { %v1012_v46 = vsel %vm170_vm1, %v1002_v26, -inf }
 0x3c8   :  { %1013 = vmax.xlane.f32.xlu2 %v1012_v46 }
 0x403   :  { %v741_v27 = vpop.xlane.xlu1 %740 }
 0x404   :  { %v751_v48 = vsub.f32 %v735_v14, %v741_v27 }
 0x406   :  { %v755_v56 = vmul.f32 1.442695, %v751_v48 }
 0x408   :  { %5080 = vpow2.f32 %v755_v56 }
 0x40b   :  { %v744_v61 = vpop.xlane.xlu2 %743 }
 0x40c   :  { %v752_v0 = vsub.f32 %v736_v29, %v744_v61 }
 0x40e   :  { %v5081_v63 = vpop.eup %5080  ;;  %v757_v2 = vmul.f32 1.442695, %v752_v0 }
 0x40f   :  { %4854 = vmatmul.msk.f32.vlgmr.msra.gmra.mxu0 %vm170_vm1, %v5081_v63  ;;  %4858 = vmatmul.msk.f32.vlgmr.msra.gmra.mxu1 %vm170_vm1, %v5081_v63 }
 0x410   :  { %5082 = vpow2.f32 %v757_v2  ;;  %1286 = vmatpush.msra.mxu0 %v5525_v1 }
 0x412   :  { %1287 = vmatpush.msra.mxu0 %v5534_v3 }
 0x413   :  { %v747_v4 = vpop.xlane.xlu0 %746 }
 0x414   :  { %v753_v6 = vsub.f32 %v737_v32, %v747_v4  ;;  %1288 = vmatpush.msra.mxu0 %v5542_v5 }
 0x416   :  { %v5083_v8 = vpop.eup %5082  ;;  %v759_v9 = vmul.f32 1.442695, %v753_v6  ;;  %1289 = vmatpush.msra.mxu0 %v5551_v7 }
 0x417   :  { %4855 = vmatmul.msk.f32.gmra.mxu0 %vm170_vm1, %v5083_v8  ;;  %4859 = vmatmul.msk.f32.gmra.mxu1 %vm170_vm1, %v5083_v8 }
 0x418   :  { %5084 = vpow2.f32 %v759_v9 }
 0x41b   :  { %v750_v10 = vpop.xlane.xlu1 %749 }
 0x41c   :  { %v754_v11 = vsub.f32 %v738_v35, %v750_v10  ;;  %v5792_v35 = vpop.f32.mrf.mxu1 }
 0x41e   :  { %v5085_v12 = vpop.eup %5084  ;;  %v761_v14 = vmul.f32 1.442695, %v754_v11 }
 0x41f   :  { %4856 = vmatmul.msk.f32.gmra.mxu0 %vm170_vm1, %v5085_v12  ;;  %4860 = vmatmul.msk.f32.gmra.mxu1 %vm170_vm1, %v5085_v12 }
 0x420   :  { %5086 = vpow2.f32 %v761_v14 }
 0x423   :  { %v1005_v1 = vpop.xlane.xlu2 %1004 }
 0x424   :  { %v1015_v3 = vsub.f32 %v999_v38, %v1005_v1  ;;  %v5794_v36 = vpop.f32.mrf.mxu1  ;;  %v5801_v38 = vld [vmem:[%s6986_s8 + $0x10] sm:$0xff] }
 0x425   :  { %932 = vmatpush.msrb.mxu3 %v5801_v38 }
 0x426   :  { %v5087_v5 = vpop.eup %5086  ;;  %v1019_v15 = vmul.f32 1.442695, %v1015_v3 }
 0x427   :  { %4857 = vmatmul.msk.f32.gmra.mxu0 %vm170_vm1, %v5087_v5  ;;  %4861 = vmatmul.msk.f32.gmra.mxu1 %vm170_vm1, %v5087_v5 }
 0x428   :  { %5088 = vpow2.f32 %v1019_v15  ;;  %v5818_v15 = vld [vmem:[%s6986_s8 + $0x18] sm:$0xff] }
 0x429   :  { %1196 = vmatpush.msra.mxu3 %v5818_v15 }
 0x42b   :  { %v1008_v7 = vpop.xlane.xlu0 %1007 }
 0x42c   :  { %v1016_v13 = vsub.f32 %v1000_v40, %v1008_v7  ;;  %v5796_v37 = vpop.f32.mrf.mxu1 }
 0x42e   :  { %v5089_v16 = vpop.eup %5088  ;;  %v1021_v19 = vmul.f32 1.442695, %v1016_v13 }
 0x42f   :  { %4871 = vmatmul.msk.f32.vlgmr.msrb.gmra.mxu0 %vm170_vm1, %v5089_v16  ;;  %4875 = vmatmul.msk.f32.vlgmr.msrb.gmra.mxu1 %vm170_vm1, %v5089_v16 }
 0x430   :  { %5090 = vpow2.f32 %v1021_v19 }
 0x433   :  { %v1011_v21 = vpop.xlane.xlu1 %1010 }
 0x434   :  { %v1017_v23 = vsub.f32 %v1001_v43, %v1011_v21  ;;  %v5804_v39 = vpop.f32.mrf.mxu1 }
 0x436   :  { %v5091_v25 = vpop.eup %5090  ;;  %v1023_v28 = vmul.f32 1.442695, %v1017_v23 }
 0x437   :  { %4872 = vmatmul.msk.f32.gmra.mxu0 %vm170_vm1, %v5091_v25  ;;  %4876 = vmatmul.msk.f32.gmra.mxu1 %vm170_vm1, %v5091_v25 }
 0x438   :  { %5092 = vpow2.f32 %v1023_v28 }
 0x43b   :  { %v1014_v29 = vpop.xlane.xlu2 %1013 }
 0x43c   :  { %v1018_v30 = vsub.f32 %v1002_v26, %v1014_v29 }
 0x43e   :  { %v5093_v31 = vpop.eup %5092  ;;  %v1025_v32 = vmul.f32 1.442695, %v1018_v30 }
 0x43f   :  { %4873 = vmatmul.msk.f32.gmra.mxu0 %vm170_vm1, %v5093_v31  ;;  %4877 = vmatmul.msk.f32.gmra.mxu1 %vm170_vm1, %v5093_v31 }
 0x440   :  { %5094 = vpow2.f32 %v1025_v32 }
 0x446   :  { %v5095_v33 = vpop.eup %5094 }
 0x447   :  { %4874 = vmatmul.msk.f32.gmra.mxu0 %vm170_vm1, %v5095_v33  ;;  %4878 = vmatmul.msk.f32.gmra.mxu1 %vm170_vm1, %v5095_v33 }
 0x44f   :  { %4890 = vmatmul.msk.f32.vlgmr.msra.gmra.mxu0 %vm98_vm0, %v4887_v34 }
 0x48c   :  { %v792_v17 = vpop.f32.mrf.mxu0  ;;  %v821_v40 = vpop.f32.mrf.mxu1 }
 0x48d   :  { %vm833_vm14 = vcmp.gt.f32.partialorder %v821_v40, 0.0 }
 0x48e   :  { %v837_v41 = vsel %vm833_vm14, %v821_v40, 1.0 }
 0x48f   :  { %5096 = vrcp.f32 %v837_v41  ;;  %v852_v27 = vand.u32 2147483648, %v837_v41  ;;  %v850_v56 = vand.u32 2147483647, %v837_v41  ;;  %vm846_vm4 = vweird.f32 %v837_v41 }
 0x491   :  { %v853_v4 = vor.u32 1.1754944e-38, %v852_v27  ;;  %vm851_vm6 = vcmp.eq.f32.partialorder %v850_v56, 8.507059e+37 }
 0x494   :  { %v795_v42 = vpop.f32.mrf.mxu0  ;;  %v824_v43 = vpop.f32.mrf.mxu1 }
 0x495   :  { %v5097_v44 = vpop.eup %5096  ;;  %vm834_vm15 = vcmp.gt.f32.partialorder %v824_v43, 0.0 }
 0x496   :  { %v842_v45 = vmul.f32 %v5097_v44, %v837_v41  ;;  %v838_v26 = vsel %vm834_vm15, %v824_v43, 1.0  ;;  %vm847_vm2 = vweird.f32 %v5097_v44 }
 0x497   :  { %5098 = vrcp.f32 %v838_v26  ;;  %vm848_vm5 = vmor %vm846_vm4, %vm847_vm2  ;;  %v867_v14 = vand.u32 2147483648, %v838_v26  ;;  %v865_v5 = vand.u32 2147483647, %v838_v26  ;;  %vm861_vm8 = vweird.f32 %v838_v26 }
 0x498   :  { %v843_v46 = vsub.f32 1.0, %v842_v45 }
 0x499   :  { %v868_v21 = vor.u32 1.1754944e-38, %v867_v14  ;;  %vm866_vm11 = vcmp.eq.f32.partialorder %v865_v5, 8.507059e+37 }
 0x49a   :  { %v844_v48 = vmul.f32 %v5097_v44, %v843_v46 }
 0x49c   :  { %v845_v61 = vadd.f32 %v5097_v44, %v844_v48  ;;  %v798_v0 = vpop.f32.mrf.mxu0  ;;  %v5808_v63 = vpop.f32.mrf.mxu1 }
 0x49d   :  { %v5099_v2 = vpop.eup %5098  ;;  %vm835_vm3 = vcmp.gt.f32.partialorder %v5808_v63, 0.0 }
 0x49e   :  { %v849_v6 = vsel %vm848_vm5, %v5097_v44, %v845_v61  ;;  %v857_v8 = vmul.f32 %v5099_v2, %v838_v26  ;;  %v839_v9 = vsel %vm835_vm3, %v5808_v63, 1.0  ;;  %vm862_vm7 = vweird.f32 %v5099_v2 }
 0x49f   :  { %v854_v10 = vsel %vm851_vm6, %v853_v4, %v849_v6  ;;  %5100 = vrcp.f32 %v839_v9  ;;  %vm863_vm10 = vmor %vm861_vm8, %vm862_vm7  ;;  %v882_v34 = vand.u32 2147483648, %v839_v9  ;;  %vm876_vm13 = vweird.f32 %v839_v9 }
 0x4a0   :  { %v855_v11 = vmul.f32 %v854_v10, %v792_v17  ;;  %v858_v12 = vsub.f32 1.0, %v857_v8  ;;  %v880_v17 = vand.u32 2147483647, %v839_v9 }
 0x4a2   :  { %v901_v1 = vsel %vm833_vm14, %v855_v11, 0.0  ;;  %v859_v3 = vmul.f32 %v5099_v2, %v858_v12 }
 0x4a3   :  { %4862 = vmatmul.msk.f32.vlgmr.msrb.gmra.mxu3 %vm170_vm1, %v901_v1 }
 0x4a4   :  { %v801_v7 = vpop.f32.mrf.mxu0  ;;  %v5821_v13 = vpop.f32.mrf.mxu1  ;;  %v860_v16 = vadd.f32 %v5099_v2, %v859_v3 }
 0x4a5   :  { %v5101_v19 = vpop.eup %5100  ;;  %vm836_vm9 = vcmp.gt.f32.partialorder %v5821_v13, 0.0 }
 0x4a6   :  { %v864_v23 = vsel %vm863_vm10, %v5099_v2, %v860_v16  ;;  %v872_v25 = vmul.f32 %v5101_v19, %v839_v9  ;;  %v840_v28 = vsel %vm836_vm9, %v5821_v13, 1.0  ;;  %vm877_vm12 = vweird.f32 %v5101_v19 }
 0x4a7   :  { %v869_v29 = vsel %vm866_vm11, %v868_v21, %v864_v23  ;;  %5102 = vrcp.f32 %v840_v28  ;;  %vm878_vm2 = vmor %vm876_vm13, %vm877_vm12  ;;  %v897_v61 = vand.u32 2147483648, %v840_v28  ;;  %v895_v4 = vand.u32 2147483647, %v840_v28 }
 0x4a8   :  { %v870_v30 = vmul.f32 %v869_v29, %v795_v42  ;;  %v873_v31 = vsub.f32 1.0, %v872_v25  ;;  %v883_v42 = vor.u32 1.1754944e-38, %v882_v34  ;;  %vm891_vm5 = vweird.f32 %v840_v28 }
 0x4a9   :  { %v898_v12 = vor.u32 1.1754944e-38, %v897_v61  ;;  %vm896_vm8 = vcmp.eq.f32.partialorder %v895_v4, 8.507059e+37 }
 0x4aa   :  { %v902_v32 = vsel %vm834_vm15, %v870_v30, 0.0  ;;  %v874_v33 = vmul.f32 %v5101_v19, %v873_v31  ;;  %vm881_vm15 = vcmp.eq.f32.partialorder %v880_v17, 8.507059e+37 }
 0x4ab   :  { %4863 = vmatmul.msk.f32.gmra.mxu3 %vm170_vm1, %v902_v32 }
 0x4ac   :  { %v1056_v40 = vpop.f32.mrf.mxu0  ;;  %v1085_v41 = vpop.f32.mrf.mxu1  ;;  %v875_v44 = vadd.f32 %v5101_v19, %v874_v33 }
 0x4ad   :  { %v5103_v45 = vpop.eup %5102  ;;  %vm1097_vm14 = vcmp.gt.f32.partialorder %v1085_v41, 0.0 }
 0x4ae   :  { %v1101_v26 = vsel %vm1097_vm14, %v1085_v41, 1.0  ;;  %v879_v46 = vsel %vm878_vm2, %v5101_v19, %v875_v44  ;;  %v887_v27 = vmul.f32 %v5103_v45, %v840_v28  ;;  %vm892_vm4 = vweird.f32 %v5103_v45 }
 0x4af   :  { %5104 = vrcp.f32 %v1101_v26  ;;  %v884_v43 = vsel %vm881_vm15, %v883_v42, %v879_v46  ;;  %vm893_vm6 = vmor %vm891_vm5, %vm892_vm4  ;;  %v1116_v16 = vand.u32 2147483648, %v1101_v26  ;;  %v1114_v21 = vand.u32 2147483647, %v1101_v26 }
 0x4b0   :  { %v888_v48 = vsub.f32 1.0, %v887_v27  ;;  %v885_v56 = vmul.f32 %v884_v43, %v798_v0  ;;  %vm1110_vm10 = vweird.f32 %v1101_v26 }
 0x4b1   :  { %v1117_v31 = vor.u32 1.1754944e-38, %v1116_v16  ;;  %vm1115_vm13 = vcmp.eq.f32.partialorder %v1114_v21, 8.507059e+37 }
 0x4b2   :  { %v889_v2 = vmul.f32 %v5103_v45, %v888_v48  ;;  %v903_v6 = vsel %vm835_vm3, %v885_v56, 0.0 }
 0x4b3   :  { %4864 = vmatmul.msk.f32.gmra.mxu3 %vm170_vm1, %v903_v6 }
 0x4b4   :  { %v1059_v8 = vpop.f32.mrf.mxu0  ;;  %v1088_v9 = vpop.f32.mrf.mxu1  ;;  %v890_v10 = vadd.f32 %v5103_v45, %v889_v2 }
 0x4b5   :  { %v5105_v11 = vpop.eup %5104  ;;  %vm1098_vm7 = vcmp.gt.f32.partialorder %v1088_v9, 0.0 }
 0x4b6   :  { %v1106_v14 = vmul.f32 %v5105_v11, %v1101_v26  ;;  %v894_v1 = vsel %vm893_vm6, %v5103_v45, %v890_v10  ;;  %v1102_v0 = vsel %vm1098_vm7, %v1088_v9, 1.0  ;;  %vm1111_vm3 = vweird.f32 %v5105_v11 }
 0x4b7   :  { %v899_v3 = vsel %vm896_vm8, %v898_v12, %v894_v1  ;;  %5106 = vrcp.f32 %v1102_v0  ;;  %vm1112_vm11 = vmor %vm1110_vm10, %vm1111_vm3  ;;  %v1131_v44 = vand.u32 2147483648, %v1102_v0  ;;  %v1129_v46 = vand.u32 2147483647, %v1102_v0 }
 0x4b8   :  { %v1107_v5 = vsub.f32 1.0, %v1106_v14  ;;  %v900_v63 = vmul.f32 %v899_v3, %v801_v7  ;;  %vm1125_vm2 = vweird.f32 %v1102_v0 }
 0x4b9   :  { %v1132_v56 = vor.u32 1.1754944e-38, %v1131_v44  ;;  %vm1130_vm5 = vcmp.eq.f32.partialorder %v1129_v46, 8.507059e+37  ;;  %v5886_v46 = vld [vmem:[%s6988_s10] sm:$0xff] }
 0x4ba   :  { %v1108_v19 = vmul.f32 %v5105_v11, %v1107_v5  ;;  %v904_v23 = vsel %vm836_vm9, %v900_v63, 0.0  ;;  %v5368_v5 = vld [vmem:[%s6985_s7] ss:$0 sm:$0xff] }
 0x4bb   :  { %4865 = vmatmul.msk.f32.gmra.mxu3 %vm170_vm1, %v904_v23 }
 0x4bc   :  { %v1109_v25 = vadd.f32 %v5105_v11, %v1108_v19  ;;  %v1062_v28 = vpop.f32.mrf.mxu0  ;;  %v1091_v29 = vpop.f32.mrf.mxu1 }
 0x4bd   :  { %v5107_v30 = vpop.eup %5106  ;;  %vm1099_vm12 = vcmp.gt.f32.partialorder %v1091_v29, 0.0 }
 0x4be   :  { %v1113_v32 = vsel %vm1112_vm11, %v5105_v11, %v1109_v25  ;;  %v1121_v7 = vmul.f32 %v5107_v30, %v1102_v0  ;;  %v1103_v33 = vsel %vm1099_vm12, %v1091_v29, 1.0  ;;  %vm1126_vm9 = vweird.f32 %v5107_v30  ;;  %v674_v29 = vpop.f32.mrf.mxu3 }
 0x4bf   :  { %v1118_v34 = vsel %vm1115_vm13, %v1117_v31, %v1113_v32  ;;  %5108 = vrcp.f32 %v1103_v33  ;;  %vm1127_vm15 = vmor %vm1125_vm2, %vm1126_vm9  ;;  %v1146_v10 = vand.u32 2147483648, %v1103_v33  ;;  %v1144_v14 = vand.u32 2147483647, %v1103_v33 }
 0x4c0   :  { %v1119_v17 = vmul.f32 %v1118_v34, %v1056_v40  ;;  %v1122_v13 = vsub.f32 1.0, %v1121_v7  ;;  %vm1140_vm6 = vweird.f32 %v1103_v33 }
 0x4c1   :  { %vm1145_vm3 = vcmp.eq.f32.partialorder %v1144_v14, 8.507059e+37 }
 0x4c2   :  { %v1165_v45 = vsel %vm1097_vm14, %v1119_v17, 0.0  ;;  %v1123_v26 = vmul.f32 %v5107_v30, %v1122_v13 }
 0x4c3   :  { %4879 = vmatmul.msk.f32.vlgmr.msra.gmra.mxu3 %vm170_vm1, %v1165_v45  ;;  %v5868_v45 = vld [vmem:[%s6988_s10 + $0x18] sm:$0xff] }
 0x4c4   :  { %v1065_v42 = vpop.f32.mrf.mxu0  ;;  %v1094_v27 = vpop.f32.mrf.mxu1  ;;  %v1124_v43 = vadd.f32 %v5107_v30, %v1123_v26  ;;  %1248 = vmatpush.msra.mxu2 %v5868_v45  ;;  %v5874_v26 = vld [vmem:[%s6988_s10 + $0x10] sm:$0xff] }
 0x4c5   :  { %v5109_v48 = vpop.eup %5108  ;;  %vm1100_vm4 = vcmp.gt.f32.partialorder %v1094_v27, 0.0 }
 0x4c6   :  { %v1128_v61 = vsel %vm1127_vm15, %v5107_v30, %v1124_v43  ;;  %v1136_v40 = vmul.f32 %v5109_v48, %v1103_v33  ;;  %v1104_v2 = vsel %vm1100_vm4, %v1094_v27, 1.0  ;;  %vm1141_vm14 = vweird.f32 %v5109_v48  ;;  %v677_v13 = vpop.f32.mrf.mxu3  ;;  %1249 = vmatpush.msra.mxu2 %v5874_v26 }
 0x4c7   :  { %v1133_v41 = vsel %vm1130_vm5, %v1132_v56, %v1128_v61  ;;  %5110 = vrcp.f32 %v1104_v2  ;;  %vm1142_vm8 = vmor %vm1140_vm6, %vm1141_vm14  ;;  %v1161_v25 = vand.u32 2147483648, %v1104_v2  ;;  %v1159_v32 = vand.u32 2147483647, %v1104_v2 }
 0x4c8   :  { %v1134_v4 = vmul.f32 %v1133_v41, %v1059_v8  ;;  %v1137_v6 = vsub.f32 1.0, %v1136_v40  ;;  %v1147_v8 = vor.u32 1.1754944e-38, %v1146_v10  ;;  %vm1155_vm10 = vweird.f32 %v1104_v2  ;;  %v5044_v40 = vld [vmem:[%s6987_s9] ss:$0 sm:$0xff] }
 0x4c9   :  { %v1162_v33 = vor.u32 1.1754944e-38, %v1161_v25  ;;  %vm1160_vm13 = vcmp.eq.f32.partialorder %v1159_v32, 8.507059e+37  ;;  %v675_v56 = vadd.f32 %v674_v29, %v5792_v35  ;;  %v5369_v10 = vld [vmem:[%s6986_s8] sm:$0xff] }
 0x4ca   :  { %v1166_v11 = vsel %vm1098_vm7, %v1134_v4, 0.0  ;;  %v1138_v12 = vmul.f32 %v5109_v48, %v1137_v6  ;;  %v678_v6 = vadd.f32 %v677_v13, %v5794_v36 }
 0x4cb   :  { %4880 = vmatmul.msk.f32.gmra.mxu3 %vm170_vm1, %v1166_v11 }
 0x4cc   :  { %v1291_v1 = vpop.f32.mrf.mxu0  ;;  %v1139_v0 = vadd.f32 %v5109_v48, %v1138_v12 }
 0x4cd   :  { %v5111_v3 = vpop.eup %5110  ;;  %v5847_v63 = vadd.f32 %v5368_v5, %v1291_v1 }
 0x4ce   :  { %v1143_v16 = vsel %vm1142_vm8, %v5109_v48, %v1139_v0  ;;  %v1151_v9 = vmul.f32 %v5111_v3, %v1104_v2  ;;  %vm1156_vm7 = vweird.f32 %v5111_v3  ;;  %v680_v44 = vpop.f32.mrf.mxu3 }
 0x4cf   :  { %4891 = vmatpush.xpose.msk.msrb.mxu0 %vm170_vm1, %v5847_v63  ;;  %v1148_v19 = vsel %vm1145_vm3, %v1147_v8, %v1143_v16  ;;  %1497 = vrot.lane.b32.xlu0 %v5847_v63, %s5407_s24  ;;  %vm1157_vm11 = vmor %vm1155_vm10, %vm1156_vm7  ;;  %v681_v5 = vadd.f32 %v680_v44, %v5796_v37 }
 0x4d0   :  { %v1149_v21 = vmul.f32 %v1148_v19, %v1062_v28  ;;  %v1152_v23 = vsub.f32 1.0, %v1151_v9 }
 0x4d2   :  { %4892 = vmatmul.msk.f32.vlgmr.msrb.gmra.mxu0 %vm170_vm1, %v5587_v18  ;;  %v1167_v30 = vsel %vm1099_vm12, %v1149_v21, 0.0  ;;  %v1153_v31 = vmul.f32 %v5111_v3, %v1152_v23 }
 0x4d3   :  { %4881 = vmatmul.msk.f32.gmra.mxu3 %vm170_vm1, %v1167_v30 }
 0x4d4   :  { %v1154_v7 = vadd.f32 %v5111_v3, %v1153_v31 }
 0x4d6   :  { %v1158_v34 = vsel %vm1157_vm11, %v5111_v3, %v1154_v7 }
 0x4d7   :  { %v1163_v17 = vsel %vm1160_vm13, %v1162_v33, %v1158_v34 }
 0x4d8   :  { %v1164_v28 = vmul.f32 %v1163_v17, %v1065_v42  ;;  %v5922_v17 = vld [vmem:[%s7013_s6 + $0x8] sm:$0xff]  ;;  %s4801_s6 = sshll.u32 %s6998_s20, 4  ;;  %s4802_s6 = int_to_ptr.hbm [resolvable:$true] %s4801_s6 }
 0x4d9   :  { %1411 = vmatpush.msrb.mxu3 %v5922_v17 }
 0x4da   :  { %4893 = vmatmul.msk.f32.gmra.mxu0 %vm170_vm1, %v5593_v20  ;;  %v1168_v18 = vsel %vm1100_vm4, %v1164_v28, 0.0  ;;  %v683_v20 = vpop.f32.mrf.mxu3 }
 0x4db   :  { %4882 = vmatmul.msk.f32.gmra.mxu3 %vm170_vm1, %v1168_v18  ;;  %v684_v25 = vadd.f32 %v683_v20, %v5804_v39  ;;  %v4888_v39 = vld [vmem:[%s7012_s25 + $0x8] sm:$0xff] }
 0x4dc   :  { %1727 = vmatpush.msra.mxu3 %v5735_v54 }
 0x4e2   :  { %4894 = vmatmul.msk.f32.gmra.mxu0 %vm170_vm1, %v5599_v22 }
 0x4ea   :  { %4895 = vmatmul.msk.f32.gmra.mxu0 %vm170_vm1, %v5603_v24  ;;  %v5880_v24 = vld [vmem:[%s6988_s10 + $0x8] sm:$0xff] }
 0x4eb   :  { %1250 = vmatpush.msra.mxu2 %v5880_v24 }
 0x4ed   :  { %1251 = vmatpush.msra.mxu2 %v5886_v46 }
 0x526   :  { %v934_v22 = vpop.f32.mrf.mxu3 }
 0x527   :  { %v946_v61 = vadd.f32 %v934_v22, %v675_v56 }
 0x52e   :  { %v937_v42 = vpop.f32.mrf.mxu3 }
 0x52f   :  { %v947_v11 = vadd.f32 %v937_v42, %v678_v6 }
 0x536   :  { %v940_v27 = vpop.f32.mrf.mxu3 }
 0x537   :  { %v948_v36 = vadd.f32 %v940_v27, %v681_v5 }
 0x53e   :  { %v943_v43 = vpop.f32.mrf.mxu3 }
 0x53f   :  { %v949_v30 = vadd.f32 %v943_v43, %v684_v25 }
 0x541   :  { %v1498_v48 = vpop.permute.xlu0 %1497 }
 0x542   :  { %4904 = vmatpush.xpose.msk.msrb.mxu2 %vm170_vm1, %v1498_v48 }
 0x546   :  { %v1198_v2 = vpop.f32.mrf.mxu3 }
 0x547   :  { %v1210_v41 = vadd.f32 %v1198_v2, %v946_v61 }
 0x549   :  { %v1217_v4 = vadd.f32 %v5044_v40, %v1210_v41 }
 0x54b   :  { %4883 = vmatmul.msk.f32.vlgmr.msra.gmra.mxu2 %vm98_vm0, %v1217_v4 }
 0x54c   :  { %1768 = vmatpush.msra.mxu2 %v5369_v10 }
 0x54e   :  { %v1201_v12 = vpop.f32.mrf.mxu3 }
 0x54f   :  { %v1315_v35 = vpop.f32.mrf.mxu0  ;;  %v1211_v14 = vadd.f32 %v1201_v12, %v947_v11 }
 0x550   :  { %v1327_v1 = vmul.f32 0.35355338, %v1315_v35 }
 0x551   :  { %v1218_v0 = vadd.f32 %v5044_v40, %v1211_v14 }
 0x552   :  { %v1331_v3 = vsel %vm170_vm1, %v1327_v1, -inf }
 0x553   :  { %1332 = vmax.xlane.f32.xlu1 %v1331_v3  ;;  %4884 = vmatmul.msk.f32.gmra.mxu2 %vm98_vm0, %v1218_v0 }
 0x556   :  { %v1204_v8 = vpop.f32.mrf.mxu3 }
 0x557   :  { %v1318_v16 = vpop.f32.mrf.mxu0  ;;  %v1212_v9 = vadd.f32 %v1204_v8, %v948_v36 }
 0x558   :  { %v1328_v19 = vmul.f32 0.35355338, %v1318_v16 }
 0x559   :  { %v1219_v21 = vadd.f32 %v5044_v40, %v1212_v9 }
 0x55a   :  { %v1334_v23 = vsel %vm170_vm1, %v1328_v19, -inf }
 0x55b   :  { %1335 = vmax.xlane.f32.xlu1 %v1334_v23  ;;  %4885 = vmatmul.msk.f32.gmra.mxu2 %vm98_vm0, %v1219_v21 }
 0x55e   :  { %v1207_v31 = vpop.f32.mrf.mxu3 }
 0x55f   :  { %v1321_v32 = vpop.f32.mrf.mxu0  ;;  %v1213_v7 = vadd.f32 %v1207_v31, %v949_v30 }
 0x560   :  { %v1329_v37 = vmul.f32 0.35355338, %v1321_v32 }
 0x561   :  { %v1220_v33 = vadd.f32 %v5044_v40, %v1213_v7 }
 0x562   :  { %v1337_v34 = vsel %vm170_vm1, %v1329_v37, -inf }
 0x563   :  { %1338 = vmax.xlane.f32.xlu1 %v1337_v34  ;;  %4886 = vmatmul.msk.f32.gmra.mxu2 %vm98_vm0, %v1220_v33 }
 0x567   :  { %v1324_v6 = vpop.f32.mrf.mxu0 }
 0x568   :  { %v5953_v10 = vmul.f32 0.35355338, %v1324_v6 }
 0x56a   :  { %v1340_v35 = vsel %vm170_vm1, %v5953_v10, -inf }
 0x56b   :  { %4905 = vmatmul.msk.f32.vlgmr.msrb.gmra.mxu2 %vm170_vm1, %v5642_v57  ;;  %v5925_v57 = vmul.f32 %v5922_v17, %v4888_v39 }
 0x56c   :  { %2012 = vmatpush.msrb.mxu2 %v5801_v38 }
 0x56d   :  { %1382 = vmatpush.msra.mxu1 %v5925_v57  ;;  %1585 = vmatpush.msra.mxu0 %v5925_v57 }
 0x56f   :  { %1614 = vmatpush.msrb.mxu1 %v5922_v17 }
 0x573   :  { %4906 = vmatmul.msk.f32.gmra.mxu2 %vm170_vm1, %v5646_v58 }
 0x57b   :  { %4907 = vmatmul.msk.f32.gmra.mxu2 %vm170_vm1, %v5650_v59 }
 0x583   :  { %4908 = vmatmul.msk.f32.gmra.mxu2 %vm170_vm1, %v5654_v60 }
 0x5c6   :  { %v1333_v58 = vpop.xlane.xlu1 %1332 }
 0x5c7   :  { %v1343_v59 = vsub.f32 %v1327_v1, %v1333_v58 }
 0x5c9   :  { %v1347_v60 = vmul.f32 1.442695, %v1343_v59 }
 0x5cb   :  { %5112 = vpow2.f32 %v1347_v60 }
 0x5ce   :  { %v1336_v38 = vpop.xlane.xlu1 %1335  ;;  %v5932_v28 = vpop.f32.mrf.mxu2 }
 0x5cf   :  { %v1344_v18 = vsub.f32 %v1328_v19, %v1336_v38 }
 0x5d1   :  { %v5113_v29 = vpop.eup %5112  ;;  %v1349_v13 = vmul.f32 1.442695, %v1344_v18 }
 0x5d2   :  { %4896 = vmatmul.msk.f32.vlgmr.msra.gmra.mxu1 %vm170_vm1, %v5113_v29  ;;  %4900 = vmatmul.msk.f32.vlgmr.msrb.gmra.mxu3 %vm170_vm1, %v5113_v29 }
 0x5d3   :  { %5114 = vpow2.f32 %v1349_v13  ;;  %1899 = vmatpush.msrb.mxu3 %v5922_v17  ;;  %1870 = vmatpush.msra.mxu1 %v5925_v57 }
 0x5d6   :  { %v1339_v54 = vpop.xlane.xlu1 %1338  ;;  %v5938_v44 = vpop.f32.mrf.mxu2 }
 0x5d7   :  { %v1345_v20 = vsub.f32 %v1329_v37, %v1339_v54 }
 0x5d9   :  { %v5115_v22 = vpop.eup %5114  ;;  %v1351_v42 = vmul.f32 1.442695, %v1345_v20 }
 0x5da   :  { %4897 = vmatmul.msk.f32.gmra.mxu1 %vm170_vm1, %v5115_v22  ;;  %4901 = vmatmul.msk.f32.gmra.mxu3 %vm170_vm1, %v5115_v22 }
 0x5db   :  { %5116 = vpow2.f32 %v1351_v42 }
 0x5de   :  { %v5942_v27 = vpop.f32.mrf.mxu2 }
 0x5e1   :  { %v5117_v43 = vpop.eup %5116 }
 0x5e2   :  { %4898 = vmatmul.msk.f32.gmra.mxu1 %vm170_vm1, %v5117_v43  ;;  %4902 = vmatmul.msk.f32.gmra.mxu3 %vm170_vm1, %v5117_v43 }
 0x5e6   :  { %v5946_v48 = vpop.f32.mrf.mxu2 }
 0x5ee   :  { %v1518_v56 = vpop.f32.mrf.mxu2 }
 0x5ef   :  { %v1530_v61 = vmul.f32 0.35355338, %v1518_v56 }
 0x5f1   :  { %v1534_v40 = vsel %vm170_vm1, %v1530_v61, -inf }
 0x5f2   :  { %1535 = vmax.xlane.f32.xlu2 %v1534_v40 }
 0x5f6   :  { %v1521_v2 = vpop.f32.mrf.mxu2 }
 0x5f7   :  { %v5949_v41 = vmul.f32 0.35355338, %v1521_v2 }
 0x5f9   :  { %v1537_v4 = vsel %vm170_vm1, %v5949_v41, -inf }
 0x5fa   :  { %1538 = vmax.xlane.f32.xlu2 %v1537_v4 }
 0x5fe   :  { %v1524_v11 = vpop.f32.mrf.mxu2 }
 0x5ff   :  { %v5955_v12 = vmul.f32 0.35355338, %v1524_v11 }
 0x601   :  { %v1540_v14 = vsel %vm170_vm1, %v5955_v12, -inf }
 0x602   :  { %1341 = vmax.xlane.f32.xlu2 %v1340_v35  ;;  %1541 = vmax.xlane.f32.xlu0 %v1540_v14 }
 0x606   :  { %v1527_v1 = vpop.f32.mrf.mxu2 }
 0x607   :  { %v5961_v0 = vmul.f32 0.35355338, %v1527_v1 }
 0x609   :  { %v1543_v3 = vsel %vm170_vm1, %v5961_v0, -inf }
 0x60a   :  { %1544 = vmax.xlane.f32.xlu1 %v1543_v3 }
 0x61a   :  { %1782 = vrot.lane.b32.xlu2 %v5847_v63, %s5408_s4 }
 0x623   :  { %2030 = vrot.lane.b32.xlu1 %v5847_v63, %s5409_s29 }
 0x64f   :  { %v1384_v31 = vpop.f32.mrf.mxu1 }
 0x655   :  { %v1413_v5 = vpop.f32.mrf.mxu3 }
 0x656   :  { %vm1425_vm12 = vcmp.gt.f32.partialorder %v1413_v5, 0.0 }
 0x657   :  { %v1429_v36 = vsel %vm1425_vm12, %v1413_v5, 1.0  ;;  %v1387_v56 = vpop.f32.mrf.mxu1 }
 0x658   :  { %5118 = vrcp.f32 %v1429_v36  ;;  %v1444_v23 = vand.u32 2147483648, %v1429_v36  ;;  %v1442_v30 = vand.u32 2147483647, %v1429_v36  ;;  %vm1438_vm15 = vweird.f32 %v1429_v36 }
 0x65a   :  { %v1445_v37 = vor.u32 1.1754944e-38, %v1444_v23  ;;  %vm1443_vm14 = vcmp.eq.f32.partialorder %v1442_v30, 8.507059e+37 }
 0x65d   :  { %v1416_v8 = vpop.f32.mrf.mxu3 }
 0x65e   :  { %v5119_v16 = vpop.eup %5118  ;;  %vm1426_vm9 = vcmp.gt.f32.partialorder %v1416_v8, 0.0 }
 0x65f   :  { %v1434_v9 = vmul.f32 %v5119_v16, %v1429_v36  ;;  %v1430_v19 = vsel %vm1426_vm9, %v1416_v8, 1.0  ;;  %vm1439_vm2 = vweird.f32 %v5119_v16  ;;  %v1390_v30 = vpop.f32.mrf.mxu1 }
 0x660   :  { %5120 = vrcp.f32 %v1430_v19  ;;  %vm1440_vm4 = vmor %vm1438_vm15, %vm1439_vm2  ;;  %v1457_v29 = vand.u32 2147483647, %v1430_v19  ;;  %v1459_v13 = vand.u32 2147483648, %v1430_v19  ;;  %vm1453_vm8 = vweird.f32 %v1430_v19 }
 0x661   :  { %v1435_v21 = vsub.f32 1.0, %v1434_v9 }
 0x662   :  { %v1460_v40 = vor.u32 1.1754944e-38, %v1459_v13  ;;  %vm1458_vm7 = vcmp.eq.f32.partialorder %v1457_v29, 8.507059e+37 }
 0x663   :  { %v1436_v25 = vmul.f32 %v5119_v16, %v1435_v21 }
 0x665   :  { %v1437_v32 = vadd.f32 %v5119_v16, %v1436_v25  ;;  %v5971_v63 = vpop.f32.mrf.mxu3  ;;  %v1536_v33 = vpop.xlane.xlu2 %1535 }
 0x666   :  { %v5121_v7 = vpop.eup %5120  ;;  %vm1427_vm5 = vcmp.gt.f32.partialorder %v5971_v63, 0.0  ;;  %v1546_v18 = vsub.f32 %v1530_v61, %v1536_v33 }
 0x667   :  { %v1441_v34 = vsel %vm1440_vm4, %v5119_v16, %v1437_v32  ;;  %v1449_v39 = vmul.f32 %v5121_v7, %v1430_v19  ;;  %v1431_v58 = vsel %vm1427_vm5, %v5971_v63, 1.0  ;;  %vm1454_vm6 = vweird.f32 %v5121_v7 }
 0x668   :  { %v1446_v59 = vsel %vm1443_vm14, %v1445_v37, %v1441_v34  ;;  %5122 = vrcp.f32 %v1431_v58  ;;  %v1550_v22 = vmul.f32 1.442695, %v1546_v18  ;;  %vm1455_vm3 = vmor %vm1453_vm8, %vm1454_vm6  ;;  %v1472_v3 = vand.u32 2147483647, %v1431_v58 }
 0x669   :  { %v1447_v60 = vmul.f32 %v1446_v59, %v1384_v31  ;;  %v1450_v38 = vsub.f32 1.0, %v1449_v39  ;;  %v1474_v5 = vand.u32 2147483648, %v1431_v58  ;;  %vm1468_vm11 = vweird.f32 %v1431_v58 }
 0x66a   :  { %5124 = vpow2.f32 %v1550_v22 }
 0x66b   :  { %v1493_v54 = vsel %vm1425_vm12, %v1447_v60, 0.0  ;;  %v1451_v20 = vmul.f32 %v5121_v7, %v1450_v38  ;;  %vm1473_vm12 = vcmp.eq.f32.partialorder %v1472_v3, 8.507059e+37 }
 0x66c   :  { %4921 = vmatmul.msk.f32.vlgmr.msra.gmra.mxu2 %vm170_vm1, %v1493_v54 }
 0x66d   :  { %v1452_v42 = vadd.f32 %v5121_v7, %v1451_v20  ;;  %2260 = vmatpush.msra.mxu2 %v5818_v15  ;;  %v1539_v2 = vpop.xlane.xlu2 %1538 }
 0x66e   :  { %v5123_v43 = vpop.eup %5122  ;;  %v1547_v6 = vsub.f32 %v5949_v41, %v1539_v2  ;;  %v1475_v41 = vor.u32 1.1754944e-38, %v1474_v5 }
 0x66f   :  { %v1456_v61 = vsel %vm1455_vm3, %v5121_v7, %v1452_v42  ;;  %v1464_v4 = vmul.f32 %v5123_v43, %v1431_v58  ;;  %vm1469_vm10 = vweird.f32 %v5123_v43 }
 0x670   :  { %v1461_v11 = vsel %vm1458_vm7, %v1460_v40, %v1456_v61  ;;  %v1552_v1 = vmul.f32 1.442695, %v1547_v6  ;;  %v5125_v36 = vpop.eup %5124  ;;  %vm1470_vm13 = vmor %vm1468_vm11, %vm1469_vm10 }
 0x671   :  { %v1462_v35 = vmul.f32 %v1461_v11, %v1387_v56  ;;  %v1465_v14 = vsub.f32 1.0, %v1464_v4  ;;  %4909 = vmatmul.msk.f32.vlgmr.msra.gmra.mxu0 %vm170_vm1, %v5125_v36 }
 0x672   :  { %5126 = vpow2.f32 %v1552_v1 }
 0x673   :  { %v1494_v16 = vsel %vm1426_vm9, %v1462_v35, 0.0  ;;  %v1466_v15 = vmul.f32 %v5123_v43, %v1465_v14 }
 0x674   :  { %4922 = vmatmul.msk.f32.gmra.mxu2 %vm170_vm1, %v1494_v16 }
 0x675   :  { %v1467_v9 = vadd.f32 %v5123_v43, %v1466_v15  ;;  %v1342_v19 = vpop.xlane.xlu2 %1341  ;;  %v1542_v21 = vpop.xlane.xlu0 %1541 }
 0x676   :  { %v1346_v25 = vsub.f32 %v5953_v10, %v1342_v19  ;;  %v1548_v8 = vsub.f32 %v5955_v12, %v1542_v21 }
 0x677   :  { %v1471_v23 = vsel %vm1470_vm13, %v5123_v43, %v1467_v9 }
 0x678   :  { %v1476_v31 = vsel %vm1473_vm12, %v1475_v41, %v1471_v23  ;;  %v5127_v32 = vpop.eup %5126  ;;  %v1353_v37 = vmul.f32 1.442695, %v1346_v25  ;;  %v1554_v33 = vmul.f32 1.442695, %v1548_v8 }
 0x679   :  { %v1477_v7 = vmul.f32 %v1476_v31, %v1390_v30  ;;  %4910 = vmatmul.msk.f32.gmra.mxu0 %vm170_vm1, %v5127_v32 }
 0x67a   :  { %5128 = vpow2.f32 %v1353_v37 }
 0x67b   :  { %v1495_v34 = vsel %vm1427_vm5, %v1477_v7, 0.0  ;;  %5130 = vpow2.f32 %v1554_v33 }
 0x67c   :  { %4923 = vmatmul.msk.f32.gmra.mxu2 %vm170_vm1, %v1495_v34 }
 0x67d   :  { %v1783_v39 = vpop.permute.xlu2 %1782  ;;  %v1545_v58 = vpop.xlane.xlu1 %1544 }
 0x67e   :  { %v1549_v10 = vsub.f32 %v5961_v0, %v1545_v58  ;;  %4925 = vmatpush.xpose.msk.msrb.mxu0 %vm170_vm1, %v1783_v39 }
 0x680   :  { %v5129_v12 = vpop.eup %5128  ;;  %v1556_v59 = vmul.f32 1.442695, %v1549_v10 }
 0x681   :  { %v5131_v60 = vpop.eup %5130  ;;  %4899 = vmatmul.msk.f32.gmra.mxu1 %vm170_vm1, %v5129_v12  ;;  %4903 = vmatmul.msk.f32.gmra.mxu3 %vm170_vm1, %v5129_v12 }
 0x682   :  { %5132 = vpow2.f32 %v1556_v59  ;;  %4911 = vmatmul.msk.f32.gmra.mxu0 %vm170_vm1, %v5131_v60 }
 0x688   :  { %v5133_v63 = vpop.eup %5132 }
 0x689   :  { %4913 = vmatmul.msk.f32.vlgmr.msrb.gmra.mxu1 %vm170_vm1, %v5125_v36 }
 0x68a   :  { %2118 = vmatpush.msrb.mxu1 %v5925_v57  ;;  %4912 = vmatmul.msk.f32.gmra.mxu0 %vm170_vm1, %v5133_v63 }
 0x691   :  { %4914 = vmatmul.msk.f32.gmra.mxu1 %vm170_vm1, %v5127_v32 }
 0x692   :  { %4926 = vmatmul.msk.f32.vlgmr.msrb.gmra.mxu0 %vm170_vm1, %v5710_v49 }
 0x695   :  { %v2031_v0 = vpop.permute.xlu1 %2030 }
 0x696   :  { %4942 = vmatpush.xpose.msk.msra.mxu0 %vm170_vm1, %v2031_v0 }
 0x699   :  { %4915 = vmatmul.msk.f32.gmra.mxu1 %vm170_vm1, %v5131_v60 }
 0x69a   :  { %2306 = vmatpush.msrb.mxu0 %v5868_v45 }
 0x69b   :  { %4927 = vmatmul.msk.f32.gmra.mxu0 %vm170_vm1, %v5714_v50 }
 0x69c   :  { %2307 = vmatpush.msrb.mxu0 %v5874_v26 }
 0x69e   :  { %2308 = vmatpush.msrb.mxu0 %v5880_v24 }
 0x6a0   :  { %2309 = vmatpush.msrb.mxu0 %v5886_v46 }
 0x6a1   :  { %4916 = vmatmul.msk.f32.gmra.mxu1 %vm170_vm1, %v5133_v63 }
 0x6a3   :  { %4928 = vmatmul.msk.f32.gmra.mxu0 %vm170_vm1, %v5705_v47 }
 0x6ab   :  { %4929 = vmatmul.msk.f32.gmra.mxu0 %vm170_vm1, %v5720_v51 }
 0x6b3   :  { %4943 = vmatmul.msk.f32.vlgmr.msra.gmra.mxu0 %vm170_vm1, %v5724_v52 }
 0x6bb   :  { %4944 = vmatmul.msk.f32.gmra.mxu0 %vm170_vm1, %v5728_v53 }
 0x6c3   :  { %4945 = vmatmul.msk.f32.gmra.mxu0 %vm170_vm1, %v5739_v55 }
 0x6cb   :  { %4946 = vmatmul.msk.f32.gmra.mxu0 %vm170_vm1, %v5744_v62 }
 0x6ee   :  { %v1587_v49 = vpop.f32.mrf.mxu0 }
 0x6f6   :  { %v6022_v50 = vpop.f32.mrf.mxu0 }
 0x6fe   :  { %v1393_v45 = vpop.f32.mrf.mxu1 }
 0x6ff   :  { %v6024_v47 = vpop.f32.mrf.mxu0 }
 0x704   :  { %v1422_v26 = vpop.f32.mrf.mxu3 }
 0x705   :  { %vm1428_vm9 = vcmp.gt.f32.partialorder %v1422_v26, 0.0 }
 0x706   :  { %v1432_v51 = vsel %vm1428_vm9, %v1422_v26, 1.0  ;;  %v1616_v52 = vpop.f32.mrf.mxu1 }
 0x707   :  { %5134 = vrcp.f32 %v1432_v51  ;;  %v6027_v24 = vpop.f32.mrf.mxu0  ;;  %vm1628_vm2 = vcmp.gt.f32.partialorder %v1616_v52, 0.0  ;;  %v1489_v13 = vand.u32 2147483648, %v1432_v51  ;;  %v1487_v22 = vand.u32 2147483647, %v1432_v51 }
 0x708   :  { %v1632_v53 = vsel %vm1628_vm2, %v1616_v52, 1.0  ;;  %vm1483_vm5 = vweird.f32 %v1432_v51 }
 0x709   :  { %5136 = vrcp.f32 %v1632_v53  ;;  %v1647_v40 = vand.u32 2147483648, %v1632_v53  ;;  %v1490_v61 = vor.u32 1.1754944e-38, %v1489_v13  ;;  %v1645_v6 = vand.u32 2147483647, %v1632_v53 }
 0x70a   :  { %vm1488_vm8 = vcmp.eq.f32.partialorder %v1487_v22, 8.507059e+37  ;;  %vm1641_vm3 = vweird.f32 %v1632_v53 }
 0x70b   :  { %v1648_v36 = vor.u32 1.1754944e-38, %v1647_v40  ;;  %vm1646_vm11 = vcmp.eq.f32.partialorder %v1645_v6, 8.507059e+37 }
 0x70d   :  { %v5135_v55 = vpop.eup %5134 }
 0x70e   :  { %v1479_v62 = vmul.f32 %v5135_v55, %v1432_v51  ;;  %v6030_v46 = vpop.f32.mrf.mxu1  ;;  %vm1484_vm4 = vweird.f32 %v5135_v55 }
 0x70f   :  { %vm1629_vm15 = vcmp.gt.f32.partialorder %v6030_v46, 0.0  ;;  %v5137_v57 = vpop.eup %5136  ;;  %v1803_v29 = vpop.f32.mrf.mxu0  ;;  %vm1485_vm14 = vmor %vm1483_vm5, %vm1484_vm4 }
 0x710   :  { %v1480_v38 = vsub.f32 1.0, %v1479_v62  ;;  %v1633_v18 = vsel %vm1629_vm15, %v6030_v46, 1.0  ;;  %v1637_v54 = vmul.f32 %v5137_v57, %v1632_v53  ;;  %v6036_v42 = vmul.f32 0.35355338, %v1803_v29 }
 0x711   :  { %5138 = vrcp.f32 %v1633_v18  ;;  %vm1642_vm6 = vweird.f32 %v5137_v57  ;;  %v1662_v8 = vand.u32 2147483648, %v1633_v18  ;;  %v1660_v32 = vand.u32 2147483647, %v1633_v18 }
 0x712   :  { %v1481_v20 = vmul.f32 %v5135_v55, %v1480_v38  ;;  %v1638_v43 = vsub.f32 1.0, %v1637_v54  ;;  %v1819_v2 = vsel %vm170_vm1, %v6036_v42, -inf  ;;  %vm1643_vm10 = vmor %vm1641_vm3, %vm1642_vm6  ;;  %vm1656_vm12 = vweird.f32 %v1633_v18 }
 0x713   :  { %1820 = vmax.xlane.f32.xlu2 %v1819_v2  ;;  %v1663_v58 = vor.u32 1.1754944e-38, %v1662_v8  ;;  %vm1661_vm5 = vcmp.eq.f32.partialorder %v1660_v32, 8.507059e+37 }
 0x714   :  { %v1482_v56 = vadd.f32 %v5135_v55, %v1481_v20  ;;  %v1639_v4 = vmul.f32 %v5137_v57, %v1638_v43 }
 0x716   :  { %v1486_v11 = vsel %vm1485_vm14, %v5135_v55, %v1482_v56  ;;  %v6040_v35 = vpop.f32.mrf.mxu1  ;;  %v1640_v3 = vadd.f32 %v5137_v57, %v1639_v4 }
 0x717   :  { %v5139_v14 = vpop.eup %5138  ;;  %v1491_v1 = vsel %vm1488_vm8, %v1490_v61, %v1486_v11  ;;  %vm1630_vm7 = vcmp.gt.f32.partialorder %v6040_v35, 0.0 }
 0x718   :  { %v1492_v5 = vmul.f32 %v1491_v1, %v1393_v45  ;;  %v1652_v16 = vmul.f32 %v5139_v14, %v1633_v18  ;;  %v1634_v15 = vsel %vm1630_vm7, %v6040_v35, 1.0  ;;  %v1806_v9 = vpop.f32.mrf.mxu0  ;;  %v1644_v41 = vsel %vm1643_vm10, %v5137_v57, %v1640_v3 }
 0x719   :  { %5140 = vrcp.f32 %v1634_v15  ;;  %v1649_v21 = vsel %vm1646_vm11, %v1648_v36, %v1644_v41  ;;  %v6047_v30 = vmul.f32 0.35355338, %v1806_v9  ;;  %vm1657_vm13 = vweird.f32 %v5139_v14 }
 0x71a   :  { %v1496_v19 = vsel %vm1428_vm9, %v1492_v5, 0.0  ;;  %v1653_v23 = vsub.f32 1.0, %v1652_v16  ;;  %v1650_v25 = vmul.f32 %v1649_v21, %v1587_v49  ;;  %vm1658_vm9 = vmor %vm1656_vm12, %vm1657_vm13  ;;  %v1675_v26 = vand.u32 2147483647, %v1634_v15 }
 0x71b   :  { %4924 = vmatmul.msk.f32.gmra.mxu2 %vm170_vm1, %v1496_v19  ;;  %v1822_v37 = vsel %vm170_vm1, %v6047_v30, -inf  ;;  %v1677_v51 = vand.u32 2147483648, %v1634_v15  ;;  %vm1671_vm14 = vweird.f32 %v1634_v15 }
 0x71c   :  { %v1654_v31 = vmul.f32 %v5139_v14, %v1653_v23  ;;  %v1696_v7 = vsel %vm1628_vm2, %v1650_v25, 0.0  ;;  %1823 = vmax.xlane.f32.xlu1 %v1822_v37  ;;  %vm1676_vm8 = vcmp.eq.f32.partialorder %v1675_v26, 8.507059e+37 }
 0x71d   :  { %4917 = vmatmul.msk.f32.vlgmr.msra.gmra.mxu3 %vm170_vm1, %v1696_v7 }
 0x71e   :  { %v1655_v33 = vadd.f32 %v5139_v14, %v1654_v31  ;;  %v1625_v34 = vpop.f32.mrf.mxu1  ;;  %2147 = vmatpush.msra.mxu3 %v5922_v17 }
 0x71f   :  { %v5141_v39 = vpop.eup %5140  ;;  %vm1631_vm4 = vcmp.gt.f32.partialorder %v1625_v34, 0.0 }
 0x720   :  { %v1659_v10 = vsel %vm1658_vm9, %v5139_v14, %v1655_v33  ;;  %v1667_v12 = vmul.f32 %v5141_v39, %v1634_v15  ;;  %v1635_v59 = vsel %vm1631_vm4, %v1625_v34, 1.0  ;;  %v1809_v60 = vpop.f32.mrf.mxu0  ;;  %vm1672_vm2 = vweird.f32 %v5141_v39 }
 0x721   :  { %v1664_v63 = vsel %vm1661_vm5, %v1663_v58, %v1659_v10  ;;  %5142 = vrcp.f32 %v1635_v59  ;;  %v6057_v45 = vmul.f32 0.35355338, %v1809_v60  ;;  %vm1673_vm6 = vmor %vm1671_vm14, %vm1672_vm2  ;;  %v1692_v20 = vand.u32 2147483648, %v1635_v59 }
 0x722   :  { %v1665_v0 = vmul.f32 %v1664_v63, %v6022_v50  ;;  %v1668_v49 = vsub.f32 1.0, %v1667_v12  ;;  %v1678_v50 = vor.u32 1.1754944e-38, %v1677_v51  ;;  %v1690_v40 = vand.u32 2147483647, %v1635_v59 }
 0x723   :  { %v1825_v17 = vsel %vm170_vm1, %v6057_v45, -inf  ;;  %vm1686_vm3 = vweird.f32 %v1635_v59  ;;  %v1693_v61 = vor.u32 1.1754944e-38, %v1692_v20 }
 0x724   :  { %v1697_v52 = vsel %vm1629_vm15, %v1665_v0, 0.0  ;;  %v1669_v53 = vmul.f32 %v5141_v39, %v1668_v49  ;;  %1826 = vmax.xlane.f32.xlu0 %v1825_v17  ;;  %vm1691_vm11 = vcmp.eq.f32.partialorder %v1690_v40, 8.507059e+37 }
 0x725   :  { %4918 = vmatmul.msk.f32.gmra.mxu3 %vm170_vm1, %v1697_v52 }
 0x726   :  { %v1670_v55 = vadd.f32 %v5141_v39, %v1669_v53 }
 0x727   :  { %v5143_v62 = vpop.eup %5142 }
 0x728   :  { %v1674_v57 = vsel %vm1673_vm6, %v5141_v39, %v1670_v55  ;;  %v1682_v38 = vmul.f32 %v5143_v62, %v1635_v59  ;;  %v1812_v18 = vpop.f32.mrf.mxu0  ;;  %vm1687_vm15 = vweird.f32 %v5143_v62 }
 0x729   :  { %v1679_v29 = vsel %vm1676_vm8, %v1678_v50, %v1674_v57  ;;  %v1818_v46 = vmul.f32 0.35355338, %v1812_v18  ;;  %vm1688_vm10 = vmor %vm1686_vm3, %vm1687_vm15 }
 0x72a   :  { %v1680_v13 = vmul.f32 %v1679_v29, %v6024_v47  ;;  %v1683_v54 = vsub.f32 1.0, %v1682_v38 }
 0x72b   :  { %v1828_v22 = vsel %vm170_vm1, %v1818_v46, -inf }
 0x72c   :  { %v1698_v43 = vsel %vm1630_vm7, %v1680_v13, 0.0  ;;  %v1684_v56 = vmul.f32 %v5143_v62, %v1683_v54  ;;  %1829 = vmax.xlane.f32.xlu0 %v1828_v22 }
 0x72d   :  { %4919 = vmatmul.msk.f32.gmra.mxu3 %vm170_vm1, %v1698_v43 }
 0x72e   :  { %v1685_v2 = vadd.f32 %v5143_v62, %v1684_v56 }
 0x730   :  { %v1689_v4 = vsel %vm1688_vm10, %v5143_v62, %v1685_v2  ;;  %v2051_v47 = vpop.f32.mrf.mxu0 }
 0x731   :  { %v1694_v6 = vsel %vm1691_vm11, %v1693_v61, %v1689_v4  ;;  %v2063_v11 = vmul.f32 0.35355338, %v2051_v47 }
 0x732   :  { %v1695_v14 = vmul.f32 %v1694_v6, %v6027_v24 }
 0x733   :  { %v2067_v35 = vsel %vm170_vm1, %v2063_v11, -inf }
 0x734   :  { %v1699_v1 = vsel %vm1631_vm4, %v1695_v14, 0.0  ;;  %2068 = vmax.xlane.f32.xlu0 %v2067_v35 }
 0x735   :  { %4920 = vmatmul.msk.f32.gmra.mxu3 %vm170_vm1, %v1699_v1 }
 0x738   :  { %v2054_v3 = vpop.f32.mrf.mxu0 }
 0x739   :  { %v2064_v5 = vmul.f32 0.35355338, %v2054_v3 }
 0x73b   :  { %v2070_v36 = vsel %vm170_vm1, %v2064_v5, -inf }
 0x73c   :  { %2071 = vmax.xlane.f32.xlu0 %v2070_v36 }
 0x740   :  { %v2057_v16 = vpop.f32.mrf.mxu0 }
 0x741   :  { %v2065_v15 = vmul.f32 0.35355338, %v2057_v16 }
 0x743   :  { %v2073_v9 = vsel %vm170_vm1, %v2065_v15, -inf }
 0x744   :  { %2074 = vmax.xlane.f32.xlu0 %v2073_v9 }
 0x748   :  { %v2060_v41 = vpop.f32.mrf.mxu0 }
 0x749   :  { %v2066_v19 = vmul.f32 0.35355338, %v2060_v41 }
 0x74b   :  { %v2076_v24 = vsel %vm170_vm1, %v2066_v19, -inf }
 0x74c   :  { %2077 = vmax.xlane.f32.xlu2 %v2076_v24 }
 0x786   :  { %v1821_v21 = vpop.xlane.xlu2 %1820 }
 0x787   :  { %v1831_v23 = vsub.f32 %v6036_v42, %v1821_v21 }
 0x789   :  { %v1835_v25 = vmul.f32 1.442695, %v1831_v23 }
 0x78b   :  { %5144 = vpow2.f32 %v1835_v25 }
 0x78f   :  { %v1824_v8 = vpop.xlane.xlu1 %1823 }
 0x790   :  { %v1832_v31 = vsub.f32 %v6047_v30, %v1824_v8 }
 0x791   :  { %v5145_v32 = vpop.eup %5144 }
 0x792   :  { %v1837_v7 = vmul.f32 1.442695, %v1832_v31  ;;  %4930 = vmatmul.msk.f32.vlgmr.msra.gmra.mxu1 %vm170_vm1, %v5145_v32  ;;  %4934 = vmatmul.msk.f32.vlgmr.msrb.gmra.mxu3 %vm170_vm1, %v5145_v32 }
 0x794   :  { %5146 = vpow2.f32 %v1837_v7 }
 0x797   :  { %v1827_v37 = vpop.xlane.xlu0 %1826 }
 0x798   :  { %v1833_v33 = vsub.f32 %v6057_v45, %v1827_v37 }
 0x79a   :  { %v1839_v34 = vmul.f32 1.442695, %v1833_v33  ;;  %v5147_v39 = vpop.eup %5146 }
 0x79b   :  { %4931 = vmatmul.msk.f32.gmra.mxu1 %vm170_vm1, %v5147_v39  ;;  %4935 = vmatmul.msk.f32.gmra.mxu3 %vm170_vm1, %v5147_v39 }
 0x79c   :  { %5148 = vpow2.f32 %v1839_v34 }
 0x79f   :  { %v1830_v42 = vpop.xlane.xlu0 %1829 }
 0x7a0   :  { %v1834_v58 = vsub.f32 %v1818_v46, %v1830_v42  ;;  %v6095_v18 = vpop.f32.mrf.mxu3 }
 0x7a2   :  { %v5149_v30 = vpop.eup %5148  ;;  %v1841_v10 = vmul.f32 1.442695, %v1834_v58 }
 0x7a3   :  { %4932 = vmatmul.msk.f32.gmra.mxu1 %vm170_vm1, %v5149_v30  ;;  %4936 = vmatmul.msk.f32.gmra.mxu3 %vm170_vm1, %v5149_v30 }
 0x7a4   :  { %5150 = vpow2.f32 %v1841_v10 }
 0x7a7   :  { %v2069_v12 = vpop.xlane.xlu0 %2068 }
 0x7a8   :  { %v2079_v59 = vsub.f32 %v2063_v11, %v2069_v12  ;;  %v6097_v29 = vpop.f32.mrf.mxu3 }
 0x7aa   :  { %v5151_v60 = vpop.eup %5150  ;;  %v2083_v63 = vmul.f32 1.442695, %v2079_v59 }
 0x7ab   :  { %4933 = vmatmul.msk.f32.gmra.mxu1 %vm170_vm1, %v5151_v60  ;;  %4937 = vmatmul.msk.f32.gmra.mxu3 %vm170_vm1, %v5151_v60 }
 0x7ac   :  { %5152 = vpow2.f32 %v2083_v63 }
 0x7af   :  { %v2072_v0 = vpop.xlane.xlu0 %2071 }
 0x7b0   :  { %v2080_v49 = vsub.f32 %v2064_v5, %v2072_v0  ;;  %v6099_v46 = vpop.f32.mrf.mxu3 }
 0x7b2   :  { %v5153_v45 = vpop.eup %5152  ;;  %v2085_v26 = vmul.f32 1.442695, %v2080_v49 }
 0x7b3   :  { %4947 = vmatmul.msk.f32.vlgmr.msrb.gmra.mxu1 %vm170_vm1, %v5153_v45  ;;  %4951 = vmatmul.msk.f32.vlgmr.msra.gmra.mxu3 %vm170_vm1, %v5153_v45 }
 0x7b4   :  { %5154 = vpow2.f32 %v2085_v26 }
 0x7b7   :  { %v2075_v51 = vpop.xlane.xlu0 %2074 }
 0x7b8   :  { %v2081_v52 = vsub.f32 %v2065_v15, %v2075_v51  ;;  %v6101_v13 = vpop.f32.mrf.mxu3 }
 0x7ba   :  { %v5155_v53 = vpop.eup %5154  ;;  %v2087_v17 = vmul.f32 1.442695, %v2081_v52 }
 0x7bb   :  { %4948 = vmatmul.msk.f32.gmra.mxu1 %vm170_vm1, %v5155_v53  ;;  %4952 = vmatmul.msk.f32.gmra.mxu3 %vm170_vm1, %v5155_v53 }
 0x7bc   :  { %5156 = vpow2.f32 %v2087_v17 }
 0x7bf   :  { %v2078_v55 = vpop.xlane.xlu2 %2077 }
 0x7c0   :  { %v2082_v62 = vsub.f32 %v2066_v19, %v2078_v55 }
 0x7c2   :  { %v2089_v50 = vmul.f32 1.442695, %v2082_v62  ;;  %v5157_v57 = vpop.eup %5156 }
 0x7c3   :  { %4949 = vmatmul.msk.f32.gmra.mxu1 %vm170_vm1, %v5157_v57  ;;  %4953 = vmatmul.msk.f32.gmra.mxu3 %vm170_vm1, %v5157_v57 }
 0x7c4   :  { %5158 = vpow2.f32 %v2089_v50 }
 0x7ca   :  { %v5159_v38 = vpop.eup %5158 }
 0x7cb   :  { %4950 = vmatmul.msk.f32.gmra.mxu1 %vm170_vm1, %v5159_v38  ;;  %4954 = vmatmul.msk.f32.gmra.mxu3 %vm170_vm1, %v5159_v38 }
 0x80f   :  { %v1872_v22 = vpop.f32.mrf.mxu1 }
 0x815   :  { %v1901_v54 = vpop.f32.mrf.mxu3 }
 0x816   :  { %vm1913_vm7 = vcmp.gt.f32.partialorder %v1901_v54, 0.0 }
 0x817   :  { %v1917_v20 = vsel %vm1913_vm7, %v1901_v54, 1.0 }
 0x818   :  { %5160 = vrcp.f32 %v1917_v20  ;;  %v1932_v4 = vand.u32 2147483648, %v1917_v20  ;;  %v1930_v6 = vand.u32 2147483647, %v1917_v20  ;;  %vm1926_vm9 = vweird.f32 %v1917_v20  ;;  %v1875_v14 = vpop.f32.mrf.mxu1 }
 0x81a   :  { %v1933_v35 = vor.u32 1.1754944e-38, %v1932_v4  ;;  %vm1931_vm5 = vcmp.eq.f32.partialorder %v1930_v6, 8.507059e+37 }
 0x81e   :  { %v5161_v43 = vpop.eup %5160  ;;  %v1904_v56 = vpop.f32.mrf.mxu3 }
 0x81f   :  { %v1922_v40 = vmul.f32 %v5161_v43, %v1917_v20  ;;  %vm1914_vm13 = vcmp.gt.f32.partialorder %v1904_v56, 0.0  ;;  %vm1927_vm12 = vweird.f32 %v5161_v43 }
 0x820   :  { %v1918_v2 = vsel %vm1914_vm13, %v1904_v56, 1.0  ;;  %vm1928_vm4 = vmor %vm1926_vm9, %vm1927_vm12  ;;  %v1878_v7 = vpop.f32.mrf.mxu1 }
 0x821   :  { %v1923_v61 = vsub.f32 1.0, %v1922_v40  ;;  %5162 = vrcp.f32 %v1918_v2  ;;  %v1947_v24 = vand.u32 2147483648, %v1918_v2  ;;  %v1945_v23 = vand.u32 2147483647, %v1918_v2 }
 0x822   :  { %vm1941_vm6 = vweird.f32 %v1918_v2 }
 0x823   :  { %v1924_v47 = vmul.f32 %v5161_v43, %v1923_v61  ;;  %v1948_v32 = vor.u32 1.1754944e-38, %v1947_v24  ;;  %vm1946_vm3 = vcmp.eq.f32.partialorder %v1945_v23, 8.507059e+37 }
 0x825   :  { %v1925_v11 = vadd.f32 %v5161_v43, %v1924_v47 }
 0x826   :  { %v1907_v1 = vpop.f32.mrf.mxu3 }
 0x827   :  { %v5163_v3 = vpop.eup %5162  ;;  %v1929_v5 = vsel %vm1928_vm4, %v5161_v43, %v1925_v11  ;;  %vm1915_vm2 = vcmp.gt.f32.partialorder %v1907_v1, 0.0 }
 0x828   :  { %v1934_v36 = vsel %vm1931_vm5, %v1933_v35, %v1929_v5  ;;  %v1937_v16 = vmul.f32 %v5163_v3, %v1918_v2  ;;  %v1919_v15 = vsel %vm1915_vm2, %v1907_v1, 1.0  ;;  %vm1942_vm14 = vweird.f32 %v5163_v3  ;;  %v1881_v53 = vpop.f32.mrf.mxu1  ;;  %v6138_v5 = vld [vmem:[%s6990_s12 + $0x10] sm:$0xff] }
 0x829   :  { %v1935_v9 = vmul.f32 %v1934_v36, %v1872_v22  ;;  %5164 = vrcp.f32 %v1919_v15  ;;  %vm1943_vm8 = vmor %vm1941_vm6, %vm1942_vm14  ;;  %v1962_v30 = vand.u32 2147483648, %v1919_v15  ;;  %v1960_v59 = vand.u32 2147483647, %v1919_v15 }
 0x82a   :  { %v1938_v41 = vsub.f32 1.0, %v1937_v16  ;;  %vm1956_vm11 = vweird.f32 %v1919_v15 }
 0x82b   :  { %v1981_v19 = vsel %vm1913_vm7, %v1935_v9, 0.0  ;;  %v1963_v49 = vor.u32 1.1754944e-38, %v1962_v30  ;;  %vm1961_vm9 = vcmp.eq.f32.partialorder %v1960_v59, 8.507059e+37 }
 0x82c   :  { %v1939_v21 = vmul.f32 %v5163_v3, %v1938_v41  ;;  %4938 = vmatmul.msk.f32.vlgmr.msrb.gmra.mxu2 %vm170_vm1, %v1981_v19  ;;  %v6148_v41 = vld [vmem:[%s6990_s12 + $0x8] sm:$0xff] }
 0x82e   :  { %v1940_v25 = vadd.f32 %v5163_v3, %v1939_v21  ;;  %v1910_v8 = vpop.f32.mrf.mxu3 }
 0x82f   :  { %v5165_v31 = vpop.eup %5164  ;;  %vm1916_vm15 = vcmp.gt.f32.partialorder %v1910_v8, 0.0 }
 0x830   :  { %v1944_v37 = vsel %vm1943_vm8, %v5163_v3, %v1940_v25  ;;  %v1952_v33 = vmul.f32 %v5165_v31, %v1919_v15  ;;  %v1920_v34 = vsel %vm1916_vm15, %v1910_v8, 1.0  ;;  %vm1957_vm10 = vweird.f32 %v5165_v31  ;;  %v2120_v6 = vpop.f32.mrf.mxu1  ;;  %v6133_v3 = vld [vmem:[%s6990_s12 + $0x18] sm:$0xff]  ;;  %v6164_v25 = vld [vmem:[%s6990_s12] sm:$0xff] }
 0x831   :  { %v1949_v39 = vsel %vm1946_vm3, %v1948_v32, %v1944_v37  ;;  %5166 = vrcp.f32 %v1920_v34  ;;  %vm1958_vm7 = vmor %vm1956_vm11, %vm1957_vm10  ;;  %v1977_v62 = vand.u32 2147483648, %v1920_v34  ;;  %v1975_v38 = vand.u32 2147483647, %v1920_v34  ;;  %2346 = vmatpush.msra.mxu1 %v6133_v3  ;;  %2552 = vmatpush.msrb.mxu3 %v6133_v3 }
 0x832   :  { %v1950_v42 = vmul.f32 %v1949_v39, %v1875_v14  ;;  %v1953_v58 = vsub.f32 1.0, %v1952_v33  ;;  %vm1971_vm4 = vweird.f32 %v1920_v34  ;;  %2621 = vmatpush.msrb.mxu2 %v6133_v3  ;;  %2896 = vmatpush.msra.mxu0 %v6133_v3  ;;  %v5410_v39 = vmov 0.0  }
 0x833   :  { %v1978_v43 = vor.u32 1.1754944e-38, %v1977_v62  ;;  %vm1976_vm6 = vcmp.eq.f32.partialorder %v1975_v38, 8.507059e+37  ;;  %2347 = vmatpush.msra.mxu1 %v6138_v5  ;;  %2553 = vmatpush.msrb.mxu3 %v6138_v5 }
 0x834   :  { %v1982_v10 = vsel %vm1914_vm13, %v1950_v42, 0.0  ;;  %v1954_v12 = vmul.f32 %v5165_v31, %v1953_v58  ;;  %2622 = vmatpush.msrb.mxu2 %v6138_v5  ;;  %2897 = vmatpush.msra.mxu0 %v6138_v5 }
 0x835   :  { %4939 = vmatmul.msk.f32.gmra.mxu2 %vm170_vm1, %v1982_v10  ;;  %2348 = vmatpush.msra.mxu1 %v6148_v41 }
 0x836   :  { %v1955_v60 = vadd.f32 %v5165_v31, %v1954_v12  ;;  %v6111_v63 = vpop.f32.mrf.mxu3  ;;  %2554 = vmatpush.msrb.mxu3 %v6148_v41  ;;  %2623 = vmatpush.msrb.mxu2 %v6148_v41 }
 0x837   :  { %v5167_v0 = vpop.eup %5166  ;;  %vm2161_vm12 = vcmp.gt.f32.partialorder %v6111_v63, 0.0  ;;  %2898 = vmatpush.msra.mxu0 %v6148_v41  ;;  %2349 = vmatpush.msra.mxu1 %v6164_v25 }
 0x838   :  { %v1959_v45 = vsel %vm1958_vm7, %v5165_v31, %v1955_v60  ;;  %v1967_v26 = vmul.f32 %v5167_v0, %v1920_v34  ;;  %v2165_v51 = vsel %vm2161_vm12, %v6111_v63, 1.0  ;;  %vm1972_vm13 = vweird.f32 %v5167_v0  ;;  %2555 = vmatpush.msrb.mxu3 %v6164_v25  ;;  %v2123_v34 = vpop.f32.mrf.mxu1  ;;  %2350 = vmatmul.f32.vlgmr.msra.gmra.mxu1 %v5410_v39 }
 0x839   :  { %v1964_v52 = vsel %vm1961_vm9, %v1963_v49, %v1959_v45  ;;  %5168 = vrcp.f32 %v2165_v51  ;;  %vm1973_vm5 = vmor %vm1971_vm4, %vm1972_vm13  ;;  %v2180_v11 = vand.u32 2147483648, %v2165_v51  ;;  %v2178_v1 = vand.u32 2147483647, %v2165_v51  ;;  %2414 = vmatpush.msrb.mxu1 %v6133_v3  ;;  %2624 = vmatpush.msrb.mxu2 %v6164_v25 }
 0x83a   :  { %v1965_v17 = vmul.f32 %v1964_v52, %v1878_v7  ;;  %v1968_v55 = vsub.f32 1.0, %v1967_v26  ;;  %vm2174_vm8 = vweird.f32 %v2165_v51  ;;  %2759 = vmatpush.msra.mxu3 %v6133_v3  ;;  %2899 = vmatpush.msra.mxu0 %v6164_v25 }
 0x83b   :  { %v2181_v9 = vor.u32 1.1754944e-38, %v2180_v11  ;;  %vm2179_vm10 = vcmp.eq.f32.partialorder %v2178_v1, 8.507059e+37  ;;  %2415 = vmatpush.msrb.mxu1 %v6138_v5 }
 0x83c   :  { %v1983_v50 = vsel %vm1915_vm2, %v1965_v17, 0.0  ;;  %v1969_v57 = vmul.f32 %v5167_v0, %v1968_v55  ;;  %2760 = vmatpush.msra.mxu3 %v6138_v5 }
 0x83d   :  { %4940 = vmatmul.msk.f32.gmra.mxu2 %vm170_vm1, %v1983_v50  ;;  %2416 = vmatpush.msrb.mxu1 %v6148_v41 }
 0x83e   :  { %v1970_v54 = vadd.f32 %v5167_v0, %v1969_v57  ;;  %v6119_v20 = vpop.f32.mrf.mxu3  ;;  %2761 = vmatpush.msra.mxu3 %v6148_v41 }
 0x83f   :  { %v5169_v22 = vpop.eup %5168  ;;  %vm2162_vm14 = vcmp.gt.f32.partialorder %v6119_v20, 0.0  ;;  %2417 = vmatpush.msrb.mxu1 %v6164_v25 }
 0x840   :  { %v1974_v56 = vsel %vm1973_vm5, %v5167_v0, %v1970_v54  ;;  %v2170_v40 = vmul.f32 %v5169_v22, %v2165_v51  ;;  %v6125_v2 = vsel %vm2162_vm14, %v6119_v20, 1.0  ;;  %vm2175_vm2 = vweird.f32 %v5169_v22  ;;  %2762 = vmatpush.msra.mxu3 %v6164_v25  ;;  %v2126_v55 = vpop.f32.mrf.mxu1 }
 0x841   :  { %v1979_v61 = vsel %vm1976_vm6, %v1978_v43, %v1974_v56  ;;  %5170 = vrcp.f32 %v6125_v2  ;;  %v2195_v32 = vand.u32 2147483648, %v6125_v2  ;;  %v2193_v33 = vand.u32 2147483647, %v6125_v2  ;;  %2483 = vmatpush.msra.mxu1 %v6133_v3 }
 0x842   :  { %v1980_v4 = vmul.f32 %v1979_v61, %v1881_v53  ;;  %v2171_v47 = vsub.f32 1.0, %v2170_v40  ;;  %vm2189_vm7 = vweird.f32 %v6125_v2 }
 0x843   :  { %v2196_v10 = vor.u32 1.1754944e-38, %v2195_v32  ;;  %vm2194_vm13 = vcmp.eq.f32.partialorder %v2193_v33, 8.507059e+37  ;;  %2484 = vmatpush.msra.mxu1 %v6138_v5  ;;  %v5370_v33 = vld [vmem:[%s6987_s9] ss:$0 sm:$0xff] }
 0x844   :  { %v1984_v14 = vsel %vm1916_vm15, %v1980_v4, 0.0  ;;  %v2172_v35 = vmul.f32 %v5169_v22, %v2171_v47  ;;  %vm2176_vm15 = vmor %vm2174_vm8, %vm2175_vm2 }
 0x845   :  { %4941 = vmatmul.msk.f32.gmra.mxu2 %vm170_vm1, %v1984_v14  ;;  %2485 = vmatpush.msra.mxu1 %v6148_v41 }
 0x846   :  { %v2173_v36 = vadd.f32 %v5169_v22, %v2172_v35  ;;  %v6140_v16 = vpop.f32.mrf.mxu3  ;;  %v1770_v35 = vpop.f32.mrf.mxu2 }
 0x847   :  { %v5171_v15 = vpop.eup %5170  ;;  %vm2163_vm3 = vcmp.gt.f32.partialorder %v6140_v16, 0.0  ;;  %2486 = vmatpush.msra.mxu1 %v6164_v25 }
 0x848   :  { %v2177_v19 = vsel %vm2176_vm15, %v5169_v22, %v2173_v36  ;;  %v2185_v24 = vmul.f32 %v5171_v15, %v6125_v2  ;;  %v6156_v21 = vsel %vm2163_vm3, %v6140_v16, 1.0  ;;  %vm2190_vm11 = vweird.f32 %v5171_v15  ;;  %v2129_v47 = vpop.f32.mrf.mxu1 }
 0x849   :  { %v2182_v23 = vsel %vm2179_vm10, %v2181_v9, %v2177_v19  ;;  %5172 = vrcp.f32 %v6156_v21  ;;  %v2210_v45 = vand.u32 2147483648, %v6156_v21  ;;  %v2208_v52 = vand.u32 2147483647, %v6156_v21 }
 0x84a   :  { %v2183_v8 = vmul.f32 %v2182_v23, %v2120_v6  ;;  %v2186_v31 = vsub.f32 1.0, %v2185_v24  ;;  %vm2204_vm5 = vweird.f32 %v6156_v21  ;;  %v6221_v23 = vld [vmem:[%s6991_s13] ss:$0 sm:$0xff] }
 0x84b   :  { %v2211_v62 = vor.u32 1.1754944e-38, %v2210_v45  ;;  %vm2209_vm6 = vcmp.eq.f32.partialorder %v2208_v52, 8.507059e+37 }
 0x84c   :  { %v2229_v7 = vsel %vm2161_vm12, %v2183_v8, 0.0  ;;  %v2187_v37 = vmul.f32 %v5171_v15, %v2186_v31  ;;  %vm2191_vm12 = vmor %vm2189_vm7, %vm2190_vm11 }
 0x84d   :  { %4955 = vmatmul.msk.f32.vlgmr.msra.gmra.mxu2 %vm170_vm1, %v2229_v7 }
 0x84e   :  { %v2188_v42 = vadd.f32 %v5171_v15, %v2187_v37  ;;  %v6180_v58 = vpop.f32.mrf.mxu3  ;;  %2828 = vmatpush.msra.mxu2 %v6133_v3  ;;  %v1773_v1 = vpop.f32.mrf.mxu2 }
 0x84f   :  { %v5173_v30 = vpop.eup %5172  ;;  %vm2164_vm9 = vcmp.gt.f32.partialorder %v6180_v58, 0.0 }
 0x850   :  { %v2192_v12 = vsel %vm2191_vm12, %v5171_v15, %v2188_v42  ;;  %v2200_v59 = vmul.f32 %v5173_v30, %v6156_v21  ;;  %v2168_v60 = vsel %vm2164_vm9, %v6180_v58, 1.0  ;;  %2829 = vmatpush.msra.mxu2 %v6138_v5  ;;  %vm2205_vm4 = vweird.f32 %v5173_v30 }
 0x851   :  { %v2197_v63 = vsel %vm2194_vm13, %v2196_v10, %v2192_v12  ;;  %5174 = vrcp.f32 %v2168_v60  ;;  %v2225_v22 = vand.u32 2147483648, %v2168_v60  ;;  %v2223_v40 = vand.u32 2147483647, %v2168_v60 }
 0x852   :  { %v2198_v0 = vmul.f32 %v2197_v63, %v2123_v34  ;;  %v2201_v49 = vsub.f32 1.0, %v2200_v59  ;;  %2830 = vmatpush.msra.mxu2 %v6148_v41  ;;  %vm2219_vm8 = vweird.f32 %v2168_v60  ;;  %v1771_v21 = vadd.f32 %v1770_v35, %v6095_v18 }
 0x853   :  { %v2226_v61 = vor.u32 1.1754944e-38, %v2225_v22  ;;  %vm2224_vm10 = vcmp.eq.f32.partialorder %v2223_v40, 8.507059e+37  ;;  %v1774_v18 = vadd.f32 %v1773_v1, %v6097_v29 }
 0x854   :  { %v2230_v26 = vsel %vm2162_vm14, %v2198_v0, 0.0  ;;  %v2202_v51 = vmul.f32 %v5173_v30, %v2201_v49  ;;  %2831 = vmatpush.msra.mxu2 %v6164_v25  ;;  %vm2206_vm14 = vmor %vm2204_vm5, %vm2205_vm4 }
 0x855   :  { %4956 = vmatmul.msk.f32.gmra.mxu2 %vm170_vm1, %v2230_v26 }
 0x856   :  { %v2203_v53 = vadd.f32 %v5173_v30, %v2202_v51  ;;  %v1776_v36 = vpop.f32.mrf.mxu2 }
 0x857   :  { %v5175_v17 = vpop.eup %5174  ;;  %v1777_v10 = vadd.f32 %v1776_v36, %v6099_v46  ;;  %v6242_v46 = vld [vmem:[%s6989_s11] ss:$0 sm:$0xff]  ;;  %s5412_s11 = smov 96  }
 0x858   :  { %v2207_v50 = vsel %vm2206_vm14, %v5173_v30, %v2203_v53  ;;  %v2215_v57 = vmul.f32 %v5175_v17, %v2168_v60  ;;  %vm2220_vm2 = vweird.f32 %v5175_v17  ;;  %v1254_v51 = vadd.f32 %v6242_v46, %v5932_v28 }
 0x859   :  { %v2212_v38 = vsel %vm2209_vm6, %v2211_v62, %v2207_v50  ;;  %vm2221_vm15 = vmor %vm2219_vm8, %vm2220_vm2  ;;  %v1257_v62 = vadd.f32 %v6242_v46, %v5938_v44 }
 0x85a   :  { %v2213_v54 = vmul.f32 %v2212_v38, %v2126_v55  ;;  %v2216_v20 = vsub.f32 1.0, %v2215_v57  ;;  %v2394_v53 = vrot.slane %v1254_v51, 1  ;;  %v2530_v55 = vrot.slane %v1254_v51, 3 }
 0x85b   :  { %v2599_v50 = vrot.slane %v1254_v51, 4  ;;  %v2668_v57 = vrot.slane %v1254_v51, 5  ;;  %v2737_v38 = vrot.slane %v1254_v51, 6 }
 0x85c   :  { %v2231_v43 = vsel %vm2163_vm3, %v2213_v54, 0.0  ;;  %v2217_v56 = vmul.f32 %v5175_v17, %v2216_v20 }
 0x85d   :  { %4957 = vmatmul.msk.f32.gmra.mxu2 %vm170_vm1, %v2231_v43 }
 0x85e   :  { %v2218_v2 = vadd.f32 %v5175_v17, %v2217_v56  ;;  %v1779_v16 = vpop.f32.mrf.mxu2 }
 0x85f   :  { %v1780_v63 = vadd.f32 %v1779_v16, %v6101_v13 }
 0x860   :  { %v2222_v4 = vsel %vm2221_vm15, %v5175_v17, %v2218_v2  ;;  %v2461_v17 = vrot.slane %v1254_v51, 2 }
 0x861   :  { %v2227_v6 = vsel %vm2224_vm10, %v2226_v61, %v2222_v4 }
 0x862   :  { %v2228_v11 = vmul.f32 %v2227_v6, %v2129_v47  ;;  %v2806_v47 = vrot.slane %v1254_v51, 7 }
 0x864   :  { %v2232_v14 = vsel %vm2164_vm9, %v2228_v11, 0.0 }
 0x865   :  { %4958 = vmatmul.msk.f32.gmra.mxu2 %vm170_vm1, %v2232_v14  ;;  %vm2326_vm1 = vcmask 1040384  }
 0x8af   :  { %v2014_v15 = vpop.f32.mrf.mxu2 }
 0x8b0   :  { %v2026_v31 = vadd.f32 %v2014_v15, %v1771_v21  ;;  %v2944_v15 = vrot.slane %v1257_v62, 1  ;;  %v3149_v21 = vrot.slane %v1257_v62, 4 }
 0x8b5   :  { %v2351_v8 = vpop.f32.mrf.mxu1 }
 0x8b6   :  { %v2352_v32 = vadd.f32 %v6221_v23, %v2351_v8  ;;  %v3218_v8 = vrot.slane %v1257_v62, 5 }
 0x8b8   :  { %v2017_v9 = vpop.f32.mrf.mxu2  ;;  %2375 = vrot.lane.b32.xlu1 %v2352_v32, %s5411_s21 }
 0x8b9   :  { %v2027_v39 = vadd.f32 %v2017_v9, %v1774_v18 }
 0x8c0   :  { %v2020_v19 = vpop.f32.mrf.mxu2 }
 0x8c1   :  { %v2028_v12 = vadd.f32 %v2020_v19, %v1777_v10  ;;  %v3011_v19 = vrot.slane %v1257_v62, 2 }
 0x8c8   :  { %v2023_v24 = vpop.f32.mrf.mxu2 }
 0x8c9   :  { %v2029_v0 = vadd.f32 %v2023_v24, %v1780_v63  ;;  %v3080_v24 = vrot.slane %v1257_v62, 3 }
 0x8d0   :  { %v2262_v7 = vpop.f32.mrf.mxu2 }
 0x8d1   :  { %v2274_v37 = vadd.f32 %v2262_v7, %v2026_v31  ;;  %v3287_v31 = vrot.slane %v1257_v62, 6 }
 0x8d3   :  { %v2278_v34 = vadd.f32 %v5370_v33, %v2274_v37 }
 0x8d5   :  { %4959 = vmatmul.msk.f32.vlgmr.msrb.gmra.mxu0 %vm98_vm0, %v2278_v34 }
 0x8d6   :  { %3171 = vmatpush.msrb.mxu0 %v6133_v3 }
 0x8d8   :  { %v2265_v42 = vpop.f32.mrf.mxu2  ;;  %3172 = vmatpush.msrb.mxu0 %v6138_v5 }
 0x8d9   :  { %v2275_v58 = vadd.f32 %v2265_v42, %v2027_v39 }
 0x8da   :  { %3173 = vmatpush.msrb.mxu0 %v6148_v41 }
 0x8db   :  { %v2279_v30 = vadd.f32 %v5370_v33, %v2275_v58 }
 0x8dc   :  { %3174 = vmatpush.msrb.mxu0 %v6164_v25 }
 0x8dd   :  { %4960 = vmatmul.msk.f32.gmra.mxu0 %vm98_vm0, %v2279_v30  ;;  %v1260_v30 = vadd.f32 %v6242_v46, %v5942_v27 }
 0x8e0   :  { %v2268_v29 = vpop.f32.mrf.mxu2 }
 0x8e1   :  { %v2276_v59 = vadd.f32 %v2268_v29, %v2028_v12 }
 0x8e3   :  { %v2280_v60 = vadd.f32 %v5370_v33, %v2276_v59 }
 0x8e5   :  { %4961 = vmatmul.msk.f32.gmra.mxu0 %vm98_vm0, %v2280_v60 }
 0x8e8   :  { %v2271_v49 = vpop.f32.mrf.mxu2 }
 0x8e9   :  { %v2277_v45 = vadd.f32 %v2271_v49, %v2029_v0 }
 0x8eb   :  { %v2281_v26 = vadd.f32 %v5370_v33, %v2277_v45 }
 0x8ed   :  { %4962 = vmatmul.msk.f32.gmra.mxu0 %vm98_vm0, %v2281_v26 }
 0x952   :  { %v2311_v52 = vpop.f32.mrf.mxu0 }
 0x953   :  { %v2312_v13 = vadd.f32 %v6242_v46, %v2311_v52  ;;  %v3561_v52 = vrot.slane %v1260_v30, 2 }
 0x955   :  { %v2324_v54 = vrot.slane %v2312_v13, 7  ;;  %v6250_v20 = vsel %vm2326_vm1, %v2394_v53, %v2312_v13  ;;  %v2463_v22 = vrot.slane %v2312_v13, 1  ;;  %v2532_v43 = vrot.slane %v2312_v13, 2 }
 0x956   :  { %v2601_v28 = vrot.slane %v2312_v13, 3  ;;  %v2670_v56 = vrot.slane %v2312_v13, 4  ;;  %v2739_v40 = vrot.slane %v2312_v13, 5  ;;  %v2808_v2 = vrot.slane %v2312_v13, 6 }
 0x957   :  { %v6253_v61 = vsel %vm2326_vm1, %v1254_v51, %v2324_v54  ;;  %v6256_v4 = vsel %vm2326_vm1, %v2461_v17, %v2463_v22  ;;  %v6259_v44 = vsel %vm2326_vm1, %v2530_v55, %v2532_v43  ;;  %v3494_v51 = vrot.slane %v1260_v30, 1 }
 0x958   :  { %v2354_v6 = vadd.f32 %v2352_v32, %v6253_v61  ;;  %v6263_v11 = vsel %vm2326_vm1, %v2599_v50, %v2601_v28  ;;  %v6266_v14 = vsel %vm2326_vm1, %v2668_v57, %v2670_v56  ;;  %v6269_v35 = vsel %vm2326_vm1, %v2737_v38, %v2739_v40 }
 0x959   :  { %v6272_v1 = vsel %vm2326_vm1, %v2806_v47, %v2808_v2  ;;  %v3356_v32 = vrot.slane %v1257_v62, 7  ;;  %v6304_v13 = vadd.f32 %v6242_v46, %v5946_v48  ;;  %v3630_v53 = vrot.slane %v1260_v30, 3 }
 0x95a   :  { %v2314_v36 = vpop.f32.mrf.mxu0  ;;  %v4963_v16 = vmul.f32 -1.442695, %v2354_v6  ;;  %v3699_v17 = vrot.slane %v1260_v30, 4  ;;  %v3768_v54 = vrot.slane %v1260_v30, 5  ;;  %v3837_v43 = vrot.slane %v1260_v30, 6 }
 0x95b   :  { %v2315_v9 = vadd.f32 %v6242_v46, %v2314_v36  ;;  %v3906_v6 = vrot.slane %v1260_v30, 7 }
 0x95c   :  { %5176 = vpow2.f32 %v4963_v16 }
 0x95d   :  { %v2876_v7 = vrot.slane %v2315_v9, 7  ;;  %v6276_v37 = vsel %vm2326_vm1, %v2944_v15, %v2315_v9  ;;  %v3013_v33 = vrot.slane %v2315_v9, 1  ;;  %v3082_v34 = vrot.slane %v2315_v9, 2 }
 0x95e   :  { %v3151_v18 = vrot.slane %v2315_v9, 3  ;;  %v3220_v39 = vrot.slane %v2315_v9, 4  ;;  %v3289_v42 = vrot.slane %v2315_v9, 5  ;;  %v3358_v58 = vrot.slane %v2315_v9, 6 }
 0x95f   :  { %v6281_v10 = vsel %vm2326_vm1, %v1257_v62, %v2876_v7  ;;  %v6284_v12 = vsel %vm2326_vm1, %v3011_v19, %v3013_v33  ;;  %v6287_v29 = vsel %vm2326_vm1, %v3080_v24, %v3082_v34  ;;  %v4044_v9 = vrot.slane %v6304_v13, 1 }
 0x960   :  { %v6290_v59 = vsel %vm2326_vm1, %v3149_v21, %v3151_v18  ;;  %v6293_v60 = vsel %vm2326_vm1, %v3218_v8, %v3220_v39  ;;  %v6296_v63 = vsel %vm2326_vm1, %v3287_v31, %v3289_v42  ;;  %v6299_v27 = vsel %vm2326_vm1, %v3356_v32, %v3358_v58 }
 0x961   :  { %v4111_v19 = vrot.slane %v6304_v13, 2  ;;  %v4180_v24 = vrot.slane %v6304_v13, 3  ;;  %v4249_v32 = vrot.slane %v6304_v13, 4  ;;  %v4318_v7 = vrot.slane %v6304_v13, 5 }
 0x962   :  { %v5177_v0 = vpop.eup %5176  ;;  %v2317_v49 = vpop.f32.mrf.mxu0  ;;  %v4387_v18 = vrot.slane %v6304_v13, 6  ;;  %v4456_v39 = vrot.slane %v6304_v13, 7 }
 0x963   :  { %v2318_v45 = vadd.f32 %v6242_v46, %v2317_v49  ;;  %v2358_v26 = vadd.f32 1.0, %v5177_v0 }
 0x965   :  { %5178 = vrcp.f32 %v2358_v26  ;;  %v3426_v55 = vrot.slane %v2318_v45, 7  ;;  %v6307_v62 = vsel %vm2326_vm1, %v3494_v51, %v2318_v45  ;;  %v3563_v50 = vrot.slane %v2318_v45, 1 }
 0x966   :  { %v3632_v57 = vrot.slane %v2318_v45, 2  ;;  %v3701_v38 = vrot.slane %v2318_v45, 3  ;;  %v3770_v22 = vrot.slane %v2318_v45, 4  ;;  %v3839_v40 = vrot.slane %v2318_v45, 5 }
 0x967   :  { %v6310_v28 = vsel %vm2326_vm1, %v1260_v30, %v3426_v55  ;;  %v6313_v56 = vsel %vm2326_vm1, %v3561_v52, %v3563_v50  ;;  %v3908_v36 = vrot.slane %v2318_v45, 6  ;;  %v2368_v34 = vand.u32 2147483647, %v2358_v26 }
 0x968   :  { %v6316_v48 = vsel %vm2326_vm1, %v3630_v53, %v3632_v57  ;;  %v6319_v2 = vsel %vm2326_vm1, %v3699_v17, %v3701_v38  ;;  %v6322_v47 = vsel %vm2326_vm1, %v3768_v54, %v3770_v22  ;;  %v6325_v15 = vsel %vm2326_vm1, %v3837_v43, %v3839_v40  ;;  %v2376_v43 = vpop.permute.xlu1 %2375 }
 0x969   :  { %v6334_v31 = vsel %vm2326_vm1, %v3906_v6, %v3908_v36  ;;  %v2370_v42 = vand.u32 2147483648, %v2358_v26  ;;  %vm2364_vm11 = vweird.f32 %v2358_v26  ;;  %vm2369_vm12 = vcmp.eq.f32.partialorder %v2368_v34, 8.507059e+37 }
 0x96a   :  { %v2320_v16 = vpop.f32.mrf.mxu0 }
 0x96b   :  { %v5179_v21 = vpop.eup %5178  ;;  %v6331_v8 = vadd.f32 %v6242_v46, %v2320_v16  ;;  %v2371_v40 = vor.u32 1.1754944e-38, %v2370_v42 }
 0x96c   :  { %v2360_v33 = vmul.f32 %v5179_v21, %v2358_v26  ;;  %vm2365_vm3 = vweird.f32 %v5179_v21 }
 0x96d   :  { %v6342_v58 = vsel %vm2326_vm1, %v4044_v9, %v6331_v8  ;;  %v4113_v46 = vrot.slane %v6331_v8, 1  ;;  %v4182_v30 = vrot.slane %v6331_v8, 2  ;;  %v4251_v49 = vrot.slane %v6331_v8, 3  ;;  %vm2366_vm7 = vmor %vm2364_vm11, %vm2365_vm3 }
 0x96e   :  { %v2361_v0 = vsub.f32 1.0, %v2360_v33  ;;  %v4320_v45 = vrot.slane %v6331_v8, 4  ;;  %v4389_v51 = vrot.slane %v6331_v8, 5  ;;  %v4458_v17 = vrot.slane %v6331_v8, 6 }
 0x96f   :  { %v6350_v52 = vsel %vm2326_vm1, %v4111_v19, %v4113_v46  ;;  %v6353_v53 = vsel %vm2326_vm1, %v4180_v24, %v4182_v30  ;;  %v6357_v50 = vsel %vm2326_vm1, %v4249_v32, %v4251_v49 }
 0x970   :  { %v2362_v55 = vmul.f32 %v5179_v21, %v2361_v0  ;;  %v6360_v57 = vsel %vm2326_vm1, %v4318_v7, %v4320_v45  ;;  %v6363_v38 = vsel %vm2326_vm1, %v4387_v18, %v4389_v51  ;;  %v6366_v54 = vsel %vm2326_vm1, %v4456_v39, %v4458_v17 }
 0x972   :  { %v2363_v22 = vadd.f32 %v5179_v21, %v2362_v55 }
 0x974   :  { %v2367_v6 = vsel %vm2366_vm7, %v5179_v21, %v2363_v22 }
 0x975   :  { %v2372_v36 = vsel %vm2369_vm12, %v2371_v40, %v2367_v6 }
 0x976   :  { %v2378_v16 = vmul.f32 %v2376_v43, %v2372_v36  ;;  %v2385_v32 = vsub.f32 1.0, %v2372_v36  ;;  %v2391_v26 = vmul.f32 0.0, %v2372_v36 }
 0x978   :  { %2380 = vrot.lane.b32.xlu0 %v2378_v16, %s5411_s21 }
 0x9ea   :  { %v2381_v9 = vpop.permute.xlu0 %2380 }
 0x9eb   :  { %v2383_v19 = vadd.f32 %v2381_v9, %v6253_v61 }
 0x9ed   :  { %5180 = vtanh.f32 %v2383_v19 }
 0x9f3   :  { %v5181_v24 = vpop.eup %5180 }
 0x9f4   :  { %2387 = vrot.lane.b32.xlu2 %v5181_v24, %s5412_s11 }
 0xa4e   :  { %v2388_v7 = vpop.permute.xlu2 %2387 }
 0xa4f   :  { %v2390_v33 = vmul.f32 %v2388_v7, %v2385_v32 }
 0xa51   :  { %v2392_v18 = vadd.f32 %v2391_v26, %v2390_v33 }
 0xa53   :  { %2398 = vrot.lane.b32.xlu0 %v2392_v18, %s5412_s11 }
 0xac5   :  { %v2399_v21 = vpop.permute.xlu0 %2398 }
 0xac6   :  { %4964 = vmatmul.msk.f32.vlgmr.msrb.gmra.mxu1 %vm98_vm0, %v2399_v21 }
 0xac7   :  { %2690 = vmatpush.msrb.mxu1 %v6133_v3 }
 0xac9   :  { %2691 = vmatpush.msrb.mxu1 %v6138_v5 }
 0xacb   :  { %2692 = vmatpush.msrb.mxu1 %v6148_v41 }
 0xacd   :  { %2693 = vmatpush.msrb.mxu1 %v6164_v25 }
 0xb43   :  { %v2419_v61 = vpop.f32.mrf.mxu1 }
 0xb44   :  { %v2420_v34 = vadd.f32 %v6221_v23, %v2419_v61 }
 0xb46   :  { %2443 = vrot.lane.b32.xlu1 %v2420_v34, %s5411_s21  ;;  %v2422_v39 = vadd.f32 %v2420_v34, %v6250_v20 }
 0xb48   :  { %v4965_v42 = vmul.f32 -1.442695, %v2422_v39 }
 0xb4a   :  { %5182 = vpow2.f32 %v4965_v42 }
 0xb50   :  { %v5183_v46 = vpop.eup %5182 }
 0xb51   :  { %v2426_v30 = vadd.f32 1.0, %v5183_v46 }
 0xb53   :  { %5184 = vrcp.f32 %v2426_v30  ;;  %v2438_v55 = vand.u32 2147483648, %v2426_v30  ;;  %vm2432_vm13 = vweird.f32 %v2426_v30  ;;  %v2436_v22 = vand.u32 2147483647, %v2426_v30 }
 0xb55   :  { %v2439_v40 = vor.u32 1.1754944e-38, %v2438_v55  ;;  %vm2437_vm5 = vcmp.eq.f32.partialorder %v2436_v22, 8.507059e+37 }
 0xb59   :  { %v5185_v0 = vpop.eup %5184 }
 0xb5a   :  { %v2428_v49 = vmul.f32 %v5185_v0, %v2426_v30  ;;  %vm2433_vm9 = vweird.f32 %v5185_v0 }
 0xb5b   :  { %vm2434_vm4 = vmor %vm2432_vm13, %vm2433_vm9 }
 0xb5c   :  { %v2429_v45 = vsub.f32 1.0, %v2428_v49 }
 0xb5e   :  { %v2430_v51 = vmul.f32 %v5185_v0, %v2429_v45 }
 0xb60   :  { %v2431_v17 = vadd.f32 %v5185_v0, %v2430_v51 }
 0xb62   :  { %v2435_v43 = vsel %vm2434_vm4, %v5185_v0, %v2431_v17 }
 0xb63   :  { %v2440_v36 = vsel %vm2437_vm5, %v2439_v40, %v2435_v43 }
 0xb64   :  { %v2453_v32 = vsub.f32 1.0, %v2440_v36  ;;  %v2459_v26 = vmul.f32 %v2440_v36, %v2392_v18 }
 0xbb8   :  { %v2444_v6 = vpop.permute.xlu1 %2443 }
 0xbb9   :  { %v2446_v16 = vmul.f32 %v2444_v6, %v2440_v36 }
 0xbbb   :  { %2448 = vrot.lane.b32.xlu2 %v2446_v16, %s5411_s21 }
 0xc15   :  { %v2449_v9 = vpop.permute.xlu2 %2448 }
 0xc16   :  { %v2451_v19 = vadd.f32 %v2449_v9, %v6250_v20 }
 0xc18   :  { %5186 = vtanh.f32 %v2451_v19 }
 0xc1e   :  { %v5187_v24 = vpop.eup %5186 }
 0xc1f   :  { %2455 = vrot.lane.b32.xlu0 %v5187_v24, %s5412_s11 }
 0xc91   :  { %v2456_v7 = vpop.permute.xlu0 %2455 }
 0xc92   :  { %v2458_v33 = vmul.f32 %v2456_v7, %v2453_v32 }
 0xc94   :  { %v2460_v21 = vadd.f32 %v2459_v26, %v2458_v33 }
 0xc96   :  { %2467 = vrot.lane.b32.xlu1 %v2460_v21, %s5412_s11 }
 0xd08   :  { %v2468_v61 = vpop.permute.xlu1 %2467 }
 0xd09   :  { %4966 = vmatmul.msk.f32.vlgmr.msra.gmra.mxu1 %vm98_vm0, %v2468_v61 }
 0xd0a   :  { %2964 = vmatpush.msra.mxu1 %v6133_v3 }
 0xd0c   :  { %2965 = vmatpush.msra.mxu1 %v6138_v5 }
 0xd0e   :  { %2966 = vmatpush.msra.mxu1 %v6148_v41 }
 0xd10   :  { %2967 = vmatpush.msra.mxu1 %v6164_v25 }
 0xd86   :  { %v2488_v20 = vpop.f32.mrf.mxu1 }
 0xd87   :  { %v2489_v34 = vadd.f32 %v6221_v23, %v2488_v20 }
 0xd89   :  { %2512 = vrot.lane.b32.xlu2 %v2489_v34, %s5411_s21  ;;  %v2491_v18 = vadd.f32 %v2489_v34, %v6256_v4 }
 0xd8b   :  { %v4967_v39 = vmul.f32 -1.442695, %v2491_v18 }
 0xd8d   :  { %5188 = vpow2.f32 %v4967_v39 }
 0xd93   :  { %v5189_v42 = vpop.eup %5188 }
 0xd94   :  { %v2495_v46 = vadd.f32 1.0, %v5189_v42 }
 0xd96   :  { %5190 = vrcp.f32 %v2495_v46  ;;  %v2507_v17 = vand.u32 2147483648, %v2495_v46  ;;  %vm2501_vm6 = vweird.f32 %v2495_v46  ;;  %v2505_v55 = vand.u32 2147483647, %v2495_v46 }
 0xd98   :  { %v2508_v43 = vor.u32 1.1754944e-38, %v2507_v17  ;;  %vm2506_vm8 = vcmp.eq.f32.partialorder %v2505_v55, 8.507059e+37 }
 0xd9c   :  { %v5191_v30 = vpop.eup %5190 }
 0xd9d   :  { %v2497_v0 = vmul.f32 %v5191_v30, %v2495_v46  ;;  %vm2502_vm14 = vweird.f32 %v5191_v30 }
 0xd9e   :  { %vm2503_vm2 = vmor %vm2501_vm6, %vm2502_vm14 }
 0xd9f   :  { %v2498_v49 = vsub.f32 1.0, %v2497_v0 }
 0xda1   :  { %v2499_v45 = vmul.f32 %v5191_v30, %v2498_v49 }
 0xda3   :  { %v2500_v51 = vadd.f32 %v5191_v30, %v2499_v45 }
 0xda5   :  { %v2504_v22 = vsel %vm2503_vm2, %v5191_v30, %v2500_v51 }
 0xda6   :  { %v2509_v6 = vsel %vm2506_vm8, %v2508_v43, %v2504_v22 }
 0xda7   :  { %v2522_v24 = vsub.f32 1.0, %v2509_v6  ;;  %v2528_v7 = vmul.f32 %v2509_v6, %v2460_v21 }
 0xde3   :  { %v2513_v40 = vpop.permute.xlu2 %2512 }
 0xde4   :  { %v2515_v36 = vmul.f32 %v2513_v40, %v2509_v6 }
 0xde6   :  { %2517 = vrot.lane.b32.xlu0 %v2515_v36, %s5411_s21 }
 0xe58   :  { %v2518_v16 = vpop.permute.xlu0 %2517 }
 0xe59   :  { %v2520_v9 = vadd.f32 %v2518_v16, %v6256_v4 }
 0xe5b   :  { %5192 = vtanh.f32 %v2520_v9 }
 0xe61   :  { %v5193_v19 = vpop.eup %5192 }
 0xe62   :  { %2524 = vrot.lane.b32.xlu1 %v5193_v19, %s5412_s11 }
 0xed4   :  { %v2525_v32 = vpop.permute.xlu1 %2524 }
 0xed5   :  { %v2527_v26 = vmul.f32 %v2525_v32, %v2522_v24 }
 0xed7   :  { %v2529_v33 = vadd.f32 %v2528_v7, %v2527_v26 }
 0xed9   :  { %2536 = vrot.lane.b32.xlu2 %v2529_v33, %s5412_s11 }
 0xf33   :  { %v2537_v61 = vpop.permute.xlu2 %2536 }
 0xf34   :  { %4968 = vmatmul.msk.f32.vlgmr.msrb.gmra.mxu3 %vm98_vm0, %v2537_v61 }
 0xf35   :  { %3033 = vmatpush.msrb.mxu3 %v6133_v3 }
 0xf37   :  { %3034 = vmatpush.msrb.mxu3 %v6138_v5 }
 0xf39   :  { %3035 = vmatpush.msrb.mxu3 %v6148_v41 }
 0xf3b   :  { %3036 = vmatpush.msrb.mxu3 %v6164_v25 }
 0xfb7   :  { %v2557_v4 = vpop.f32.mrf.mxu3 }
 0xfb8   :  { %v2558_v20 = vadd.f32 %v6221_v23, %v2557_v4 }
 0xfba   :  { %2581 = vrot.lane.b32.xlu0 %v2558_v20, %s5411_s21  ;;  %v2560_v21 = vadd.f32 %v2558_v20, %v6259_v44 }
 0xfbc   :  { %v4969_v34 = vmul.f32 -1.442695, %v2560_v21 }
 0xfbe   :  { %5194 = vpow2.f32 %v4969_v34 }
 0xfc4   :  { %v5195_v18 = vpop.eup %5194 }
 0xfc5   :  { %v2564_v39 = vadd.f32 1.0, %v5195_v18 }
 0xfc7   :  { %5196 = vrcp.f32 %v2564_v39  ;;  %v2576_v45 = vand.u32 2147483648, %v2564_v39  ;;  %vm2570_vm10 = vweird.f32 %v2564_v39  ;;  %v2574_v51 = vand.u32 2147483647, %v2564_v39 }
 0xfc9   :  { %v2577_v55 = vor.u32 1.1754944e-38, %v2576_v45  ;;  %vm2575_vm11 = vcmp.eq.f32.partialorder %v2574_v51, 8.507059e+37 }
 0xfcd   :  { %v5197_v42 = vpop.eup %5196 }
 0xfce   :  { %v2566_v46 = vmul.f32 %v5197_v42, %v2564_v39  ;;  %vm2571_vm15 = vweird.f32 %v5197_v42 }
 0xfcf   :  { %vm2572_vm3 = vmor %vm2570_vm10, %vm2571_vm15 }
 0xfd0   :  { %v2567_v30 = vsub.f32 1.0, %v2566_v46 }
 0xfd2   :  { %v2568_v0 = vmul.f32 %v5197_v42, %v2567_v30 }
 0xfd4   :  { %v2569_v49 = vadd.f32 %v5197_v42, %v2568_v0 }
 0xfd6   :  { %v2573_v17 = vsel %vm2572_vm3, %v5197_v42, %v2569_v49 }
 0xfd7   :  { %v2578_v43 = vsel %vm2575_vm11, %v2577_v55, %v2573_v17 }
 0xfd8   :  { %v2591_v9 = vsub.f32 1.0, %v2578_v43  ;;  %v2597_v24 = vmul.f32 %v2578_v43, %v2529_v33 }
0x102c   :  { %v2582_v22 = vpop.permute.xlu0 %2581 }
0x102d   :  { %v2584_v40 = vmul.f32 %v2582_v22, %v2578_v43 }
0x102f   :  { %2586 = vrot.lane.b32.xlu1 %v2584_v40, %s5411_s21 }
0x10a1   :  { %v2587_v6 = vpop.permute.xlu1 %2586 }
0x10a2   :  { %v2589_v36 = vadd.f32 %v2587_v6, %v6259_v44 }
0x10a4   :  { %5198 = vtanh.f32 %v2589_v36 }
0x10aa   :  { %v5199_v16 = vpop.eup %5198 }
0x10ab   :  { %2593 = vrot.lane.b32.xlu2 %v5199_v16, %s5412_s11 }
0x1105   :  { %v2594_v19 = vpop.permute.xlu2 %2593 }
0x1106   :  { %v2596_v32 = vmul.f32 %v2594_v19, %v2591_v9 }
0x1108   :  { %v2598_v7 = vadd.f32 %v2597_v24, %v2596_v32 }
0x110a   :  { %2605 = vrot.lane.b32.xlu0 %v2598_v7, %s5412_s11 }
0x117c   :  { %v2606_v26 = vpop.permute.xlu0 %2605 }
0x117d   :  { %4970 = vmatmul.msk.f32.vlgmr.msrb.gmra.mxu2 %vm98_vm0, %v2606_v26 }
0x117e   :  { %3102 = vmatpush.msrb.mxu2 %v6133_v3 }
0x1180   :  { %3103 = vmatpush.msrb.mxu2 %v6138_v5 }
0x1182   :  { %3104 = vmatpush.msrb.mxu2 %v6148_v41 }
0x1184   :  { %3105 = vmatpush.msrb.mxu2 %v6164_v25 }
0x1200   :  { %v2626_v44 = vpop.f32.mrf.mxu2 }
0x1201   :  { %v2627_v61 = vadd.f32 %v6221_v23, %v2626_v44 }
0x1203   :  { %2650 = vrot.lane.b32.xlu1 %v2627_v61, %s5411_s21  ;;  %v2629_v33 = vadd.f32 %v2627_v61, %v6263_v11 }
0x1205   :  { %v4971_v4 = vmul.f32 -1.442695, %v2629_v33 }
0x1207   :  { %5200 = vpow2.f32 %v4971_v4 }
0x120d   :  { %v5201_v20 = vpop.eup %5200 }
0x120e   :  { %v2633_v21 = vadd.f32 1.0, %v5201_v20 }
0x1210   :  { %5202 = vrcp.f32 %v2633_v21  ;;  %v2645_v30 = vand.u32 2147483648, %v2633_v21  ;;  %vm2639_vm12 = vweird.f32 %v2633_v21  ;;  %v2643_v0 = vand.u32 2147483647, %v2633_v21 }
0x1212   :  { %v2646_v45 = vor.u32 1.1754944e-38, %v2645_v30  ;;  %vm2644_vm13 = vcmp.eq.f32.partialorder %v2643_v0, 8.507059e+37 }
0x1216   :  { %v5203_v34 = vpop.eup %5202 }
0x1217   :  { %v2635_v18 = vmul.f32 %v5203_v34, %v2633_v21  ;;  %vm2640_vm7 = vweird.f32 %v5203_v34 }
0x1218   :  { %vm2641_vm9 = vmor %vm2639_vm12, %vm2640_vm7 }
0x1219   :  { %v2636_v39 = vsub.f32 1.0, %v2635_v18 }
0x121b   :  { %v2637_v42 = vmul.f32 %v5203_v34, %v2636_v39 }
0x121d   :  { %v2638_v46 = vadd.f32 %v5203_v34, %v2637_v42 }
0x121f   :  { %v2642_v49 = vsel %vm2641_vm9, %v5203_v34, %v2638_v46 }
0x1220   :  { %v2647_v17 = vsel %vm2644_vm13, %v2646_v45, %v2642_v49 }
0x1221   :  { %v2660_v6 = vsub.f32 1.0, %v2647_v17  ;;  %v2666_v16 = vmul.f32 %v2647_v17, %v2598_v7 }
0x1275   :  { %v2651_v51 = vpop.permute.xlu1 %2650 }
0x1276   :  { %v2653_v55 = vmul.f32 %v2651_v51, %v2647_v17 }
0x1278   :  { %2655 = vrot.lane.b32.xlu2 %v2653_v55, %s5411_s21 }
0x12d2   :  { %v2656_v22 = vpop.permute.xlu2 %2655 }
0x12d3   :  { %v2658_v43 = vadd.f32 %v2656_v22, %v6263_v11 }
0x12d5   :  { %5204 = vtanh.f32 %v2658_v43 }
0x12db   :  { %v5205_v40 = vpop.eup %5204 }
0x12dc   :  { %2662 = vrot.lane.b32.xlu0 %v5205_v40, %s5412_s11 }
0x134e   :  { %v2663_v36 = vpop.permute.xlu0 %2662 }
0x134f   :  { %v2665_v9 = vmul.f32 %v2663_v36, %v2660_v6 }
0x1351   :  { %v2667_v19 = vadd.f32 %v2666_v16, %v2665_v9 }
0x1353   :  { %2674 = vrot.lane.b32.xlu1 %v2667_v19, %s5412_s11 }
0x13c5   :  { %v2675_v24 = vpop.permute.xlu1 %2674 }
0x13c6   :  { %4972 = vmatmul.msk.f32.vlgmr.msrb.gmra.mxu1 %vm98_vm0, %v2675_v24 }
0x13c7   :  { %3240 = vmatpush.msrb.mxu1 %v6133_v3 }
0x13c9   :  { %3241 = vmatpush.msrb.mxu1 %v6138_v5 }
0x13cb   :  { %3242 = vmatpush.msrb.mxu1 %v6148_v41 }
0x13cd   :  { %3243 = vmatpush.msrb.mxu1 %v6164_v25 }
0x1443   :  { %v2695_v11 = vpop.f32.mrf.mxu1 }
0x1444   :  { %v2696_v32 = vadd.f32 %v6221_v23, %v2695_v11 }
0x1446   :  { %2719 = vrot.lane.b32.xlu2 %v2696_v32, %s5411_s21  ;;  %v2698_v7 = vadd.f32 %v2696_v32, %v6266_v14 }
0x1448   :  { %v4973_v26 = vmul.f32 -1.442695, %v2698_v7 }
0x144a   :  { %5206 = vpow2.f32 %v4973_v26 }
0x1450   :  { %v5207_v44 = vpop.eup %5206 }
0x1451   :  { %v2702_v61 = vadd.f32 1.0, %v5207_v44 }
0x1453   :  { %5208 = vrcp.f32 %v2702_v61  ;;  %v2714_v18 = vand.u32 2147483648, %v2702_v61  ;;  %vm2708_vm5 = vweird.f32 %v2702_v61  ;;  %v2712_v39 = vand.u32 2147483647, %v2702_v61 }
0x1455   :  { %v2715_v46 = vor.u32 1.1754944e-38, %v2714_v18  ;;  %vm2713_vm6 = vcmp.eq.f32.partialorder %v2712_v39, 8.507059e+37 }
0x1459   :  { %v5209_v33 = vpop.eup %5208 }
0x145a   :  { %v2704_v4 = vmul.f32 %v5209_v33, %v2702_v61  ;;  %vm2709_vm4 = vweird.f32 %v5209_v33 }
0x145b   :  { %vm2710_vm14 = vmor %vm2708_vm5, %vm2709_vm4 }
0x145c   :  { %v2705_v20 = vsub.f32 1.0, %v2704_v4 }
0x145e   :  { %v2706_v21 = vmul.f32 %v5209_v33, %v2705_v20 }
0x1460   :  { %v2707_v34 = vadd.f32 %v5209_v33, %v2706_v21 }
0x1462   :  { %v2711_v42 = vsel %vm2710_vm14, %v5209_v33, %v2707_v34 }
0x1463   :  { %v2716_v0 = vsel %vm2713_vm6, %v2715_v46, %v2711_v42 }
0x1464   :  { %v2729_v55 = vsub.f32 1.0, %v2716_v0  ;;  %v2735_v43 = vmul.f32 %v2716_v0, %v2667_v19 }
0x14a0   :  { %v2720_v30 = vpop.permute.xlu2 %2719 }
0x14a1   :  { %v2722_v49 = vmul.f32 %v2720_v30, %v2716_v0 }
0x14a3   :  { %2724 = vrot.lane.b32.xlu0 %v2722_v49, %s5411_s21 }
0x1515   :  { %v2725_v45 = vpop.permute.xlu0 %2724 }
0x1516   :  { %v2727_v51 = vadd.f32 %v2725_v45, %v6266_v14  ;;  %v6448_v45 = vld [vmem:[%s6990_s12 + $0x18] sm:$0xff] }
0x1518   :  { %5210 = vtanh.f32 %v2727_v51  ;;  %v6460_v51 = vld [vmem:[%s6990_s12 + $0x8] sm:$0xff] }
0x151e   :  { %v5211_v17 = vpop.eup %5210 }
0x151f   :  { %2731 = vrot.lane.b32.xlu1 %v5211_v17, %s5412_s11  ;;  %v6466_v17 = vld [vmem:[%s6990_s12] sm:$0xff] }
0x1591   :  { %v2732_v22 = vpop.permute.xlu1 %2731 }
0x1592   :  { %v2734_v40 = vmul.f32 %v2732_v22, %v2729_v55 }
0x1594   :  { %v2736_v6 = vadd.f32 %v2735_v43, %v2734_v40 }
0x1596   :  { %2743 = vrot.lane.b32.xlu2 %v2736_v6, %s5412_s11 }
0x15f0   :  { %v2744_v36 = vpop.permute.xlu2 %2743 }
0x15f1   :  { %4974 = vmatmul.msk.f32.vlgmr.msra.gmra.mxu3 %vm98_vm0, %v2744_v36 }
0x15f2   :  { %3309 = vmatpush.msra.mxu3 %v6133_v3 }
0x15f4   :  { %3310 = vmatpush.msra.mxu3 %v6138_v5 }
0x15f6   :  { %3311 = vmatpush.msra.mxu3 %v6148_v41 }
0x15f8   :  { %3312 = vmatpush.msra.mxu3 %v6164_v25 }
0x1674   :  { %v2764_v14 = vpop.f32.mrf.mxu3 }
0x1675   :  { %v2765_v16 = vadd.f32 %v6221_v23, %v2764_v14 }
0x1677   :  { %2788 = vrot.lane.b32.xlu0 %v2765_v16, %s5411_s21  ;;  %v2767_v9 = vadd.f32 %v2765_v16, %v6269_v35 }
0x1679   :  { %v4975_v19 = vmul.f32 -1.442695, %v2767_v9 }
0x167b   :  { %5212 = vpow2.f32 %v4975_v19 }
0x1681   :  { %v5213_v24 = vpop.eup %5212 }
0x1682   :  { %v2771_v11 = vadd.f32 1.0, %v5213_v24 }
0x1684   :  { %5214 = vrcp.f32 %v2771_v11  ;;  %v2783_v41 = vand.u32 2147483648, %v2771_v11  ;;  %vm2777_vm8 = vweird.f32 %v2771_v11  ;;  %v2781_v25 = vand.u32 2147483647, %v2771_v11 }
0x1686   :  { %v2784_v61 = vor.u32 1.1754944e-38, %v2783_v41  ;;  %vm2782_vm10 = vcmp.eq.f32.partialorder %v2781_v25, 8.507059e+37 }
0x168a   :  { %v5215_v32 = vpop.eup %5214 }
0x168b   :  { %v2773_v3 = vmul.f32 %v5215_v32, %v2771_v11  ;;  %vm2778_vm2 = vweird.f32 %v5215_v32 }
0x168c   :  { %vm2779_vm15 = vmor %vm2777_vm8, %vm2778_vm2 }
0x168d   :  { %v2774_v7 = vsub.f32 1.0, %v2773_v3 }
0x168f   :  { %v2775_v5 = vmul.f32 %v5215_v32, %v2774_v7 }
0x1691   :  { %v2776_v26 = vadd.f32 %v5215_v32, %v2775_v5 }
0x1693   :  { %v2780_v44 = vsel %vm2779_vm15, %v5215_v32, %v2776_v26 }
0x1694   :  { %v2785_v4 = vsel %vm2782_vm10, %v2784_v61, %v2780_v44 }
0x1695   :  { %v2798_v39 = vsub.f32 1.0, %v2785_v4  ;;  %v2804_v46 = vmul.f32 %v2785_v4, %v2736_v6 }
0x16e9   :  { %v2789_v33 = vpop.permute.xlu0 %2788 }
0x16ea   :  { %v2791_v20 = vmul.f32 %v2789_v33, %v2785_v4 }
0x16ec   :  { %2793 = vrot.lane.b32.xlu1 %v2791_v20, %s5411_s21 }
0x175e   :  { %v2794_v21 = vpop.permute.xlu1 %2793 }
0x175f   :  { %v2796_v34 = vadd.f32 %v2794_v21, %v6269_v35  ;;  %v6454_v35 = vld [vmem:[%s6990_s12 + $0x10] sm:$0xff] }
0x1761   :  { %5216 = vtanh.f32 %v2796_v34 }
0x1767   :  { %v5217_v18 = vpop.eup %5216 }
0x1768   :  { %2800 = vrot.lane.b32.xlu2 %v5217_v18, %s5412_s11 }
0x17c2   :  { %v2801_v42 = vpop.permute.xlu2 %2800 }
0x17c3   :  { %v2803_v30 = vmul.f32 %v2801_v42, %v2798_v39 }
0x17c5   :  { %v2805_v0 = vadd.f32 %v2804_v46, %v2803_v30 }
0x17c7   :  { %2812 = vrot.lane.b32.xlu0 %v2805_v0, %s5412_s11 }
0x1839   :  { %v2813_v49 = vpop.permute.xlu0 %2812 }
0x183a   :  { %4976 = vmatmul.msk.f32.vlgmr.msra.gmra.mxu2 %vm98_vm0, %v2813_v49 }
0x183b   :  { %3378 = vmatpush.msra.mxu2 %v6448_v45 }
0x183d   :  { %3379 = vmatpush.msra.mxu2 %v6454_v35 }
0x183f   :  { %3380 = vmatpush.msra.mxu2 %v6460_v51 }
0x1841   :  { %3381 = vmatpush.msra.mxu2 %v6466_v17 }
0x18bd   :  { %v2833_v55 = vpop.f32.mrf.mxu2 }
0x18be   :  { %v2834_v22 = vadd.f32 %v6221_v23, %v2833_v55 }
0x18c0   :  { %2857 = vrot.lane.b32.xlu1 %v2834_v22, %s5411_s21  ;;  %v2836_v43 = vadd.f32 %v2834_v22, %v6272_v1 }
0x18c2   :  { %v4977_v40 = vmul.f32 -1.442695, %v2836_v43 }
0x18c4   :  { %5218 = vpow2.f32 %v4977_v40 }
0x18ca   :  { %v5219_v6 = vpop.eup %5218 }
0x18cb   :  { %v2840_v36 = vadd.f32 1.0, %v5219_v6 }
0x18cd   :  { %5220 = vrcp.f32 %v2840_v36  ;;  %v2852_v11 = vand.u32 2147483648, %v2840_v36  ;;  %vm2846_vm11 = vweird.f32 %v2840_v36  ;;  %v2850_v32 = vand.u32 2147483647, %v2840_v36 }
0x18cf   :  { %v2853_v7 = vor.u32 1.1754944e-38, %v2852_v11  ;;  %vm2851_vm12 = vcmp.eq.f32.partialorder %v2850_v32, 8.507059e+37 }
0x18d3   :  { %v5221_v14 = vpop.eup %5220 }
0x18d4   :  { %v2842_v16 = vmul.f32 %v5221_v14, %v2840_v36  ;;  %vm2847_vm3 = vweird.f32 %v5221_v14 }
0x18d5   :  { %vm2848_vm7 = vmor %vm2846_vm11, %vm2847_vm3 }
0x18d6   :  { %v2843_v9 = vsub.f32 1.0, %v2842_v16 }
0x18d8   :  { %v2844_v19 = vmul.f32 %v5221_v14, %v2843_v9 }
0x18da   :  { %v2845_v24 = vadd.f32 %v5221_v14, %v2844_v19 }
0x18dc   :  { %v2849_v3 = vsel %vm2848_vm7, %v5221_v14, %v2845_v24 }
0x18dd   :  { %v2854_v26 = vsel %vm2851_vm12, %v2853_v7, %v2849_v3 }
0x18de   :  { %v2867_v33 = vsub.f32 1.0, %v2854_v26  ;;  %v2873_v20 = vmul.f32 %v2854_v26, %v2805_v0 }
0x1932   :  { %v2858_v5 = vpop.permute.xlu1 %2857 }
0x1933   :  { %v2860_v41 = vmul.f32 %v2858_v5, %v2854_v26 }
0x1935   :  { %2862 = vrot.lane.b32.xlu2 %v2860_v41, %s5411_s21 }
0x198f   :  { %v2863_v25 = vpop.permute.xlu2 %2862 }
0x1990   :  { %v2865_v44 = vadd.f32 %v2863_v25, %v6272_v1 }
0x1992   :  { %5222 = vtanh.f32 %v2865_v44  ;;  %v6496_v44 = vld [vmem:[%s6991_s13] ss:$0 sm:$0xff] }
0x1998   :  { %v5223_v61 = vpop.eup %5222 }
0x1999   :  { %2869 = vrot.lane.b32.xlu0 %v5223_v61, %s5412_s11 }
0x1a0b   :  { %v2870_v4 = vpop.permute.xlu0 %2869 }
0x1a0c   :  { %v2872_v21 = vmul.f32 %v2870_v4, %v2867_v33 }
0x1a0e   :  { %v2874_v34 = vadd.f32 %v2873_v20, %v2872_v21 }
0x1a10   :  { %2880 = vrot.lane.b32.xlu1 %v2874_v34, %s5412_s11 }
0x1a82   :  { %v2881_v18 = vpop.permute.xlu1 %2880 }
0x1a83   :  { %4978 = vmatmul.msk.f32.vlgmr.msra.gmra.mxu0 %vm98_vm0, %v2881_v18 }
0x1a84   :  { %3446 = vmatpush.msra.mxu0 %v6448_v45 }
0x1a86   :  { %3447 = vmatpush.msra.mxu0 %v6454_v35 }
0x1a88   :  { %3448 = vmatpush.msra.mxu0 %v6460_v51 }
0x1a8a   :  { %3449 = vmatpush.msra.mxu0 %v6466_v17 }
0x1b00   :  { %v2901_v1 = vpop.f32.mrf.mxu0 }
0x1b01   :  { %v2902_v39 = vadd.f32 %v6221_v23, %v2901_v1 }
0x1b03   :  { %2925 = vrot.lane.b32.xlu2 %v2902_v39, %s5411_s21  ;;  %v2904_v42 = vadd.f32 %v2902_v39, %v6281_v10 }
0x1b05   :  { %v4979_v46 = vmul.f32 -1.442695, %v2904_v42 }
0x1b07   :  { %5224 = vpow2.f32 %v4979_v46 }
0x1b0d   :  { %v5225_v30 = vpop.eup %5224 }
0x1b0e   :  { %v2908_v0 = vadd.f32 1.0, %v5225_v30 }
0x1b10   :  { %5226 = vrcp.f32 %v2908_v0  ;;  %v2920_v6 = vand.u32 2147483648, %v2908_v0  ;;  %vm2914_vm13 = vweird.f32 %v2908_v0  ;;  %v2918_v36 = vand.u32 2147483647, %v2908_v0 }
0x1b12   :  { %v2921_v14 = vor.u32 1.1754944e-38, %v2920_v6  ;;  %vm2919_vm5 = vcmp.eq.f32.partialorder %v2918_v36, 8.507059e+37 }
0x1b16   :  { %v5227_v49 = vpop.eup %5226 }
0x1b17   :  { %v2910_v55 = vmul.f32 %v5227_v49, %v2908_v0  ;;  %vm2915_vm9 = vweird.f32 %v5227_v49 }
0x1b18   :  { %vm2916_vm4 = vmor %vm2914_vm13, %vm2915_vm9 }
0x1b19   :  { %v2911_v22 = vsub.f32 1.0, %v2910_v55 }
0x1b1b   :  { %v2912_v43 = vmul.f32 %v5227_v49, %v2911_v22 }
0x1b1d   :  { %v2913_v40 = vadd.f32 %v5227_v49, %v2912_v43 }
0x1b1f   :  { %v2917_v23 = vsel %vm2916_vm4, %v5227_v49, %v2913_v40 }
0x1b20   :  { %v2922_v9 = vsel %vm2919_vm5, %v2921_v14, %v2917_v23 }
0x1b21   :  { %v2935_v3 = vsub.f32 1.0, %v2922_v9  ;;  %v2941_v5 = vmul.f32 %v2922_v9, %v2874_v34 }
0x1b5d   :  { %v2926_v16 = vpop.permute.xlu2 %2925 }
0x1b5e   :  { %v2928_v19 = vmul.f32 %v2926_v16, %v2922_v9 }
0x1b60   :  { %2930 = vrot.lane.b32.xlu0 %v2928_v19, %s5411_s21 }
0x1bd2   :  { %v2931_v24 = vpop.permute.xlu0 %2930 }
0x1bd3   :  { %v2933_v11 = vadd.f32 %v2931_v24, %v6281_v10 }
0x1bd5   :  { %5228 = vtanh.f32 %v2933_v11 }
0x1bdb   :  { %v5229_v32 = vpop.eup %5228 }
0x1bdc   :  { %2937 = vrot.lane.b32.xlu1 %v5229_v32, %s5412_s11 }
0x1c4e   :  { %v2938_v7 = vpop.permute.xlu1 %2937 }
0x1c4f   :  { %v2940_v26 = vmul.f32 %v2938_v7, %v2935_v3 }
0x1c51   :  { %v2942_v41 = vadd.f32 %v2941_v5, %v2940_v26 }
0x1c53   :  { %2948 = vrot.lane.b32.xlu2 %v2942_v41, %s5412_s11 }
0x1cad   :  { %v2949_v25 = vpop.permute.xlu2 %2948 }
0x1cae   :  { %4980 = vmatmul.msk.f32.vlgmr.msra.gmra.mxu1 %vm98_vm0, %v2949_v25 }
0x1caf   :  { %3514 = vmatpush.msra.mxu1 %v6448_v45 }
0x1cb1   :  { %3515 = vmatpush.msra.mxu1 %v6454_v35 }
0x1cb3   :  { %3516 = vmatpush.msra.mxu1 %v6460_v51 }
0x1cb5   :  { %3517 = vmatpush.msra.mxu1 %v6466_v17 }
0x1d2b   :  { %v2969_v10 = vpop.f32.mrf.mxu1 }
0x1d2c   :  { %v2970_v61 = vadd.f32 %v6496_v44, %v2969_v10 }
0x1d2e   :  { %2993 = vrot.lane.b32.xlu0 %v2970_v61, %s5411_s21  ;;  %v2972_v33 = vadd.f32 %v2970_v61, %v6276_v37 }
0x1d30   :  { %v4981_v4 = vmul.f32 -1.442695, %v2972_v33 }
0x1d32   :  { %5230 = vpow2.f32 %v4981_v4 }
0x1d38   :  { %v5231_v20 = vpop.eup %5230 }
0x1d39   :  { %v2976_v21 = vadd.f32 1.0, %v5231_v20 }
0x1d3b   :  { %5232 = vrcp.f32 %v2976_v21  ;;  %v2988_v46 = vand.u32 2147483648, %v2976_v21  ;;  %vm2982_vm6 = vweird.f32 %v2976_v21  ;;  %v2986_v30 = vand.u32 2147483647, %v2976_v21 }
0x1d3d   :  { %v2989_v49 = vor.u32 1.1754944e-38, %v2988_v46  ;;  %vm2987_vm8 = vcmp.eq.f32.partialorder %v2986_v30, 8.507059e+37 }
0x1d41   :  { %v5233_v34 = vpop.eup %5232 }
0x1d42   :  { %v2978_v18 = vmul.f32 %v5233_v34, %v2976_v21  ;;  %vm2983_vm14 = vweird.f32 %v5233_v34 }
0x1d43   :  { %vm2984_vm2 = vmor %vm2982_vm6, %vm2983_vm14 }
0x1d44   :  { %v2979_v1 = vsub.f32 1.0, %v2978_v18 }
0x1d46   :  { %v2980_v39 = vmul.f32 %v5233_v34, %v2979_v1 }
0x1d48   :  { %v2981_v42 = vadd.f32 %v5233_v34, %v2980_v39 }
0x1d4a   :  { %v2985_v0 = vsel %vm2984_vm2, %v5233_v34, %v2981_v42 }
0x1d4b   :  { %v2990_v22 = vsel %vm2987_vm8, %v2989_v49, %v2985_v0 }
0x1d4c   :  { %v3003_v23 = vsub.f32 1.0, %v2990_v22  ;;  %v3009_v16 = vmul.f32 %v2990_v22, %v2942_v41 }
0x1da0   :  { %v2994_v55 = vpop.permute.xlu0 %2993 }
0x1da1   :  { %v2996_v43 = vmul.f32 %v2994_v55, %v2990_v22 }
0x1da3   :  { %2998 = vrot.lane.b32.xlu1 %v2996_v43, %s5411_s21 }
0x1e15   :  { %v2999_v40 = vpop.permute.xlu1 %2998 }
0x1e16   :  { %v3001_v6 = vadd.f32 %v2999_v40, %v6276_v37 }
0x1e18   :  { %5234 = vtanh.f32 %v3001_v6 }
0x1e1e   :  { %v5235_v36 = vpop.eup %5234 }
0x1e1f   :  { %3005 = vrot.lane.b32.xlu2 %v5235_v36, %s5412_s11 }
0x1e79   :  { %v3006_v14 = vpop.permute.xlu2 %3005 }
0x1e7a   :  { %v3008_v9 = vmul.f32 %v3006_v14, %v3003_v23 }
0x1e7c   :  { %v3010_v19 = vadd.f32 %v3009_v16, %v3008_v9 }
0x1e7e   :  { %3017 = vrot.lane.b32.xlu0 %v3010_v19, %s5412_s11 }
0x1ef0   :  { %v3018_v24 = vpop.permute.xlu0 %3017 }
0x1ef1   :  { %4982 = vmatmul.msk.f32.vlgmr.msrb.gmra.mxu3 %vm98_vm0, %v3018_v24 }
0x1ef2   :  { %3583 = vmatpush.msrb.mxu3 %v6448_v45 }
0x1ef4   :  { %3584 = vmatpush.msrb.mxu3 %v6454_v35 }
0x1ef6   :  { %3585 = vmatpush.msrb.mxu3 %v6460_v51 }
0x1ef8   :  { %3586 = vmatpush.msrb.mxu3 %v6466_v17 }
0x1f74   :  { %v3038_v37 = vpop.f32.mrf.mxu3 }
0x1f75   :  { %v3039_v11 = vadd.f32 %v6496_v44, %v3038_v37 }
0x1f77   :  { %3062 = vrot.lane.b32.xlu1 %v3039_v11, %s5411_s21  ;;  %v3041_v32 = vadd.f32 %v3039_v11, %v6284_v12 }
0x1f79   :  { %v4983_v3 = vmul.f32 -1.442695, %v3041_v32 }
0x1f7b   :  { %5236 = vpow2.f32 %v4983_v3 }
0x1f81   :  { %v5237_v7 = vpop.eup %5236 }
0x1f82   :  { %v3045_v5 = vadd.f32 1.0, %v5237_v7 }
0x1f84   :  { %5238 = vrcp.f32 %v3045_v5  ;;  %v3057_v33 = vand.u32 2147483648, %v3045_v5  ;;  %vm3051_vm10 = vweird.f32 %v3045_v5  ;;  %v3055_v4 = vand.u32 2147483647, %v3045_v5 }
0x1f86   :  { %v3058_v21 = vor.u32 1.1754944e-38, %v3057_v33  ;;  %vm3056_vm11 = vcmp.eq.f32.partialorder %v3055_v4, 8.507059e+37 }
0x1f8a   :  { %v5239_v26 = vpop.eup %5238 }
0x1f8b   :  { %v3047_v41 = vmul.f32 %v5239_v26, %v3045_v5  ;;  %vm3052_vm15 = vweird.f32 %v5239_v26 }
0x1f8c   :  { %vm3053_vm3 = vmor %vm3051_vm10, %vm3052_vm15 }
0x1f8d   :  { %v3048_v25 = vsub.f32 1.0, %v3047_v41 }
0x1f8f   :  { %v3049_v10 = vmul.f32 %v5239_v26, %v3048_v25 }
0x1f91   :  { %v3050_v61 = vadd.f32 %v5239_v26, %v3049_v10 }
0x1f93   :  { %v3054_v20 = vsel %vm3053_vm3, %v5239_v26, %v3050_v61 }
0x1f94   :  { %v3059_v18 = vsel %vm3056_vm11, %v3058_v21, %v3054_v20 }
0x1f95   :  { %v3072_v30 = vsub.f32 1.0, %v3059_v18  ;;  %v3078_v49 = vmul.f32 %v3059_v18, %v3010_v19 }
0x1fe9   :  { %v3063_v34 = vpop.permute.xlu1 %3062 }
0x1fea   :  { %v3065_v1 = vmul.f32 %v3063_v34, %v3059_v18 }
0x1fec   :  { %3067 = vrot.lane.b32.xlu2 %v3065_v1, %s5411_s21 }
0x2046   :  { %v3068_v39 = vpop.permute.xlu2 %3067 }
0x2047   :  { %v3070_v42 = vadd.f32 %v3068_v39, %v6284_v12 }
0x2049   :  { %5240 = vtanh.f32 %v3070_v42 }
0x204f   :  { %v5241_v46 = vpop.eup %5240 }
0x2050   :  { %3074 = vrot.lane.b32.xlu0 %v5241_v46, %s5412_s11 }
0x20c2   :  { %v3075_v0 = vpop.permute.xlu0 %3074 }
0x20c3   :  { %v3077_v55 = vmul.f32 %v3075_v0, %v3072_v30 }
0x20c5   :  { %v3079_v22 = vadd.f32 %v3078_v49, %v3077_v55 }
0x20c7   :  { %3086 = vrot.lane.b32.xlu1 %v3079_v22, %s5412_s11 }
0x2139   :  { %v3087_v43 = vpop.permute.xlu1 %3086 }
0x213a   :  { %4984 = vmatmul.msk.f32.vlgmr.msrb.gmra.mxu2 %vm98_vm0, %v3087_v43 }
0x213b   :  { %3652 = vmatpush.msrb.mxu2 %v6448_v45 }
0x213d   :  { %3653 = vmatpush.msrb.mxu2 %v6454_v35 }
0x213f   :  { %3654 = vmatpush.msrb.mxu2 %v6460_v51 }
0x2141   :  { %3655 = vmatpush.msrb.mxu2 %v6466_v17 }
0x21bd   :  { %v3107_v12 = vpop.f32.mrf.mxu2 }
0x21be   :  { %v3108_v40 = vadd.f32 %v6496_v44, %v3107_v12 }
0x21c0   :  { %3131 = vrot.lane.b32.xlu2 %v3108_v40, %s5411_s21  ;;  %v3110_v6 = vadd.f32 %v3108_v40, %v6287_v29 }
0x21c2   :  { %v4985_v36 = vmul.f32 -1.442695, %v3110_v6 }
0x21c4   :  { %5242 = vpow2.f32 %v4985_v36 }
0x21ca   :  { %v5243_v23 = vpop.eup %5242 }
0x21cb   :  { %v3114_v14 = vadd.f32 1.0, %v5243_v23 }
0x21cd   :  { %5244 = vrcp.f32 %v3114_v14  ;;  %v3126_v11 = vand.u32 2147483648, %v3114_v14  ;;  %vm3120_vm12 = vweird.f32 %v3114_v14  ;;  %v3124_v32 = vand.u32 2147483647, %v3114_v14 }
0x21cf   :  { %v3127_v7 = vor.u32 1.1754944e-38, %v3126_v11  ;;  %vm3125_vm13 = vcmp.eq.f32.partialorder %v3124_v32, 8.507059e+37 }
0x21d3   :  { %v5245_v16 = vpop.eup %5244 }
0x21d4   :  { %v3116_v9 = vmul.f32 %v5245_v16, %v3114_v14  ;;  %vm3121_vm7 = vweird.f32 %v5245_v16 }
0x21d5   :  { %vm3122_vm9 = vmor %vm3120_vm12, %vm3121_vm7 }
0x21d6   :  { %v3117_v19 = vsub.f32 1.0, %v3116_v9 }
0x21d8   :  { %v3118_v24 = vmul.f32 %v5245_v16, %v3117_v19 }
0x21da   :  { %v3119_v37 = vadd.f32 %v5245_v16, %v3118_v24 }
0x21dc   :  { %v3123_v3 = vsel %vm3122_vm9, %v5245_v16, %v3119_v37 }
0x21dd   :  { %v3128_v26 = vsel %vm3125_vm13, %v3127_v7, %v3123_v3 }
0x21de   :  { %v3141_v33 = vsub.f32 1.0, %v3128_v26  ;;  %v3147_v20 = vmul.f32 %v3128_v26, %v3079_v22 }
0x221a   :  { %v3132_v5 = vpop.permute.xlu2 %3131 }
0x221b   :  { %v3134_v41 = vmul.f32 %v3132_v5, %v3128_v26 }
0x221d   :  { %3136 = vrot.lane.b32.xlu0 %v3134_v41, %s5411_s21 }
0x228f   :  { %v3137_v25 = vpop.permute.xlu0 %3136 }
0x2290   :  { %v3139_v10 = vadd.f32 %v3137_v25, %v6287_v29 }
0x2292   :  { %5246 = vtanh.f32 %v3139_v10 }
0x2298   :  { %v5247_v61 = vpop.eup %5246 }
0x2299   :  { %3143 = vrot.lane.b32.xlu1 %v5247_v61, %s5412_s11 }
0x230b   :  { %v3144_v4 = vpop.permute.xlu1 %3143 }
0x230c   :  { %v3146_v21 = vmul.f32 %v3144_v4, %v3141_v33 }
0x230e   :  { %v3148_v34 = vadd.f32 %v3147_v20, %v3146_v21 }
0x2310   :  { %3155 = vrot.lane.b32.xlu2 %v3148_v34, %s5412_s11 }
0x236a   :  { %v3156_v18 = vpop.permute.xlu2 %3155 }
0x236b   :  { %4986 = vmatmul.msk.f32.vlgmr.msrb.gmra.mxu0 %vm98_vm0, %v3156_v18 }
0x236c   :  { %3721 = vmatpush.msrb.mxu0 %v6448_v45 }
0x236e   :  { %3722 = vmatpush.msrb.mxu0 %v6454_v35 }
0x2370   :  { %3723 = vmatpush.msrb.mxu0 %v6460_v51 }
0x2372   :  { %3724 = vmatpush.msrb.mxu0 %v6466_v17 }
0x23e8   :  { %v3176_v29 = vpop.f32.mrf.mxu0 }
0x23e9   :  { %v3177_v1 = vadd.f32 %v6496_v44, %v3176_v29 }
0x23eb   :  { %3200 = vrot.lane.b32.xlu0 %v3177_v1, %s5411_s21  ;;  %v3179_v39 = vadd.f32 %v3177_v1, %v6290_v59 }
0x23ed   :  { %v4987_v42 = vmul.f32 -1.442695, %v3179_v39 }
0x23ef   :  { %5248 = vpow2.f32 %v4987_v42 }
0x23f5   :  { %v5249_v46 = vpop.eup %5248 }
0x23f6   :  { %v3183_v30 = vadd.f32 1.0, %v5249_v46 }
0x23f8   :  { %5250 = vrcp.f32 %v3183_v30  ;;  %v3195_v12 = vand.u32 2147483648, %v3183_v30  ;;  %vm3189_vm5 = vweird.f32 %v3183_v30  ;;  %v3193_v40 = vand.u32 2147483647, %v3183_v30 }
0x23fa   :  { %v3196_v36 = vor.u32 1.1754944e-38, %v3195_v12  ;;  %vm3194_vm6 = vcmp.eq.f32.partialorder %v3193_v40, 8.507059e+37 }
0x23fe   :  { %v5251_v0 = vpop.eup %5250 }
0x23ff   :  { %v3185_v49 = vmul.f32 %v5251_v0, %v3183_v30  ;;  %vm3190_vm4 = vweird.f32 %v5251_v0 }
0x2400   :  { %vm3191_vm14 = vmor %vm3189_vm5, %vm3190_vm4 }
0x2401   :  { %v3186_v55 = vsub.f32 1.0, %v3185_v49 }
0x2403   :  { %v3187_v22 = vmul.f32 %v5251_v0, %v3186_v55 }
0x2405   :  { %v3188_v43 = vadd.f32 %v5251_v0, %v3187_v22 }
0x2407   :  { %v3192_v6 = vsel %vm3191_vm14, %v5251_v0, %v3188_v43 }
0x2408   :  { %v3197_v14 = vsel %vm3194_vm6, %v3196_v36, %v3192_v6 }
0x2409   :  { %v3210_v37 = vsub.f32 1.0, %v3197_v14  ;;  %v3216_v32 = vmul.f32 %v3197_v14, %v3148_v34 }
0x245d   :  { %v3201_v23 = vpop.permute.xlu0 %3200 }
0x245e   :  { %v3203_v16 = vmul.f32 %v3201_v23, %v3197_v14 }
0x2460   :  { %3205 = vrot.lane.b32.xlu1 %v3203_v16, %s5411_s21 }
0x24d2   :  { %v3206_v9 = vpop.permute.xlu1 %3205 }
0x24d3   :  { %v3208_v19 = vadd.f32 %v3206_v9, %v6290_v59 }
0x24d5   :  { %5252 = vtanh.f32 %v3208_v19 }
0x24db   :  { %v5253_v24 = vpop.eup %5252 }
0x24dc   :  { %3212 = vrot.lane.b32.xlu2 %v5253_v24, %s5412_s11 }
0x2536   :  { %v3213_v11 = vpop.permute.xlu2 %3212 }
0x2537   :  { %v3215_v3 = vmul.f32 %v3213_v11, %v3210_v37 }
0x2539   :  { %v3217_v7 = vadd.f32 %v3216_v32, %v3215_v3 }
0x253b   :  { %3224 = vrot.lane.b32.xlu0 %v3217_v7, %s5412_s11 }
0x25ad   :  { %v3225_v5 = vpop.permute.xlu0 %3224 }
0x25ae   :  { %4988 = vmatmul.msk.f32.vlgmr.msrb.gmra.mxu1 %vm98_vm0, %v3225_v5 }
0x25af   :  { %3790 = vmatpush.msrb.mxu1 %v6448_v45 }
0x25b1   :  { %3791 = vmatpush.msrb.mxu1 %v6454_v35 }
0x25b3   :  { %3792 = vmatpush.msrb.mxu1 %v6460_v51 }
0x25b5   :  { %3793 = vmatpush.msrb.mxu1 %v6466_v17 }
0x262b   :  { %v3245_v59 = vpop.f32.mrf.mxu1 }
0x262c   :  { %v3246_v26 = vadd.f32 %v6496_v44, %v3245_v59 }
0x262e   :  { %3269 = vrot.lane.b32.xlu1 %v3246_v26, %s5411_s21  ;;  %v3248_v41 = vadd.f32 %v3246_v26, %v6293_v60 }
0x2630   :  { %v4989_v25 = vmul.f32 -1.442695, %v3248_v41 }
0x2632   :  { %5254 = vpow2.f32 %v4989_v25 }
0x2638   :  { %v5255_v10 = vpop.eup %5254 }
0x2639   :  { %v3252_v61 = vadd.f32 1.0, %v5255_v10 }
0x263b   :  { %5256 = vrcp.f32 %v3252_v61  ;;  %v3264_v18 = vand.u32 2147483648, %v3252_v61  ;;  %vm3258_vm8 = vweird.f32 %v3252_v61  ;;  %v3262_v29 = vand.u32 2147483647, %v3252_v61 }
0x263d   :  { %v3265_v39 = vor.u32 1.1754944e-38, %v3264_v18  ;;  %vm3263_vm10 = vcmp.eq.f32.partialorder %v3262_v29, 8.507059e+37 }
0x2641   :  { %v5257_v33 = vpop.eup %5256 }
0x2642   :  { %v3254_v4 = vmul.f32 %v5257_v33, %v3252_v61  ;;  %vm3259_vm2 = vweird.f32 %v5257_v33 }
0x2643   :  { %vm3260_vm15 = vmor %vm3258_vm8, %vm3259_vm2 }
0x2644   :  { %v3255_v20 = vsub.f32 1.0, %v3254_v4 }
0x2646   :  { %v3256_v21 = vmul.f32 %v5257_v33, %v3255_v20 }
0x2648   :  { %v3257_v34 = vadd.f32 %v5257_v33, %v3256_v21 }
0x264a   :  { %v3261_v1 = vsel %vm3260_vm15, %v5257_v33, %v3257_v34 }
0x264b   :  { %v3266_v46 = vsel %vm3263_vm10, %v3265_v39, %v3261_v1 }
0x264c   :  { %v3279_v22 = vsub.f32 1.0, %v3266_v46  ;;  %v3285_v12 = vmul.f32 %v3266_v46, %v3217_v7 }
0x26a0   :  { %v3270_v42 = vpop.permute.xlu1 %3269 }
0x26a1   :  { %v3272_v30 = vmul.f32 %v3270_v42, %v3266_v46 }
0x26a3   :  { %3274 = vrot.lane.b32.xlu2 %v3272_v30, %s5411_s21 }
0x26fd   :  { %v3275_v0 = vpop.permute.xlu2 %3274 }
0x26fe   :  { %v3277_v49 = vadd.f32 %v3275_v0, %v6293_v60 }
0x2700   :  { %5258 = vtanh.f32 %v3277_v49 }
0x2706   :  { %v5259_v55 = vpop.eup %5258 }
0x2707   :  { %3281 = vrot.lane.b32.xlu0 %v5259_v55, %s5412_s11 }
0x2779   :  { %v3282_v43 = vpop.permute.xlu0 %3281 }
0x277a   :  { %v3284_v40 = vmul.f32 %v3282_v43, %v3279_v22 }
0x277c   :  { %v3286_v6 = vadd.f32 %v3285_v12, %v3284_v40 }
0x277e   :  { %3293 = vrot.lane.b32.xlu1 %v3286_v6, %s5412_s11 }
0x27f0   :  { %v3294_v36 = vpop.permute.xlu1 %3293 }
0x27f1   :  { %4990 = vmatmul.msk.f32.vlgmr.msra.gmra.mxu3 %vm98_vm0, %v3294_v36 }
0x27f2   :  { %3859 = vmatpush.msra.mxu3 %v6448_v45 }
0x27f4   :  { %3860 = vmatpush.msra.mxu3 %v6454_v35 }
0x27f6   :  { %3861 = vmatpush.msra.mxu3 %v6460_v51 }
0x27f8   :  { %3862 = vmatpush.msra.mxu3 %v6466_v17 }
0x2874   :  { %v3314_v60 = vpop.f32.mrf.mxu3 }
0x2875   :  { %v3315_v23 = vadd.f32 %v6496_v44, %v3314_v60 }
0x2877   :  { %3338 = vrot.lane.b32.xlu2 %v3315_v23, %s5411_s21  ;;  %v3317_v14 = vadd.f32 %v3315_v23, %v6296_v63 }
0x2879   :  { %v4991_v16 = vmul.f32 -1.442695, %v3317_v14 }
0x287b   :  { %5260 = vpow2.f32 %v4991_v16 }
0x2881   :  { %v5261_v9 = vpop.eup %5260 }
0x2882   :  { %v3321_v19 = vadd.f32 1.0, %v5261_v9 }
0x2884   :  { %5262 = vrcp.f32 %v3321_v19  ;;  %v3333_v7 = vand.u32 2147483648, %v3321_v19  ;;  %vm3327_vm11 = vweird.f32 %v3321_v19  ;;  %v3331_v5 = vand.u32 2147483647, %v3321_v19 }
0x2886   :  { %v3334_v26 = vor.u32 1.1754944e-38, %v3333_v7  ;;  %vm3332_vm12 = vcmp.eq.f32.partialorder %v3331_v5, 8.507059e+37 }
0x288a   :  { %v5263_v24 = vpop.eup %5262 }
0x288b   :  { %v3323_v37 = vmul.f32 %v5263_v24, %v3321_v19  ;;  %vm3328_vm3 = vweird.f32 %v5263_v24 }
0x288c   :  { %vm3329_vm7 = vmor %vm3327_vm11, %vm3328_vm3 }
0x288d   :  { %v3324_v11 = vsub.f32 1.0, %v3323_v37 }
0x288f   :  { %v3325_v32 = vmul.f32 %v5263_v24, %v3324_v11 }
0x2891   :  { %v3326_v3 = vadd.f32 %v5263_v24, %v3325_v32 }
0x2893   :  { %v3330_v59 = vsel %vm3329_vm7, %v5263_v24, %v3326_v3 }
0x2894   :  { %v3335_v25 = vsel %vm3332_vm12, %v3334_v26, %v3330_v59 }
0x2895   :  { %v3348_v20 = vsub.f32 1.0, %v3335_v25  ;;  %v3354_v34 = vmul.f32 %v3335_v25, %v3286_v6 }
0x28d1   :  { %v3339_v41 = vpop.permute.xlu2 %3338 }
0x28d2   :  { %v3341_v10 = vmul.f32 %v3339_v41, %v3335_v25 }
0x28d4   :  { %3343 = vrot.lane.b32.xlu0 %v3341_v10, %s5411_s21 }
0x2946   :  { %v3344_v61 = vpop.permute.xlu0 %3343 }
0x2947   :  { %v3346_v33 = vadd.f32 %v3344_v61, %v6296_v63 }
0x2949   :  { %5264 = vtanh.f32 %v3346_v33 }
0x294f   :  { %v5265_v4 = vpop.eup %5264 }
0x2950   :  { %3350 = vrot.lane.b32.xlu1 %v5265_v4, %s5412_s11 }
0x29c2   :  { %v3351_v21 = vpop.permute.xlu1 %3350 }
0x29c3   :  { %v3353_v18 = vmul.f32 %v3351_v21, %v3348_v20 }
0x29c5   :  { %v3355_v29 = vadd.f32 %v3354_v34, %v3353_v18 }
0x29c7   :  { %3362 = vrot.lane.b32.xlu2 %v3355_v29, %s5412_s11 }
0x2a21   :  { %v3363_v1 = vpop.permute.xlu2 %3362 }
0x2a22   :  { %4992 = vmatmul.msk.f32.vlgmr.msra.gmra.mxu2 %vm98_vm0, %v3363_v1 }
0x2a23   :  { %3928 = vmatpush.msra.mxu2 %v6448_v45 }
0x2a25   :  { %3929 = vmatpush.msra.mxu2 %v6454_v35 }
0x2a27   :  { %3930 = vmatpush.msra.mxu2 %v6460_v51 }
0x2a29   :  { %3931 = vmatpush.msra.mxu2 %v6466_v17 }
0x2aa5   :  { %v3383_v63 = vpop.f32.mrf.mxu2 }
0x2aa6   :  { %v3384_v39 = vadd.f32 %v6496_v44, %v3383_v63 }
0x2aa8   :  { %3407 = vrot.lane.b32.xlu0 %v3384_v39, %s5411_s21  ;;  %v3386_v42 = vadd.f32 %v3384_v39, %v6299_v27 }
0x2aaa   :  { %v4993_v46 = vmul.f32 -1.442695, %v3386_v42 }
0x2aac   :  { %5266 = vpow2.f32 %v4993_v46 }
0x2ab2   :  { %v5267_v30 = vpop.eup %5266 }
0x2ab3   :  { %v3390_v0 = vadd.f32 1.0, %v5267_v30 }
0x2ab5   :  { %5268 = vrcp.f32 %v3390_v0  ;;  %v3402_v40 = vand.u32 2147483648, %v3390_v0  ;;  %vm3396_vm13 = vweird.f32 %v3390_v0  ;;  %v3400_v6 = vand.u32 2147483647, %v3390_v0 }
0x2ab7   :  { %v3403_v60 = vor.u32 1.1754944e-38, %v3402_v40  ;;  %vm3401_vm5 = vcmp.eq.f32.partialorder %v3400_v6, 8.507059e+37 }
0x2abb   :  { %v5269_v49 = vpop.eup %5268 }
0x2abc   :  { %v3392_v55 = vmul.f32 %v5269_v49, %v3390_v0  ;;  %vm3397_vm9 = vweird.f32 %v5269_v49 }
0x2abd   :  { %vm3398_vm4 = vmor %vm3396_vm13, %vm3397_vm9 }
0x2abe   :  { %v3393_v22 = vsub.f32 1.0, %v3392_v55 }
0x2ac0   :  { %v3394_v43 = vmul.f32 %v5269_v49, %v3393_v22 }
0x2ac2   :  { %v3395_v12 = vadd.f32 %v5269_v49, %v3394_v43 }
0x2ac4   :  { %v3399_v36 = vsel %vm3398_vm4, %v5269_v49, %v3395_v12 }
0x2ac5   :  { %v3404_v14 = vsel %vm3401_vm5, %v3403_v60, %v3399_v36 }
0x2ac6   :  { %v3417_v37 = vsub.f32 1.0, %v3404_v14  ;;  %v3423_v32 = vmul.f32 %v3404_v14, %v3355_v29 }
0x2b1a   :  { %v3408_v23 = vpop.permute.xlu0 %3407 }
0x2b1b   :  { %v3410_v16 = vmul.f32 %v3408_v23, %v3404_v14 }
0x2b1d   :  { %3412 = vrot.lane.b32.xlu1 %v3410_v16, %s5411_s21 }
0x2b8f   :  { %v3413_v9 = vpop.permute.xlu1 %3412 }
0x2b90   :  { %v3415_v19 = vadd.f32 %v3413_v9, %v6299_v27 }
0x2b92   :  { %5270 = vtanh.f32 %v3415_v19 }
0x2b98   :  { %v5271_v24 = vpop.eup %5270 }
0x2b99   :  { %3419 = vrot.lane.b32.xlu2 %v5271_v24, %s5412_s11 }
0x2bf3   :  { %v3420_v11 = vpop.permute.xlu2 %3419 }
0x2bf4   :  { %v3422_v3 = vmul.f32 %v3420_v11, %v3417_v37 }
0x2bf6   :  { %v3424_v7 = vadd.f32 %v3423_v32, %v3422_v3 }
0x2bf8   :  { %3430 = vrot.lane.b32.xlu0 %v3424_v7, %s5412_s11 }
0x2c6a   :  { %v3431_v5 = vpop.permute.xlu0 %3430 }
0x2c6b   :  { %4994 = vmatmul.msk.f32.vlgmr.msra.gmra.mxu0 %vm98_vm0, %v3431_v5 }
0x2c6c   :  { %3996 = vmatpush.msra.mxu0 %v6448_v45 }
0x2c6e   :  { %3997 = vmatpush.msra.mxu0 %v6454_v35 }
0x2c70   :  { %3998 = vmatpush.msra.mxu0 %v6460_v51 }
0x2c72   :  { %3999 = vmatpush.msra.mxu0 %v6466_v17 }
0x2ce8   :  { %v3451_v27 = vpop.f32.mrf.mxu0 }
0x2ce9   :  { %v3452_v59 = vadd.f32 %v6496_v44, %v3451_v27 }
0x2ceb   :  { %3475 = vrot.lane.b32.xlu1 %v3452_v59, %s5411_s21  ;;  %v3454_v26 = vadd.f32 %v3452_v59, %v6310_v28 }
0x2ced   :  { %v4995_v41 = vmul.f32 -1.442695, %v3454_v26 }
0x2cef   :  { %5272 = vpow2.f32 %v4995_v41 }
0x2cf5   :  { %v5273_v25 = vpop.eup %5272 }
0x2cf6   :  { %v3458_v10 = vadd.f32 1.0, %v5273_v25 }
0x2cf8   :  { %5274 = vrcp.f32 %v3458_v10  ;;  %v3470_v34 = vand.u32 2147483648, %v3458_v10  ;;  %vm3464_vm6 = vweird.f32 %v3458_v10  ;;  %v3468_v18 = vand.u32 2147483647, %v3458_v10 }
0x2cfa   :  { %v3471_v1 = vor.u32 1.1754944e-38, %v3470_v34  ;;  %vm3469_vm8 = vcmp.eq.f32.partialorder %v3468_v18, 8.507059e+37 }
0x2cfe   :  { %v5275_v61 = vpop.eup %5274 }
0x2cff   :  { %v3460_v33 = vmul.f32 %v5275_v61, %v3458_v10  ;;  %vm3465_vm14 = vweird.f32 %v5275_v61 }
0x2d00   :  { %vm3466_vm2 = vmor %vm3464_vm6, %vm3465_vm14 }
0x2d01   :  { %v3461_v4 = vsub.f32 1.0, %v3460_v33 }
0x2d03   :  { %v3462_v20 = vmul.f32 %v5275_v61, %v3461_v4 }
0x2d05   :  { %v3463_v21 = vadd.f32 %v5275_v61, %v3462_v20 }
0x2d07   :  { %v3467_v29 = vsel %vm3466_vm2, %v5275_v61, %v3463_v21 }
0x2d08   :  { %v3472_v39 = vsel %vm3469_vm8, %v3471_v1, %v3467_v29 }
0x2d09   :  { %v3485_v49 = vsub.f32 1.0, %v3472_v39  ;;  %v3491_v22 = vmul.f32 %v3472_v39, %v3424_v7 }
0x2d5d   :  { %v3476_v63 = vpop.permute.xlu1 %3475 }
0x2d5e   :  { %v3478_v42 = vmul.f32 %v3476_v63, %v3472_v39 }
0x2d60   :  { %3480 = vrot.lane.b32.xlu2 %v3478_v42, %s5411_s21 }
0x2dba   :  { %v3481_v46 = vpop.permute.xlu2 %3480 }
0x2dbb   :  { %v3483_v30 = vadd.f32 %v3481_v46, %v6310_v28 }
0x2dbd   :  { %5276 = vtanh.f32 %v3483_v30 }
0x2dc3   :  { %v5277_v0 = vpop.eup %5276 }
0x2dc4   :  { %3487 = vrot.lane.b32.xlu0 %v5277_v0, %s5412_s11 }
0x2e36   :  { %v3488_v55 = vpop.permute.xlu0 %3487 }
0x2e37   :  { %v3490_v43 = vmul.f32 %v3488_v55, %v3485_v49 }
0x2e39   :  { %v3492_v12 = vadd.f32 %v3491_v22, %v3490_v43 }
0x2e3b   :  { %3498 = vrot.lane.b32.xlu1 %v3492_v12, %s5412_s11 }
0x2ead   :  { %v3499_v40 = vpop.permute.xlu1 %3498 }
0x2eae   :  { %4996 = vmatmul.msk.f32.vlgmr.msra.gmra.mxu1 %vm98_vm0, %v3499_v40 }
0x2eaf   :  { %4064 = vmatpush.msra.mxu1 %v6448_v45 }
0x2eb1   :  { %4065 = vmatpush.msra.mxu1 %v6454_v35 }
0x2eb3   :  { %4066 = vmatpush.msra.mxu1 %v6460_v51 }
0x2eb5   :  { %4067 = vmatpush.msra.mxu1 %v6466_v17 }
0x2f2b   :  { %v3519_v28 = vpop.f32.mrf.mxu1 }
0x2f2c   :  { %v3520_v6 = vadd.f32 %v6496_v44, %v3519_v28 }
0x2f2e   :  { %3543 = vrot.lane.b32.xlu2 %v3520_v6, %s5411_s21  ;;  %v3522_v36 = vadd.f32 %v3520_v6, %v6307_v62 }
0x2f30   :  { %v4997_v60 = vmul.f32 -1.442695, %v3522_v36 }
0x2f32   :  { %5278 = vpow2.f32 %v4997_v60 }
0x2f38   :  { %v5279_v23 = vpop.eup %5278 }
0x2f39   :  { %v3526_v14 = vadd.f32 1.0, %v5279_v23 }
0x2f3b   :  { %5280 = vrcp.f32 %v3526_v14  ;;  %v3538_v11 = vand.u32 2147483648, %v3526_v14  ;;  %vm3532_vm10 = vweird.f32 %v3526_v14  ;;  %v3536_v32 = vand.u32 2147483647, %v3526_v14 }
0x2f3d   :  { %v3539_v7 = vor.u32 1.1754944e-38, %v3538_v11  ;;  %vm3537_vm11 = vcmp.eq.f32.partialorder %v3536_v32, 8.507059e+37 }
0x2f41   :  { %v5281_v16 = vpop.eup %5280 }
0x2f42   :  { %v3528_v9 = vmul.f32 %v5281_v16, %v3526_v14  ;;  %vm3533_vm15 = vweird.f32 %v5281_v16 }
0x2f43   :  { %vm3534_vm3 = vmor %vm3532_vm10, %vm3533_vm15 }
0x2f44   :  { %v3529_v19 = vsub.f32 1.0, %v3528_v9  ;;  %v6629_v9 = vld [vmem:[%s6990_s12 + $0x8] sm:$0xff] }
0x2f46   :  { %v3530_v24 = vmul.f32 %v5281_v16, %v3529_v19  ;;  %v6635_v19 = vld [vmem:[%s6990_s12] sm:$0xff] }
0x2f48   :  { %v3531_v37 = vadd.f32 %v5281_v16, %v3530_v24 }
0x2f4a   :  { %v3535_v3 = vsel %vm3534_vm3, %v5281_v16, %v3531_v37  ;;  %v6617_v16 = vld [vmem:[%s6990_s12 + $0x18] sm:$0xff] }
0x2f4b   :  { %v3540_v27 = vsel %vm3537_vm11, %v3539_v7, %v3535_v3 }
0x2f4c   :  { %v3553_v10 = vsub.f32 1.0, %v3540_v27  ;;  %v3559_v33 = vmul.f32 %v3540_v27, %v3492_v12 }
0x2f88   :  { %v3544_v5 = vpop.permute.xlu2 %3543 }
0x2f89   :  { %v3546_v59 = vmul.f32 %v3544_v5, %v3540_v27 }
0x2f8b   :  { %3548 = vrot.lane.b32.xlu0 %v3546_v59, %s5411_s21 }
0x2ffd   :  { %v3549_v26 = vpop.permute.xlu0 %3548 }
0x2ffe   :  { %v3551_v41 = vadd.f32 %v3549_v26, %v6307_v62 }
0x3000   :  { %5282 = vtanh.f32 %v3551_v41 }
0x3006   :  { %v5283_v25 = vpop.eup %5282 }
0x3007   :  { %3555 = vrot.lane.b32.xlu1 %v5283_v25, %s5412_s11 }
0x3079   :  { %v3556_v61 = vpop.permute.xlu1 %3555 }
0x307a   :  { %v3558_v4 = vmul.f32 %v3556_v61, %v3553_v10 }
0x307c   :  { %v3560_v20 = vadd.f32 %v3559_v33, %v3558_v4 }
0x307e   :  { %3567 = vrot.lane.b32.xlu2 %v3560_v20, %s5412_s11 }
0x30d8   :  { %v3568_v21 = vpop.permute.xlu2 %3567 }
0x30d9   :  { %4998 = vmatmul.msk.f32.vlgmr.msrb.gmra.mxu3 %vm98_vm0, %v3568_v21 }
0x30da   :  { %4133 = vmatpush.msrb.mxu3 %v6448_v45 }
0x30dc   :  { %4134 = vmatpush.msrb.mxu3 %v6454_v35 }
0x30de   :  { %4135 = vmatpush.msrb.mxu3 %v6460_v51 }
0x30e0   :  { %4136 = vmatpush.msrb.mxu3 %v6466_v17 }
0x315c   :  { %v3588_v62 = vpop.f32.mrf.mxu3 }
0x315d   :  { %v3589_v34 = vadd.f32 %v6496_v44, %v3588_v62 }
0x315f   :  { %3612 = vrot.lane.b32.xlu0 %v3589_v34, %s5411_s21  ;;  %v3591_v18 = vadd.f32 %v3589_v34, %v6313_v56 }
0x3161   :  { %v4999_v29 = vmul.f32 -1.442695, %v3591_v18 }
0x3163   :  { %5284 = vpow2.f32 %v4999_v29 }
0x3169   :  { %v5285_v1 = vpop.eup %5284 }
0x316a   :  { %v3595_v63 = vadd.f32 1.0, %v5285_v1 }
0x316c   :  { %5286 = vrcp.f32 %v3595_v63  ;;  %v3607_v51 = vand.u32 2147483648, %v3595_v63  ;;  %vm3601_vm12 = vweird.f32 %v3595_v63  ;;  %v3605_v17 = vand.u32 2147483647, %v3595_v63 }
0x316e   :  { %v3608_v0 = vor.u32 1.1754944e-38, %v3607_v51  ;;  %vm3606_vm13 = vcmp.eq.f32.partialorder %v3605_v17, 8.507059e+37 }
0x3172   :  { %v5287_v39 = vpop.eup %5286 }
0x3173   :  { %v3597_v45 = vmul.f32 %v5287_v39, %v3595_v63  ;;  %vm3602_vm7 = vweird.f32 %v5287_v39 }
0x3174   :  { %vm3603_vm9 = vmor %vm3601_vm12, %vm3602_vm7 }
0x3175   :  { %v3598_v42 = vsub.f32 1.0, %v3597_v45 }
0x3177   :  { %v3599_v35 = vmul.f32 %v5287_v39, %v3598_v42 }
0x3179   :  { %v3600_v46 = vadd.f32 %v5287_v39, %v3599_v35 }
0x317b   :  { %v3604_v30 = vsel %vm3603_vm9, %v5287_v39, %v3600_v46 }
0x317c   :  { %v3609_v55 = vsel %vm3606_vm13, %v3608_v0, %v3604_v30 }
0x317d   :  { %v3622_v28 = vsub.f32 1.0, %v3609_v55  ;;  %v3628_v36 = vmul.f32 %v3609_v55, %v3560_v20 }
0x31d1   :  { %v3613_v49 = vpop.permute.xlu0 %3612 }
0x31d2   :  { %v3615_v22 = vmul.f32 %v3613_v49, %v3609_v55 }
0x31d4   :  { %3617 = vrot.lane.b32.xlu1 %v3615_v22, %s5411_s21 }
0x3246   :  { %v3618_v43 = vpop.permute.xlu1 %3617 }
0x3247   :  { %v3620_v12 = vadd.f32 %v3618_v43, %v6313_v56  ;;  %v6623_v56 = vld [vmem:[%s6990_s12 + $0x10] sm:$0xff] }
0x3249   :  { %5288 = vtanh.f32 %v3620_v12 }
0x324f   :  { %v5289_v40 = vpop.eup %5288 }
0x3250   :  { %3624 = vrot.lane.b32.xlu2 %v5289_v40, %s5412_s11 }
0x32aa   :  { %v3625_v6 = vpop.permute.xlu2 %3624 }
0x32ab   :  { %v3627_v60 = vmul.f32 %v3625_v6, %v3622_v28 }
0x32ad   :  { %v3629_v23 = vadd.f32 %v3628_v36, %v3627_v60 }
0x32af   :  { %3636 = vrot.lane.b32.xlu0 %v3629_v23, %s5412_s11 }
0x3321   :  { %v3637_v14 = vpop.permute.xlu0 %3636 }
0x3322   :  { %5000 = vmatmul.msk.f32.vlgmr.msrb.gmra.mxu2 %vm98_vm0, %v3637_v14 }
0x3323   :  { %4202 = vmatpush.msrb.mxu2 %v6617_v16 }
0x3325   :  { %4203 = vmatpush.msrb.mxu2 %v6623_v56 }
0x3327   :  { %4204 = vmatpush.msrb.mxu2 %v6629_v9 }
0x3329   :  { %4205 = vmatpush.msrb.mxu2 %v6635_v19 }
0x33a5   :  { %v3657_v24 = vpop.f32.mrf.mxu2 }
0x33a6   :  { %v3658_v37 = vadd.f32 %v6496_v44, %v3657_v24 }
0x33a8   :  { %3681 = vrot.lane.b32.xlu1 %v3658_v37, %s5411_s21  ;;  %v3660_v11 = vadd.f32 %v3658_v37, %v6316_v48 }
0x33aa   :  { %v5001_v32 = vmul.f32 -1.442695, %v3660_v11 }
0x33ac   :  { %5290 = vpow2.f32 %v5001_v32 }
0x33b2   :  { %v5291_v3 = vpop.eup %5290 }
0x33b3   :  { %v3664_v7 = vadd.f32 1.0, %v5291_v3 }
0x33b5   :  { %5292 = vrcp.f32 %v3664_v7  ;;  %v3676_v25 = vand.u32 2147483648, %v3664_v7  ;;  %vm3670_vm5 = vweird.f32 %v3664_v7  ;;  %v3674_v10 = vand.u32 2147483647, %v3664_v7 }
0x33b7   :  { %v3677_v33 = vor.u32 1.1754944e-38, %v3676_v25  ;;  %vm3675_vm6 = vcmp.eq.f32.partialorder %v3674_v10, 8.507059e+37 }
0x33bb   :  { %v5293_v5 = vpop.eup %5292 }
0x33bc   :  { %v3666_v27 = vmul.f32 %v5293_v5, %v3664_v7  ;;  %vm3671_vm4 = vweird.f32 %v5293_v5 }
0x33bd   :  { %vm3672_vm14 = vmor %vm3670_vm5, %vm3671_vm4 }
0x33be   :  { %v3667_v59 = vsub.f32 1.0, %v3666_v27  ;;  %v6665_v27 = vld [vmem:[%s6991_s13] ss:$0 sm:$0xff] }
0x33c0   :  { %v3668_v26 = vmul.f32 %v5293_v5, %v3667_v59 }
0x33c2   :  { %v3669_v41 = vadd.f32 %v5293_v5, %v3668_v26 }
0x33c4   :  { %v3673_v61 = vsel %vm3672_vm14, %v5293_v5, %v3669_v41 }
0x33c5   :  { %v3678_v20 = vsel %vm3675_vm6, %v3677_v33, %v3673_v61 }
0x33c6   :  { %v3691_v29 = vsub.f32 1.0, %v3678_v20  ;;  %v3697_v63 = vmul.f32 %v3678_v20, %v3629_v23 }
0x341a   :  { %v3682_v4 = vpop.permute.xlu1 %3681 }
0x341b   :  { %v3684_v21 = vmul.f32 %v3682_v4, %v3678_v20 }
0x341d   :  { %3686 = vrot.lane.b32.xlu2 %v3684_v21, %s5411_s21 }
0x3477   :  { %v3687_v62 = vpop.permute.xlu2 %3686 }
0x3478   :  { %v3689_v34 = vadd.f32 %v3687_v62, %v6316_v48 }
0x347a   :  { %5294 = vtanh.f32 %v3689_v34 }
0x3480   :  { %v5295_v18 = vpop.eup %5294 }
0x3481   :  { %3693 = vrot.lane.b32.xlu0 %v5295_v18, %s5412_s11 }
0x34f3   :  { %v3694_v1 = vpop.permute.xlu0 %3693 }
0x34f4   :  { %v3696_v39 = vmul.f32 %v3694_v1, %v3691_v29 }
0x34f6   :  { %v3698_v45 = vadd.f32 %v3697_v63, %v3696_v39 }
0x34f8   :  { %3705 = vrot.lane.b32.xlu1 %v3698_v45, %s5412_s11 }
0x356a   :  { %v3706_v42 = vpop.permute.xlu1 %3705 }
0x356b   :  { %5002 = vmatmul.msk.f32.vlgmr.msrb.gmra.mxu0 %vm98_vm0, %v3706_v42 }
0x356c   :  { %4271 = vmatpush.msrb.mxu0 %v6617_v16 }
0x356e   :  { %4272 = vmatpush.msrb.mxu0 %v6623_v56 }
0x3570   :  { %4273 = vmatpush.msrb.mxu0 %v6629_v9 }
0x3572   :  { %4274 = vmatpush.msrb.mxu0 %v6635_v19 }
0x35e8   :  { %v3726_v48 = vpop.f32.mrf.mxu0 }
0x35e9   :  { %v3727_v35 = vadd.f32 %v6496_v44, %v3726_v48 }
0x35eb   :  { %3750 = vrot.lane.b32.xlu2 %v3727_v35, %s5411_s21  ;;  %v3729_v46 = vadd.f32 %v3727_v35, %v6319_v2 }
0x35ed   :  { %v5003_v51 = vmul.f32 -1.442695, %v3729_v46 }
0x35ef   :  { %5296 = vpow2.f32 %v5003_v51 }
0x35f5   :  { %v5297_v17 = vpop.eup %5296 }
0x35f6   :  { %v3733_v30 = vadd.f32 1.0, %v5297_v17 }
0x35f8   :  { %5298 = vrcp.f32 %v3733_v30  ;;  %v3745_v12 = vand.u32 2147483648, %v3733_v30  ;;  %vm3739_vm8 = vweird.f32 %v3733_v30  ;;  %v3743_v40 = vand.u32 2147483647, %v3733_v30 }
0x35fa   :  { %v3746_v28 = vor.u32 1.1754944e-38, %v3745_v12  ;;  %vm3744_vm10 = vcmp.eq.f32.partialorder %v3743_v40, 8.507059e+37 }
0x35fe   :  { %v5299_v0 = vpop.eup %5298 }
0x35ff   :  { %v3735_v49 = vmul.f32 %v5299_v0, %v3733_v30  ;;  %vm3740_vm2 = vweird.f32 %v5299_v0 }
0x3600   :  { %vm3741_vm15 = vmor %vm3739_vm8, %vm3740_vm2 }
0x3601   :  { %v3736_v55 = vsub.f32 1.0, %v3735_v49 }
0x3603   :  { %v3737_v22 = vmul.f32 %v5299_v0, %v3736_v55 }
0x3605   :  { %v3738_v43 = vadd.f32 %v5299_v0, %v3737_v22 }
0x3607   :  { %v3742_v44 = vsel %vm3741_vm15, %v5299_v0, %v3738_v43 }
0x3608   :  { %v3747_v36 = vsel %vm3744_vm10, %v3746_v28, %v3742_v44 }
0x3609   :  { %v3760_v37 = vsub.f32 1.0, %v3747_v36  ;;  %v3766_v32 = vmul.f32 %v3747_v36, %v3698_v45 }
0x3645   :  { %v3751_v6 = vpop.permute.xlu2 %3750 }
0x3646   :  { %v3753_v60 = vmul.f32 %v3751_v6, %v3747_v36 }
0x3648   :  { %3755 = vrot.lane.b32.xlu0 %v3753_v60, %s5411_s21 }
0x36ba   :  { %v3756_v23 = vpop.permute.xlu0 %3755 }
0x36bb   :  { %v3758_v14 = vadd.f32 %v3756_v23, %v6319_v2 }
0x36bd   :  { %5300 = vtanh.f32 %v3758_v14 }
0x36c3   :  { %v5301_v24 = vpop.eup %5300 }
0x36c4   :  { %3762 = vrot.lane.b32.xlu1 %v5301_v24, %s5412_s11 }
0x3736   :  { %v3763_v11 = vpop.permute.xlu1 %3762 }
0x3737   :  { %v3765_v3 = vmul.f32 %v3763_v11, %v3760_v37 }
0x3739   :  { %v3767_v7 = vadd.f32 %v3766_v32, %v3765_v3 }
0x373b   :  { %3774 = vrot.lane.b32.xlu2 %v3767_v7, %s5412_s11 }
0x3795   :  { %v3775_v5 = vpop.permute.xlu2 %3774 }
0x3796   :  { %5004 = vmatmul.msk.f32.vlgmr.msrb.gmra.mxu1 %vm98_vm0, %v3775_v5 }
0x3797   :  { %4340 = vmatpush.msrb.mxu1 %v6617_v16 }
0x3799   :  { %4341 = vmatpush.msrb.mxu1 %v6623_v56 }
0x379b   :  { %4342 = vmatpush.msrb.mxu1 %v6629_v9 }
0x379d   :  { %4343 = vmatpush.msrb.mxu1 %v6635_v19 }
0x3813   :  { %v3795_v2 = vpop.f32.mrf.mxu1 }
0x3814   :  { %v3796_v59 = vadd.f32 %v6665_v27, %v3795_v2 }
0x3816   :  { %3819 = vrot.lane.b32.xlu0 %v3796_v59, %s5411_s21  ;;  %v3798_v26 = vadd.f32 %v3796_v59, %v6322_v47 }
0x3818   :  { %v5005_v41 = vmul.f32 -1.442695, %v3798_v26 }
0x381a   :  { %5302 = vpow2.f32 %v5005_v41 }
0x3820   :  { %v5303_v25 = vpop.eup %5302 }
0x3821   :  { %v3802_v10 = vadd.f32 1.0, %v5303_v25 }
0x3823   :  { %5304 = vrcp.f32 %v3802_v10  ;;  %v3814_v62 = vand.u32 2147483648, %v3802_v10  ;;  %vm3808_vm11 = vweird.f32 %v3802_v10  ;;  %v3812_v34 = vand.u32 2147483647, %v3802_v10 }
0x3825   :  { %v3815_v29 = vor.u32 1.1754944e-38, %v3814_v62  ;;  %vm3813_vm12 = vcmp.eq.f32.partialorder %v3812_v34, 8.507059e+37 }
0x3829   :  { %v5305_v61 = vpop.eup %5304 }
0x382a   :  { %v3804_v33 = vmul.f32 %v5305_v61, %v3802_v10  ;;  %vm3809_vm3 = vweird.f32 %v5305_v61 }
0x382b   :  { %vm3810_vm7 = vmor %vm3808_vm11, %vm3809_vm3 }
0x382c   :  { %v3805_v4 = vsub.f32 1.0, %v3804_v33 }
0x382e   :  { %v3806_v20 = vmul.f32 %v5305_v61, %v3805_v4 }
0x3830   :  { %v3807_v21 = vadd.f32 %v5305_v61, %v3806_v20 }
0x3832   :  { %v3811_v18 = vsel %vm3810_vm7, %v5305_v61, %v3807_v21 }
0x3833   :  { %v3816_v63 = vsel %vm3813_vm12, %v3815_v29, %v3811_v18 }
0x3834   :  { %v3829_v35 = vsub.f32 1.0, %v3816_v63  ;;  %v3835_v51 = vmul.f32 %v3816_v63, %v3767_v7 }
0x3888   :  { %v3820_v1 = vpop.permute.xlu0 %3819 }
0x3889   :  { %v3822_v39 = vmul.f32 %v3820_v1, %v3816_v63 }
0x388b   :  { %3824 = vrot.lane.b32.xlu1 %v3822_v39, %s5411_s21 }
0x38fd   :  { %v3825_v45 = vpop.permute.xlu1 %3824 }
0x38fe   :  { %v3827_v42 = vadd.f32 %v3825_v45, %v6322_v47 }
0x3900   :  { %5306 = vtanh.f32 %v3827_v42 }
0x3906   :  { %v5307_v48 = vpop.eup %5306 }
0x3907   :  { %3831 = vrot.lane.b32.xlu2 %v5307_v48, %s5412_s11 }
0x3961   :  { %v3832_v46 = vpop.permute.xlu2 %3831 }
0x3962   :  { %v3834_v17 = vmul.f32 %v3832_v46, %v3829_v35 }
0x3964   :  { %v3836_v30 = vadd.f32 %v3835_v51, %v3834_v17 }
0x3966   :  { %3843 = vrot.lane.b32.xlu0 %v3836_v30, %s5412_s11 }
0x39d8   :  { %v3844_v0 = vpop.permute.xlu0 %3843 }
0x39d9   :  { %5006 = vmatmul.msk.f32.vlgmr.msra.gmra.mxu3 %vm98_vm0, %v3844_v0 }
0x39da   :  { %4409 = vmatpush.msra.mxu3 %v6617_v16 }
0x39dc   :  { %4410 = vmatpush.msra.mxu3 %v6623_v56 }
0x39de   :  { %4411 = vmatpush.msra.mxu3 %v6629_v9 }
0x39e0   :  { %4412 = vmatpush.msra.mxu3 %v6635_v19 }
0x3a5c   :  { %v3864_v47 = vpop.f32.mrf.mxu3 }
0x3a5d   :  { %v3865_v49 = vadd.f32 %v6665_v27, %v3864_v47 }
0x3a5f   :  { %3888 = vrot.lane.b32.xlu1 %v3865_v49, %s5411_s21  ;;  %v3867_v55 = vadd.f32 %v3865_v49, %v6325_v15 }
0x3a61   :  { %v5007_v22 = vmul.f32 -1.442695, %v3867_v55 }
0x3a63   :  { %5308 = vpow2.f32 %v5007_v22 }
0x3a69   :  { %v5309_v43 = vpop.eup %5308 }
0x3a6a   :  { %v3871_v12 = vadd.f32 1.0, %v5309_v43 }
0x3a6c   :  { %5310 = vrcp.f32 %v3871_v12  ;;  %v3883_v60 = vand.u32 2147483648, %v3871_v12  ;;  %vm3877_vm13 = vweird.f32 %v3871_v12  ;;  %v3881_v23 = vand.u32 2147483647, %v3871_v12 }
0x3a6e   :  { %v3884_v24 = vor.u32 1.1754944e-38, %v3883_v60  ;;  %vm3882_vm5 = vcmp.eq.f32.partialorder %v3881_v23, 8.507059e+37 }
0x3a72   :  { %v5311_v40 = vpop.eup %5310 }
0x3a73   :  { %v3873_v44 = vmul.f32 %v5311_v40, %v3871_v12  ;;  %vm3878_vm9 = vweird.f32 %v5311_v40 }
0x3a74   :  { %vm3879_vm4 = vmor %vm3877_vm13, %vm3878_vm9 }
0x3a75   :  { %v3874_v28 = vsub.f32 1.0, %v3873_v44 }
0x3a77   :  { %v3875_v6 = vmul.f32 %v5311_v40, %v3874_v28 }
0x3a79   :  { %v3876_v36 = vadd.f32 %v5311_v40, %v3875_v6 }
0x3a7b   :  { %v3880_v14 = vsel %vm3879_vm4, %v5311_v40, %v3876_v36 }
0x3a7c   :  { %v3885_v11 = vsel %vm3882_vm5, %v3884_v24, %v3880_v14 }
0x3a7d   :  { %v3898_v2 = vsub.f32 1.0, %v3885_v11  ;;  %v3904_v26 = vmul.f32 %v3885_v11, %v3836_v30 }
0x3ad1   :  { %v3889_v37 = vpop.permute.xlu1 %3888 }
0x3ad2   :  { %v3891_v32 = vmul.f32 %v3889_v37, %v3885_v11 }
0x3ad4   :  { %3893 = vrot.lane.b32.xlu2 %v3891_v32, %s5411_s21 }
0x3b2e   :  { %v3894_v3 = vpop.permute.xlu2 %3893 }
0x3b2f   :  { %v3896_v7 = vadd.f32 %v3894_v3, %v6325_v15 }
0x3b31   :  { %5312 = vtanh.f32 %v3896_v7 }
0x3b37   :  { %v5313_v5 = vpop.eup %5312 }
0x3b38   :  { %3900 = vrot.lane.b32.xlu0 %v5313_v5, %s5412_s11 }
0x3baa   :  { %v3901_v59 = vpop.permute.xlu0 %3900 }
0x3bab   :  { %v3903_v41 = vmul.f32 %v3901_v59, %v3898_v2 }
0x3bad   :  { %v3905_v25 = vadd.f32 %v3904_v26, %v3903_v41 }
0x3baf   :  { %3912 = vrot.lane.b32.xlu1 %v3905_v25, %s5412_s11 }
0x3c21   :  { %v3913_v10 = vpop.permute.xlu1 %3912 }
0x3c22   :  { %5008 = vmatmul.msk.f32.vlgmr.msra.gmra.mxu2 %vm98_vm0, %v3913_v10 }
0x3c23   :  { %4478 = vmatpush.msra.mxu2 %v6617_v16 }
0x3c25   :  { %4479 = vmatpush.msra.mxu2 %v6623_v56 }
0x3c27   :  { %4480 = vmatpush.msra.mxu2 %v6629_v9 }
0x3c29   :  { %4481 = vmatpush.msra.mxu2 %v6635_v19 }
0x3ca5   :  { %v3933_v15 = vpop.f32.mrf.mxu2 }
0x3ca6   :  { %v3934_v61 = vadd.f32 %v6665_v27, %v3933_v15 }
0x3ca8   :  { %3957 = vrot.lane.b32.xlu2 %v3934_v61, %s5411_s21  ;;  %v3936_v33 = vadd.f32 %v3934_v61, %v6334_v31 }
0x3caa   :  { %v5009_v4 = vmul.f32 -1.442695, %v3936_v33 }
0x3cac   :  { %5314 = vpow2.f32 %v5009_v4 }
0x3cb2   :  { %v5315_v20 = vpop.eup %5314 }
0x3cb3   :  { %v3940_v21 = vadd.f32 1.0, %v5315_v20 }
0x3cb5   :  { %5316 = vrcp.f32 %v3940_v21  ;;  %v3952_v9 = vand.u32 2147483648, %v3940_v21  ;;  %vm3946_vm6 = vweird.f32 %v3940_v21  ;;  %v3950_v19 = vand.u32 2147483647, %v3940_v21 }
0x3cb7   :  { %v3953_v1 = vor.u32 1.1754944e-38, %v3952_v9  ;;  %vm3951_vm8 = vcmp.eq.f32.partialorder %v3950_v19, 8.507059e+37 }
0x3cbb   :  { %v5317_v62 = vpop.eup %5316 }
0x3cbc   :  { %v3942_v16 = vmul.f32 %v5317_v62, %v3940_v21  ;;  %vm3947_vm14 = vweird.f32 %v5317_v62 }
0x3cbd   :  { %vm3948_vm2 = vmor %vm3946_vm6, %vm3947_vm14 }
0x3cbe   :  { %v3943_v34 = vsub.f32 1.0, %v3942_v16 }
0x3cc0   :  { %v3944_v56 = vmul.f32 %v5317_v62, %v3943_v34 }
0x3cc2   :  { %v3945_v18 = vadd.f32 %v5317_v62, %v3944_v56 }
0x3cc4   :  { %v3949_v29 = vsel %vm3948_vm2, %v5317_v62, %v3945_v18 }
0x3cc5   :  { %v3954_v39 = vsel %vm3951_vm8, %v3953_v1, %v3949_v29 }
0x3cc6   :  { %v3967_v46 = vsub.f32 1.0, %v3954_v39  ;;  %v3973_v17 = vmul.f32 %v3954_v39, %v3905_v25 }
0x3d02   :  { %v3958_v63 = vpop.permute.xlu2 %3957 }
0x3d03   :  { %v3960_v45 = vmul.f32 %v3958_v63, %v3954_v39 }
0x3d05   :  { %3962 = vrot.lane.b32.xlu0 %v3960_v45, %s5411_s21 }
0x3d77   :  { %v3963_v42 = vpop.permute.xlu0 %3962 }
0x3d78   :  { %v3965_v48 = vadd.f32 %v3963_v42, %v6334_v31  ;;  %v3976_v31 = vrot.slane %v6331_v8, 7 }
0x3d7a   :  { %5318 = vtanh.f32 %v3965_v48  ;;  %v3978_v22 = vsel %vm2326_vm1, %v6304_v13, %v3976_v31 }
0x3d80   :  { %v5319_v35 = vpop.eup %5318 }
0x3d81   :  { %3969 = vrot.lane.b32.xlu1 %v5319_v35, %s5412_s11 }
0x3df3   :  { %v3970_v51 = vpop.permute.xlu1 %3969 }
0x3df4   :  { %v3972_v30 = vmul.f32 %v3970_v51, %v3967_v46 }
0x3df6   :  { %v3974_v0 = vadd.f32 %v3973_v17, %v3972_v30 }
0x3df8   :  { %3980 = vrot.lane.b32.xlu2 %v3974_v0, %s5412_s11 }
0x3e52   :  { %v3981_v47 = vpop.permute.xlu2 %3980 }
0x3e53   :  { %5010 = vmatmul.msk.f32.vlgmr.msra.gmra.mxu0 %vm98_vm0, %v3981_v47 }
0x3ed0   :  { %v4001_v49 = vpop.f32.mrf.mxu0 }
0x3ed1   :  { %v4002_v55 = vadd.f32 %v6665_v27, %v4001_v49 }
0x3ed3   :  { %4025 = vrot.lane.b32.xlu0 %v4002_v55, %s5411_s21  ;;  %v4004_v43 = vadd.f32 %v4002_v55, %v3978_v22 }
0x3ed5   :  { %v5011_v12 = vmul.f32 -1.442695, %v4004_v43 }
0x3ed7   :  { %5320 = vpow2.f32 %v5011_v12 }
0x3edd   :  { %v5321_v40 = vpop.eup %5320 }
0x3ede   :  { %v4008_v44 = vadd.f32 1.0, %v5321_v40 }
0x3ee0   :  { %5322 = vrcp.f32 %v4008_v44  ;;  %v4020_v14 = vand.u32 2147483648, %v4008_v44  ;;  %vm4014_vm10 = vweird.f32 %v4008_v44  ;;  %v4018_v24 = vand.u32 2147483647, %v4008_v44 }
0x3ee2   :  { %v4021_v37 = vor.u32 1.1754944e-38, %v4020_v14  ;;  %vm4019_vm11 = vcmp.eq.f32.partialorder %v4018_v24, 8.507059e+37 }
0x3ee6   :  { %v5323_v28 = vpop.eup %5322 }
0x3ee7   :  { %v4010_v6 = vmul.f32 %v5323_v28, %v4008_v44  ;;  %vm4015_vm15 = vweird.f32 %v5323_v28 }
0x3ee8   :  { %vm4016_vm3 = vmor %vm4014_vm10, %vm4015_vm15 }
0x3ee9   :  { %v4011_v36 = vsub.f32 1.0, %v4010_v6 }
0x3eeb   :  { %v4012_v60 = vmul.f32 %v5323_v28, %v4011_v36 }
0x3eed   :  { %v4013_v23 = vadd.f32 %v5323_v28, %v4012_v60 }
0x3eef   :  { %v4017_v8 = vsel %vm4016_vm3, %v5323_v28, %v4013_v23 }
0x3ef0   :  { %v4022_v11 = vsel %vm4019_vm11, %v4021_v37, %v4017_v8 }
0x3ef1   :  { %v4035_v2 = vsub.f32 1.0, %v4022_v11  ;;  %v4041_v26 = vmul.f32 %v4022_v11, %v3974_v0 }
0x3f45   :  { %v4026_v13 = vpop.permute.xlu0 %4025 }
0x3f46   :  { %v4028_v32 = vmul.f32 %v4026_v13, %v4022_v11 }
0x3f48   :  { %4030 = vrot.lane.b32.xlu1 %v4028_v32, %s5411_s21 }
0x3fba   :  { %v4031_v3 = vpop.permute.xlu1 %4030 }
0x3fbb   :  { %v4033_v7 = vadd.f32 %v4031_v3, %v3978_v22 }
0x3fbd   :  { %5324 = vtanh.f32 %v4033_v7 }
0x3fc3   :  { %v5325_v5 = vpop.eup %5324 }
0x3fc4   :  { %4037 = vrot.lane.b32.xlu2 %v5325_v5, %s5412_s11 }
0x401e   :  { %v4038_v59 = vpop.permute.xlu2 %4037 }
0x401f   :  { %v4040_v41 = vmul.f32 %v4038_v59, %v4035_v2 }
0x4021   :  { %v4042_v25 = vadd.f32 %v4041_v26, %v4040_v41 }
0x4023   :  { %4048 = vrot.lane.b32.xlu0 %v4042_v25, %s5412_s11 }
0x4095   :  { %v4049_v10 = vpop.permute.xlu0 %4048 }
0x4096   :  { %5012 = vmatmul.msk.f32.vlgmr.msra.gmra.mxu1 %vm98_vm0, %v4049_v10 }
0x4113   :  { %v4069_v15 = vpop.f32.mrf.mxu1 }
0x4114   :  { %v4070_v61 = vadd.f32 %v6665_v27, %v4069_v15 }
0x4116   :  { %4093 = vrot.lane.b32.xlu1 %v4070_v61, %s5411_s21  ;;  %v4072_v33 = vadd.f32 %v4070_v61, %v6342_v58 }
0x4118   :  { %v5013_v4 = vmul.f32 -1.442695, %v4072_v33 }
0x411a   :  { %5326 = vpow2.f32 %v5013_v4 }
0x4120   :  { %v5327_v20 = vpop.eup %5326 }
0x4121   :  { %v4076_v21 = vadd.f32 1.0, %v5327_v20 }
0x4123   :  { %5328 = vrcp.f32 %v4076_v21  ;;  %v4088_v9 = vand.u32 2147483648, %v4076_v21  ;;  %vm4082_vm7 = vweird.f32 %v4076_v21  ;;  %v4086_v19 = vand.u32 2147483647, %v4076_v21 }
0x4125   :  { %v4089_v1 = vor.u32 1.1754944e-38, %v4088_v9  ;;  %vm4087_vm9 = vcmp.eq.f32.partialorder %v4086_v19, 8.507059e+37 }
0x4129   :  { %v5329_v62 = vpop.eup %5328 }
0x412a   :  { %v4078_v16 = vmul.f32 %v5329_v62, %v4076_v21  ;;  %vm4083_vm1 = vweird.f32 %v5329_v62 }
0x412b   :  { %vm4084_vm12 = vmor %vm4082_vm7, %vm4083_vm1 }
0x412c   :  { %v4079_v34 = vsub.f32 1.0, %v4078_v16 }
0x412e   :  { %v4080_v56 = vmul.f32 %v5329_v62, %v4079_v34 }
0x4130   :  { %v4081_v18 = vadd.f32 %v5329_v62, %v4080_v56 }
0x4132   :  { %v4085_v29 = vsel %vm4084_vm12, %v5329_v62, %v4081_v18 }
0x4133   :  { %v4090_v39 = vsel %vm4087_vm9, %v4089_v1, %v4085_v29 }
0x4134   :  { %v4103_v46 = vsub.f32 1.0, %v4090_v39  ;;  %v4109_v17 = vmul.f32 %v4090_v39, %v4042_v25 }
0x4188   :  { %v4094_v63 = vpop.permute.xlu1 %4093 }
0x4189   :  { %v4096_v45 = vmul.f32 %v4094_v63, %v4090_v39 }
0x418b   :  { %4098 = vrot.lane.b32.xlu2 %v4096_v45, %s5411_s21 }
0x41e5   :  { %v4099_v42 = vpop.permute.xlu2 %4098 }
0x41e6   :  { %v4101_v48 = vadd.f32 %v4099_v42, %v6342_v58 }
0x41e8   :  { %5330 = vtanh.f32 %v4101_v48 }
0x41ee   :  { %v5331_v35 = vpop.eup %5330 }
0x41ef   :  { %4105 = vrot.lane.b32.xlu0 %v5331_v35, %s5412_s11 }
0x4261   :  { %v4106_v51 = vpop.permute.xlu0 %4105 }
0x4262   :  { %v4108_v30 = vmul.f32 %v4106_v51, %v4103_v46 }
0x4264   :  { %v4110_v0 = vadd.f32 %v4109_v17, %v4108_v30 }
0x4266   :  { %4117 = vrot.lane.b32.xlu1 %v4110_v0, %s5412_s11 }
0x42d8   :  { %v4118_v47 = vpop.permute.xlu1 %4117 }
0x42d9   :  { %5014 = vmatmul.msk.f32.vlgmr.msrb.gmra.mxu3 %vm98_vm0, %v4118_v47 }
0x435c   :  { %v4138_v49 = vpop.f32.mrf.mxu3 }
0x435d   :  { %v4139_v55 = vadd.f32 %v6665_v27, %v4138_v49 }
0x435f   :  { %4162 = vrot.lane.b32.xlu2 %v4139_v55, %s5411_s21  ;;  %v4141_v58 = vadd.f32 %v4139_v55, %v6350_v52 }
0x4361   :  { %v5015_v31 = vmul.f32 -1.442695, %v4141_v58 }
0x4363   :  { %5332 = vpow2.f32 %v5015_v31 }
0x4369   :  { %v5333_v22 = vpop.eup %5332 }
0x436a   :  { %v4145_v43 = vadd.f32 1.0, %v5333_v22 }
0x436c   :  { %5334 = vrcp.f32 %v4145_v43  ;;  %v4157_v36 = vand.u32 2147483648, %v4145_v43  ;;  %vm4151_vm4 = vweird.f32 %v4145_v43  ;;  %v4155_v60 = vand.u32 2147483647, %v4145_v43 }
0x436e   :  { %v4158_v14 = vor.u32 1.1754944e-38, %v4157_v36  ;;  %vm4156_vm14 = vcmp.eq.f32.partialorder %v4155_v60, 8.507059e+37 }
0x4372   :  { %v5335_v12 = vpop.eup %5334 }
0x4373   :  { %v4147_v40 = vmul.f32 %v5335_v12, %v4145_v43  ;;  %vm4152_vm13 = vweird.f32 %v5335_v12 }
0x4374   :  { %vm4153_vm5 = vmor %vm4151_vm4, %vm4152_vm13 }
0x4375   :  { %v4148_v44 = vsub.f32 1.0, %v4147_v40 }
0x4377   :  { %v4149_v28 = vmul.f32 %v5335_v12, %v4148_v44 }
0x4379   :  { %v4150_v6 = vadd.f32 %v5335_v12, %v4149_v28 }
0x437b   :  { %v4154_v23 = vsel %vm4153_vm5, %v5335_v12, %v4150_v6 }
0x437c   :  { %v4159_v8 = vsel %vm4156_vm14, %v4158_v14, %v4154_v23 }
0x437d   :  { %v4172_v3 = vsub.f32 1.0, %v4159_v8  ;;  %v4178_v5 = vmul.f32 %v4159_v8, %v4110_v0 }
0x43b9   :  { %v4163_v24 = vpop.permute.xlu2 %4162 }
0x43ba   :  { %v4165_v37 = vmul.f32 %v4163_v24, %v4159_v8 }
0x43bc   :  { %4167 = vrot.lane.b32.xlu0 %v4165_v37, %s5411_s21 }
0x442e   :  { %v4168_v13 = vpop.permute.xlu0 %4167 }
0x442f   :  { %v4170_v11 = vadd.f32 %v4168_v13, %v6350_v52 }
0x4431   :  { %5336 = vtanh.f32 %v4170_v11 }
0x4437   :  { %v5337_v32 = vpop.eup %5336 }
0x4438   :  { %4174 = vrot.lane.b32.xlu1 %v5337_v32, %s5412_s11 }
0x44aa   :  { %v4175_v7 = vpop.permute.xlu1 %4174 }
0x44ab   :  { %v4177_v2 = vmul.f32 %v4175_v7, %v4172_v3 }
0x44ad   :  { %v4179_v59 = vadd.f32 %v4178_v5, %v4177_v2 }
0x44af   :  { %4186 = vrot.lane.b32.xlu2 %v4179_v59, %s5412_s11 }
0x4509   :  { %v4187_v26 = vpop.permute.xlu2 %4186 }
0x450a   :  { %5016 = vmatmul.msk.f32.vlgmr.msrb.gmra.mxu2 %vm98_vm0, %v4187_v26 }
0x458d   :  { %v4207_v41 = vpop.f32.mrf.mxu2 }
0x458e   :  { %v4208_v25 = vadd.f32 %v6665_v27, %v4207_v41 }
0x4590   :  { %4231 = vrot.lane.b32.xlu0 %v4208_v25, %s5411_s21  ;;  %v4210_v52 = vadd.f32 %v4208_v25, %v6353_v53 }
0x4592   :  { %v5017_v10 = vmul.f32 -1.442695, %v4210_v52 }
0x4594   :  { %5338 = vpow2.f32 %v5017_v10 }
0x459a   :  { %v5339_v15 = vpop.eup %5338 }
0x459b   :  { %v4214_v61 = vadd.f32 1.0, %v5339_v15 }
0x459d   :  { %5340 = vrcp.f32 %v4214_v61  ;;  %v4226_v16 = vand.u32 2147483648, %v4214_v61  ;;  %vm4220_vm2 = vweird.f32 %v4214_v61  ;;  %v4224_v34 = vand.u32 2147483647, %v4214_v61 }
0x459f   :  { %v4227_v18 = vor.u32 1.1754944e-38, %v4226_v16  ;;  %vm4225_vm15 = vcmp.eq.f32.partialorder %v4224_v34, 8.507059e+37 }
0x45a3   :  { %v5341_v33 = vpop.eup %5340 }
0x45a4   :  { %v4216_v4 = vmul.f32 %v5341_v33, %v4214_v61  ;;  %vm4221_vm6 = vweird.f32 %v5341_v33 }
0x45a5   :  { %vm4222_vm8 = vmor %vm4220_vm2, %vm4221_vm6 }
0x45a6   :  { %v4217_v20 = vsub.f32 1.0, %v4216_v4 }
0x45a8   :  { %v4218_v21 = vmul.f32 %v5341_v33, %v4217_v20 }
0x45aa   :  { %v4219_v62 = vadd.f32 %v5341_v33, %v4218_v21 }
0x45ac   :  { %v4223_v56 = vsel %vm4222_vm8, %v5341_v33, %v4219_v62 }
0x45ad   :  { %v4228_v19 = vsel %vm4225_vm15, %v4227_v18, %v4223_v56 }
0x45ae   :  { %v4241_v45 = vsub.f32 1.0, %v4228_v19  ;;  %v4247_v48 = vmul.f32 %v4228_v19, %v4179_v59 }
0x4602   :  { %v4232_v9 = vpop.permute.xlu0 %4231 }
0x4603   :  { %v4234_v29 = vmul.f32 %v4232_v9, %v4228_v19 }
0x4605   :  { %4236 = vrot.lane.b32.xlu1 %v4234_v29, %s5411_s21 }
0x4677   :  { %v4237_v1 = vpop.permute.xlu1 %4236 }
0x4678   :  { %v4239_v63 = vadd.f32 %v4237_v1, %v6353_v53 }
0x467a   :  { %5342 = vtanh.f32 %v4239_v63 }
0x4680   :  { %v5343_v39 = vpop.eup %5342 }
0x4681   :  { %4243 = vrot.lane.b32.xlu2 %v5343_v39, %s5412_s11 }
0x46db   :  { %v4244_v42 = vpop.permute.xlu2 %4243 }
0x46dc   :  { %v4246_v35 = vmul.f32 %v4244_v42, %v4241_v45 }
0x46de   :  { %v4248_v46 = vadd.f32 %v4247_v48, %v4246_v35 }
0x46e0   :  { %4255 = vrot.lane.b32.xlu0 %v4248_v46, %s5412_s11 }
0x4752   :  { %v4256_v51 = vpop.permute.xlu0 %4255 }
0x4753   :  { %5018 = vmatmul.msk.f32.vlgmr.msrb.gmra.mxu0 %vm98_vm0, %v4256_v51 }
0x47d0   :  { %v4276_v17 = vpop.f32.mrf.mxu0 }
0x47d1   :  { %v4277_v30 = vadd.f32 %v6665_v27, %v4276_v17 }
0x47d3   :  { %4300 = vrot.lane.b32.xlu1 %v4277_v30, %s5411_s21  ;;  %v4279_v53 = vadd.f32 %v4277_v30, %v6357_v50 }
0x47d5   :  { %v5019_v0 = vmul.f32 -1.442695, %v4279_v53 }
0x47d7   :  { %5344 = vpow2.f32 %v5019_v0 }
0x47dd   :  { %v5345_v47 = vpop.eup %5344 }
0x47de   :  { %v4283_v49 = vadd.f32 1.0, %v5345_v47 }
0x47e0   :  { %5346 = vrcp.f32 %v4283_v49  ;;  %v4295_v12 = vand.u32 2147483648, %v4283_v49  ;;  %vm4289_vm3 = vweird.f32 %v4283_v49  ;;  %v4293_v40 = vand.u32 2147483647, %v4283_v49 }
0x47e2   :  { %v4296_v28 = vor.u32 1.1754944e-38, %v4295_v12  ;;  %vm4294_vm1 = vcmp.eq.f32.partialorder %v4293_v40, 8.507059e+37 }
0x47e6   :  { %v5347_v55 = vpop.eup %5346 }
0x47e7   :  { %v4285_v58 = vmul.f32 %v5347_v55, %v4283_v49  ;;  %vm4290_vm10 = vweird.f32 %v5347_v55 }
0x47e8   :  { %vm4291_vm11 = vmor %vm4289_vm3, %vm4290_vm10  ;;  %vm4634_vm3 = vcmask 1045504  }
0x47e9   :  { %v4286_v31 = vsub.f32 1.0, %v4285_v58 }
0x47eb   :  { %v4287_v22 = vmul.f32 %v5347_v55, %v4286_v31 }
0x47ed   :  { %v4288_v43 = vadd.f32 %v5347_v55, %v4287_v22 }
0x47ef   :  { %v4292_v44 = vsel %vm4291_vm11, %v5347_v55, %v4288_v43  ;;  %vm4792_vm11 = vcmask 9216  }
0x47f0   :  { %v4297_v36 = vsel %vm4294_vm1, %v4296_v28, %v4292_v44 }
0x47f1   :  { %v4310_v8 = vsub.f32 1.0, %v4297_v36  ;;  %v4316_v13 = vmul.f32 %v4297_v36, %v4248_v46 }
0x4845   :  { %v4301_v6 = vpop.permute.xlu1 %4300 }
0x4846   :  { %v4303_v60 = vmul.f32 %v4301_v6, %v4297_v36 }
0x4848   :  { %4305 = vrot.lane.b32.xlu2 %v4303_v60, %s5411_s21 }
0x48a2   :  { %v4306_v23 = vpop.permute.xlu2 %4305 }
0x48a3   :  { %v4308_v14 = vadd.f32 %v4306_v23, %v6357_v50 }
0x48a5   :  { %5348 = vtanh.f32 %v4308_v14 }
0x48ab   :  { %v5349_v24 = vpop.eup %5348 }
0x48ac   :  { %4312 = vrot.lane.b32.xlu0 %v5349_v24, %s5412_s11 }
0x491e   :  { %v4313_v37 = vpop.permute.xlu0 %4312 }
0x491f   :  { %v4315_v11 = vmul.f32 %v4313_v37, %v4310_v8 }
0x4921   :  { %v4317_v32 = vadd.f32 %v4316_v13, %v4315_v11 }
0x4923   :  { %4324 = vrot.lane.b32.xlu1 %v4317_v32, %s5412_s11 }
0x4995   :  { %v4325_v3 = vpop.permute.xlu1 %4324 }
0x4996   :  { %5020 = vmatmul.msk.f32.vlgmr.msrb.gmra.mxu1 %vm98_vm0, %v4325_v3 }
0x4a13   :  { %v4345_v7 = vpop.f32.mrf.mxu1 }
0x4a14   :  { %v4346_v5 = vadd.f32 %v6665_v27, %v4345_v7 }
0x4a16   :  { %4369 = vrot.lane.b32.xlu2 %v4346_v5, %s5411_s21  ;;  %v4348_v50 = vadd.f32 %v4346_v5, %v6360_v57 }
0x4a18   :  { %v5021_v2 = vmul.f32 -1.442695, %v4348_v50 }
0x4a1a   :  { %5350 = vpow2.f32 %v5021_v2 }
0x4a20   :  { %v5351_v59 = vpop.eup %5350 }
0x4a21   :  { %v4352_v26 = vadd.f32 1.0, %v5351_v59 }
0x4a23   :  { %5352 = vrcp.f32 %v4352_v26  ;;  %v4364_v61 = vand.u32 2147483648, %v4352_v26  ;;  %vm4358_vm12 = vweird.f32 %v4352_v26  ;;  %v4362_v33 = vand.u32 2147483647, %v4352_v26 }
0x4a25   :  { %v4365_v20 = vor.u32 1.1754944e-38, %v4364_v61  ;;  %vm4363_vm13 = vcmp.eq.f32.partialorder %v4362_v33, 8.507059e+37  ;;  %v4531_v33 = vld [vmem:[%s6992_s14 + $0x30] sm:$0xff] }
0x4a26   :  { %4556 = vmatpush.msra.mxu0 %v4531_v33 }
0x4a29   :  { %v5353_v41 = vpop.eup %5352 }
0x4a2a   :  { %v4354_v25 = vmul.f32 %v5353_v41, %v4352_v26  ;;  %vm4359_vm7 = vweird.f32 %v5353_v41 }
0x4a2b   :  { %vm4360_vm9 = vmor %vm4358_vm12, %vm4359_vm7 }
0x4a2c   :  { %v4355_v52 = vsub.f32 1.0, %v4354_v25 }
0x4a2e   :  { %v4356_v10 = vmul.f32 %v5353_v41, %v4355_v52 }
0x4a30   :  { %v4357_v15 = vadd.f32 %v5353_v41, %v4356_v10 }
0x4a32   :  { %v4361_v4 = vsel %vm4360_vm9, %v5353_v41, %v4357_v15 }
0x4a33   :  { %v4366_v62 = vsel %vm4363_vm13, %v4365_v20, %v4361_v4  ;;  %v4532_v4 = vld [vmem:[%s6992_s14 + $0x38] sm:$0xff]  ;;  %v4529_v20 = vld [vmem:[%s6992_s14 + $0x20] sm:$0xff] }
0x4a34   :  { %v4379_v9 = vsub.f32 1.0, %v4366_v62  ;;  %v4385_v29 = vmul.f32 %v4366_v62, %v4317_v32  ;;  %4576 = vmatpush.msra.mxu1 %v4532_v4  ;;  %4557 = vmatpush.msra.mxu0 %v4529_v20 }
0x4a70   :  { %v4370_v21 = vpop.permute.xlu2 %4369 }
0x4a71   :  { %v4372_v16 = vmul.f32 %v4370_v21, %v4366_v62  ;;  %v4527_v21 = vld [vmem:[%s6992_s14 + $0x10] sm:$0xff]  ;;  %v4528_v62 = vld [vmem:[%s6992_s14 + $0x18] sm:$0xff] }
0x4a72   :  { %4558 = vmatpush.msra.mxu0 %v4527_v21 }
0x4a73   :  { %4374 = vrot.lane.b32.xlu0 %v4372_v16, %s5411_s21  ;;  %v4525_v16 = vld [vmem:[%s6992_s14] sm:$0xff] }
0x4a74   :  { %4559 = vmatpush.msra.mxu0 %v4525_v16  ;;  %v4729_v16 = vld [vmem:[%s6996_s18 + $0x30] sm:$0xff] }
0x4ae5   :  { %v4375_v34 = vpop.permute.xlu0 %4374 }
0x4ae6   :  { %v4377_v56 = vadd.f32 %v4375_v34, %v6360_v57  ;;  %v4526_v34 = vld [vmem:[%s6992_s14 + $0x8] sm:$0xff] }
0x4ae8   :  { %5354 = vtanh.f32 %v4377_v56 }
0x4aee   :  { %v5355_v18 = vpop.eup %5354 }
0x4aef   :  { %4381 = vrot.lane.b32.xlu1 %v5355_v18, %s5412_s11 }
0x4b61   :  { %v4382_v19 = vpop.permute.xlu1 %4381 }
0x4b62   :  { %v4384_v1 = vmul.f32 %v4382_v19, %v4379_v9 }
0x4b64   :  { %v4386_v63 = vadd.f32 %v4385_v29, %v4384_v1  ;;  %v4616_v1 = vld [vmem:[%s6994_s16 + $0xf0] sm:$0xff] }
0x4b65   :  { %4641 = vmatpush.msrb.mxu3 %v4616_v1  ;;  %v4725_v1 = vld [vmem:[%s6996_s18 + $0x10] sm:$0xff] }
0x4b66   :  { %4393 = vrot.lane.b32.xlu2 %v4386_v63, %s5412_s11 }
0x4bc0   :  { %v4394_v39 = vpop.permute.xlu2 %4393 }
0x4bc1   :  { %5022 = vmatmul.msk.f32.vlgmr.msra.gmra.mxu3 %vm98_vm0, %v4394_v39  ;;  %v4614_v39 = vld [vmem:[%s6994_s16 + $0xe0] sm:$0xff] }
0x4bc2   :  { %4642 = vmatpush.msrb.mxu3 %v4614_v39  ;;  %v4723_v39 = vld [vmem:[%s6996_s18] sm:$0xff] }
0x4c44   :  { %v4414_v45 = vpop.f32.mrf.mxu3 }
0x4c45   :  { %v4415_v42 = vadd.f32 %v6665_v27, %v4414_v45  ;;  %v4615_v45 = vld [vmem:[%s6994_s16 + $0xe8] sm:$0xff] }
0x4c47   :  { %4438 = vrot.lane.b32.xlu0 %v4415_v42, %s5411_s21  ;;  %v4417_v57 = vadd.f32 %v4415_v42, %v6363_v38  ;;  %v4612_v42 = vld [vmem:[%s6994_s16 + $0xd0] sm:$0xff] }
0x4c48   :  { %4643 = vmatpush.msrb.mxu3 %v4612_v42 }
0x4c49   :  { %v5023_v48 = vmul.f32 -1.442695, %v4417_v57  ;;  %v4613_v57 = vld [vmem:[%s6994_s16 + $0xd8] sm:$0xff] }
0x4c4b   :  { %5356 = vpow2.f32 %v5023_v48  ;;  %v4610_v48 = vld [vmem:[%s6994_s16 + $0xc0] sm:$0xff] }
0x4c4c   :  { %4644 = vmatpush.msrb.mxu3 %v4610_v48 }
0x4c51   :  { %v5357_v35 = vpop.eup %5356 }
0x4c52   :  { %v4421_v46 = vadd.f32 1.0, %v5357_v35  ;;  %v4611_v35 = vld [vmem:[%s6994_s16 + $0xc8] sm:$0xff] }
0x4c54   :  { %5358 = vrcp.f32 %v4421_v46  ;;  %v4433_v47 = vand.u32 2147483648, %v4421_v46  ;;  %vm4427_vm5 = vweird.f32 %v4421_v46  ;;  %v4431_v49 = vand.u32 2147483647, %v4421_v46 }
0x4c56   :  { %v4434_v58 = vor.u32 1.1754944e-38, %v4433_v47  ;;  %vm4432_vm6 = vcmp.eq.f32.partialorder %v4431_v49, 8.507059e+37  ;;  %v4602_v47 = vld [vmem:[%s6994_s16 + $0x80] sm:$0xff]  ;;  %v4603_v49 = vld [vmem:[%s6994_s16 + $0x88] sm:$0xff] }
0x4c5a   :  { %v5359_v51 = vpop.eup %5358 }
0x4c5b   :  { %v4423_v17 = vmul.f32 %v5359_v51, %v4421_v46  ;;  %vm4428_vm4 = vweird.f32 %v5359_v51  ;;  %v4608_v46 = vld [vmem:[%s6994_s16 + $0xb0] sm:$0xff] }
0x4c5c   :  { %vm4429_vm14 = vmor %vm4427_vm5, %vm4428_vm4  ;;  %4645 = vmatpush.msrb.mxu3 %v4608_v46 }
0x4c5d   :  { %v4424_v30 = vsub.f32 1.0, %v4423_v17  ;;  %v4606_v17 = vld [vmem:[%s6994_s16 + $0xa0] sm:$0xff] }
0x4c5e   :  { %4646 = vmatpush.msrb.mxu3 %v4606_v17 }
0x4c5f   :  { %v4425_v53 = vmul.f32 %v5359_v51, %v4424_v30  ;;  %v4607_v30 = vld [vmem:[%s6994_s16 + $0xa8] sm:$0xff] }
0x4c61   :  { %v4426_v0 = vadd.f32 %v5359_v51, %v4425_v53  ;;  %v4604_v53 = vld [vmem:[%s6994_s16 + $0x90] sm:$0xff] }
0x4c62   :  { %4647 = vmatpush.msrb.mxu3 %v4604_v53 }
0x4c63   :  { %v4430_v55 = vsel %vm4429_vm14, %v5359_v51, %v4426_v0  ;;  %v4609_v51 = vld [vmem:[%s6994_s16 + $0xb8] sm:$0xff] }
0x4c64   :  { %v4435_v22 = vsel %vm4432_vm6, %v4434_v58, %v4430_v55  ;;  %v4605_v0 = vld [vmem:[%s6994_s16 + $0x98] sm:$0xff]  ;;  %v4600_v55 = vld [vmem:[%s6994_s16 + $0x70] sm:$0xff]  ;;  %4648 = vmatpush.msrb.mxu3 %v4602_v47 }
0x4c65   :  { %v4448_v28 = vsub.f32 1.0, %v4435_v22  ;;  %v4454_v36 = vmul.f32 %v4435_v22, %v4386_v63  ;;  %v4617_v63 = vld [vmem:[%s6994_s16 + $0xf8] sm:$0xff] }
0x4c66   :  { %4681 = vmatpush.msrb.mxu0 %v4617_v63  ;;  %v4601_v58 = vld [vmem:[%s6994_s16 + $0x78] sm:$0xff]  ;;  %4649 = vmatpush.msrb.mxu3 %v4600_v55  ;;  %v4724_v63 = vld [vmem:[%s6996_s18 + $0x8] sm:$0xff]  ;;  %v5047_v55 = vld [vmem:[%s6997_s19] ss:$0 sm:$0xff] }
0x4c68   :  { %4682 = vmatpush.msrb.mxu0 %v4615_v45  ;;  %v4624_v45 = vld [vmem:[%s6995_s17] sm:$0x3]  ;;  %s5413_s17 = smov [#allocation2]  }
0x4c69   :  { %v4627_v42 = vperm.slane %v4624_v45, 1  ;;  %v4626_v46 = vperm.slane %v4624_v45, 0  ;;  %s4799_s3 = sshll.u32 %s5413_s17, 4  ;;  %s4800_s3 = int_to_ptr.vmem [resolvable:$true] %s4799_s3 }
0x4c6a   :  { %4683 = vmatpush.msrb.mxu0 %v4613_v57 }
0x4c6c   :  { %4684 = vmatpush.msrb.mxu0 %v4611_v35 }
0x4c6e   :  { %4685 = vmatpush.msrb.mxu0 %v4609_v51 }
0x4c70   :  { %4686 = vmatpush.msrb.mxu0 %v4607_v30 }
0x4c72   :  { %4687 = vmatpush.msrb.mxu0 %v4605_v0 }
0x4c74   :  { %4688 = vmatpush.msrb.mxu0 %v4603_v49 }
0x4c76   :  { %4689 = vmatpush.msrb.mxu0 %v4601_v58 }
0x4cb9   :  { %v4439_v31 = vpop.permute.xlu0 %4438 }
0x4cba   :  { %v4441_v43 = vmul.f32 %v4439_v31, %v4435_v22  ;;  %v4598_v31 = vld [vmem:[%s6994_s16 + $0x60] sm:$0xff]  ;;  %v4599_v22 = vld [vmem:[%s6994_s16 + $0x68] sm:$0xff] }
0x4cbb   :  { %4650 = vmatpush.msrb.mxu3 %v4598_v31  ;;  %4690 = vmatpush.msrb.mxu0 %v4599_v22 }
0x4cbc   :  { %4443 = vrot.lane.b32.xlu1 %v4441_v43, %s5411_s21  ;;  %v4596_v43 = vld [vmem:[%s6994_s16 + $0x50] sm:$0xff] }
0x4cbd   :  { %4651 = vmatpush.msrb.mxu3 %v4596_v43 }
0x4d2e   :  { %v4444_v12 = vpop.permute.xlu1 %4443 }
0x4d2f   :  { %v4446_v40 = vadd.f32 %v4444_v12, %v6363_v38  ;;  %v4597_v12 = vld [vmem:[%s6994_s16 + $0x58] sm:$0xff] }
0x4d30   :  { %4691 = vmatpush.msrb.mxu0 %v4597_v12 }
0x4d31   :  { %5360 = vtanh.f32 %v4446_v40  ;;  %v4594_v40 = vld [vmem:[%s6994_s16 + $0x40] sm:$0xff] }
0x4d32   :  { %4652 = vmatpush.msrb.mxu3 %v4594_v40 }
0x4d37   :  { %v5361_v44 = vpop.eup %5360 }
0x4d38   :  { %4450 = vrot.lane.b32.xlu2 %v5361_v44, %s5412_s11  ;;  %v4595_v44 = vld [vmem:[%s6994_s16 + $0x48] sm:$0xff] }
0x4d39   :  { %4692 = vmatpush.msrb.mxu0 %v4595_v44 }
0x4d92   :  { %v4451_v6 = vpop.permute.xlu2 %4450 }
0x4d93   :  { %v4453_v60 = vmul.f32 %v4451_v6, %v4448_v28  ;;  %v4592_v28 = vld [vmem:[%s6994_s16 + $0x30] sm:$0xff]  ;;  %v4593_v6 = vld [vmem:[%s6994_s16 + $0x38] sm:$0xff] }
0x4d94   :  { %4653 = vmatpush.msrb.mxu3 %v4592_v28  ;;  %4693 = vmatpush.msrb.mxu0 %v4593_v6 }
0x4d95   :  { %v4455_v23 = vadd.f32 %v4454_v36, %v4453_v60  ;;  %v4590_v60 = vld [vmem:[%s6994_s16 + $0x20] sm:$0xff] }
0x4d96   :  { %4654 = vmatpush.msrb.mxu3 %v4590_v60 }
0x4d97   :  { %4462 = vrot.lane.b32.xlu0 %v4455_v23, %s5412_s11 }
0x4e09   :  { %v4463_v14 = vpop.permute.xlu0 %4462 }
0x4e0a   :  { %5024 = vmatmul.msk.f32.vlgmr.msra.gmra.mxu2 %vm98_vm0, %v4463_v14  ;;  %v4591_v14 = vld [vmem:[%s6994_s16 + $0x28] sm:$0xff] }
0x4e0b   :  { %4694 = vmatpush.msrb.mxu0 %v4591_v14 }
0x4e8d   :  { %v4483_v24 = vpop.f32.mrf.mxu2 }
0x4e8e   :  { %v4484_v8 = vadd.f32 %v6665_v27, %v4483_v24  ;;  %v4623_v24 = vld [vmem:[%s6994_s16 + $0x128] sm:$0x3f] }
0x4e90   :  { %4507 = vrot.lane.b32.xlu1 %v4484_v8, %s5411_s21  ;;  %v4486_v38 = vadd.f32 %v4484_v8, %v6366_v54  ;;  %v4588_v8 = vld [vmem:[%s6994_s16 + $0x10] sm:$0xff] }
0x4e91   :  { %4655 = vmatpush.msrb.mxu3 %v4588_v8 }
0x4e92   :  { %v5025_v37 = vmul.f32 -1.442695, %v4486_v38  ;;  %v4620_v38 = vld [vmem:[%s6994_s16 + $0x110] sm:$0xff] }
0x4e94   :  { %5362 = vpow2.f32 %v5025_v37  ;;  %v4589_v37 = vld [vmem:[%s6994_s16 + $0x18] sm:$0xff] }
0x4e95   :  { %4695 = vmatpush.msrb.mxu0 %v4589_v37 }
0x4e9a   :  { %v5363_v13 = vpop.eup %5362 }
0x4e9b   :  { %v4490_v11 = vadd.f32 1.0, %v5363_v13  ;;  %v4621_v13 = vld [vmem:[%s6994_s16 + $0x118] sm:$0xff] }
0x4e9d   :  { %5364 = vrcp.f32 %v4490_v11  ;;  %v4502_v2 = vand.u32 2147483648, %v4490_v11  ;;  %vm4496_vm8 = vweird.f32 %v4490_v11  ;;  %v4500_v59 = vand.u32 2147483647, %v4490_v11 }
0x4e9f   :  { %v4503_v26 = vor.u32 1.1754944e-38, %v4502_v2  ;;  %vm4501_vm10 = vcmp.eq.f32.partialorder %v4500_v59, 8.507059e+37  ;;  %v4736_v2 = vld [vmem:[%s6996_s18 + $0x68] sm:$0xff]  ;;  %v4735_v59 = vld [vmem:[%s6996_s18 + $0x60] sm:$0xff] }
0x4ea3   :  { %v5365_v32 = vpop.eup %5364 }
0x4ea4   :  { %v4492_v3 = vmul.f32 %v5365_v32, %v4490_v11  ;;  %vm4497_vm2 = vweird.f32 %v5365_v32  ;;  %v4586_v11 = vld [vmem:[%s6994_s16] sm:$0xff] }
0x4ea5   :  { %vm4498_vm15 = vmor %vm4496_vm8, %vm4497_vm2  ;;  %4656 = vmatpush.msrb.mxu3 %v4586_v11 }
0x4ea6   :  { %v4493_v7 = vsub.f32 1.0, %v4492_v3  ;;  %v4587_v3 = vld [vmem:[%s6994_s16 + $0x8] sm:$0xff] }
0x4ea7   :  { %4696 = vmatpush.msrb.mxu0 %v4587_v3 }
0x4ea8   :  { %v4494_v5 = vmul.f32 %v5365_v32, %v4493_v7  ;;  %v4619_v7 = vld [vmem:[%s6994_s16 + $0x108] sm:$0xff] }
0x4eaa   :  { %v4495_v50 = vadd.f32 %v5365_v32, %v4494_v5  ;;  %v4738_v5 = vld [vmem:[%s6996_s18 + $0x78] sm:$0xff] }
0x4eac   :  { %v4499_v27 = vsel %vm4498_vm15, %v5365_v32, %v4495_v50  ;;  %v4618_v32 = vld [vmem:[%s6994_s16 + $0x100] sm:$0xff]  ;;  %v4737_v50 = vld [vmem:[%s6996_s18 + $0x70] sm:$0xff] }
0x4ead   :  { %v4504_v25 = vsel %vm4501_vm10, %v4503_v26, %v4499_v27  ;;  %v4734_v27 = vld [vmem:[%s6996_s18 + $0x58] sm:$0xff]  ;;  %v4733_v26 = vld [vmem:[%s6996_s18 + $0x50] sm:$0xff] }
0x4eae   :  { %v4517_v56 = vsub.f32 1.0, %v4504_v25  ;;  %v4523_v9 = vmul.f32 %v4504_v25, %v4455_v23  ;;  %v4622_v23 = vld [vmem:[%s6994_s16 + $0x120] sm:$0x3f] }
0x4eaf   :  { %5028 = vmatpush.msk.msrb.mxu2 %vm4634_vm3, %v4622_v23 }
0x4eb1   :  { %4675 = vmatpush.msrb.mxu2 %v4620_v38 }
0x4eb3   :  { %4676 = vmatpush.msrb.mxu2 %v4618_v32 }
0x4eb5   :  { %4752 = vmatpush.msra.mxu2 %v4738_v5 }
0x4eb7   :  { %4753 = vmatpush.msra.mxu2 %v4737_v50 }
0x4eb9   :  { %4754 = vmatpush.msra.mxu2 %v4736_v2 }
0x4ebb   :  { %4755 = vmatpush.msra.mxu2 %v4735_v59 }
0x4ebd   :  { %4756 = vmatpush.msra.mxu2 %v4734_v27 }
0x4ebf   :  { %4757 = vmatpush.msra.mxu2 %v4733_v26 }
0x4f02   :  { %v4508_v41 = vpop.permute.xlu1 %4507 }
0x4f03   :  { %v4510_v52 = vmul.f32 %v4508_v41, %v4504_v25  ;;  %v4732_v41 = vld [vmem:[%s6996_s18 + $0x48] sm:$0xff]  ;;  %v4731_v25 = vld [vmem:[%s6996_s18 + $0x40] sm:$0xff] }
0x4f04   :  { %4758 = vmatpush.msra.mxu2 %v4732_v41 }
0x4f05   :  { %4512 = vrot.lane.b32.xlu2 %v4510_v52, %s5411_s21  ;;  %v4730_v52 = vld [vmem:[%s6996_s18 + $0x38] sm:$0xff] }
0x4f06   :  { %4759 = vmatpush.msra.mxu2 %v4731_v25 }
0x4f08   :  { %4760 = vmatpush.msra.mxu2 %v4730_v52 }
0x4f0a   :  { %4761 = vmatpush.msra.mxu2 %v4729_v16 }
0x4f5f   :  { %v4513_v10 = vpop.permute.xlu2 %4512 }
0x4f60   :  { %v4515_v15 = vadd.f32 %v4513_v10, %v6366_v54  ;;  %v4530_v54 = vld [vmem:[%s6992_s14 + $0x28] sm:$0xff]  ;;  %v4533_v10 = vld [vmem:[%s6993_s15] sm:$0x3] }
0x4f61   :  { %4577 = vmatpush.msra.mxu1 %v4530_v54 }
0x4f62   :  { %5366 = vtanh.f32 %v4515_v15  ;;  %v4535_v15 = vperm.slane %v4533_v10, 0 }
0x4f63   :  { %4578 = vmatpush.msra.mxu1 %v4528_v62 }
0x4f65   :  { %4579 = vmatpush.msra.mxu1 %v4526_v34  ;;  %v4728_v34 = vld [vmem:[%s6996_s18 + $0x28] sm:$0xff] }
0x4f66   :  { %4762 = vmatpush.msra.mxu2 %v4728_v34 }
0x4f67   :  { %5030 = vmatpush.msk.msrb.mxu1 %vm4634_vm3, %v4623_v24 }
0x4f68   :  { %v5367_v61 = vpop.eup %5366 }
0x4f69   :  { %4519 = vrot.lane.b32.xlu0 %v5367_v61, %s5412_s11  ;;  %4715 = vmatpush.msrb.mxu1 %v4621_v13  ;;  %v4536_v61 = vperm.slane %v4533_v10, 1 }
0x4f6b   :  { %4716 = vmatpush.msrb.mxu1 %v4619_v7 }
0x4fdb   :  { %v4520_v18 = vpop.permute.xlu0 %4519 }
0x4fdc   :  { %v4522_v19 = vmul.f32 %v4520_v18, %v4517_v56  ;;  %v4741_v56 = vld [vmem:[%s6996_s18 + $0x90] sm:$0x3f]  ;;  %v4727_v18 = vld [vmem:[%s6996_s18 + $0x20] sm:$0xff] }
0x4fdd   :  { %4763 = vmatpush.msra.mxu2 %v4727_v18 }
0x4fde   :  { %v4524_v29 = vadd.f32 %v4523_v9, %v4522_v19  ;;  %v4740_v9 = vld [vmem:[%s6996_s18 + $0x88] sm:$0xff]  ;;  %v4726_v19 = vld [vmem:[%s6996_s18 + $0x18] sm:$0xff] }
0x4fdf   :  { %4764 = vmatpush.msra.mxu2 %v4726_v19 }
0x4fe0   :  { %4540 = vrot.lane.b32.xlu1 %v4524_v29, %s5412_s11  ;;  %v4739_v29 = vld [vmem:[%s6996_s18 + $0x80] sm:$0xff] }
0x4fe1   :  { %4765 = vmatpush.msra.mxu2 %v4725_v1 }
0x4fe3   :  { %4766 = vmatpush.msra.mxu2 %v4724_v63 }
0x4fe5   :  { %4767 = vmatpush.msra.mxu2 %v4723_v39 }
0x5052   :  { %v4541_v36 = vpop.permute.xlu1 %4540 }
0x5053   :  { %5026 = vmatmul.msk.f32.vlgmr.msra.gmra.mxu0 %vm98_vm0, %v4541_v36  ;;  %5027 = vmatmul.msk.f32.vlgmr.msra.gmra.mxu1 %vm98_vm0, %v4541_v36  ;;  %vm4630_vm0 = vcmask 179200  }
0x5054   :  { %5032 = vmatpush.msk.msra.mxu1 %vm4634_vm3, %v4741_v56 }
0x5056   :  { %4786 = vmatpush.msra.mxu1 %v4740_v9 }
0x5058   :  { %4787 = vmatpush.msra.mxu1 %v4739_v29 }
0x50d0   :  { %v4561_v33 = vpop.f32.mrf.mxu0  ;;  %v4581_v4 = vpop.f32.mrf.mxu1 }
0x50d1   :  { %v4562_v20 = vadd.f32 %v4561_v33, %v4535_v15  ;;  %v4582_v54 = vadd.f32 %v4581_v4, %v4536_v61 }
0x50d3   :  { %v4584_v21 = vmax.f32 %v4562_v20, 0.0  ;;  %v4585_v62 = vmax.f32 %v4582_v54, 0.0 }
0x50d5   :  { %4657 = vmatmul.f32.vlgmr.msrb.gmra.mxu3 %v4584_v21  ;;  %5029 = vmatmul.msk.f32.vlgmr.msrb.gmra.mxu2 %vm4630_vm0, %v4585_v62 }
0x50d6   :  { %4697 = vmatmul.f32.vlgmr.msrb.gmra.mxu0 %v4584_v21  ;;  %5031 = vmatmul.msk.f32.vlgmr.msrb.gmra.mxu1 %vm4630_vm0, %v4585_v62 }
0x5153   :  { %v4698_v57 = vpop.f32.mrf.mxu0  ;;  %v4718_v35 = vpop.f32.mrf.mxu1 }
0x5154   :  { %v4699_v48 = vadd.f32 %v4698_v57, %v4627_v42 }
0x5156   :  { %v4719_v51 = vadd.f32 %v4718_v35, %v4699_v48 }
0x5158   :  { %v4722_v17 = vmax.f32 %v4719_v51, 0.0  ;;  %v4658_v30 = vpop.f32.mrf.mxu3  ;;  %v4678_v0 = vpop.f32.mrf.mxu2 }
0x5159   :  { %v4659_v53 = vadd.f32 %v4658_v30, %v4626_v46 }
0x515a   :  { %5033 = vmatmul.msk.f32.vlgmr.msra.gmra.mxu1 %vm4630_vm0, %v4722_v17 }
0x515b   :  { %v4679_v47 = vadd.f32 %v4678_v0, %v4659_v53 }
0x515d   :  { %v4721_v49 = vmax.f32 %v4679_v47, 0.0 }
0x515f   :  { %4768 = vmatmul.f32.vlgmr.msra.gmra.mxu2 %v4721_v49 }
0x51d7   :  { %v4789_v22 = vpop.f32.mrf.mxu1 }
0x51e2   :  { %v4769_v58 = vpop.f32.mrf.mxu2 }
0x51e3   :  { %v4770_v31 = vadd.f32 %v5047_v55, %v4769_v58 }
0x51e5   :  { %v4790_v43 = vadd.f32 %v4789_v22, %v4770_v31 }
0x51e7   :  { %4793 = vst.msk [vmem:[#allocation2] sm:$0x3] %vm4792_vm11, %v4790_v43 }
0x51e8   :  { %4804 = dma.vmem_to_hbm [thread:$0]  %s4800_s3, 32, %s4802_s6, [#allocation3]  }
0x51e9   :  { %5405 = dma.done.wait [#allocation3], 32  }
0x51ea   :  { %5406 = vsyncadd [#allocation3], 4294967264 }
0x51eb   :  { %4809 = vsyncpa [#allocation3], 1 }

</bundles_post_ra>
